<compile_context>
chip_gen: v7x
topology: tpu7x:2x2x1
jax: 0.10.0
libtpu: 0.0.40
codegen_flags: <defaults>
</compile_context>

<pallas_src>
import functools

import jax
import jax.numpy as jnp
from jax.experimental import pallas as pl
from jax.experimental.pallas import tpu as pltpu

CP = 128      # lane width: every conv channel dim is zero-padded to this (exact padding)
NCP = 128     # lane-padded num_classes for the fc output (sliced back in the wrapper)
PAD = 2       # spatial halo = max dilation; d=1 and d=2 convs share this interior offset


def _round_up(x, m):
    return (x + m - 1) // m * m


def _pack_geom(cin_real):
    """Tap-packing geometry: cpk lanes per tap, tpg taps per 128-lane group."""
    cpk = 8
    while cpk < cin_real:
        cpk *= 2
    cpk = min(cpk, CP)
    tpg = CP // cpk                  # taps packed per 128-lane group
    ngroups = -(-9 // tpg)           # ceil(9 / tpg); == 9 when cin > 64 (classic im2col)
    return cpk, tpg, ngroups


# ----------------------------------------------------------------------------
# Fused Pallas kernel: Bt images per grid step.
#   conv3x3(d=1)+BN+ReLU -> conv3x3(d=2)+BN+ReLU -> conv3x3(d=2)+BN -> +res -> ReLU
#   -> global average pool -> 1x1-conv fc (matmul + bias)
# ----------------------------------------------------------------------------
def _conv3x3(xp_ref, col_ref, w_ref, scale, bias, *, d, geom, Bt, H, W):
    """3x3 conv (stride 1, padding=dilation=d) + folded BN over a Bt-image block.

    Layer input is already resident (bf16) in the interior of xp_ref with a zero halo.
    Builds a tap-packed im2col matrix in col_ref (full-lane-width group stores) and
    performs ONE MXU matmul with contraction K = ngroups*128.
    """
    cpk, tpg, ngroups = geom
    HW = H * W
    K = ngroups * CP
    for bi in range(Bt):
        for g in range(ngroups):
            pieces = []
            for ti in range(tpg):
                t = g * tpg + ti
                if t >= 9:
                    break
                ky, kx = divmod(t, 3)
                r0 = PAD - d + ky * d
                c0 = PAD - d + kx * d
                patch = xp_ref[bi, r0:r0 + H, c0:c0 + W, :]            # (H, W, CP) bf16
                pieces.append(patch.reshape(HW, CP)[:, :cpk])
            live = len(pieces) * cpk
            if live < CP:                                              # pad group to 128 lanes
                pieces.append(jnp.zeros((HW, CP - live), jnp.bfloat16))
            group = jnp.concatenate(pieces, axis=1) if len(pieces) > 1 else pieces[0]
            col_ref[bi * HW:(bi + 1) * HW, g * CP:(g + 1) * CP] = group
    y = jnp.dot(col_ref[:, :K], w_ref[...], preferred_element_type=jnp.float32)
    return y * scale + bias                                            # (Bt*HW, CP) f32


def _store_interior(xp_ref, h, *, Bt, H, W):
    """Write a (Bt*H*W, CP) f32 activation back into xp's interior as bf16 (one cast)."""
    HW = H * W
    for bi in range(Bt):
        xp_ref[bi, PAD:PAD + H, PAD:PAD + W, :] = (
            h[bi * HW:(bi + 1) * HW].reshape(H, W, CP).astype(jnp.bfloat16))


def _fused_drn_kernel(x_ref, w0_ref, w1_ref, w2_ref, sb_ref, wfc_ref, bfc_ref,
                      o_ref, xp_ref, col_ref, *, Bt, H, W, Wp, g0, g1, g2):
    HW = H * W
    Hp = H + 2 * PAD
    zeros_bf16 = functools.partial(jnp.zeros, dtype=jnp.bfloat16)

    # Zero only the halo strips (once per grid step); the interior is fully overwritten
    # by every layer, and both dilations read relative to the same PAD offset, so the
    # halo never goes stale.  (Interior stores start at sublane offset PAD=2; reads and
    # writes cannot both be 8-aligned, but the row width Wp is rounded to 8 sublanes.)
    for bi in range(Bt):
        xp_ref[bi, 0:PAD, :, :] = zeros_bf16((PAD, Wp, CP))
        xp_ref[bi, PAD + H:Hp, :, :] = zeros_bf16((Hp - PAD - H, Wp, CP))
        xp_ref[bi, PAD:PAD + H, 0:PAD, :] = zeros_bf16((H, PAD, CP))
        xp_ref[bi, PAD:PAD + H, PAD + W:Wp, :] = zeros_bf16((H, Wp - PAD - W, CP))
        # place this image's (bf16, channel-padded) input in the interior
        xp_ref[bi, PAD:PAD + H, PAD:PAD + W, :] = x_ref[bi]

    s0, b0 = sb_ref[0:1, :], sb_ref[1:2, :]
    s1, b1 = sb_ref[2:3, :], sb_ref[3:4, :]
    s2, b2 = sb_ref[4:5, :], sb_ref[5:6, :]
    conv = functools.partial(_conv3x3, xp_ref, col_ref, Bt=Bt, H=H, W=W)
    put = functools.partial(_store_interior, xp_ref, Bt=Bt, H=H, W=W)

    # stem: conv3x3(d=1) + BN + ReLU
    h0 = jnp.maximum(conv(w0_ref, s0, b0, d=1, geom=g0), 0.0)          # (Bt*HW, CP) f32
    put(h0)
    # dilated residual basic block (d=2): conv+BN+ReLU, conv+BN, +residual, ReLU
    h1 = jnp.maximum(conv(w1_ref, s1, b1, d=2, geom=g1), 0.0)
    put(h1)
    h2 = conv(w2_ref, s2, b2, d=2, geom=g2)
    h2 = jnp.maximum(h2 + h0, 0.0)                                     # residual + ReLU

    # head (fused): global average pool + 1x1-conv fc, all f32
    pooled = jnp.sum(h2.reshape(Bt, HW, CP), axis=1) * (1.0 / HW)      # (Bt, CP)
    logits = (jnp.dot(pooled, wfc_ref[...], preferred_element_type=jnp.float32)
              + bfc_ref[...])                                          # (Bt, NCP)
    o_ref[...] = logits.reshape(Bt, 1, NCP)


def _const_spec(shape):
    """BlockSpec for parameter blocks whose index_map never changes across the grid:
    single-buffer them (double-buffering constants only burns VMEM)."""
    idx = lambda b: (0,) * len(shape)
    try:
        return pl.BlockSpec(shape, idx, pipeline_mode=pl.Buffered(1))
    except (AttributeError, TypeError):   # older JAX without the pipeline_mode knob
        return pl.BlockSpec(shape, idx)


def fused_forward_nhwc(x_nhwc_cp, pp, geom, batch_tile):
    """x_nhwc_cp: (B, H, W, CP) bf16 with channels already zero-padded to CP."""
    B, H, W, _ = x_nhwc_cp.shape
    Bt = batch_tile
    assert B % Bt == 0
    Wp = _round_up(W + 2 * PAD, 8)
    Kmax = max(pp["w0"].shape[0], pp["w1"].shape[0], pp["w2"].shape[0])

    kernel = functools.partial(_fused_drn_kernel, Bt=Bt, H=H, W=W, Wp=Wp,
                               g0=geom[0], g1=geom[1], g2=geom[2])
    return pl.pallas_call(
        kernel,
        out_shape=jax.ShapeDtypeStruct((B, 1, NCP), jnp.float32),
        grid=(B // Bt,),
        in_specs=[
            pl.BlockSpec((Bt, H, W, CP), lambda b: (b, 0, 0, 0)),     # input (bf16)
            _const_spec(pp["w0"].shape),                              # packed conv weights
            _const_spec(pp["w1"].shape),
            _const_spec(pp["w2"].shape),
            _const_spec((8, CP)),                                     # BN scale/bias stack
            _const_spec((CP, NCP)),                                   # fc weight (f32)
            _const_spec((1, NCP)),                                    # fc bias (f32)
        ],
        out_specs=pl.BlockSpec((Bt, 1, NCP), lambda b: (b, 0, 0)),
        scratch_shapes=[
            pltpu.VMEM((Bt, H + 2 * PAD, Wp, CP), jnp.bfloat16),      # padded activation slab
            pltpu.VMEM((Bt * H * W, Kmax), jnp.bfloat16),             # tap-packed im2col
        ],
        compiler_params=pltpu.CompilerParams(
            dimension_semantics=("parallel",),       # >=2 grid steps -> both v7x TCs
            vmem_limit_bytes=8 * 1024 * 1024,        # actual working set < 2 MiB
        ),
    )(x_nhwc_cp, pp["w0"], pp["w1"], pp["w2"], pp["sb"], pp["w_fc"], pp["b_fc"])


# ----------------------------------------------------------------------------
# Parameters: PyTorch-style f32 params + one-time repack into the kernel layout.
# ----------------------------------------------------------------------------
def init_params(key, cin, c1, c2, num_classes):
    ks = jax.random.split(key, 11)
    p = {}
    p["w0"] = 0.1 * jax.random.normal(ks[0], (3, 3, cin, c1), jnp.float32)
    p["s0"] = 1.0 + 0.05 * jax.random.normal(ks[1], (c1,), jnp.float32)
    p["b0"] = 0.05 * jax.random.normal(ks[2], (c1,), jnp.float32)
    p["w1"] = 0.1 * jax.random.normal(ks[3], (3, 3, c1, c2), jnp.float32)
    p["s1"] = 1.0 + 0.05 * jax.random.normal(ks[4], (c2,), jnp.float32)
    p["b1"] = 0.05 * jax.random.normal(ks[5], (c2,), jnp.float32)
    p["w2"] = 0.1 * jax.random.normal(ks[6], (3, 3, c2, c2), jnp.float32)
    p["s2"] = 1.0 + 0.05 * jax.random.normal(ks[7], (c2,), jnp.float32)
    p["b2"] = 0.05 * jax.random.normal(ks[8], (c2,), jnp.float32)
    # replaced head: fc = nn.Conv2d(in_channels=c2, num_classes, kernel_size=1, bias=True)
    p["w_fc"] = 0.1 * jax.random.normal(ks[9], (c2, num_classes), jnp.float32)
    p["b_fc"] = 0.05 * jax.random.normal(ks[10], (num_classes,), jnp.float32)
    return p


def _pad_to(x, shape):
    return jnp.pad(x, [(0, t - s) for s, t in zip(x.shape, shape)])


def _pack_conv_weight(w):
    """(3,3,Cin,Cout) -> (ngroups*128, 128) bf16, matching the kernel's tap-packed
    im2col column layout (tap t at lanes (t % tpg)*cpk .. of group t // tpg)."""
    kh, kw, cin, cout = w.shape
    cpk, tpg, _ngroups = _pack_geom(cin)
    wp = jnp.zeros((_ngroups * CP, CP), jnp.float32)
    for t in range(kh * kw):
        g, ti = divmod(t, tpg)
        ky, kx = divmod(t, kw)
        r0 = g * CP + ti * cpk
        wp = wp.at[r0:r0 + cin, :cout].set(w[ky, kx])
    return wp.astype(jnp.bfloat16)


def prepare_params(p):
    """One-time repack: tap-packed bf16 conv weights, lane-padded BN/fc params."""
    sb = jnp.zeros((8, CP), jnp.float32)
    for row, name in enumerate(["s0", "b0", "s1", "b1", "s2", "b2"]):
        sb = sb.at[row, :p[name].shape[0]].set(p[name])
    prepared = {
        "w0": _pack_conv_weight(p["w0"]),
        "w1": _pack_conv_weight(p["w1"]),
        "w2": _pack_conv_weight(p["w2"]),
        "sb": sb,
        "w_fc": _pad_to(p["w_fc"], (CP, NCP)).astype(jnp.float32),
        "b_fc": _pad_to(p["b_fc"].reshape(1, -1), (1, NCP)).astype(jnp.float32),
    }
    geom = (_pack_geom(p["w0"].shape[2]),
            _pack_geom(p["w1"].shape[2]),
            _pack_geom(p["w2"].shape[2]))
    return prepared, geom


def forward(prepared, geom, x_nchw, num_classes):
    """NCHW in -> (B, num_classes) out, like DRN: features -> avgpool -> fc -> view."""
    x = jnp.transpose(x_nchw, (0, 2, 3, 1)).astype(jnp.bfloat16)      # NCHW -> NHWC, bf16 once
    B, H, W, _ = x.shape
    x = _pad_to(x, (B, H, W, CP))                                     # exact zero channel pad
    # Bt > 1 amortizes per-step overhead on single-TC v5e/v6e when B is large, but we
    # keep >= 2 grid steps so both v7x TensorCores get work.
    batch_tile = B // 2 if (B % 2 == 0 and B >= 4) else 1
    out = fused_forward_nhwc(x, prepared, geom, batch_tile)           # (B, 1, NCP)
    return out[:, 0, :num_classes]                                    # view(B, -1)


# ----------------------------------------------------------------------------
# Pure-JAX reference (same bf16-input / f32-accumulate matmul precision as the kernel)
# ----------------------------------------------------------------------------
def _ref_conv(x, w, s, b, d, relu, residual=None):
    y = jax.lax.conv_general_dilated(
        x.astype(jnp.bfloat16), w.astype(jnp.bfloat16),
        window_strides=(1, 1), padding=[(d, d), (d, d)],
        rhs_dilation=(d, d), dimension_numbers=("NHWC", "HWIO", "NHWC"),
        preferred_element_type=jnp.float32)
    y = y * s.reshape(1, 1, 1, -1) + b.reshape(1, 1, 1, -1)
    if residual is not None:
        y = y + residual
    if relu:
        y = jnp.maximum(y, 0.0)
    return y


def forward_ref(params, x_nchw):
    x = jnp.transpose(x_nchw, (0, 2, 3, 1)).astype(jnp.float32)
    h = _ref_conv(x, params["w0"], params["s0"], params["b0"], 1, True)
    r = h
    h = _ref_conv(h, params["w1"], params["s1"], params["b1"], 2, True)
    h = _ref_conv(h, params["w2"], params["s2"], params["b2"], 2, True, residual=r)
    pooled = jnp.mean(h, axis=(1, 2))
    return pooled @ params["w_fc"] + params["b_fc"]


if __name__ == "__main__":
    key = jax.random.PRNGKey(0)
    k_x, k_p = jax.random.split(key)

    B, Cin, H, W = 2, 4, 16, 16
    C1, C2, NUM_CLASSES = 16, 16, 8

    x = jax.random.normal(k_x, (B, Cin, H, W), jnp.float32)           # PyTorch-style NCHW
    params = init_params(k_p, Cin, C1, C2, NUM_CLASSES)
    prepared, geom = prepare_params(params)                           # one-time repack

    out = forward(prepared, geom, x, NUM_CLASSES)
    out = jax.block_until_ready(out)

    ref = forward_ref(params, x)
    assert out.shape == (B, NUM_CLASSES)
    assert jnp.allclose(out, ref, atol=5e-3, rtol=5e-3), "mismatch vs JAX reference"

    print("KERNEL_OK")
</pallas_src>

<mosaic_0001>
module attributes {stable_mosaic.version = 11 : i64} {
  func.func @_fused_drn_kernel(%arg0: i32, %arg1: memref<1x16x16x128xbf16, #tpu.memory_space<vmem>>, %arg2: memref<128x128xbf16, #tpu.memory_space<vmem>>, %arg3: memref<256x128xbf16, #tpu.memory_space<vmem>>, %arg4: memref<256x128xbf16, #tpu.memory_space<vmem>>, %arg5: memref<8x128xf32, #tpu.memory_space<vmem>>, %arg6: memref<128x128xf32, #tpu.memory_space<vmem>>, %arg7: memref<1x128xf32, #tpu.memory_space<vmem>>, %arg8: memref<1x1x128xf32, #tpu.memory_space<vmem>>, %arg9: memref<1x20x24x128xbf16, #tpu.memory_space<vmem>>, %arg10: memref<256x256xbf16, #tpu.memory_space<vmem>>) attributes {dimension_semantics = [#tpu.dimension_semantics<parallel>], iteration_bounds = array<i64: 2>, scalar_prefetch = 0 : i64, scratch_operands = 2 : i64, tpu.core_type = #tpu.core_type<tc>, window_params = [{transform_indices = @transform_0, window_bounds = array<i64: 1, 16, 16, 128>}, {pipeline_mode = #tpu.pipeline_mode<synchronous>, transform_indices = @transform_1, window_bounds = array<i64: 128, 128>}, {pipeline_mode = #tpu.pipeline_mode<synchronous>, transform_indices = @transform_2, window_bounds = array<i64: 256, 128>}, {pipeline_mode = #tpu.pipeline_mode<synchronous>, transform_indices = @transform_3, window_bounds = array<i64: 256, 128>}, {pipeline_mode = #tpu.pipeline_mode<synchronous>, transform_indices = @transform_4, window_bounds = array<i64: 8, 128>}, {pipeline_mode = #tpu.pipeline_mode<synchronous>, transform_indices = @transform_5, window_bounds = array<i64: 128, 128>}, {pipeline_mode = #tpu.pipeline_mode<synchronous>, transform_indices = @transform_6, window_bounds = array<i64: 1, 128>}, {transform_indices = @transform_7, window_bounds = array<i64: 1, 1, 128>}]} {
    %cst = arith.constant 0.000000e+00 : bf16
    %0 = vector.broadcast %cst : bf16 to vector<2x24x128xbf16>
    %c0 = arith.constant 0 : index
    %c0_0 = arith.constant 0 : index
    %c0_1 = arith.constant 0 : index
    %c0_2 = arith.constant 0 : index
    %1 = vector.load %arg9[%c0, %c0_0, %c0_1, %c0_2] : memref<1x20x24x128xbf16, #tpu.memory_space<vmem>>, vector<1x2x24x128xbf16>
    %2 = vector.shape_cast %1 : vector<1x2x24x128xbf16> to vector<2x24x128xbf16>
    %3 = vector.shape_cast %0 : vector<2x24x128xbf16> to vector<1x2x24x128xbf16>
    tpu.vector_store %arg9[%c0, %c0_0, %c0_1, %c0_2], %3 {strides = array<i32>} : memref<1x20x24x128xbf16, #tpu.memory_space<vmem>>, vector<1x2x24x128xbf16>,
    %cst_3 = arith.constant 0.000000e+00 : bf16
    %4 = vector.broadcast %cst_3 : bf16 to vector<2x24x128xbf16>
    %c0_4 = arith.constant 0 : index
    %c18 = arith.constant 18 : index
    %c0_5 = arith.constant 0 : index
    %c0_6 = arith.constant 0 : index
    %5 = vector.load %arg9[%c0_4, %c18, %c0_5, %c0_6] : memref<1x20x24x128xbf16, #tpu.memory_space<vmem>>, vector<1x2x24x128xbf16>
    %6 = vector.shape_cast %5 : vector<1x2x24x128xbf16> to vector<2x24x128xbf16>
    %7 = vector.shape_cast %4 : vector<2x24x128xbf16> to vector<1x2x24x128xbf16>
    tpu.vector_store %arg9[%c0_4, %c18, %c0_5, %c0_6], %7 {strides = array<i32>} : memref<1x20x24x128xbf16, #tpu.memory_space<vmem>>, vector<1x2x24x128xbf16>,
    %cst_7 = arith.constant 0.000000e+00 : bf16
    %8 = vector.broadcast %cst_7 : bf16 to vector<16x2x128xbf16>
    %c0_8 = arith.constant 0 : index
    %c2 = arith.constant 2 : index
    %c0_9 = arith.constant 0 : index
    %c0_10 = arith.constant 0 : index
    %9 = vector.load %arg9[%c0_8, %c2, %c0_9, %c0_10] : memref<1x20x24x128xbf16, #tpu.memory_space<vmem>>, vector<1x16x2x128xbf16>
    %10 = vector.shape_cast %9 : vector<1x16x2x128xbf16> to vector<16x2x128xbf16>
    %11 = vector.shape_cast %8 : vector<16x2x128xbf16> to vector<1x16x2x128xbf16>
    tpu.vector_store %arg9[%c0_8, %c2, %c0_9, %c0_10], %11 {strides = array<i32>} : memref<1x20x24x128xbf16, #tpu.memory_space<vmem>>, vector<1x16x2x128xbf16>,
    %cst_11 = arith.constant 0.000000e+00 : bf16
    %12 = vector.broadcast %cst_11 : bf16 to vector<16x6x128xbf16>
    %c0_12 = arith.constant 0 : index
    %c2_13 = arith.constant 2 : index
    %c18_14 = arith.constant 18 : index
    %c0_15 = arith.constant 0 : index
    %13 = vector.load %arg9[%c0_12, %c2_13, %c18_14, %c0_15] : memref<1x20x24x128xbf16, #tpu.memory_space<vmem>>, vector<1x16x6x128xbf16>
    %14 = vector.shape_cast %13 : vector<1x16x6x128xbf16> to vector<16x6x128xbf16>
    %15 = vector.shape_cast %12 : vector<16x6x128xbf16> to vector<1x16x6x128xbf16>
    tpu.vector_store %arg9[%c0_12, %c2_13, %c18_14, %c0_15], %15 {strides = array<i32>} : memref<1x20x24x128xbf16, #tpu.memory_space<vmem>>, vector<1x16x6x128xbf16>,
    %c0_16 = arith.constant 0 : index
    %c0_17 = arith.constant 0 : index
    %c0_18 = arith.constant 0 : index
    %c0_19 = arith.constant 0 : index
    %16 = vector.load %arg1[%c0_16, %c0_17, %c0_18, %c0_19] : memref<1x16x16x128xbf16, #tpu.memory_space<vmem>>, vector<1x16x16x128xbf16>
    %17 = vector.shape_cast %16 : vector<1x16x16x128xbf16> to vector<16x16x128xbf16>
    %c0_20 = arith.constant 0 : index
    %c2_21 = arith.constant 2 : index
    %c2_22 = arith.constant 2 : index
    %c0_23 = arith.constant 0 : index
    %18 = vector.load %arg9[%c0_20, %c2_21, %c2_22, %c0_23] : memref<1x20x24x128xbf16, #tpu.memory_space<vmem>>, vector<1x16x16x128xbf16>
    %19 = vector.shape_cast %18 : vector<1x16x16x128xbf16> to vector<16x16x128xbf16>
    %20 = vector.shape_cast %17 : vector<16x16x128xbf16> to vector<1x16x16x128xbf16>
    tpu.vector_store %arg9[%c0_20, %c2_21, %c2_22, %c0_23], %20 {strides = array<i32>} : memref<1x20x24x128xbf16, #tpu.memory_space<vmem>>, vector<1x16x16x128xbf16>,
    %c0_24 = arith.constant 0 : index
    %c0_25 = arith.constant 0 : index
    %21 = vector.load %arg5[%c0_24, %c0_25] : memref<8x128xf32, #tpu.memory_space<vmem>>, vector<1x128xf32>
    %c1 = arith.constant 1 : index
    %c0_26 = arith.constant 0 : index
    %22 = vector.load %arg5[%c1, %c0_26] : memref<8x128xf32, #tpu.memory_space<vmem>>, vector<1x128xf32>
    %c2_27 = arith.constant 2 : index
    %c0_28 = arith.constant 0 : index
    %23 = vector.load %arg5[%c2_27, %c0_28] : memref<8x128xf32, #tpu.memory_space<vmem>>, vector<1x128xf32>
    %c3 = arith.constant 3 : index
    %c0_29 = arith.constant 0 : index
    %24 = vector.load %arg5[%c3, %c0_29] : memref<8x128xf32, #tpu.memory_space<vmem>>, vector<1x128xf32>
    %c4 = arith.constant 4 : index
    %c0_30 = arith.constant 0 : index
    %25 = vector.load %arg5[%c4, %c0_30] : memref<8x128xf32, #tpu.memory_space<vmem>>, vector<1x128xf32>
    %c5 = arith.constant 5 : index
    %c0_31 = arith.constant 0 : index
    %26 = vector.load %arg5[%c5, %c0_31] : memref<8x128xf32, #tpu.memory_space<vmem>>, vector<1x128xf32>
    %c0_32 = arith.constant 0 : index
    %c1_33 = arith.constant 1 : index
    %c1_34 = arith.constant 1 : index
    %c0_35 = arith.constant 0 : index
    %27 = vector.load %arg9[%c0_32, %c1_33, %c1_34, %c0_35] : memref<1x20x24x128xbf16, #tpu.memory_space<vmem>>, vector<1x16x16x128xbf16>
    %28 = vector.shape_cast %27 : vector<1x16x16x128xbf16> to vector<16x16x128xbf16>
    %29 = vector.shape_cast %28 : vector<16x16x128xbf16> to vector<256x128xbf16>
    %30 = vector.extract_strided_slice %29 {offsets = [0, 0], sizes = [256, 8], strides = [1, 1]} : vector<256x128xbf16> to vector<256x8xbf16>
    %c0_36 = arith.constant 0 : index
    %c1_37 = arith.constant 1 : index
    %c2_38 = arith.constant 2 : index
    %c0_39 = arith.constant 0 : index
    %31 = vector.load %arg9[%c0_36, %c1_37, %c2_38, %c0_39] : memref<1x20x24x128xbf16, #tpu.memory_space<vmem>>, vector<1x16x16x128xbf16>
    %32 = vector.shape_cast %31 : vector<1x16x16x128xbf16> to vector<16x16x128xbf16>
    %33 = vector.shape_cast %32 : vector<16x16x128xbf16> to vector<256x128xbf16>
    %34 = vector.extract_strided_slice %33 {offsets = [0, 0], sizes = [256, 8], strides = [1, 1]} : vector<256x128xbf16> to vector<256x8xbf16>
    %c0_40 = arith.constant 0 : index
    %c1_41 = arith.constant 1 : index
    %c3_42 = arith.constant 3 : index
    %c0_43 = arith.constant 0 : index
    %35 = vector.load %arg9[%c0_40, %c1_41, %c3_42, %c0_43] : memref<1x20x24x128xbf16, #tpu.memory_space<vmem>>, vector<1x16x16x128xbf16>
    %36 = vector.shape_cast %35 : vector<1x16x16x128xbf16> to vector<16x16x128xbf16>
    %37 = vector.shape_cast %36 : vector<16x16x128xbf16> to vector<256x128xbf16>
    %38 = vector.extract_strided_slice %37 {offsets = [0, 0], sizes = [256, 8], strides = [1, 1]} : vector<256x128xbf16> to vector<256x8xbf16>
    %c0_44 = arith.constant 0 : index
    %c2_45 = arith.constant 2 : index
    %c1_46 = arith.constant 1 : index
    %c0_47 = arith.constant 0 : index
    %39 = vector.load %arg9[%c0_44, %c2_45, %c1_46, %c0_47] : memref<1x20x24x128xbf16, #tpu.memory_space<vmem>>, vector<1x16x16x128xbf16>
    %40 = vector.shape_cast %39 : vector<1x16x16x128xbf16> to vector<16x16x128xbf16>
    %41 = vector.shape_cast %40 : vector<16x16x128xbf16> to vector<256x128xbf16>
    %42 = vector.extract_strided_slice %41 {offsets = [0, 0], sizes = [256, 8], strides = [1, 1]} : vector<256x128xbf16> to vector<256x8xbf16>
    %c0_48 = arith.constant 0 : index
    %c2_49 = arith.constant 2 : index
    %c2_50 = arith.constant 2 : index
    %c0_51 = arith.constant 0 : index
    %43 = vector.load %arg9[%c0_48, %c2_49, %c2_50, %c0_51] : memref<1x20x24x128xbf16, #tpu.memory_space<vmem>>, vector<1x16x16x128xbf16>
    %44 = vector.shape_cast %43 : vector<1x16x16x128xbf16> to vector<16x16x128xbf16>
    %45 = vector.shape_cast %44 : vector<16x16x128xbf16> to vector<256x128xbf16>
    %46 = vector.extract_strided_slice %45 {offsets = [0, 0], sizes = [256, 8], strides = [1, 1]} : vector<256x128xbf16> to vector<256x8xbf16>
    %c0_52 = arith.constant 0 : index
    %c2_53 = arith.constant 2 : index
    %c3_54 = arith.constant 3 : index
    %c0_55 = arith.constant 0 : index
    %47 = vector.load %arg9[%c0_52, %c2_53, %c3_54, %c0_55] : memref<1x20x24x128xbf16, #tpu.memory_space<vmem>>, vector<1x16x16x128xbf16>
    %48 = vector.shape_cast %47 : vector<1x16x16x128xbf16> to vector<16x16x128xbf16>
    %49 = vector.shape_cast %48 : vector<16x16x128xbf16> to vector<256x128xbf16>
    %50 = vector.extract_strided_slice %49 {offsets = [0, 0], sizes = [256, 8], strides = [1, 1]} : vector<256x128xbf16> to vector<256x8xbf16>
    %c0_56 = arith.constant 0 : index
    %c3_57 = arith.constant 3 : index
    %c1_58 = arith.constant 1 : index
    %c0_59 = arith.constant 0 : index
    %51 = vector.load %arg9[%c0_56, %c3_57, %c1_58, %c0_59] : memref<1x20x24x128xbf16, #tpu.memory_space<vmem>>, vector<1x16x16x128xbf16>
    %52 = vector.shape_cast %51 : vector<1x16x16x128xbf16> to vector<16x16x128xbf16>
    %53 = vector.shape_cast %52 : vector<16x16x128xbf16> to vector<256x128xbf16>
    %54 = vector.extract_strided_slice %53 {offsets = [0, 0], sizes = [256, 8], strides = [1, 1]} : vector<256x128xbf16> to vector<256x8xbf16>
    %c0_60 = arith.constant 0 : index
    %c3_61 = arith.constant 3 : index
    %c2_62 = arith.constant 2 : index
    %c0_63 = arith.constant 0 : index
    %55 = vector.load %arg9[%c0_60, %c3_61, %c2_62, %c0_63] : memref<1x20x24x128xbf16, #tpu.memory_space<vmem>>, vector<1x16x16x128xbf16>
    %56 = vector.shape_cast %55 : vector<1x16x16x128xbf16> to vector<16x16x128xbf16>
    %57 = vector.shape_cast %56 : vector<16x16x128xbf16> to vector<256x128xbf16>
    %58 = vector.extract_strided_slice %57 {offsets = [0, 0], sizes = [256, 8], strides = [1, 1]} : vector<256x128xbf16> to vector<256x8xbf16>
    %c0_64 = arith.constant 0 : index
    %c3_65 = arith.constant 3 : index
    %c3_66 = arith.constant 3 : index
    %c0_67 = arith.constant 0 : index
    %59 = vector.load %arg9[%c0_64, %c3_65, %c3_66, %c0_67] : memref<1x20x24x128xbf16, #tpu.memory_space<vmem>>, vector<1x16x16x128xbf16>
    %60 = vector.shape_cast %59 : vector<1x16x16x128xbf16> to vector<16x16x128xbf16>
    %61 = vector.shape_cast %60 : vector<16x16x128xbf16> to vector<256x128xbf16>
    %62 = vector.extract_strided_slice %61 {offsets = [0, 0], sizes = [256, 8], strides = [1, 1]} : vector<256x128xbf16> to vector<256x8xbf16>
    %cst_68 = arith.constant 0.000000e+00 : bf16
    %63 = vector.broadcast %cst_68 : bf16 to vector<256x56xbf16>
    %64 = tpu.concatenate %30, %34, %38, %42, %46, %50, %54, %58, %62, %63 in 1 : vector<256x8xbf16>, vector<256x8xbf16>, vector<256x8xbf16>, vector<256x8xbf16>, vector<256x8xbf16>, vector<256x8xbf16>, vector<256x8xbf16>, vector<256x8xbf16>, vector<256x8xbf16>, vector<256x56xbf16> -> vector<256x128xbf16>
    %c0_69 = arith.constant 0 : index
    %c0_70 = arith.constant 0 : index
    %65 = vector.load %arg10[%c0_69, %c0_70] : memref<256x256xbf16, #tpu.memory_space<vmem>>, vector<256x128xbf16>
    tpu.vector_store %arg10[%c0_69, %c0_70], %64 {strides = array<i32>} : memref<256x256xbf16, #tpu.memory_space<vmem>>, vector<256x128xbf16>,
    %c0_71 = arith.constant 0 : index
    %c0_72 = arith.constant 0 : index
    %66 = vector.load %arg10[%c0_71, %c0_72] : memref<256x256xbf16, #tpu.memory_space<vmem>>, vector<256x128xbf16>
    %c0_73 = arith.constant 0 : index
    %c0_74 = arith.constant 0 : index
    %67 = vector.load %arg2[%c0_73, %c0_74] : memref<128x128xbf16, #tpu.memory_space<vmem>>, vector<128x128xbf16>
    %cst_75 = arith.constant dense<0.000000e+00> : vector<256x128xf32>
    %68 = tpu.matmul %66, %67, %cst_75 {dimension_numbers = #tpu.dot_dimension_numbers<[1], [0], [0], [1], [0, 0, 1, 1], [], []>} : vector<256x128xbf16>, vector<128x128xbf16>, vector<256x128xf32> -> vector<256x128xf32>
    %69 = vector.broadcast %21 : vector<1x128xf32> to vector<256x128xf32>
    %70 = arith.mulf %68, %69 : vector<256x128xf32>
    %71 = vector.broadcast %22 : vector<1x128xf32> to vector<256x128xf32>
    %72 = arith.addf %70, %71 : vector<256x128xf32>
    %cst_76 = arith.constant 0.000000e+00 : f32
    %73 = vector.broadcast %cst_76 : f32 to vector<256x128xf32>
    %74 = arith.maximumf %72, %73 : vector<256x128xf32>
    %75 = vector.shape_cast %74 : vector<256x128xf32> to vector<16x16x128xf32>
    %76 = arith.truncf %75 : vector<16x16x128xf32> to vector<16x16x128xbf16>
    %c0_77 = arith.constant 0 : index
    %c2_78 = arith.constant 2 : index
    %c2_79 = arith.constant 2 : index
    %c0_80 = arith.constant 0 : index
    %77 = vector.load %arg9[%c0_77, %c2_78, %c2_79, %c0_80] : memref<1x20x24x128xbf16, #tpu.memory_space<vmem>>, vector<1x16x16x128xbf16>
    %78 = vector.shape_cast %77 : vector<1x16x16x128xbf16> to vector<16x16x128xbf16>
    %79 = vector.shape_cast %76 : vector<16x16x128xbf16> to vector<1x16x16x128xbf16>
    tpu.vector_store %arg9[%c0_77, %c2_78, %c2_79, %c0_80], %79 {strides = array<i32>} : memref<1x20x24x128xbf16, #tpu.memory_space<vmem>>, vector<1x16x16x128xbf16>,
    %c0_81 = arith.constant 0 : index
    %c0_82 = arith.constant 0 : index
    %c0_83 = arith.constant 0 : index
    %c0_84 = arith.constant 0 : index
    %80 = vector.load %arg9[%c0_81, %c0_82, %c0_83, %c0_84] : memref<1x20x24x128xbf16, #tpu.memory_space<vmem>>, vector<1x16x16x128xbf16>
    %81 = vector.shape_cast %80 : vector<1x16x16x128xbf16> to vector<16x16x128xbf16>
    %82 = vector.shape_cast %81 : vector<16x16x128xbf16> to vector<256x128xbf16>
    %83 = vector.extract_strided_slice %82 {offsets = [0, 0], sizes = [256, 16], strides = [1, 1]} : vector<256x128xbf16> to vector<256x16xbf16>
    %c0_85 = arith.constant 0 : index
    %c0_86 = arith.constant 0 : index
    %c2_87 = arith.constant 2 : index
    %c0_88 = arith.constant 0 : index
    %84 = vector.load %arg9[%c0_85, %c0_86, %c2_87, %c0_88] : memref<1x20x24x128xbf16, #tpu.memory_space<vmem>>, vector<1x16x16x128xbf16>
    %85 = vector.shape_cast %84 : vector<1x16x16x128xbf16> to vector<16x16x128xbf16>
    %86 = vector.shape_cast %85 : vector<16x16x128xbf16> to vector<256x128xbf16>
    %87 = vector.extract_strided_slice %86 {offsets = [0, 0], sizes = [256, 16], strides = [1, 1]} : vector<256x128xbf16> to vector<256x16xbf16>
    %c0_89 = arith.constant 0 : index
    %c0_90 = arith.constant 0 : index
    %c4_91 = arith.constant 4 : index
    %c0_92 = arith.constant 0 : index
    %88 = vector.load %arg9[%c0_89, %c0_90, %c4_91, %c0_92] : memref<1x20x24x128xbf16, #tpu.memory_space<vmem>>, vector<1x16x16x128xbf16>
    %89 = vector.shape_cast %88 : vector<1x16x16x128xbf16> to vector<16x16x128xbf16>
    %90 = vector.shape_cast %89 : vector<16x16x128xbf16> to vector<256x128xbf16>
    %91 = vector.extract_strided_slice %90 {offsets = [0, 0], sizes = [256, 16], strides = [1, 1]} : vector<256x128xbf16> to vector<256x16xbf16>
    %c0_93 = arith.constant 0 : index
    %c2_94 = arith.constant 2 : index
    %c0_95 = arith.constant 0 : index
    %c0_96 = arith.constant 0 : index
    %92 = vector.load %arg9[%c0_93, %c2_94, %c0_95, %c0_96] : memref<1x20x24x128xbf16, #tpu.memory_space<vmem>>, vector<1x16x16x128xbf16>
    %93 = vector.shape_cast %92 : vector<1x16x16x128xbf16> to vector<16x16x128xbf16>
    %94 = vector.shape_cast %93 : vector<16x16x128xbf16> to vector<256x128xbf16>
    %95 = vector.extract_strided_slice %94 {offsets = [0, 0], sizes = [256, 16], strides = [1, 1]} : vector<256x128xbf16> to vector<256x16xbf16>
    %c0_97 = arith.constant 0 : index
    %c2_98 = arith.constant 2 : index
    %c2_99 = arith.constant 2 : index
    %c0_100 = arith.constant 0 : index
    %96 = vector.load %arg9[%c0_97, %c2_98, %c2_99, %c0_100] : memref<1x20x24x128xbf16, #tpu.memory_space<vmem>>, vector<1x16x16x128xbf16>
    %97 = vector.shape_cast %96 : vector<1x16x16x128xbf16> to vector<16x16x128xbf16>
    %98 = vector.shape_cast %97 : vector<16x16x128xbf16> to vector<256x128xbf16>
    %99 = vector.extract_strided_slice %98 {offsets = [0, 0], sizes = [256, 16], strides = [1, 1]} : vector<256x128xbf16> to vector<256x16xbf16>
    %c0_101 = arith.constant 0 : index
    %c2_102 = arith.constant 2 : index
    %c4_103 = arith.constant 4 : index
    %c0_104 = arith.constant 0 : index
    %100 = vector.load %arg9[%c0_101, %c2_102, %c4_103, %c0_104] : memref<1x20x24x128xbf16, #tpu.memory_space<vmem>>, vector<1x16x16x128xbf16>
    %101 = vector.shape_cast %100 : vector<1x16x16x128xbf16> to vector<16x16x128xbf16>
    %102 = vector.shape_cast %101 : vector<16x16x128xbf16> to vector<256x128xbf16>
    %103 = vector.extract_strided_slice %102 {offsets = [0, 0], sizes = [256, 16], strides = [1, 1]} : vector<256x128xbf16> to vector<256x16xbf16>
    %c0_105 = arith.constant 0 : index
    %c4_106 = arith.constant 4 : index
    %c0_107 = arith.constant 0 : index
    %c0_108 = arith.constant 0 : index
    %104 = vector.load %arg9[%c0_105, %c4_106, %c0_107, %c0_108] : memref<1x20x24x128xbf16, #tpu.memory_space<vmem>>, vector<1x16x16x128xbf16>
    %105 = vector.shape_cast %104 : vector<1x16x16x128xbf16> to vector<16x16x128xbf16>
    %106 = vector.shape_cast %105 : vector<16x16x128xbf16> to vector<256x128xbf16>
    %107 = vector.extract_strided_slice %106 {offsets = [0, 0], sizes = [256, 16], strides = [1, 1]} : vector<256x128xbf16> to vector<256x16xbf16>
    %c0_109 = arith.constant 0 : index
    %c4_110 = arith.constant 4 : index
    %c2_111 = arith.constant 2 : index
    %c0_112 = arith.constant 0 : index
    %108 = vector.load %arg9[%c0_109, %c4_110, %c2_111, %c0_112] : memref<1x20x24x128xbf16, #tpu.memory_space<vmem>>, vector<1x16x16x128xbf16>
    %109 = vector.shape_cast %108 : vector<1x16x16x128xbf16> to vector<16x16x128xbf16>
    %110 = vector.shape_cast %109 : vector<16x16x128xbf16> to vector<256x128xbf16>
    %111 = vector.extract_strided_slice %110 {offsets = [0, 0], sizes = [256, 16], strides = [1, 1]} : vector<256x128xbf16> to vector<256x16xbf16>
    %112 = tpu.concatenate %83, %87, %91, %95, %99, %103, %107, %111 in 1 : vector<256x16xbf16>, vector<256x16xbf16>, vector<256x16xbf16>, vector<256x16xbf16>, vector<256x16xbf16>, vector<256x16xbf16>, vector<256x16xbf16>, vector<256x16xbf16> -> vector<256x128xbf16>
    %c0_113 = arith.constant 0 : index
    %c0_114 = arith.constant 0 : index
    %113 = vector.load %arg10[%c0_113, %c0_114] : memref<256x256xbf16, #tpu.memory_space<vmem>>, vector<256x128xbf16>
    tpu.vector_store %arg10[%c0_113, %c0_114], %112 {strides = array<i32>} : memref<256x256xbf16, #tpu.memory_space<vmem>>, vector<256x128xbf16>,
    %c0_115 = arith.constant 0 : index
    %c4_116 = arith.constant 4 : index
    %c4_117 = arith.constant 4 : index
    %c0_118 = arith.constant 0 : index
    %114 = vector.load %arg9[%c0_115, %c4_116, %c4_117, %c0_118] : memref<1x20x24x128xbf16, #tpu.memory_space<vmem>>, vector<1x16x16x128xbf16>
    %115 = vector.shape_cast %114 : vector<1x16x16x128xbf16> to vector<16x16x128xbf16>
    %116 = vector.shape_cast %115 : vector<16x16x128xbf16> to vector<256x128xbf16>
    %117 = vector.extract_strided_slice %116 {offsets = [0, 0], sizes = [256, 16], strides = [1, 1]} : vector<256x128xbf16> to vector<256x16xbf16>
    %cst_119 = arith.constant 0.000000e+00 : bf16
    %118 = vector.broadcast %cst_119 : bf16 to vector<256x112xbf16>
    %119 = tpu.concatenate %117, %118 in 1 : vector<256x16xbf16>, vector<256x112xbf16> -> vector<256x128xbf16>
    %c0_120 = arith.constant 0 : index
    %c128 = arith.constant 128 : index
    %120 = vector.load %arg10[%c0_120, %c128] : memref<256x256xbf16, #tpu.memory_space<vmem>>, vector<256x128xbf16>
    tpu.vector_store %arg10[%c0_120, %c128], %119 {strides = array<i32>} : memref<256x256xbf16, #tpu.memory_space<vmem>>, vector<256x128xbf16>,
    %c0_121 = arith.constant 0 : index
    %c0_122 = arith.constant 0 : index
    %121 = vector.load %arg10[%c0_121, %c0_122] : memref<256x256xbf16, #tpu.memory_space<vmem>>, vector<256x256xbf16>
    %c0_123 = arith.constant 0 : index
    %c0_124 = arith.constant 0 : index
    %122 = vector.load %arg3[%c0_123, %c0_124] : memref<256x128xbf16, #tpu.memory_space<vmem>>, vector<256x128xbf16>
    %cst_125 = arith.constant dense<0.000000e+00> : vector<256x128xf32>
    %123 = tpu.matmul %121, %122, %cst_125 {dimension_numbers = #tpu.dot_dimension_numbers<[1], [0], [0], [1], [0, 0, 1, 1], [], []>} : vector<256x256xbf16>, vector<256x128xbf16>, vector<256x128xf32> -> vector<256x128xf32>
    %124 = vector.broadcast %23 : vector<1x128xf32> to vector<256x128xf32>
    %125 = arith.mulf %123, %124 : vector<256x128xf32>
    %126 = vector.broadcast %24 : vector<1x128xf32> to vector<256x128xf32>
    %127 = arith.addf %125, %126 : vector<256x128xf32>
    %cst_126 = arith.constant 0.000000e+00 : f32
    %128 = vector.broadcast %cst_126 : f32 to vector<256x128xf32>
    %129 = arith.maximumf %127, %128 : vector<256x128xf32>
    %130 = vector.shape_cast %129 : vector<256x128xf32> to vector<16x16x128xf32>
    %131 = arith.truncf %130 : vector<16x16x128xf32> to vector<16x16x128xbf16>
    %c0_127 = arith.constant 0 : index
    %c2_128 = arith.constant 2 : index
    %c2_129 = arith.constant 2 : index
    %c0_130 = arith.constant 0 : index
    %132 = vector.load %arg9[%c0_127, %c2_128, %c2_129, %c0_130] : memref<1x20x24x128xbf16, #tpu.memory_space<vmem>>, vector<1x16x16x128xbf16>
    %133 = vector.shape_cast %132 : vector<1x16x16x128xbf16> to vector<16x16x128xbf16>
    %134 = vector.shape_cast %131 : vector<16x16x128xbf16> to vector<1x16x16x128xbf16>
    tpu.vector_store %arg9[%c0_127, %c2_128, %c2_129, %c0_130], %134 {strides = array<i32>} : memref<1x20x24x128xbf16, #tpu.memory_space<vmem>>, vector<1x16x16x128xbf16>,
    %c0_131 = arith.constant 0 : index
    %c0_132 = arith.constant 0 : index
    %c0_133 = arith.constant 0 : index
    %c0_134 = arith.constant 0 : index
    %135 = vector.load %arg9[%c0_131, %c0_132, %c0_133, %c0_134] : memref<1x20x24x128xbf16, #tpu.memory_space<vmem>>, vector<1x16x16x128xbf16>
    %136 = vector.shape_cast %135 : vector<1x16x16x128xbf16> to vector<16x16x128xbf16>
    %137 = vector.shape_cast %136 : vector<16x16x128xbf16> to vector<256x128xbf16>
    %138 = vector.extract_strided_slice %137 {offsets = [0, 0], sizes = [256, 16], strides = [1, 1]} : vector<256x128xbf16> to vector<256x16xbf16>
    %c0_135 = arith.constant 0 : index
    %c0_136 = arith.constant 0 : index
    %c2_137 = arith.constant 2 : index
    %c0_138 = arith.constant 0 : index
    %139 = vector.load %arg9[%c0_135, %c0_136, %c2_137, %c0_138] : memref<1x20x24x128xbf16, #tpu.memory_space<vmem>>, vector<1x16x16x128xbf16>
    %140 = vector.shape_cast %139 : vector<1x16x16x128xbf16> to vector<16x16x128xbf16>
    %141 = vector.shape_cast %140 : vector<16x16x128xbf16> to vector<256x128xbf16>
    %142 = vector.extract_strided_slice %141 {offsets = [0, 0], sizes = [256, 16], strides = [1, 1]} : vector<256x128xbf16> to vector<256x16xbf16>
    %c0_139 = arith.constant 0 : index
    %c0_140 = arith.constant 0 : index
    %c4_141 = arith.constant 4 : index
    %c0_142 = arith.constant 0 : index
    %143 = vector.load %arg9[%c0_139, %c0_140, %c4_141, %c0_142] : memref<1x20x24x128xbf16, #tpu.memory_space<vmem>>, vector<1x16x16x128xbf16>
    %144 = vector.shape_cast %143 : vector<1x16x16x128xbf16> to vector<16x16x128xbf16>
    %145 = vector.shape_cast %144 : vector<16x16x128xbf16> to vector<256x128xbf16>
    %146 = vector.extract_strided_slice %145 {offsets = [0, 0], sizes = [256, 16], strides = [1, 1]} : vector<256x128xbf16> to vector<256x16xbf16>
    %c0_143 = arith.constant 0 : index
    %c2_144 = arith.constant 2 : index
    %c0_145 = arith.constant 0 : index
    %c0_146 = arith.constant 0 : index
    %147 = vector.load %arg9[%c0_143, %c2_144, %c0_145, %c0_146] : memref<1x20x24x128xbf16, #tpu.memory_space<vmem>>, vector<1x16x16x128xbf16>
    %148 = vector.shape_cast %147 : vector<1x16x16x128xbf16> to vector<16x16x128xbf16>
    %149 = vector.shape_cast %148 : vector<16x16x128xbf16> to vector<256x128xbf16>
    %150 = vector.extract_strided_slice %149 {offsets = [0, 0], sizes = [256, 16], strides = [1, 1]} : vector<256x128xbf16> to vector<256x16xbf16>
    %c0_147 = arith.constant 0 : index
    %c2_148 = arith.constant 2 : index
    %c2_149 = arith.constant 2 : index
    %c0_150 = arith.constant 0 : index
    %151 = vector.load %arg9[%c0_147, %c2_148, %c2_149, %c0_150] : memref<1x20x24x128xbf16, #tpu.memory_space<vmem>>, vector<1x16x16x128xbf16>
    %152 = vector.shape_cast %151 : vector<1x16x16x128xbf16> to vector<16x16x128xbf16>
    %153 = vector.shape_cast %152 : vector<16x16x128xbf16> to vector<256x128xbf16>
    %154 = vector.extract_strided_slice %153 {offsets = [0, 0], sizes = [256, 16], strides = [1, 1]} : vector<256x128xbf16> to vector<256x16xbf16>
    %c0_151 = arith.constant 0 : index
    %c2_152 = arith.constant 2 : index
    %c4_153 = arith.constant 4 : index
    %c0_154 = arith.constant 0 : index
    %155 = vector.load %arg9[%c0_151, %c2_152, %c4_153, %c0_154] : memref<1x20x24x128xbf16, #tpu.memory_space<vmem>>, vector<1x16x16x128xbf16>
    %156 = vector.shape_cast %155 : vector<1x16x16x128xbf16> to vector<16x16x128xbf16>
    %157 = vector.shape_cast %156 : vector<16x16x128xbf16> to vector<256x128xbf16>
    %158 = vector.extract_strided_slice %157 {offsets = [0, 0], sizes = [256, 16], strides = [1, 1]} : vector<256x128xbf16> to vector<256x16xbf16>
    %c0_155 = arith.constant 0 : index
    %c4_156 = arith.constant 4 : index
    %c0_157 = arith.constant 0 : index
    %c0_158 = arith.constant 0 : index
    %159 = vector.load %arg9[%c0_155, %c4_156, %c0_157, %c0_158] : memref<1x20x24x128xbf16, #tpu.memory_space<vmem>>, vector<1x16x16x128xbf16>
    %160 = vector.shape_cast %159 : vector<1x16x16x128xbf16> to vector<16x16x128xbf16>
    %161 = vector.shape_cast %160 : vector<16x16x128xbf16> to vector<256x128xbf16>
    %162 = vector.extract_strided_slice %161 {offsets = [0, 0], sizes = [256, 16], strides = [1, 1]} : vector<256x128xbf16> to vector<256x16xbf16>
    %c0_159 = arith.constant 0 : index
    %c4_160 = arith.constant 4 : index
    %c2_161 = arith.constant 2 : index
    %c0_162 = arith.constant 0 : index
    %163 = vector.load %arg9[%c0_159, %c4_160, %c2_161, %c0_162] : memref<1x20x24x128xbf16, #tpu.memory_space<vmem>>, vector<1x16x16x128xbf16>
    %164 = vector.shape_cast %163 : vector<1x16x16x128xbf16> to vector<16x16x128xbf16>
    %165 = vector.shape_cast %164 : vector<16x16x128xbf16> to vector<256x128xbf16>
    %166 = vector.extract_strided_slice %165 {offsets = [0, 0], sizes = [256, 16], strides = [1, 1]} : vector<256x128xbf16> to vector<256x16xbf16>
    %167 = tpu.concatenate %138, %142, %146, %150, %154, %158, %162, %166 in 1 : vector<256x16xbf16>, vector<256x16xbf16>, vector<256x16xbf16>, vector<256x16xbf16>, vector<256x16xbf16>, vector<256x16xbf16>, vector<256x16xbf16>, vector<256x16xbf16> -> vector<256x128xbf16>
    %c0_163 = arith.constant 0 : index
    %c0_164 = arith.constant 0 : index
    %168 = vector.load %arg10[%c0_163, %c0_164] : memref<256x256xbf16, #tpu.memory_space<vmem>>, vector<256x128xbf16>
    tpu.vector_store %arg10[%c0_163, %c0_164], %167 {strides = array<i32>} : memref<256x256xbf16, #tpu.memory_space<vmem>>, vector<256x128xbf16>,
    %c0_165 = arith.constant 0 : index
    %c4_166 = arith.constant 4 : index
    %c4_167 = arith.constant 4 : index
    %c0_168 = arith.constant 0 : index
    %169 = vector.load %arg9[%c0_165, %c4_166, %c4_167, %c0_168] : memref<1x20x24x128xbf16, #tpu.memory_space<vmem>>, vector<1x16x16x128xbf16>
    %170 = vector.shape_cast %169 : vector<1x16x16x128xbf16> to vector<16x16x128xbf16>
    %171 = vector.shape_cast %170 : vector<16x16x128xbf16> to vector<256x128xbf16>
    %172 = vector.extract_strided_slice %171 {offsets = [0, 0], sizes = [256, 16], strides = [1, 1]} : vector<256x128xbf16> to vector<256x16xbf16>
    %cst_169 = arith.constant 0.000000e+00 : bf16
    %173 = vector.broadcast %cst_169 : bf16 to vector<256x112xbf16>
    %174 = tpu.concatenate %172, %173 in 1 : vector<256x16xbf16>, vector<256x112xbf16> -> vector<256x128xbf16>
    %c0_170 = arith.constant 0 : index
    %c128_171 = arith.constant 128 : index
    %175 = vector.load %arg10[%c0_170, %c128_171] : memref<256x256xbf16, #tpu.memory_space<vmem>>, vector<256x128xbf16>
    tpu.vector_store %arg10[%c0_170, %c128_171], %174 {strides = array<i32>} : memref<256x256xbf16, #tpu.memory_space<vmem>>, vector<256x128xbf16>,
    %c0_172 = arith.constant 0 : index
    %c0_173 = arith.constant 0 : index
    %176 = vector.load %arg10[%c0_172, %c0_173] : memref<256x256xbf16, #tpu.memory_space<vmem>>, vector<256x256xbf16>
    %c0_174 = arith.constant 0 : index
    %c0_175 = arith.constant 0 : index
    %177 = vector.load %arg4[%c0_174, %c0_175] : memref<256x128xbf16, #tpu.memory_space<vmem>>, vector<256x128xbf16>
    %cst_176 = arith.constant dense<0.000000e+00> : vector<256x128xf32>
    %178 = tpu.matmul %176, %177, %cst_176 {dimension_numbers = #tpu.dot_dimension_numbers<[1], [0], [0], [1], [0, 0, 1, 1], [], []>} : vector<256x256xbf16>, vector<256x128xbf16>, vector<256x128xf32> -> vector<256x128xf32>
    %179 = vector.broadcast %25 : vector<1x128xf32> to vector<256x128xf32>
    %180 = arith.mulf %178, %179 : vector<256x128xf32>
    %181 = vector.broadcast %26 : vector<1x128xf32> to vector<256x128xf32>
    %182 = arith.addf %180, %181 : vector<256x128xf32>
    %183 = arith.addf %182, %74 : vector<256x128xf32>
    %cst_177 = arith.constant 0.000000e+00 : f32
    %184 = vector.broadcast %cst_177 : f32 to vector<256x128xf32>
    %185 = arith.maximumf %183, %184 : vector<256x128xf32>
    %186 = vector.shape_cast %185 : vector<256x128xf32> to vector<1x256x128xf32>
    %cst_178 = arith.constant dense<0.000000e+00> : vector<1x128xf32>
    %187 = vector.multi_reduction <add>, %186, %cst_178 [1] : vector<1x256x128xf32> to vector<1x128xf32>
    %cst_179 = arith.constant 3.906250e-03 : f32
    %188 = vector.broadcast %cst_179 : f32 to vector<1x128xf32>
    %189 = arith.mulf %187, %188 : vector<1x128xf32>
    %c0_180 = arith.constant 0 : index
    %c0_181 = arith.constant 0 : index
    %190 = vector.load %arg6[%c0_180, %c0_181] : memref<128x128xf32, #tpu.memory_space<vmem>>, vector<128x128xf32>
    %cst_182 = arith.constant dense<0.000000e+00> : vector<1x128xf32>
    %191 = tpu.matmul %189, %190, %cst_182 {dimension_numbers = #tpu.dot_dimension_numbers<[1], [0], [0], [1], [0, 0, 1, 1], [], []>} : vector<1x128xf32>, vector<128x128xf32>, vector<1x128xf32> -> vector<1x128xf32>
    %c0_183 = arith.constant 0 : index
    %c0_184 = arith.constant 0 : index
    %192 = vector.load %arg7[%c0_183, %c0_184] : memref<1x128xf32, #tpu.memory_space<vmem>>, vector<1x128xf32>
    %193 = arith.addf %191, %192 : vector<1x128xf32>
    %194 = vector.shape_cast %193 : vector<1x128xf32> to vector<1x1x128xf32>
    %c0_185 = arith.constant 0 : index
    %c0_186 = arith.constant 0 : index
    %c0_187 = arith.constant 0 : index
    %195 = vector.load %arg8[%c0_185, %c0_186, %c0_187] : memref<1x1x128xf32, #tpu.memory_space<vmem>>, vector<1x1x128xf32>
    tpu.vector_store %arg8[%c0_185, %c0_186, %c0_187], %194 {strides = array<i32>} : memref<1x1x128xf32, #tpu.memory_space<vmem>>, vector<1x1x128xf32>,
    return
  }
  func.func @transform_0(%arg0: i32) -> (i32, i32, i32, i32) {
    %c0_i32 = arith.constant 0 : i32
    %c0_i32_0 = arith.constant 0 : i32
    %c0_i32_1 = arith.constant 0 : i32
    %c0_i32_2 = arith.constant 0 : i32
    return %arg0, %c0_i32, %c0_i32_0, %c0_i32_1 : i32, i32, i32, i32
  }
  func.func @transform_1(%arg0: i32) -> (i32, i32) {
    %c0_i32 = arith.constant 0 : i32
    %c0_i32_0 = arith.constant 0 : i32
    %c0_i32_1 = arith.constant 0 : i32
    return %c0_i32, %c0_i32_0 : i32, i32
  }
  func.func @transform_2(%arg0: i32) -> (i32, i32) {
    %c0_i32 = arith.constant 0 : i32
    %c0_i32_0 = arith.constant 0 : i32
    %c0_i32_1 = arith.constant 0 : i32
    return %c0_i32, %c0_i32_0 : i32, i32
  }
  func.func @transform_3(%arg0: i32) -> (i32, i32) {
    %c0_i32 = arith.constant 0 : i32
    %c0_i32_0 = arith.constant 0 : i32
    %c0_i32_1 = arith.constant 0 : i32
    return %c0_i32, %c0_i32_0 : i32, i32
  }
  func.func @transform_4(%arg0: i32) -> (i32, i32) {
    %c0_i32 = arith.constant 0 : i32
    %c0_i32_0 = arith.constant 0 : i32
    %c0_i32_1 = arith.constant 0 : i32
    return %c0_i32, %c0_i32_0 : i32, i32
  }
  func.func @transform_5(%arg0: i32) -> (i32, i32) {
    %c0_i32 = arith.constant 0 : i32
    %c0_i32_0 = arith.constant 0 : i32
    %c0_i32_1 = arith.constant 0 : i32
    return %c0_i32, %c0_i32_0 : i32, i32
  }
  func.func @transform_6(%arg0: i32) -> (i32, i32) {
    %c0_i32 = arith.constant 0 : i32
    %c0_i32_0 = arith.constant 0 : i32
    %c0_i32_1 = arith.constant 0 : i32
    return %c0_i32, %c0_i32_0 : i32, i32
  }
  func.func @transform_7(%arg0: i32) -> (i32, i32, i32) {
    %c0_i32 = arith.constant 0 : i32
    %c0_i32_0 = arith.constant 0 : i32
    %c0_i32_1 = arith.constant 0 : i32
    return %arg0, %c0_i32, %c0_i32_0 : i32, i32, i32
  }
}

</mosaic_0001>

<bundles_post_ra>
// kernel: tpu_custom_call.1
= control target key start
LH: loop header
LB: loop body
LE: loop exit
PB: predicated region body
PF: predicated region fallthrough
CT: control target
= control target key end

     0   :  { %12 = vsyncpa [#allocation5], 0  ;;  %s17808_s0 = inlined_call_operand.hbm [shape: bf16[2,16,16,128], index: 0, kind: input, shape index: {}]   ;;  %s17809_s1 = inlined_call_operand.hbm [shape: bf16[128,128], index: 1, kind: input, shape index: {}]   ;;  %s17810_s2 = inlined_call_operand.hbm [shape: bf16[256,128], index: 2, kind: input, shape index: {}]   ;;  %s17811_s3 = inlined_call_operand.hbm [shape: bf16[256,128], index: 3, kind: input, shape index: {}]   ;;  %s17812_s4 = inlined_call_operand.vmem [shape: f32[8,128], index: 4, kind: input, shape index: {}]   ;;  %s17813_s5 = inlined_call_operand.hbm [shape: f32[128,128], index: 5, kind: input, shape index: {}]   ;;  %s17814_s6 = inlined_call_operand.vmem [shape: f32[1,128], index: 6, kind: input, shape index: {}]   ;;  %s17815_s7 = inlined_call_operand.hbm [shape: f32[2,1,128], index: 7, kind: output, shape index: {}]  }
   0x1   :  { %14 = vsyncpa [#allocation5 + $0x1], 0 }
   0x2   :  { %15 = vsyncpa [#allocation8], 0 }
   0x3   :  { %16 = vsyncpa [#allocation11], 0 }
   0x4   :  { %17 = vsyncpa [#allocation6], 0 }
   0x5   :  { %19 = vsyncpa [#allocation6 + $0x1], 0  ;;  %s13099_s24 = smov 0   ;;  %s13101_s25 = smov 0  }
   0x6   :  { %s13103_s26 = smov 0   ;;  %s13105_s27 = smov 0  }
   0x7 LB: > { %s13120_s28 = sadd.s32 4294967295, %s13032_s27   ;;  %s11220_s29 = sadd.s32 4294967294, %s13032_s27   ;;  %s13032_s27 = sphi %s13105_s27, %s18002_s27   ;;  %s13028_s26 = sphi %s13103_s26, %s18001_s26   ;;  %s13024_s25 = sphi %s13101_s25, %s18000_s25   ;;  %s13020_s24 = sphi %s13099_s24, %s17999_s24  }
   0x8   : > { %p45_p0 = scmp.ne.s32.totalorder %s13024_s25, %s13020_s24  ;;  %p17816_p1 = scmp.eq.s32.totalorder %s13120_s28, 0 }
   0x9   : > { %p201_p3 = scmp.eq.s32.totalorder %s11220_s29, 1  ;;  %p11221_p5 = scmp.ge.s32.totalorder %s13032_s27, 1 }
   0xa   : > { %p13129_p4 = por %p17816_p1, %p45_p0  ;;  %p208_p7 = scmp.lt.s32.totalorder %s13032_s27, 3 }
   0xb   : > { %p13134_p6 = por %p201_p3, %p45_p0  ;;  %s13034_s10 = smov [#allocation7]  }
   0xc   : > { %s17869_s30 = scalar_select %p13129_p4, 1, 0 }
   0xd   : > { %s17870_s8 = scalar_select %p13134_p6, 1, 0 }
   0xe   : > { %p13139_p8 = pnand %p11221_p5, %p208_p7  ;;  %s220_s11 = sshll.u32 %s13034_s10, 4  ;;  %s13143_s11 = int_to_ptr.vmem [resolvable:$true] %s220_s11 }
   0xf   : > { %17871 = sst [smem:[#allocation18_spill]] %s17870_s8  ;;  %s13035_s13 = smov [#allocation10]  }
  0x10   : > { %s17872_s9 = scalar_select %p13139_p8, 1, 0 }
  0x11   : > { %p12542_p9 = pneg %p13139_p8  ;;  %s246_s14 = sshll.u32 %s13035_s13, 4  ;;  %s13154_s14 = int_to_ptr.vmem [resolvable:$true] %s246_s14 }
  0x12   : > { %s13036_s15 = smov [#allocation9]   ;;  %s12816_s19 = scalar_lea.hbm %s17809_s1, 1024 }
  0x13   : > { %p13150_p11 = pnand %p12542_p9, %p17816_p1  ;;  %s13156_s16 = sshll.u32 %s13036_s15, 4  ;;  %s234_s16 = int_to_ptr.vmem [resolvable:$true] %s13156_s16 }
  0x14   : > { %p12817_p12 = scmp.ne.s32.totalorder %s17809_s1, %s12816_s19  ;;  %p12823_p5 = scmp.lt.u32.totalorder %s12816_s19, %s17809_s1 }
  0x15   : > { %p13166_p13 = pneg %p13150_p11 }
  0x17   : > { %p12819_p0 = pnand %p13166_p13, %p12817_p12 }
  0x19   : > { %p12820_p3 = pneg %p12819_p0 }
  0x1b   : > { %p12825_p7 = pnand %p12823_p5, %p12820_p3 }
  0x1d   : > { %12828 = shalt.err (!%p12825_p7)
}
  0x1e   : > { %s12829_s10 = scalar_lea.vmem %s13143_s11, 1024  ;;  %p12837_p2 = scmp.lt.s32.totalorder %s13143_s11, %s13143_s11 }
  0x1f   : > { %p12830_p9 = scmp.ne.s32.totalorder %s13143_s11, %s12829_s10  ;;  %p12838_p6 = scmp.lt.s32.totalorder %s12829_s10, %s12829_s10 }
  0x21   : > { %p12832_p10 = pnand %p12830_p9, %p13166_p13  ;;  %p12839_p12 = por %p12838_p6, %p12837_p2 }
  0x23   : > { %p12833_p1 = pneg %p12832_p10 }
  0x25   : > { %p12840_p0 = pnand %p12839_p12, %p12833_p1 }
  0x27   : > { %12843 = shalt.err (!%p12840_p0)
}
  0x28   : > { %s13037_s13 = smov 64   ;;  %s13038_s15 = smov 4  }
  0x29   : > { %12545 = dma.hbm_to_vmem [thread:$0]  (!%p13150_p11), %s17809_s1, 1024, %s13143_s11, [#allocation8], %s13037_s13, %s13037_s13, %s13038_s15  }
  0x2a   : > { %s12844_s21 = scalar_lea.hbm %s17811_s3, 2048 }
  0x2b   : > { %p12845_p1 = scmp.ne.s32.totalorder %s17811_s3, %s12844_s21  ;;  %p12851_p10 = scmp.lt.u32.totalorder %s12844_s21, %s17811_s3 }
  0x2d   : > { %p12847_p2 = pnand %p12845_p1, %p13166_p13 }
  0x2f   : > { %p12848_p6 = pneg %p12847_p2 }
  0x31   : > { %p12853_p3 = pnand %p12851_p10, %p12848_p6 }
  0x33   : > { %12856 = shalt.err (!%p12853_p3)
}
  0x34   : > { %s12857_s11 = scalar_lea.vmem %s13154_s14, 2048  ;;  %p12865_p12 = scmp.lt.s32.totalorder %s13154_s14, %s13154_s14 }
  0x35   : > { %p12858_p5 = scmp.ne.s32.totalorder %s13154_s14, %s12857_s11  ;;  %p12866_p0 = scmp.lt.s32.totalorder %s12857_s11, %s12857_s11 }
  0x37   : > { %p12860_p7 = pnand %p12858_p5, %p13166_p13  ;;  %p12867_p1 = por %p12866_p0, %p12865_p12 }
  0x39   : > { %p12861_p9 = pneg %p12860_p7 }
  0x3b   : > { %p12868_p2 = pnand %p12867_p1, %p12861_p9 }
  0x3d   : > { %12871 = shalt.err (!%p12868_p2)
}
  0x3e   : > { %12551 = dma.hbm_to_vmem [thread:$0]  (!%p13150_p11), %s17811_s3, 2048, %s13154_s14, [#allocation11], %s13037_s13, %s13037_s13, %s13038_s15  }
  0x3f   : > { %s12872_s20 = scalar_lea.hbm %s17810_s2, 2048 }
  0x40   : > { %p12873_p6 = scmp.ne.s32.totalorder %s17810_s2, %s12872_s20  ;;  %p12879_p5 = scmp.lt.u32.totalorder %s12872_s20, %s17810_s2 }
  0x42   : > { %p12875_p10 = pnand %p12873_p6, %p13166_p13 }
  0x44   : > { %p12876_p3 = pneg %p12875_p10 }
  0x46   : > { %p12881_p7 = pnand %p12879_p5, %p12876_p3 }
  0x48   : > { %12884 = shalt.err (!%p12881_p7)
}
  0x49   : > { %s12885_s11 = scalar_lea.vmem %s234_s16, 2048  ;;  %p12893_p1 = scmp.lt.s32.totalorder %s234_s16, %s234_s16 }
  0x4a   : > { %p12886_p9 = scmp.ne.s32.totalorder %s234_s16, %s12885_s11  ;;  %p12894_p2 = scmp.lt.s32.totalorder %s12885_s11, %s12885_s11 }
  0x4c   : > { %p12888_p12 = pnand %p12886_p9, %p13166_p13  ;;  %p12895_p4 = por %p12894_p2, %p12893_p1 }
  0x4e   : > { %p12889_p0 = pneg %p12888_p12 }
  0x50   : > { %p12896_p8 = pnand %p12895_p4, %p12889_p0 }
  0x52   : > { %12899 = shalt.err (!%p12896_p8)
}
  0x53   : > { %12548 = dma.hbm_to_vmem [thread:$0]  (!%p13150_p11), %s17810_s2, 2048, %s234_s16, [#allocation8], %s13037_s13, %s13037_s13, %s13038_s15  }
  0x54   : > { %s13039_s17 = smov [#allocation12]   ;;  %s12900_s21 = scalar_lea.hbm %s17813_s5, 2048 }
  0x55   : > { %s262_s18 = sshll.u32 %s13039_s17, 4  ;;  %p12901_p4 = scmp.ne.s32.totalorder %s17813_s5, %s12900_s21  ;;  %s263_s18 = int_to_ptr.vmem [resolvable:$true] %s262_s18 }
  0x56   : > { %p12907_p10 = scmp.lt.u32.totalorder %s12900_s21, %s17813_s5 }
  0x57   : > { %p12903_p8 = pnand %p12901_p4, %p13166_p13 }
  0x59   : > { %p12904_p6 = pneg %p12903_p8 }
  0x5b   : > { %p12909_p3 = pnand %p12907_p10, %p12904_p6 }
  0x5d   : > { %12912 = shalt.err (!%p12909_p3)
}
  0x5e   : > { %s12913_s16 = scalar_lea.vmem %s263_s18, 2048  ;;  %p12921_p12 = scmp.lt.s32.totalorder %s263_s18, %s263_s18 }
  0x5f   : > { %p12914_p5 = scmp.ne.s32.totalorder %s263_s18, %s12913_s16  ;;  %p12922_p0 = scmp.lt.s32.totalorder %s12913_s16, %s12913_s16 }
  0x61   : > { %p12916_p7 = pnand %p12914_p5, %p13166_p13  ;;  %p12923_p1 = por %p12922_p0, %p12921_p12 }
  0x63   : > { %p12917_p9 = pneg %p12916_p7 }
  0x65   : > { %p12924_p2 = pnand %p12923_p1, %p12917_p9 }
  0x67   : > { %12927 = shalt.err (!%p12924_p2)
}
  0x68   : > { %s13040_s14 = smov 128   ;;  %s13041_s22 = smov 8  }
  0x69   : > { %12554 = dma.hbm_to_vmem [thread:$0]  (!%p13150_p11), %s17813_s5, 2048, %s263_s18, [#allocation11], %s13040_s14, %s13040_s14, %s13041_s22  }
  0x6a   : > { %s13257_s19 = sadd.s32 1, %s13032_s27   ;;  %s32_s21 = sadd.s32 1, %s13028_s26 }
  0x6b   : > { %s29_s20 = ssub.s32 %s13032_s27, %s13257_s19  ;;  %p39_p4 = scmp.ne.s32.totalorder %s13028_s26, %s13024_s25 }
  0x6c   : > { %p30_p13 = scmp.eq.s32.totalorder %s29_s20, 0  ;;  %p40_p8 = scmp.eq.s32.totalorder %s13032_s27, 0 }
  0x6d   : > { %p17875_p10 = scmp.eq.s32.totalorder %s13120_s28, 1  ;;  %p12567_p5 = scmp.lt.s32.totalorder %s13032_s27, 2 }
  0x6e   : > { %s13266_s23 = scalar_select %p30_p13, %s13028_s26, %s32_s21  }
  0x6f   : > { %p41_p6 = por %p40_p8, %p39_p4  ;;  %p13270_p3 = por %p17875_p10, %p39_p4 }
  0x70   : > { %s279_s12 = sand.u32 1, %s13028_s26   ;;  %s12021_s18 = sshll.u32 %s13032_s27, 11 }
  0x71   : > { %s11227_s10 = sshll.u32 %s279_s12, 7  ;;  %s13280_s14 = scalar_lea.hbm %s17808_s0, %s12021_s18 }
  0x72   : > { %s283_s22 = scalar_lea.vmem [#allocation4], %s11227_s10  ;;  %p13284_p11 = pnand %p12567_p5, %p41_p6 }
  0x73   : > { %s290_s8 = sshll.u32 %s283_s22, 4  ;;  %s13288_s20 = scalar_lea.sflag [#allocation5], %s279_s12  ;;  %s13282_s8 = int_to_ptr.vmem [resolvable:$true] %s290_s8 }
  0x74   : > { %s12928_s21 = scalar_lea.hbm %s13280_s14, 2048  ;;  %p12930_p9 = pneg %p13284_p11 }
  0x75   : > { %p12929_p7 = scmp.ne.s32.totalorder %s13280_s14, %s12928_s21  ;;  %s12933_s11 = scalar_lea.hbm %s17808_s0, 4096 }
  0x76   : > { %p12934_p1 = scmp.lt.u32.totalorder %s13280_s14, %s17808_s0  ;;  %p12935_p2 = scmp.lt.u32.totalorder %s12933_s11, %s12928_s21 }
  0x77   : > { %p12931_p12 = pnand %p12930_p9, %p12929_p7  ;;  %p12937_p4 = scmp.lt.u32.totalorder %s12928_s21, %s13280_s14 }
  0x78   : > { %p12936_p13 = por %p12935_p2, %p12934_p1 }
  0x79   : > { %p12932_p0 = pneg %p12931_p12 }
  0x7a   : > { %p12938_p8 = por %p12937_p4, %p12936_p13 }
  0x7c   : > { %p12939_p6 = pnand %p12938_p8, %p12932_p0 }
  0x7e   : > { %12942 = shalt.err (!%p12939_p6)
}
  0x7f   : > { %s12943_s12 = scalar_lea.vmem %s13282_s8, 2048  ;;  %s13042_s10 = smov [#allocation4]  }
  0x80   : > { %p12944_p10 = scmp.ne.s32.totalorder %s13282_s8, %s12943_s12  ;;  %s12948_s18 = sshll.u32 %s13042_s10, 4  ;;  %s12949_s18 = int_to_ptr.vmem [resolvable:$false] %s12948_s18 }
  0x81   : > { %s12950_s16 = scalar_lea.vmem %s12949_s18, 4096  ;;  %p12951_p12 = scmp.lt.s32.totalorder %s13282_s8, %s12949_s18 }
  0x82   : > { %p12946_p5 = pnand %p12944_p10, %p12930_p9  ;;  %p12952_p1 = scmp.lt.s32.totalorder %s12950_s16, %s12943_s12 }
  0x84   : > { %p12947_p7 = pneg %p12946_p5  ;;  %p12953_p2 = por %p12952_p1, %p12951_p12 }
  0x86   : > { %p12954_p13 = pnand %p12953_p2, %p12947_p7 }
  0x88   : > { %12957 = shalt.err (!%p12954_p13)
}
  0x89   : > { %12558 = dma.hbm_to_vmem [thread:$0]  (!%p13284_p11), %s13280_s14, 2048, %s13282_s8, %s13288_s20, %s13037_s13, %s13037_s13, %s13038_s15  }
  0x8a   : > { %p17878_p9 = scmp.ne.s32.totalorder %s17872_s9, 0 }
  0x8c   : > { %302 = sbr.rel (%p17878_p9) target bundleno = 2151 (0x867), region = 48 }
  0x93   : > { %s13322_s21 = sand.u32 1, %s13024_s25   ;;  %p17879_p0 = scmp.ne.s32.totalorder %s17869_s30, 0 }
  0x94   : > { %s11231_s11 = sshll.u32 %s13322_s21, 7  ;;  %s305_s22 = scalar_lea.sflag [#allocation5], %s13322_s21 }
  0x95   : > { %s13326_s12 = scalar_lea.vmem [#allocation4], %s11231_s11 }
  0x96   : > { %13003 = dma.done.wait (%p17879_p0), %s305_s22, 2048  }
  0x97   : > { %13005 = vsyncadd (%p17879_p0), %s305_s22, 4294965248  ;;  %p17880_p11 = scmp.eq.s32.totalorder %s13120_s28, 0 }
  0x99   : > { %13007 = dma.done.wait (%p17880_p11), [#allocation8], 3072   ;;  %p17881_p4 = pmov %p17880_p11 }
  0x9b   : > { %13009 = vsyncadd (%p17881_p4), [#allocation8], 4294964224  ;;  %p17882_p8 = pmov %p17881_p4 }
  0x9c   : > { %p17883_p6 = pmov %p17881_p4 }
  0x9d   : > { %13011 = dma.done.wait (%p17882_p8), [#allocation11], 4096  }
  0x9e   : > { %13013 = vsyncadd (%p17883_p6), [#allocation11], 4294963200  ;;  %v13043_v0 = vmov 0   ;;  %vm1281_vm0 = vsmask.f32 2304  ;;  %vm1150_vm2 = vcmask 1042432  }
  0x9f   : > { %358 = vst [vmem:[#allocation2 + $0xc] sm:$0xf] %v13043_v0  ;;  %359 = vst [vmem:[#allocation2 + $0x10] sm:$0xf] %v13043_v0  ;;  %vm1282_vm1 = vsmask.f32 6416 }
  0xa0   : > { %360 = vst [vmem:[#allocation2 + $0x14] sm:$0xf] %v13043_v0  ;;  %355 = vst [vmem:[#allocation2] sm:$0xf] %v13043_v0  ;;  %vm1151_vm3 = vcmask 1046532   ;;  %vm465_vm4 = vcmask 1040384  }
  0xa1   : > { %356 = vst [vmem:[#allocation2 + $0x4] sm:$0xf] %v13043_v0  ;;  %357 = vst [vmem:[#allocation2 + $0x8] sm:$0xf] %v13043_v0  ;;  %vm466_vm5 = vcmask 1044484   ;;  %v17888_v31 = vmov 0 }
  0xa2   : > { %362 = vst [vmem:[#allocation2 + $0xd8] sm:$0xf] %v13043_v0  ;;  %363 = vst [vmem:[#allocation2 + $0xdc] sm:$0xf] %v13043_v0  ;;  %v403_v8 = vld [vmem:[%s13326_s12 + $0x8] sm:$0xf] }
  0xa3   : > { %364 = vst [vmem:[#allocation2 + $0xe0] sm:$0xf] %v13043_v0  ;;  %365 = vst [vmem:[#allocation2 + $0xe4] sm:$0xf] %v13043_v0  ;;  %v404_v12 = vld [vmem:[%s13326_s12 + $0xc] sm:$0xf] }
  0xa4   : > { %366 = vst [vmem:[#allocation2 + $0xe8] sm:$0xf] %v13043_v0  ;;  %367 = vst [vmem:[#allocation2 + $0xec] sm:$0xf] %v13043_v0  ;;  %v401_v17 = vld [vmem:[%s13326_s12] sm:$0xf] }
  0xa5   : > { %369 = vst [vmem:[#allocation2 + $0x18] sm:$0x1] %v13043_v0  ;;  %370 = vst [vmem:[#allocation2 + $0x24] sm:$0x1] %v13043_v0  ;;  %v402_v22 = vld [vmem:[%s13326_s12 + $0x4] sm:$0xf] }
  0xa6   : > { %371 = vst [vmem:[#allocation2 + $0x30] sm:$0x1] %v13043_v0  ;;  %372 = vst [vmem:[#allocation2 + $0x3c] sm:$0x1] %v13043_v0  ;;  %v13340_v1 = vld [vmem:[#allocation2 + $0x10] sm:$0xf] }
  0xa7   : > { %373 = vst [vmem:[#allocation2 + $0x48] sm:$0x1] %v13043_v0  ;;  %374 = vst [vmem:[#allocation2 + $0x54] sm:$0x1] %v13043_v0  ;;  %v1086_v2 = vld [vmem:[#allocation2 + $0xc] sm:$0xe] }
  0xa8   : > { %375 = vst [vmem:[#allocation2 + $0x60] sm:$0x1] %v13043_v0  ;;  %376 = vst [vmem:[#allocation2 + $0x6c] sm:$0x1] %v13043_v0  ;;  %v1265_v3 = vld [vmem:[#allocation2 + $0x14] sm:$0x3] }
  0xa9   : > { %377 = vst [vmem:[#allocation2 + $0x78] sm:$0x1] %v13043_v0  ;;  %378 = vst [vmem:[#allocation2 + $0x84] sm:$0x1] %v13043_v0  ;;  %v712_v4 = vshll.u32 %v13340_v1, 16  ;;  %v716_v5 = vshrl.u32 %v13340_v1, 16 }
  0xaa   : > { %379 = vst [vmem:[#allocation2 + $0x90] sm:$0x1] %v13043_v0  ;;  %380 = vst [vmem:[#allocation2 + $0x9c] sm:$0x1] %v13043_v0  ;;  %v1285_v6 = vshrl.u32 %v1086_v2, 16  ;;  %v1288_v7 = vshll.u32 %v1086_v2, 16 }
  0xab   : > { %381 = vst [vmem:[#allocation2 + $0xa8] sm:$0x1] %v13043_v0  ;;  %382 = vst [vmem:[#allocation2 + $0xb4] sm:$0x1] %v13043_v0  ;;  %v1299_v9 = vshrl.u32 %v1265_v3, 16  ;;  %v1302_v10 = vshll.u32 %v1265_v3, 16 }
  0xac   : > { %383 = vst [vmem:[#allocation2 + $0xc0] sm:$0x1] %v13043_v0  ;;  %384 = vst [vmem:[#allocation2 + $0xcc] sm:$0x1] %v13043_v0  ;;  %v653_v11 = vld [vmem:[#allocation2 + $0x14] sm:$0x1] }
  0xad   : > { %385 = vst [vmem:[#allocation2 + $0x20] sm:$0xe] %v13043_v0  ;;  %386 = vst [vmem:[#allocation2 + $0x2c] sm:$0xe] %v13043_v0  ;;  %v1287_v13 = vrot.slane %v1285_v6, 5  ;;  %v1290_v14 = vrot.slane %v1288_v7, 6 }
  0xae   : > { %387 = vst [vmem:[#allocation2 + $0x38] sm:$0xe] %v13043_v0  ;;  %388 = vst [vmem:[#allocation2 + $0x44] sm:$0xe] %v13043_v0  ;;  %v1293_v15 = vrot.slane %v716_v5, 5  ;;  %v11236_v16 = vrot.slane %v1086_v2, 9 }
  0xaf   : > { %389 = vst [vmem:[#allocation2 + $0x50] sm:$0xe] %v13043_v0  ;;  %390 = vst [vmem:[#allocation2 + $0x5c] sm:$0xe] %v13043_v0  ;;  %v1294_v18 = vrot.slane %v712_v4, 6  ;;  %v1301_v19 = vrot.slane %v1299_v9, 5  ;;  %v1291_v24 = vor.u32 %v1290_v14, %v1287_v13 }
  0xb0   : > { %391 = vst [vmem:[#allocation2 + $0x68] sm:$0xe] %v13043_v0  ;;  %392 = vst [vmem:[#allocation2 + $0x74] sm:$0xe] %v13043_v0  ;;  %v1304_v20 = vrot.slane %v1302_v10, 6  ;;  %v1155_v25 = vrot.slane %v13340_v1, 5 }
  0xb1   : > { %393 = vst [vmem:[#allocation2 + $0x80] sm:$0xe] %v13043_v0  ;;  %394 = vst [vmem:[#allocation2 + $0x8c] sm:$0xe] %v13043_v0  ;;  %v1158_v26 = vrot.slane %v653_v11, 5  ;;  %v473_v27 = vrot.slane %v403_v8, 7  ;;  %v1295_v29 = vor.u32 %v1294_v18, %v1293_v15 }
  0xb2   : > { %395 = vst [vmem:[#allocation2 + $0x98] sm:$0xe] %v13043_v0  ;;  %396 = vst [vmem:[#allocation2 + $0xa4] sm:$0xe] %v13043_v0  ;;  %v405_v28 = vld [vmem:[%s13326_s12 + $0x10] sm:$0xf]  ;;  %v1305_v30 = vor.u32 %v1304_v20, %v1301_v19 }
  0xb3   : > { %397 = vst [vmem:[#allocation2 + $0xb0] sm:$0xe] %v13043_v0  ;;  %398 = vst [vmem:[#allocation2 + $0xbc] sm:$0xe] %v13043_v0  ;;  %v475_v32 = vrot.slane %v404_v12, 7  ;;  %v468_v33 = vrot.slane %v401_v17, 7 }
  0xb4   : > { %399 = vst [vmem:[#allocation2 + $0xc8] sm:$0xe] %v13043_v0  ;;  %400 = vst [vmem:[#allocation2 + $0xd4] sm:$0xe] %v13043_v0  ;;  %v406_v34 = vld [vmem:[%s13326_s12 + $0x14] sm:$0xf] }
  0xb5   : > { %vm13353_vm6 = vmor %vm1150_vm2, %vm1151_vm3  ;;  %v407_v35 = vld [vmem:[%s13326_s12 + $0x18] sm:$0xf]  ;;  %v1292_v36 = vrot.slane %v1291_v24, 4  ;;  %v1157_v38 = vrot.slane %v1155_v25, 4  ;;  %v474_v39 = vrot.slane %v473_v27, 4  ;;  %v1297_v41 = vrot.slane %v1295_v29, 4 }
  0xb6   : > { %vm13360_vm7 = vmor %vm1281_vm0, %vm1282_vm1  ;;  %v1156_v37 = vsel %vm13353_vm6, %v11236_v16, %v1155_v25  ;;  %599 = vst [vmem:[#allocation2 + $0x24] sm:$0xe] %v473_v27  ;;  %v13377_v40 = vld [vmem:[%s13326_s12 + $0x1c] sm:$0xf]  ;;  %v477_v42 = vrot.slane %v475_v32, 4  ;;  %v469_v43 = vrot.slane %v468_v33, 4 }
  0xb7   : > { %vm13368_vm8 = vmor %vm465_vm4, %vm466_vm5  ;;  %v470_v44 = vrot.slane %v402_v22, 7  ;;  %596 = vst [vmem:[#allocation2 + $0x18] sm:$0xe] %v468_v33  ;;  %v13380_v45 = vld [vmem:[%s13326_s12 + $0x20] sm:$0xf]  ;;  %v1296_v46 = vsel %vm13360_vm7, %v1292_v36, %v1295_v29  ;;  %v1159_v47 = vsel %vm13353_vm6, %v1157_v38, %v1158_v26  ;;  %v478_v49 = vrot.slane %v405_v28, 7 }
  0xb8   : > { %v17889_v31 = vsel %vm13368_vm8, 4294967295, %v17888_v31  ;;  %v476_v48 = vsel %vm13368_vm8, %v474_v39, %v475_v32  ;;  %v13389_v50 = vld [vmem:[%s13326_s12 + $0x28] sm:$0xf]  ;;  %v1306_v51 = vsel %vm13360_vm7, %v1297_v41, %v1305_v30  ;;  %v11300_v52 = vcombine.low %v1156_v37, %v1159_v47  ;;  %601 = vst [vmem:[#allocation2 + $0x2c] sm:$0x1] %v477_v42  ;;  %s13044_s30 = smov 8  }
  0xb9   : > { %17890 = vst [vmem:[#allocation19_spill] sm:$0xff] %v17889_v31  ;;  %600 = vst [vmem:[#allocation2 + $0x28] sm:$0xf] %v476_v48  ;;  %v471_v53 = vsel %vm13368_vm8, %v469_v43, %v470_v44  ;;  %v472_v54 = vrot.slane %v470_v44, 4  ;;  %v13396_v55 = vld [vmem:[%s13326_s12 + $0x24] sm:$0xf]  ;;  %v11316_v56 = vcombine.low %v1296_v46, %v1306_v51 }
  0xba   : > { %597 = vst [vmem:[#allocation2 + $0x1c] sm:$0xf] %v471_v53  ;;  %v479_v57 = vrot.slane %v478_v49, 4  ;;  %v480_v58 = vrot.slane %v406_v34, 7  ;;  %602 = vst [vmem:[#allocation2 + $0x30] sm:$0xe] %v478_v49  ;;  %3733 = vrot.lane.b32.xlu0 %v11300_v52, %s13044_s30 }
  0xbb   : > { %v483_v59 = vrot.slane %v407_v35, 7  ;;  %598 = vst [vmem:[#allocation2 + $0x20] sm:$0x1] %v472_v54  ;;  %v485_v60 = vrot.slane %v13377_v40, 7  ;;  %v488_v61 = vrot.slane %v13380_v45, 7  ;;  %v493_v62 = vrot.slane %v13389_v50, 7 }
  0xbc   : > { %s13045_s9 = smov 16   ;;  %v481_v63 = vsel %vm13368_vm8, %v479_v57, %v480_v58  ;;  %v482_v0 = vrot.slane %v480_v58, 4  ;;  %v490_v11 = vrot.slane %v13396_v55, 7  ;;  %vm699_vm9 = vsmask.f32 3328  ;;  %s13046_s13 = smov 32  }
  0xbd   : > { %3813 = vrot.lane.b32.xlu1 %v11316_v56, %s13045_s9  ;;  %v484_v2 = vrot.slane %v483_v59, 4  ;;  %605 = vst [vmem:[#allocation2 + $0x3c] sm:$0xe] %v483_v59  ;;  %v13405_v3 = vld [vmem:[#allocation2 + $0x24] sm:$0xe]  ;;  %s13047_s15 = smov 56  }
  0xbe   : > { %603 = vst [vmem:[#allocation2 + $0x34] sm:$0xf] %v481_v63  ;;  %v13407_v6 = vld [vmem:[#allocation2 + $0x24] sm:$0xe]  ;;  %608 = vst [vmem:[#allocation2 + $0x48] sm:$0xe] %v488_v61 }
  0xbf   : > { %v13409_v7 = vld [vmem:[#allocation2 + $0x24] sm:$0xe]  ;;  %611 = vst [vmem:[#allocation2 + $0x54] sm:$0xe] %v493_v62  ;;  %v13415_v8 = vld [vmem:[#allocation2 + $0x18] sm:$0xe]  ;;  %v486_v10 = vsel %vm13368_vm8, %v484_v2, %v485_v60 }
  0xc0   : > { %604 = vst [vmem:[#allocation2 + $0x38] sm:$0x1] %v482_v0  ;;  %v13417_v9 = vld [vmem:[#allocation2 + $0x18] sm:$0xe]  ;;  %v11253_v12 = vrot.slane %v13405_v3, 9  ;;  %v11237_v13 = vrot.slane %v13415_v8, 9 }
  0xc1   : > { %v11252_v14 = vrot.slane %v13417_v9, 9  ;;  %v11238_v15 = vrot.slane %v13407_v6, 9  ;;  %606 = vst [vmem:[#allocation2 + $0x40] sm:$0xf] %v486_v10  ;;  %v13428_v16 = vld [vmem:[#allocation2 + $0x28] sm:$0xf] }
  0xc2   : > { %v13430_v17 = vld [vmem:[#allocation2 + $0x2c] sm:$0x1]  ;;  %v11268_v18 = vrot.slane %v13409_v7, 9  ;;  %v1308_v19 = vshrl.u32 %v13415_v8, 16  ;;  %v2157_v20 = vrot.slane %v13428_v16, 5  ;;  %s13048_s14 = smov 24  }
  0xc3   : > { %v2160_v22 = vrot.slane %v13430_v17, 5  ;;  %v13436_v24 = vld [vmem:[#allocation2 + $0x1c] sm:$0xf]  ;;  %v13438_v25 = vld [vmem:[#allocation2 + $0x30] sm:$0xe]  ;;  %s13049_s8 = smov 40  }
  0xc4   : > { %v13440_v26 = vld [vmem:[#allocation2 + $0x28] sm:$0xf]  ;;  %v656_v27 = vld [vmem:[#allocation2 + $0x20] sm:$0x1]  ;;  %v1162_v28 = vrot.slane %v13436_v24, 5  ;;  %v11269_v29 = vrot.slane %v13438_v25, 9  ;;  %v2158_v32 = vsel %vm13353_vm6, %v11253_v12, %v2157_v20 }
  0xc5   : > { %v13444_v30 = vld [vmem:[#allocation2 + $0x1c] sm:$0xf]  ;;  %v2159_v33 = vrot.slane %v2157_v20, 4  ;;  %v1165_v34 = vrot.slane %v656_v27, 5  ;;  %v13448_v35 = vld [vmem:[#allocation2 + $0x20] sm:$0x1] }
  0xc6   : > { %v2150_v36 = vrot.slane %v13444_v30, 5  ;;  %v1163_v37 = vsel %vm13353_vm6, %v11237_v13, %v1162_v28  ;;  %v1164_v38 = vrot.slane %v1162_v28, 4  ;;  %v13453_v39 = vld [vmem:[#allocation2 + $0x34] sm:$0xf]  ;;  %v2153_v41 = vrot.slane %v13448_v35, 5  ;;  %s13050_s17 = smov 48  }
  0xc7   : > { %v659_v42 = vld [vmem:[#allocation2 + $0x2c] sm:$0x1]  ;;  %v2161_v43 = vsel %vm13353_vm6, %v2159_v33, %v2160_v22  ;;  %v13458_v44 = vld [vmem:[#allocation2 + $0x38] sm:$0x1]  ;;  %v3150_v46 = vrot.slane %v13453_v39, 5  ;;  %v1169_v54 = vrot.slane %v13440_v26, 5 }
  0xc8   : > { %v2151_v47 = vsel %vm13353_vm6, %v11252_v14, %v2150_v36  ;;  %v2152_v48 = vrot.slane %v2150_v36, 4  ;;  %v13463_v49 = vld [vmem:[#allocation2 + $0x28] sm:$0xf]  ;;  %v11349_v51 = vcombine.low %v2158_v32, %v2161_v43  ;;  %v1166_v52 = vsel %vm13353_vm6, %v1164_v38, %v1165_v34  ;;  %v13469_v56 = vld [vmem:[#allocation2 + $0x2c] sm:$0x1]  ;;  %s13051_s20 = smov 64  }
  0xc9   : > { %v3153_v53 = vrot.slane %v13458_v44, 5  ;;  %v13471_v57 = vld [vmem:[#allocation2 + $0x34] sm:$0xf]  ;;  %vm700_vm10 = vsmask.f32 7440  ;;  %v11301_v58 = vcombine.low %v1163_v37, %v1166_v52  ;;  %v3151_v59 = vsel %vm13353_vm6, %v11269_v29, %v3150_v46  ;;  %s13052_s22 = smov 96  }
  0xca   : > { %v3152_v63 = vrot.slane %v3150_v46, 4  ;;  %v2154_v0 = vsel %vm13353_vm6, %v2152_v48, %v2153_v41  ;;  %v662_v2 = vld [vmem:[#allocation2 + $0x38] sm:$0x1]  ;;  %v13477_v10 = vld [vmem:[#allocation2 + $0x30] sm:$0xe]  ;;  %3975 = vrot.lane.b32.xlu1 %v11349_v51, %s13046_s13  ;;  %v1170_v13 = vsel %vm13353_vm6, %v11238_v15, %v1169_v54  ;;  %v1171_v14 = vrot.slane %v1169_v54, 4  ;;  %vm13513_vm11 = vmor %vm699_vm9, %vm700_vm10 }
  0xcb   : > { %v11348_v12 = vcombine.low %v2151_v47, %v2154_v0  ;;  %v1172_v20 = vrot.slane %v659_v42, 5  ;;  %v1652_v22 = vld [vmem:[#allocation2 + $0x18] sm:$0xf]  ;;  %3735 = vrot.lane.b32.xlu0 %v11301_v58, %s13044_s30  ;;  %v3143_v28 = vrot.slane %v13463_v49, 5  ;;  %v3146_v29 = vrot.slane %v13469_v56, 5 }
  0xcc   : > { %v3154_v27 = vsel %vm13353_vm6, %v3152_v63, %v3153_v53  ;;  %v11239_v32 = vrot.slane %v13477_v10, 9  ;;  %v1176_v15 = vrot.slane %v13471_v57, 5  ;;  %v1179_v36 = vrot.slane %v662_v2, 5  ;;  %v1266_v0 = vld [vmem:[#allocation2 + $0x20] sm:$0x3] }
  0xcd   : > { %v11397_v33 = vcombine.low %v3151_v59, %v3154_v27  ;;  %v1173_v34 = vsel %vm13353_vm6, %v1171_v14, %v1172_v20  ;;  %v3144_v38 = vsel %vm13353_vm6, %v11268_v18, %v3143_v28  ;;  %v3145_v41 = vrot.slane %v3143_v28, 4 }
  0xce   : > { %v11302_v37 = vcombine.low %v1170_v13, %v1173_v34  ;;  %v1701_v42 = vshrl.u32 %v1652_v22, 16  ;;  %v1177_v43 = vsel %vm13353_vm6, %v11239_v32, %v1176_v15  ;;  %v1178_v46 = vrot.slane %v1176_v15, 4 }
  0xcf   : > { %4215 = vrot.lane.b32.xlu1 %v11397_v33, %s13047_s15  ;;  %v1704_v47 = vshll.u32 %v1652_v22, 16  ;;  %v1710_v48 = vshll.u32 %v13444_v30, 16  ;;  %3973 = vrot.lane.b32.xlu0 %v11348_v12, %s13046_s13  ;;  %v3147_v51 = vsel %vm13353_vm6, %v3145_v41, %v3146_v29  ;;  %v1714_v18 = vshrl.u32 %v13444_v30, 16 }
  0xd0   : > { %v1703_v52 = vrot.slane %v1701_v42, 4  ;;  %v1720_v53 = vshll.u32 %v13448_v35, 16  ;;  %v11396_v54 = vcombine.low %v3144_v38, %v3147_v51  ;;  %v1180_v58 = vsel %vm13353_vm6, %v1178_v46, %v1179_v36 }
  0xd1   : > { %v1706_v59 = vrot.slane %v1704_v47, 5  ;;  %v1712_v63 = vrot.slane %v1710_v48, 5  ;;  %v11303_v2 = vcombine.low %v1177_v43, %v1180_v58  ;;  %v1716_v13 = vrot.slane %v1714_v18, 4  ;;  %v2260_v47 = vld [vmem:[#allocation2 + $0x20] sm:$0x3] }
  0xd2   : > { %v1722_v14 = vrot.slane %v1720_v53, 5  ;;  %v736_v12 = vshll.u32 %v13436_v24, 16  ;;  %v740_v22 = vshrl.u32 %v13436_v24, 16  ;;  %v1310_v30 = vrot.slane %v1308_v19, 5 }
  0xd3   : > { %3737 = vrot.lane.b32.xlu1 %v11302_v37, %s13044_s30  ;;  %v1707_v20 = vor.u32 %v1706_v59, %v1703_v52  ;;  %v1311_v35 = vshll.u32 %v13415_v8, 16  ;;  %4213 = vrot.lane.b32.xlu0 %v11396_v54, %s13047_s15  ;;  %v1717_v28 = vor.u32 %v1716_v13, %v1712_v63  ;;  %v1322_v32 = vshrl.u32 %v1266_v0, 16  ;;  %v1655_v52 = vld [vmem:[#allocation2 + $0x24] sm:$0xf] }
  0xd4   : > { %v1317_v29 = vrot.slane %v736_v12, 6  ;;  %v1325_v33 = vshll.u32 %v1266_v0, 16  ;;  %v1316_v19 = vrot.slane %v740_v22, 5  ;;  %v2277_v8 = vshrl.u32 %v13417_v9, 16 }
  0xd5   : > { %v1708_v34 = vrot.slane %v1707_v20, 4  ;;  %v1313_v15 = vrot.slane %v1311_v35, 6  ;;  %v1718_v36 = vrot.slane %v1717_v28, 4  ;;  %v1324_v37 = vrot.slane %v1322_v32, 5 }
  0xd6   : > { %v1327_v38 = vrot.slane %v1325_v33, 6  ;;  %v2280_v41 = vshll.u32 %v13417_v9, 16  ;;  %v1318_v46 = vor.u32 %v1317_v29, %v1316_v19  ;;  %v2279_v51 = vrot.slane %v2277_v8, 5 }
  0xd7   : > { %3739 = vrot.lane.b32.xlu1 %v11303_v2, %s13044_s30  ;;  %v1713_v42 = vsel %vm13513_vm11, %v1708_v34, %v1712_v63  ;;  %v1314_v43 = vor.u32 %v1313_v15, %v1310_v30  ;;  %v1723_v53 = vsel %vm13513_vm11, %v1718_v36, %v1722_v14  ;;  %v2285_v59 = vrot.slane %v1714_v18, 5 }
  0xd8   : > { %v1328_v54 = vor.u32 %v1327_v38, %v1324_v37  ;;  %v2282_v58 = vrot.slane %v2280_v41, 6  ;;  %v11332_v0 = vcombine.low %v1713_v42, %v1723_v53  ;;  %v1320_v20 = vrot.slane %v1318_v46, 4 }
  0xd9   : > { %v1315_v13 = vrot.slane %v1314_v43, 4  ;;  %v2286_v9 = vrot.slane %v1710_v48, 6  ;;  %v2291_v2 = vshrl.u32 %v2260_v47, 16  ;;  %v2294_v28 = vshll.u32 %v2260_v47, 16  ;;  %v2645_v48 = vld [vmem:[#allocation2 + $0x24] sm:$0xf] }
  0xda   : > { %v2283_v35 = vor.u32 %v2282_v58, %v2279_v51  ;;  %v1725_v32 = vshrl.u32 %v1655_v52, 16  ;;  %3893 = vrot.lane.b32.xlu0 %v11332_v0, %s13048_s14  ;;  %v1329_v14 = vsel %vm13360_vm7, %v1320_v20, %v1328_v54  ;;  %v1728_v29 = vshll.u32 %v1655_v52, 16 }
  0xdb   : > { %v1319_v63 = vsel %vm13360_vm7, %v1315_v13, %v1318_v46  ;;  %v2287_v30 = vor.u32 %v2286_v9, %v2285_v59  ;;  %v2293_v34 = vrot.slane %v2291_v2, 5  ;;  %v2296_v15 = vrot.slane %v2294_v28, 6 }
  0xdc   : > { %v11317_v18 = vcombine.low %v1319_v63, %v1329_v14  ;;  %v2284_v33 = vrot.slane %v2283_v35, 4  ;;  %v1727_v8 = vrot.slane %v1725_v32, 4  ;;  %v1730_v36 = vrot.slane %v1728_v29, 5  ;;  %v2261_v63 = vld [vmem:[#allocation2 + $0x2c] sm:$0x3] }
  0xdd   : > { %v2289_v19 = vrot.slane %v2287_v30, 4  ;;  %v1734_v37 = vshll.u32 %v13428_v16, 16  ;;  %v2297_v41 = vor.u32 %v2296_v15, %v2293_v34  ;;  %v1738_v42 = vshrl.u32 %v13428_v16, 16 }
  0xde   : > { %3815 = vrot.lane.b32.xlu1 %v11317_v18, %s13045_s9  ;;  %v2288_v38 = vsel %vm13360_vm7, %v2284_v33, %v2287_v30  ;;  %v1744_v43 = vshll.u32 %v13430_v17, 16  ;;  %v1731_v46 = vor.u32 %v1730_v36, %v1727_v8  ;;  %v2694_v51 = vshrl.u32 %v2645_v48, 16 }
  0xdf   : > { %v1736_v47 = vrot.slane %v1734_v37, 5  ;;  %v2697_v52 = vshll.u32 %v2645_v48, 16  ;;  %v2298_v53 = vsel %vm13360_vm7, %v2289_v19, %v2297_v41  ;;  %v1740_v54 = vrot.slane %v1738_v42, 4  ;;  %v3253_v41 = vld [vmem:[#allocation2 + $0x2c] sm:$0x3] }
  0xe0   : > { %v1746_v58 = vrot.slane %v1744_v43, 5  ;;  %v2703_v59 = vshll.u32 %v13463_v49, 16  ;;  %v11364_v0 = vcombine.low %v2288_v38, %v2298_v53  ;;  %v1732_v13 = vrot.slane %v1731_v46, 4 }
  0xe1   : > { %v2696_v20 = vrot.slane %v2694_v51, 4  ;;  %v2699_v9 = vrot.slane %v2697_v52, 5  ;;  %v1741_v35 = vor.u32 %v1740_v54, %v1736_v47  ;;  %v2707_v16 = vshrl.u32 %v13463_v49, 16  ;;  %v2648_v51 = vld [vmem:[#allocation2 + $0x30] sm:$0xf] }
  0xe2   : > { %v2705_v2 = vrot.slane %v2703_v59, 5  ;;  %v2713_v17 = vshll.u32 %v13469_v56, 16  ;;  %4053 = vrot.lane.b32.xlu0 %v11364_v0, %s13049_s8  ;;  %v1737_v28 = vsel %vm13513_vm11, %v1732_v13, %v1736_v47  ;;  %v2300_v14 = vshrl.u32 %v13405_v3, 16 }
  0xe3   : > { %v2700_v32 = vor.u32 %v2699_v9, %v2696_v20  ;;  %v2303_v30 = vshll.u32 %v13405_v3, 16  ;;  %v1742_v29 = vrot.slane %v1741_v35, 4  ;;  %v2709_v18 = vrot.slane %v2707_v16, 4 }
  0xe4   : > { %v2715_v33 = vrot.slane %v2713_v17, 5  ;;  %v2308_v34 = vrot.slane %v1738_v42, 5  ;;  %v2302_v49 = vrot.slane %v2300_v14, 5  ;;  %v2309_v56 = vrot.slane %v1734_v37, 6 }
  0xe5   : > { %v2701_v15 = vrot.slane %v2700_v32, 4  ;;  %v2305_v48 = vrot.slane %v2303_v30, 6  ;;  %v1747_v19 = vsel %vm13513_vm11, %v1742_v29, %v1746_v58  ;;  %v2710_v8 = vor.u32 %v2709_v18, %v2705_v2 }
  0xe6   : > { %v2314_v36 = vshrl.u32 %v2261_v63, 16  ;;  %v2317_v38 = vshll.u32 %v2261_v63, 16  ;;  %v11333_v43 = vcombine.low %v1737_v28, %v1747_v19  ;;  %v2310_v47 = vor.u32 %v2309_v56, %v2308_v34 }
  0xe7   : > { %v2706_v46 = vsel %vm13513_vm11, %v2701_v15, %v2705_v2  ;;  %v2306_v3 = vor.u32 %v2305_v48, %v2302_v49  ;;  %v2711_v52 = vrot.slane %v2710_v8, 4  ;;  %v3270_v54 = vshrl.u32 %v13409_v7, 16 }
  0xe8   : > { %v2316_v42 = vrot.slane %v2314_v36, 5  ;;  %v2319_v53 = vrot.slane %v2317_v38, 6  ;;  %3895 = vrot.lane.b32.xlu1 %v11333_v43, %s13048_s14  ;;  %v2312_v58 = vrot.slane %v2310_v47, 4  ;;  %v3273_v0 = vshll.u32 %v13409_v7, 16  ;;  %v3254_v38 = vld [vmem:[#allocation2 + $0x38] sm:$0x3] }
  0xe9   : > { %v2307_v37 = vrot.slane %v2306_v3, 4  ;;  %v3278_v13 = vrot.slane %v2707_v16, 5  ;;  %v2716_v20 = vsel %vm13513_vm11, %v2711_v52, %v2715_v33  ;;  %v3272_v35 = vrot.slane %v3270_v54, 5 }
  0xea   : > { %v2320_v9 = vor.u32 %v2319_v53, %v2316_v42  ;;  %v3279_v2 = vrot.slane %v2703_v59, 6  ;;  %v11380_v17 = vcombine.low %v2706_v46, %v2716_v20  ;;  %v3275_v32 = vrot.slane %v3273_v0, 6 }
  0xeb   : > { %v2311_v28 = vsel %vm13360_vm7, %v2307_v37, %v2310_v47  ;;  %v3284_v63 = vshrl.u32 %v3253_v41, 16  ;;  %v3287_v29 = vshll.u32 %v3253_v41, 16  ;;  %v2718_v18 = vshrl.u32 %v2648_v51, 16 }
  0xec   : > { %v2321_v14 = vsel %vm13360_vm7, %v2312_v58, %v2320_v9  ;;  %v3280_v30 = vor.u32 %v3279_v2, %v3278_v13  ;;  %4133 = vrot.lane.b32.xlu0 %v11380_v17, %s13050_s17  ;;  %v3276_v16 = vor.u32 %v3275_v32, %v3272_v35  ;;  %v2721_v34 = vshll.u32 %v2648_v51, 16  ;;  %v1268_v2 = vld [vmem:[#allocation2 + $0x38] sm:$0x3] }
  0xed   : > { %v11365_v7 = vcombine.low %v2311_v28, %v2321_v14  ;;  %v3286_v33 = vrot.slane %v3284_v63, 5  ;;  %v3289_v15 = vrot.slane %v3287_v29, 6  ;;  %v2720_v49 = vrot.slane %v2718_v18, 4 }
  0xee   : > { %v3282_v59 = vrot.slane %v3280_v30, 4  ;;  %v2727_v48 = vshll.u32 %v13453_v39, 16  ;;  %v3277_v56 = vrot.slane %v3276_v16, 4  ;;  %v2723_v19 = vrot.slane %v2721_v34, 5 }
  0xef   : > { %4055 = vrot.lane.b32.xlu1 %v11365_v7, %s13049_s8  ;;  %v2731_v8 = vshrl.u32 %v13453_v39, 16  ;;  %v2737_v36 = vshll.u32 %v13458_v44, 16  ;;  %v3290_v41 = vor.u32 %v3289_v15, %v3286_v33  ;;  %v3293_v46 = vshrl.u32 %v13438_v25, 16 }
  0xf0   : > { %v2729_v43 = vrot.slane %v2727_v48, 5  ;;  %v3296_v3 = vshll.u32 %v13438_v25, 16  ;;  %v3281_v47 = vsel %vm13360_vm7, %v3277_v56, %v3280_v30  ;;  %v2724_v51 = vor.u32 %v2723_v19, %v2720_v49  ;;  %v1267_v56 = vld [vmem:[#allocation2 + $0x2c] sm:$0x3] }
  0xf1   : > { %v2733_v52 = vrot.slane %v2731_v8, 4  ;;  %v2739_v42 = vrot.slane %v2737_v36, 5  ;;  %v3291_v53 = vsel %vm13360_vm7, %v3282_v59, %v3290_v41  ;;  %v3295_v54 = vrot.slane %v3293_v46, 5 }
  0xf2   : > { %v3298_v39 = vrot.slane %v3296_v3, 6  ;;  %v3301_v37 = vrot.slane %v2731_v8, 5  ;;  %v11412_v44 = vcombine.low %v3281_v47, %v3291_v53  ;;  %v2725_v58 = vrot.slane %v2724_v51, 4  ;;  %v1661_v3 = vld [vmem:[#allocation2 + $0x3c] sm:$0xf] }
  0xf3   : > { %v2734_v0 = vor.u32 %v2733_v52, %v2729_v43  ;;  %v3302_v13 = vrot.slane %v2727_v48, 6  ;;  %v3307_v9 = vshrl.u32 %v3254_v38, 16  ;;  %v3310_v35 = vshll.u32 %v3254_v38, 16 }
  0xf4   : > { %v3299_v20 = vor.u32 %v3298_v39, %v3295_v54  ;;  %v784_v25 = vshll.u32 %v13471_v57, 16  ;;  %4293 = vrot.lane.b32.xlu0 %v11412_v44, %s13051_s20  ;;  %v2730_v17 = vsel %vm13513_vm11, %v2725_v58, %v2729_v43  ;;  %v788_v63 = vshrl.u32 %v13471_v57, 16  ;;  %v13597_v44 = vld [vmem:[#allocation2 + $0x40] sm:$0xf] }
  0xf5   : > { %v2735_v28 = vrot.slane %v2734_v0, 4  ;;  %v3303_v32 = vor.u32 %v3302_v13, %v3301_v37  ;;  %v3309_v30 = vrot.slane %v3307_v9, 5  ;;  %v3312_v29 = vrot.slane %v3310_v35, 6 }
  0xf6   : > { %v3300_v14 = vrot.slane %v3299_v20, 4  ;;  %v1354_v18 = vshrl.u32 %v13477_v10, 16  ;;  %v1357_v33 = vshll.u32 %v13477_v10, 16  ;;  %v1362_v34 = vrot.slane %v788_v63, 5 }
  0xf7   : > { %v2740_v7 = vsel %vm13513_vm11, %v2735_v28, %v2739_v42  ;;  %v3305_v16 = vrot.slane %v3303_v32, 4  ;;  %v3313_v49 = vor.u32 %v3312_v29, %v3309_v30  ;;  %v1363_v8 = vrot.slane %v784_v25, 6 }
  0xf8   : > { %v11381_v59 = vcombine.low %v2730_v17, %v2740_v7  ;;  %v3304_v15 = vsel %vm13360_vm7, %v3300_v14, %v3303_v32  ;;  %v1356_v48 = vrot.slane %v1354_v18, 5  ;;  %v1359_v19 = vrot.slane %v1357_v33, 6  ;;  %v13608_v33 = vld [vmem:[#allocation2 + $0x34] sm:$0xf] }
  0xf9   : > { %v1368_v36 = vshrl.u32 %v1268_v2, 16  ;;  %v1371_v38 = vshll.u32 %v1268_v2, 16  ;;  %v3314_v10 = vsel %vm13360_vm7, %v3305_v16, %v3313_v49  ;;  %v760_v41 = vshll.u32 %v13440_v26, 16 }
  0xfa   : > { %4135 = vrot.lane.b32.xlu1 %v11381_v59, %s13050_s17  ;;  %v764_v43 = vshrl.u32 %v13440_v26, 16  ;;  %v1331_v46 = vshrl.u32 %v13407_v6, 16  ;;  %v11413_v47 = vcombine.low %v3304_v15, %v3314_v10  ;;  %v1360_v51 = vor.u32 %v1359_v19, %v1356_v48  ;;  %v13611_v15 = vld [vmem:[#allocation2 + $0x38] sm:$0x1] }
  0xfb   : > { %v1364_v52 = vor.u32 %v1363_v8, %v1362_v34  ;;  %v1370_v42 = vrot.slane %v1368_v36, 5  ;;  %v1373_v53 = vrot.slane %v1371_v38, 6  ;;  %v1334_v39 = vshll.u32 %v13407_v6, 16  ;;  %v1658_v6 = vld [vmem:[#allocation2 + $0x30] sm:$0xf] }
  0xfc   : > { %v1333_v54 = vrot.slane %v1331_v46, 5  ;;  %v1339_v37 = vrot.slane %v764_v43, 5  ;;  %4295 = vrot.lane.b32.xlu0 %v11413_v47, %s13051_s20  ;;  %v1361_v58 = vrot.slane %v1360_v51, 4  ;;  %v1340_v13 = vrot.slane %v760_v41, 6 }
  0xfd   : > { %v1366_v0 = vrot.slane %v1364_v52, 4  ;;  %v1345_v20 = vshrl.u32 %v1267_v56, 16  ;;  %v1374_v9 = vor.u32 %v1373_v53, %v1370_v42  ;;  %v1336_v35 = vrot.slane %v1334_v39, 6  ;;  %v13620_v42 = vld [vmem:[#allocation2 + $0x30] sm:$0xe] }
  0xfe   : > { %v1348_v2 = vshll.u32 %v1267_v56, 16  ;;  %v487_v17 = vrot.slane %v485_v60, 4  ;;  %v1365_v28 = vsel %vm13360_vm7, %v1361_v58, %v1364_v52  ;;  %v1341_v32 = vor.u32 %v1340_v13, %v1339_v37  ;;  %v2087_v52 = vld [vmem:[#allocation2 + $0x3c] sm:$0xe] }
  0xff   : > { %v1347_v14 = vrot.slane %v1345_v20, 5  ;;  %v1773_v30 = vshrl.u32 %v1661_v3, 16  ;;  %v1375_v29 = vsel %vm13360_vm7, %v1366_v0, %v1374_v9  ;;  %v1337_v18 = vor.u32 %v1336_v35, %v1333_v54 }
 0x100   : > { %v1350_v7 = vrot.slane %v1348_v2, 6  ;;  %607 = vst [vmem:[#allocation2 + $0x44] sm:$0x1] %v487_v17  ;;  %v1776_v16 = vshll.u32 %v1661_v3, 16  ;;  %v11319_v34 = vcombine.low %v1365_v28, %v1375_v29  ;;  %v1343_v59 = vrot.slane %v1341_v32, 4 }
 0x101   : > { %v1775_v40 = vrot.slane %v1773_v30, 4  ;;  %v1782_v60 = vshll.u32 %v13597_v44, 16  ;;  %v1338_v49 = vrot.slane %v1337_v18, 4  ;;  %v1786_v19 = vshrl.u32 %v13597_v44, 16 }
 0x102   : > { %v1351_v48 = vor.u32 %v1350_v7, %v1347_v14  ;;  %v1778_v56 = vrot.slane %v1776_v16, 5  ;;  %3819 = vrot.lane.b32.xlu1 %v11319_v34, %s13045_s9  ;;  %v1749_v36 = vshrl.u32 %v1658_v6, 16  ;;  %v1752_v38 = vshll.u32 %v1658_v6, 16 }
 0x103   : > { %v1784_v8 = vrot.slane %v1782_v60, 5  ;;  %v1758_v10 = vshll.u32 %v13608_v33, 16  ;;  %v1342_v46 = vsel %vm13360_vm7, %v1338_v49, %v1341_v32  ;;  %v1788_v51 = vrot.slane %v1786_v19, 4 }
 0x104   : > { %v1352_v3 = vsel %vm13360_vm7, %v1343_v59, %v1351_v48  ;;  %v1779_v47 = vor.u32 %v1778_v56, %v1775_v40  ;;  %v1751_v54 = vrot.slane %v1749_v36, 4  ;;  %v1754_v39 = vrot.slane %v1752_v38, 5 }
 0x105   : > { %v11318_v53 = vcombine.low %v1342_v46, %v1352_v3  ;;  %v1760_v37 = vrot.slane %v1758_v10, 5  ;;  %v1789_v0 = vor.u32 %v1788_v51, %v1784_v8  ;;  %v1762_v13 = vshrl.u32 %v13608_v33, 16 }
 0x106   : > { %v1780_v58 = vrot.slane %v1779_v47, 4  ;;  %v1768_v20 = vshll.u32 %v13611_v15, 16  ;;  %v1755_v35 = vor.u32 %v1754_v39, %v1751_v54  ;;  %v11255_v2 = vrot.slane %v2087_v52, 9 }
 0x107   : > { %3817 = vrot.lane.b32.xlu0 %v11318_v53, %s13045_s9  ;;  %v1663_v9 = vld [vmem:[#allocation2 + $0x44] sm:$0x1]  ;;  %v2171_v17 = vrot.slane %v13597_v44, 5  ;;  %v11254_v6 = vrot.slane %v13620_v42, 9  ;;  %v1790_v32 = vrot.slane %v1789_v0, 4  ;;  %v1764_v30 = vrot.slane %v1762_v13, 4 }
 0x108   : > { %v1785_v28 = vsel %vm13513_vm11, %v1780_v58, %v1784_v8  ;;  %v1792_v14 = vshll.u32 %v1663_v9, 16  ;;  %v1756_v29 = vrot.slane %v1755_v35, 4  ;;  %v1770_v18 = vrot.slane %v1768_v20, 5  ;;  %v2263_v47 = vld [vmem:[#allocation2 + $0x44] sm:$0x3] }
 0x109   : > { %v2172_v7 = vsel %vm13353_vm6, %v11255_v2, %v2171_v17  ;;  %v2173_v16 = vrot.slane %v2171_v17, 4  ;;  %v1765_v59 = vor.u32 %v1764_v30, %v1760_v37  ;;  %v2174_v40 = vrot.slane %v1663_v9, 5  ;;  %v2262_v0 = vld [vmem:[#allocation2 + $0x38] sm:$0x3] }
 0x10a   : > { %v1794_v34 = vrot.slane %v1792_v14, 5  ;;  %v2164_v49 = vrot.slane %v13608_v33, 5  ;;  %v1761_v44 = vsel %vm13513_vm11, %v1756_v29, %v1760_v37  ;;  %v2167_v48 = vrot.slane %v13611_v15, 5  ;;  %v2654_v29 = vld [vmem:[#allocation2 + $0x48] sm:$0xf] }
 0x10b   : > { %v2346_v56 = vshrl.u32 %v2087_v52, 16  ;;  %v2349_v8 = vshll.u32 %v2087_v52, 16  ;;  %v1766_v38 = vrot.slane %v1765_v59, 4  ;;  %v2175_v46 = vsel %vm13353_vm6, %v2173_v16, %v2174_v40  ;;  %v2651_v59 = vld [vmem:[#allocation2 + $0x3c] sm:$0xf] }
 0x10c   : > { %v1795_v36 = vsel %vm13513_vm11, %v1790_v32, %v1794_v34  ;;  %v2165_v3 = vsel %vm13353_vm6, %v11254_v6, %v2164_v49  ;;  %v11351_v53 = vcombine.low %v2172_v7, %v2175_v46  ;;  %v2166_v54 = vrot.slane %v2164_v49, 4 }
 0x10d   : > { %v11335_v51 = vcombine.low %v1785_v28, %v1795_v36  ;;  %v2348_v39 = vrot.slane %v2346_v56, 5  ;;  %v1771_v15 = vsel %vm13513_vm11, %v1766_v38, %v1770_v18  ;;  %v2351_v37 = vrot.slane %v2349_v8, 6  ;;  %v13654_v56 = vld [vmem:[#allocation2 + $0x40] sm:$0xf] }
 0x10e   : > { %v2354_v52 = vrot.slane %v1786_v19, 5  ;;  %v2355_v58 = vrot.slane %v1782_v60, 6  ;;  %v11334_v20 = vcombine.low %v1761_v44, %v1771_v15  ;;  %v2168_v9 = vsel %vm13353_vm6, %v2166_v54, %v2167_v48 }
 0x10f   : > { %3899 = vrot.lane.b32.xlu1 %v11335_v51, %s13048_s14  ;;  %v2360_v35 = vshrl.u32 %v2263_v47, 16  ;;  %v2363_v2 = vshll.u32 %v2263_v47, 16  ;;  %v11350_v17 = vcombine.low %v2165_v3, %v2168_v9  ;;  %v2352_v6 = vor.u32 %v2351_v37, %v2348_v39  ;;  %v2653_v51 = vld [vmem:[#allocation2 + $0x44] sm:$0x1]  ;;  %v13670_v37 = vld [vmem:[%s13326_s12 + $0x2c] sm:$0xf] }
 0x110   : > { %v2356_v28 = vor.u32 %v2355_v58, %v2354_v52  ;;  %v2323_v32 = vshrl.u32 %v13620_v42, 16  ;;  %3897 = vrot.lane.b32.xlu0 %v11334_v20, %s13048_s14  ;;  %v2326_v60 = vshll.u32 %v13620_v42, 16  ;;  %v2331_v19 = vrot.slane %v1762_v13, 5  ;;  %v13675_v20 = vld [vmem:[#allocation2 + $0x3c] sm:$0xe] }
 0x111   : > { %v2362_v14 = vrot.slane %v2360_v35, 5  ;;  %v2365_v30 = vrot.slane %v2363_v2, 6  ;;  %v2353_v18 = vrot.slane %v2352_v6, 4  ;;  %v2332_v34 = vrot.slane %v1758_v10, 6 }
 0x112   : > { %v2358_v7 = vrot.slane %v2356_v28, 4  ;;  %v2325_v16 = vrot.slane %v2323_v32, 5  ;;  %v2328_v49 = vrot.slane %v2326_v60, 6  ;;  %v2337_v44 = vshrl.u32 %v2262_v0, 16 }
 0x113   : > { %3979 = vrot.lane.b32.xlu1 %v11351_v53, %s13046_s13  ;;  %v2366_v40 = vor.u32 %v2365_v30, %v2362_v14  ;;  %v2340_v48 = vshll.u32 %v2262_v0, 16  ;;  %v2357_v42 = vsel %vm13360_vm7, %v2353_v18, %v2356_v28  ;;  %v2333_v13 = vor.u32 %v2332_v34, %v2331_v19  ;;  %v13685_v14 = vld [vmem:[#allocation2 + $0x14] sm:$0x1] }
 0x114   : > { %v489_v8 = vrot.slane %v488_v61, 4  ;;  %v492_v33 = vrot.slane %v490_v11, 4  ;;  %3977 = vrot.lane.b32.xlu0 %v11350_v17, %s13046_s13  ;;  %v2329_v36 = vor.u32 %v2328_v49, %v2325_v16  ;;  %v2339_v38 = vrot.slane %v2337_v44, 5 }
 0x115   : > { %v2367_v10 = vsel %vm13360_vm7, %v2358_v7, %v2366_v40  ;;  %v2342_v46 = vrot.slane %v2340_v48, 6  ;;  %v2335_v47 = vrot.slane %v2333_v13, 4  ;;  %v2766_v61 = vshrl.u32 %v2654_v29, 16 }
 0x116   : > { %v11367_v3 = vcombine.low %v2357_v42, %v2367_v10  ;;  %v491_v45 = vsel %vm13368_vm8, %v489_v8, %v490_v11  ;;  %610 = vst [vmem:[#allocation2 + $0x50] sm:$0x1] %v492_v33  ;;  %v2330_v53 = vrot.slane %v2329_v36, 4  ;;  %v2769_v39 = vshll.u32 %v2654_v29, 16  ;;  %v3080_v29 = vld [vmem:[#allocation2 + $0x48] sm:$0xe] }
 0x117   : > { %v2343_v54 = vor.u32 %v2342_v46, %v2339_v38  ;;  %609 = vst [vmem:[#allocation2 + $0x4c] sm:$0xf] %v491_v45  ;;  %v2742_v15 = vshrl.u32 %v2651_v59, 16  ;;  %v2768_v52 = vrot.slane %v2766_v61, 4  ;;  %v2745_v58 = vshll.u32 %v2651_v59, 16 }
 0x118   : > { %4059 = vrot.lane.b32.xlu1 %v11367_v3, %s13049_s8  ;;  %v2751_v0 = vshll.u32 %v13654_v56, 16  ;;  %v2755_v55 = vshrl.u32 %v13654_v56, 16  ;;  %v2334_v11 = vsel %vm13360_vm7, %v2330_v53, %v2333_v13  ;;  %v2771_v35 = vrot.slane %v2769_v39, 5 }
 0x119   : > { %v2344_v9 = vsel %vm13360_vm7, %v2335_v47, %v2343_v54  ;;  %v2744_v2 = vrot.slane %v2742_v15, 4  ;;  %v2747_v6 = vrot.slane %v2745_v58, 5  ;;  %v722_v30 = vshll.u32 %v13685_v14, 16 }
 0x11a   : > { %v11366_v17 = vcombine.low %v2334_v11, %v2344_v9  ;;  %v2753_v28 = vrot.slane %v2751_v0, 5  ;;  %v2757_v32 = vrot.slane %v2755_v55, 4  ;;  %v2772_v60 = vor.u32 %v2771_v35, %v2768_v52 }
 0x11b   : > { %v2761_v19 = vshll.u32 %v2653_v51, 16  ;;  %v11270_v18 = vrot.slane %v13675_v20, 9  ;;  %v2748_v7 = vor.u32 %v2747_v6, %v2744_v2  ;;  %v3157_v34 = vrot.slane %v13654_v56, 5 }
 0x11c   : > { %4057 = vrot.lane.b32.xlu0 %v11366_v17, %s13049_s8  ;;  %v2758_v16 = vor.u32 %v2757_v32, %v2753_v28  ;;  %v495_v59 = vrot.slane %v13670_v37, 7  ;;  %v2773_v49 = vrot.slane %v2772_v60, 4  ;;  %v11271_v48 = vrot.slane %v3080_v29, 9 }
 0x11d   : > { %v2656_v40 = vld [vmem:[#allocation2 + $0x50] sm:$0x1]  ;;  %v2763_v44 = vrot.slane %v2761_v19, 5  ;;  %v3160_v42 = vrot.slane %v2653_v51, 5  ;;  %v2749_v33 = vrot.slane %v2748_v7, 4  ;;  %v3158_v47 = vsel %vm13353_vm6, %v11270_v18, %v3157_v34 }
 0x11e   : > { %v2655_v13 = vld [vmem:[#allocation2 + $0x4c] sm:$0xf]  ;;  %v2785_v8 = vshll.u32 %v2656_v40, 16  ;;  %v2759_v10 = vrot.slane %v2758_v16, 4  ;;  %v3167_v36 = vrot.slane %v2656_v40, 5  ;;  %v3159_v54 = vrot.slane %v3157_v34, 4 }
 0x11f   : > { %v2775_v38 = vshll.u32 %v2655_v13, 16  ;;  %v2779_v46 = vshrl.u32 %v2655_v13, 16  ;;  %v3164_v3 = vrot.slane %v2655_v13, 5  ;;  %v2754_v61 = vsel %vm13513_vm11, %v2749_v33, %v2753_v28  ;;  %v3256_v9 = vld [vmem:[#allocation2 + $0x50] sm:$0x3] }
 0x120   : > { %v2787_v45 = vrot.slane %v2785_v8, 5  ;;  %v2764_v53 = vsel %vm13513_vm11, %v2759_v10, %v2763_v44  ;;  %v3161_v11 = vsel %vm13353_vm6, %v3159_v54, %v3160_v42  ;;  %v3339_v35 = vshrl.u32 %v3080_v29, 16  ;;  %v3255_v16 = vld [vmem:[#allocation2 + $0x44] sm:$0x3]  ;;  %v12628_v34 = vld [vmem:[#allocation7] sm:$0xff]  }
 0x121   : > { %v2777_v51 = vrot.slane %v2775_v38, 5  ;;  %v2781_v39 = vrot.slane %v2779_v46, 4  ;;  %v11382_v15 = vcombine.low %v2754_v61, %v2764_v53  ;;  %v13700_v52 = vsel %vm13353_vm6, %v11271_v48, %v3164_v3  ;;  %12399 = vmatprep.subr.bf16.mxu0 %v12628_v34  ;;  %12506 = vmatprep.subr.bf16.mxu1 %v12628_v34 }
 0x122   : > { %v3166_v58 = vrot.slane %v3164_v3, 4  ;;  %v3342_v2 = vshll.u32 %v3080_v29, 16  ;;  %v11398_v28 = vcombine.low %v3158_v47, %v3161_v11  ;;  %v3347_v32 = vrot.slane %v2779_v46, 5  ;;  %v13717_v46 = vld [vmem:[#allocation2 + $0x4c] sm:$0xf]  ;;  %12400 = vmatpush3.bf16.msra.mxu0 %v12628_v34  ;;  %12514 = vmatpush3.bf16.msra.mxu1 %v12628_v34 }
 0x123   : > { %v2778_v17 = vsel %vm13513_vm11, %v2773_v49, %v2777_v51  ;;  %v2782_v6 = vor.u32 %v2781_v39, %v2777_v51  ;;  %4137 = vrot.lane.b32.xlu0 %v11382_v15, %s13050_s17  ;;  %v3341_v19 = vrot.slane %v3339_v35, 5  ;;  %v3348_v7 = vrot.slane %v2775_v38, 6  ;;  %v1091_v15 = vld [vmem:[#allocation2 + $0x48] sm:$0xe] }
 0x124   : > { %v3168_v60 = vsel %vm13353_vm6, %v3166_v58, %v3167_v36  ;;  %v3344_v18 = vrot.slane %v3342_v2, 6  ;;  %v3353_v29 = vshrl.u32 %v3256_v9, 16  ;;  %v3356_v48 = vshll.u32 %v3256_v9, 16  ;;  %v668_v58 = vld [vmem:[#allocation2 + $0x50] sm:$0x1] }
 0x125   : > { %v2783_v40 = vrot.slane %v2782_v6, 4  ;;  %v11399_v44 = vcombine.low %v13700_v52, %v3168_v60  ;;  %v3349_v49 = vor.u32 %v3348_v7, %v3347_v32  ;;  %v3316_v13 = vshrl.u32 %v13675_v20, 16  ;;  %v665_v6 = vld [vmem:[#allocation2 + $0x44] sm:$0x1] }
 0x126   : > { %v3345_v42 = vor.u32 %v3344_v18, %v3341_v19  ;;  %v3319_v8 = vshll.u32 %v13675_v20, 16  ;;  %v3355_v10 = vrot.slane %v3353_v29, 5  ;;  %v3358_v36 = vrot.slane %v3356_v48, 6  ;;  %v12629_v20 = vld [vmem:[#allocation7 + $0x8] sm:$0xff]  }
 0x127   : > { %v2788_v33 = vsel %vm13513_vm11, %v2783_v40, %v2787_v45  ;;  %4217 = vrot.lane.b32.xlu0 %v11398_v28, %s13047_s15  ;;  %v3324_v38 = vrot.slane %v2755_v55, 5  ;;  %v3351_v61 = vrot.slane %v3349_v49, 4  ;;  %v3318_v53 = vrot.slane %v3316_v13, 5  ;;  %12401 = vmatprep.subr.bf16.mxu0 %v12629_v20  ;;  %v1090_v18 = vld [vmem:[#allocation2 + $0x3c] sm:$0xe] }
 0x128   : > { %v11383_v3 = vcombine.low %v2778_v17, %v2788_v33  ;;  %v3346_v47 = vrot.slane %v3345_v42, 4  ;;  %v3359_v54 = vor.u32 %v3358_v36, %v3355_v10  ;;  %v3321_v51 = vrot.slane %v3319_v8, 6  ;;  %12402 = vmatpush3.bf16.msra.mxu0 %v12629_v20  ;;  %12507 = vmatprep.subr.bf16.mxu1 %v12629_v20  ;;  %v1270_v10 = vld [vmem:[#allocation2 + $0x50] sm:$0x3] }
 0x129   : > { %v3325_v45 = vrot.slane %v2751_v0, 6  ;;  %v3330_v39 = vshrl.u32 %v3255_v16, 16  ;;  %v3333_v52 = vshll.u32 %v3255_v16, 16  ;;  %v11241_v11 = vrot.slane %v1091_v15, 9  ;;  %v13727_v0 = vld [vmem:[#allocation2 + $0x40] sm:$0xf]  ;;  %12515 = vmatpush3.bf16.msra.mxu1 %v12629_v20 }
 0x12a   : > { %4139 = vrot.lane.b32.xlu1 %v11383_v3, %s13050_s17  ;;  %v3350_v55 = vsel %vm13360_vm7, %v3346_v47, %v3349_v49  ;;  %v1190_v9 = vrot.slane %v13717_v46, 5  ;;  %v3360_v35 = vsel %vm13360_vm7, %v3351_v61, %v3359_v54  ;;  %v3322_v2 = vor.u32 %v3321_v51, %v3318_v53 }
 0x12b   : > { %v3326_v17 = vor.u32 %v3325_v45, %v3324_v38  ;;  %v3332_v56 = vrot.slane %v3330_v39, 5  ;;  %v11415_v28 = vcombine.low %v3350_v55, %v3360_v35  ;;  %v3335_v32 = vrot.slane %v3333_v52, 6  ;;  %v12630_v38 = vld [vmem:[#allocation7 + $0x10] sm:$0xff]  }
 0x12c   : > { %v1191_v60 = vsel %vm13353_vm6, %v11241_v11, %v1190_v9  ;;  %v1192_v19 = vrot.slane %v1190_v9, 4  ;;  %v3323_v7 = vrot.slane %v3322_v2, 4  ;;  %v1193_v34 = vrot.slane %v668_v58, 5  ;;  %12403 = vmatprep.subr.bf16.mxu0 %v12630_v38  ;;  %12508 = vmatprep.subr.bf16.mxu1 %v12630_v38  ;;  %v1269_v35 = vld [vmem:[#allocation2 + $0x44] sm:$0x3] }
 0x12d   : > { %v3328_v16 = vrot.slane %v3326_v17, 4  ;;  %v11240_v40 = vrot.slane %v1090_v18, 9  ;;  %v3336_v29 = vor.u32 %v3335_v32, %v3332_v56  ;;  %v1183_v48 = vrot.slane %v13727_v0, 5  ;;  %12404 = vmatpush3.bf16.msra.mxu0 %v12630_v38  ;;  %12516 = vmatpush3.bf16.msra.mxu1 %v12630_v38 }
 0x12e   : > { %4219 = vrot.lane.b32.xlu1 %v11399_v44, %s13047_s15  ;;  %v1186_v42 = vrot.slane %v665_v6, 5  ;;  %v832_v49 = vshll.u32 %v13717_v46, 16  ;;  %v3327_v13 = vsel %vm13360_vm7, %v3323_v7, %v3326_v17  ;;  %v1194_v8 = vsel %vm13353_vm6, %v1192_v19, %v1193_v34  ;;  %v12631_v7 = vld [vmem:[#allocation7 + $0x18] sm:$0xff]  }
 0x12f   : > { %v836_v33 = vshrl.u32 %v13717_v46, 16  ;;  %v1400_v36 = vshrl.u32 %v1091_v15, 16  ;;  %v3337_v44 = vsel %vm13360_vm7, %v3328_v16, %v3336_v29  ;;  %v11305_v3 = vcombine.low %v1191_v60, %v1194_v8  ;;  %12405 = vmatprep.subr.bf16.mxu0 %v12631_v7  ;;  %12509 = vmatprep.subr.bf16.mxu1 %v12631_v7  ;;  %v425_v46 = vld [vmem:[%s13326_s12 + $0x60] sm:$0xf] }
 0x130   : > { %v1184_v47 = vsel %vm13353_vm6, %v11240_v40, %v1183_v48  ;;  %v1185_v61 = vrot.slane %v1183_v48, 4  ;;  %v11414_v53 = vcombine.low %v3327_v13, %v3337_v44  ;;  %v1403_v54 = vshll.u32 %v1091_v15, 16 }
 0x131   : > { %v1402_v20 = vrot.slane %v1400_v36, 5  ;;  %v1408_v51 = vrot.slane %v836_v33, 5  ;;  %v1409_v39 = vrot.slane %v832_v49, 6  ;;  %v1414_v55 = vshrl.u32 %v1270_v10, 16  ;;  %12406 = vmatpush3.bf16.msra.mxu0 %v12631_v7  ;;  %12517 = vmatpush3.bf16.msra.mxu1 %v12631_v7 }
 0x132   : > { %4299 = vrot.lane.b32.xlu1 %v11415_v28, %s13051_s20  ;;  %v1187_v45 = vsel %vm13353_vm6, %v1185_v61, %v1186_v42  ;;  %v1417_v52 = vshll.u32 %v1270_v10, 16  ;;  %4297 = vrot.lane.b32.xlu0 %v11414_v53, %s13051_s20  ;;  %v1405_v15 = vrot.slane %v1403_v54, 6  ;;  %v808_v11 = vshll.u32 %v13727_v0, 16  ;;  %v13767_v54 = vld [vmem:[#allocation2 + $0x4c] sm:$0xf] }
 0x133   : > { %v11304_v58 = vcombine.low %v1184_v47, %v1187_v45  ;;  %v812_v9 = vshrl.u32 %v13727_v0, 16  ;;  %v1410_v2 = vor.u32 %v1409_v39, %v1408_v51  ;;  %v1416_v17 = vrot.slane %v1414_v55, 5 }
 0x134   : > { %v1419_v56 = vrot.slane %v1417_v52, 6  ;;  %v1377_v6 = vshrl.u32 %v1090_v18, 16  ;;  %v1406_v28 = vor.u32 %v1405_v15, %v1402_v20  ;;  %v1380_v32 = vshll.u32 %v1090_v18, 16  ;;  %v1667_v18 = vld [vmem:[#allocation2 + $0x54] sm:$0xf] }
 0x135   : > { %v1385_v60 = vrot.slane %v812_v9, 5  ;;  %v1386_v19 = vrot.slane %v808_v11, 6  ;;  %v1412_v16 = vrot.slane %v1410_v2, 4  ;;  %v1391_v29 = vshrl.u32 %v1269_v35, 16 }
 0x136   : > { %3743 = vrot.lane.b32.xlu1 %v11305_v3, %s13044_s30  ;;  %v1420_v34 = vor.u32 %v1419_v56, %v1416_v17  ;;  %v1379_v40 = vrot.slane %v1377_v6, 5  ;;  %3741 = vrot.lane.b32.xlu0 %v11304_v58, %s13044_s30  ;;  %v1407_v48 = vrot.slane %v1406_v28, 4  ;;  %v1382_v42 = vrot.slane %v1380_v32, 6  ;;  %v1664_v3 = vld [vmem:[#allocation2 + $0x48] sm:$0xf] }
 0x137   : > { %v1387_v13 = vor.u32 %v1386_v19, %v1385_v60  ;;  %v1394_v8 = vshll.u32 %v1269_v35, 16  ;;  %v1393_v36 = vrot.slane %v1391_v29, 5  ;;  %v494_v38 = vrot.slane %v493_v62, 4 }
 0x138   : > { %v1421_v10 = vsel %vm13360_vm7, %v1412_v16, %v1420_v34  ;;  %v497_v44 = vrot.slane %v495_v59, 4  ;;  %v1411_v47 = vsel %vm13360_vm7, %v1407_v48, %v1410_v2  ;;  %v1383_v61 = vor.u32 %v1382_v42, %v1379_v40  ;;  %v1666_v2 = vld [vmem:[#allocation2 + $0x50] sm:$0x1]  ;;  %v13784_v16 = vld [vmem:[#allocation2 + $0x48] sm:$0xe] }
 0x139   : > { %v1389_v53 = vrot.slane %v1387_v13, 4  ;;  %v1396_v20 = vrot.slane %v1394_v8, 6  ;;  %v11321_v51 = vcombine.low %v1411_v47, %v1421_v10  ;;  %v496_v50 = vsel %vm13368_vm8, %v494_v38, %v495_v59  ;;  %v2089_v48 = vld [vmem:[#allocation2 + $0x54] sm:$0xe] }
 0x13a   : > { %613 = vst [vmem:[#allocation2 + $0x5c] sm:$0x1] %v497_v44  ;;  %v1821_v62 = vshrl.u32 %v1667_v18, 16  ;;  %v1824_v45 = vshll.u32 %v1667_v18, 16  ;;  %v1384_v39 = vrot.slane %v1383_v61, 4  ;;  %v1797_v52 = vshrl.u32 %v1664_v3, 16 }
 0x13b   : > { %v1397_v55 = vor.u32 %v1396_v20, %v1393_v36  ;;  %612 = vst [vmem:[#allocation2 + $0x58] sm:$0xf] %v496_v50  ;;  %v1800_v58 = vshll.u32 %v1664_v3, 16  ;;  %3823 = vrot.lane.b32.xlu1 %v11321_v51, %s13045_s9  ;;  %v1806_v17 = vshll.u32 %v13767_v54, 16  ;;  %v1810_v37 = vshrl.u32 %v13767_v54, 16 }
 0x13c   : > { %v1823_v15 = vrot.slane %v1821_v62, 4  ;;  %v1826_v35 = vrot.slane %v1824_v45, 5  ;;  %v1388_v59 = vsel %vm13360_vm7, %v1384_v39, %v1387_v13  ;;  %v1799_v6 = vrot.slane %v1797_v52, 4 }
 0x13d   : > { %v1398_v56 = vsel %vm13360_vm7, %v1389_v53, %v1397_v55  ;;  %v1802_v28 = vrot.slane %v1800_v58, 5  ;;  %v1808_v19 = vrot.slane %v1806_v17, 5  ;;  %v1812_v7 = vrot.slane %v1810_v37, 4 }
 0x13e   : > { %v11320_v32 = vcombine.low %v1388_v59, %v1398_v56  ;;  %v1827_v60 = vor.u32 %v1826_v35, %v1823_v15  ;;  %v13788_v34 = vrot.slane %v716_v5, 4  ;;  %v1816_v29 = vshll.u32 %v1666_v2, 16 }
 0x13f   : > { %v1803_v40 = vor.u32 %v1802_v28, %v1799_v6  ;;  %v11256_v42 = vrot.slane %v13784_v16, 9  ;;  %v13793_v13 = vrot.slane %v722_v30, 5  ;;  %v1813_v8 = vor.u32 %v1812_v7, %v1808_v19 }
 0x140   : > { %3821 = vrot.lane.b32.xlu0 %v11320_v32, %s13045_s9  ;;  %v11257_v18 = vrot.slane %v2089_v48, 9  ;;  %v2178_v10 = vrot.slane %v13767_v54, 5  ;;  %v1828_v38 = vrot.slane %v1827_v60, 4  ;;  %v1818_v5 = vrot.slane %v1816_v29, 5  ;;  %v12632_v60 = vld [vmem:[#allocation7 + $0x20] sm:$0xff]  }
 0x141   : > { %v1669_v36 = vld [vmem:[#allocation2 + $0x5c] sm:$0x1]  ;;  %v1804_v44 = vrot.slane %v1803_v40, 4  ;;  %v2181_v3 = vrot.slane %v1666_v2, 5  ;;  %v1814_v53 = vrot.slane %v1813_v8, 4  ;;  %v2392_v52 = vshrl.u32 %v2089_v48, 16  ;;  %12407 = vmatprep.subr.bf16.mxu0 %v12632_v60  ;;  %12510 = vmatprep.subr.bf16.mxu1 %v12632_v60 }
 0x142   : > { %v1668_v47 = vld [vmem:[#allocation2 + $0x58] sm:$0xf]  ;;  %v1840_v61 = vshll.u32 %v1669_v36, 16  ;;  %v2188_v20 = vrot.slane %v1669_v36, 5  ;;  %v2179_v14 = vsel %vm13353_vm6, %v11256_v42, %v2178_v10  ;;  %v2180_v55 = vrot.slane %v2178_v10, 4  ;;  %12408 = vmatpush3.bf16.msra.mxu0 %v12632_v60  ;;  %12518 = vmatpush3.bf16.msra.mxu1 %v12632_v60 }
 0x143   : > { %v1830_v30 = vshll.u32 %v1668_v47, 16  ;;  %v1834_v51 = vshrl.u32 %v1668_v47, 16  ;;  %v1809_v50 = vsel %vm13513_vm11, %v1804_v44, %v1808_v19  ;;  %v2185_v62 = vrot.slane %v1668_v47, 5  ;;  %v2265_v59 = vld [vmem:[#allocation2 + $0x5c] sm:$0x3] }
 0x144   : > { %v1842_v45 = vrot.slane %v1840_v61, 5  ;;  %v1819_v39 = vsel %vm13513_vm11, %v1814_v53, %v1818_v5  ;;  %v2182_v6 = vsel %vm13353_vm6, %v2180_v55, %v2181_v3  ;;  %v2394_v28 = vrot.slane %v2392_v52, 5  ;;  %v2264_v61 = vld [vmem:[#allocation2 + $0x50] sm:$0x3] }
 0x145   : > { %v1832_v58 = vrot.slane %v1830_v30, 5  ;;  %v1836_v15 = vrot.slane %v1834_v51, 4  ;;  %v11336_v35 = vcombine.low %v1809_v50, %v1819_v39  ;;  %v13805_v2 = vsel %vm13353_vm6, %v11257_v18, %v2185_v62 }
 0x146   : > { %v2187_v56 = vrot.slane %v2185_v62, 4  ;;  %v2395_v32 = vshll.u32 %v2089_v48, 16  ;;  %v11352_v40 = vcombine.low %v2179_v14, %v2182_v6  ;;  %v2400_v29 = vrot.slane %v1834_v51, 5  ;;  %v414_v62 = vld [vmem:[%s13326_s12 + $0x34] sm:$0xf] }
 0x147   : > { %v1833_v19 = vsel %vm13513_vm11, %v1828_v38, %v1832_v58  ;;  %v1837_v7 = vor.u32 %v1836_v15, %v1832_v58  ;;  %3901 = vrot.lane.b32.xlu0 %v11336_v35, %s13048_s14  ;;  %v2401_v18 = vrot.slane %v1830_v30, 6  ;;  %v2406_v10 = vshrl.u32 %v2265_v59, 16 }
 0x148   : > { %v2189_v42 = vsel %vm13353_vm6, %v2187_v56, %v2188_v20  ;;  %v2397_v8 = vrot.slane %v2395_v32, 6  ;;  %v2409_v44 = vshll.u32 %v2265_v59, 16  ;;  %v2369_v38 = vshrl.u32 %v13784_v16, 16  ;;  %v413_v20 = vld [vmem:[%s13326_s12 + $0x30] sm:$0xf] }
 0x149   : > { %v1838_v36 = vrot.slane %v1837_v7, 4  ;;  %v11353_v48 = vcombine.low %v13805_v2, %v2189_v42  ;;  %v2402_v3 = vor.u32 %v2401_v18, %v2400_v29  ;;  %v2408_v47 = vrot.slane %v2406_v10, 5  ;;  %v13831_v7 = vld [vmem:[#allocation2 + $0x58] sm:$0xf]  ;;  %v2659_v42 = vld [vmem:[#allocation2 + $0x5c] sm:$0x1] }
 0x14a   : > { %v2398_v5 = vor.u32 %v2397_v8, %v2394_v28  ;;  %v2372_v53 = vshll.u32 %v13784_v16, 16  ;;  %v2411_v30 = vrot.slane %v2409_v44, 6  ;;  %v2371_v51 = vrot.slane %v2369_v38, 5 }
 0x14b   : > { %v1843_v14 = vsel %vm13513_vm11, %v1838_v36, %v1842_v45  ;;  %3981 = vrot.lane.b32.xlu0 %v11352_v40, %s13046_s13  ;;  %v2377_v50 = vrot.slane %v1810_v37, 5  ;;  %v2404_v52 = vrot.slane %v2402_v3, 4  ;;  %v2378_v16 = vrot.slane %v1806_v17, 6  ;;  %v2657_v37 = vld [vmem:[#allocation2 + $0x54] sm:$0xf] }
 0x14c   : > { %v11337_v39 = vcombine.low %v1833_v19, %v1843_v14  ;;  %v2399_v55 = vrot.slane %v2398_v5, 4  ;;  %v2374_v58 = vrot.slane %v2372_v53, 6  ;;  %v2412_v15 = vor.u32 %v2411_v30, %v2408_v47  ;;  %v13842_v14 = vld [vmem:[#allocation2 + $0x54] sm:$0xe] }
 0x14d   : > { %v2383_v35 = vshrl.u32 %v2264_v61, 16  ;;  %v2386_v2 = vshll.u32 %v2264_v61, 16  ;;  %v498_v56 = vrot.slane %v413_v20, 7  ;;  %v500_v6 = vrot.slane %v414_v62, 7 }
 0x14e   : > { %3903 = vrot.lane.b32.xlu1 %v11337_v39, %s13048_s14  ;;  %v2403_v45 = vsel %vm13360_vm7, %v2399_v55, %v2402_v3  ;;  %v2375_v59 = vor.u32 %v2374_v58, %v2371_v51  ;;  %v2413_v28 = vsel %vm13360_vm7, %v2404_v52, %v2412_v15  ;;  %v2379_v32 = vor.u32 %v2378_v16, %v2377_v50 }
 0x14f   : > { %v2385_v60 = vrot.slane %v2383_v35, 5  ;;  %v2388_v19 = vrot.slane %v2386_v2, 6  ;;  %v11369_v54 = vcombine.low %v2403_v45, %v2413_v28  ;;  %v499_v40 = vrot.slane %v498_v56, 4  ;;  %614 = vst [vmem:[#allocation2 + $0x60] sm:$0xe] %v498_v56 }
 0x150   : > { %v2376_v17 = vrot.slane %v2375_v59, 4  ;;  %v502_v29 = vrot.slane %v500_v6, 4  ;;  %v2381_v8 = vrot.slane %v2379_v32, 4  ;;  %v2790_v10 = vshrl.u32 %v2657_v37, 16 }
 0x151   : > { %v2389_v18 = vor.u32 %v2388_v19, %v2385_v60  ;;  %v2793_v36 = vshll.u32 %v2657_v37, 16  ;;  %v501_v38 = vsel %vm13368_vm8, %v499_v40, %v500_v6  ;;  %v2799_v5 = vshll.u32 %v13831_v7, 16 }
 0x152   : > { %3983 = vrot.lane.b32.xlu1 %v11353_v48, %s13046_s13  ;;  %v2380_v44 = vsel %vm13360_vm7, %v2376_v17, %v2379_v32  ;;  %616 = vst [vmem:[#allocation2 + $0x68] sm:$0x1] %v502_v29  ;;  %v2803_v3 = vshrl.u32 %v13831_v7, 16  ;;  %615 = vst [vmem:[#allocation2 + $0x64] sm:$0xf] %v501_v38  ;;  %v2792_v61 = vrot.slane %v2790_v10, 4 }
 0x153   : > { %v2390_v47 = vsel %vm13360_vm7, %v2381_v8, %v2389_v18  ;;  %v2795_v53 = vrot.slane %v2793_v36, 5  ;;  %v2809_v20 = vshll.u32 %v2659_v42, 16  ;;  %v2801_v30 = vrot.slane %v2799_v5, 5 }
 0x154   : > { %v11368_v48 = vcombine.low %v2380_v44, %v2390_v47  ;;  %v2805_v51 = vrot.slane %v2803_v3, 4  ;;  %v11272_v50 = vrot.slane %v13842_v14, 9  ;;  %v3171_v55 = vrot.slane %v13831_v7, 5  ;;  %v12633_v44 = vld [vmem:[#allocation7 + $0x28] sm:$0xff]  }
 0x155   : > { %v2796_v62 = vor.u32 %v2795_v53, %v2792_v61  ;;  %v2811_v39 = vrot.slane %v2809_v20, 5  ;;  %v3174_v52 = vrot.slane %v2659_v42, 5  ;;  %v3362_v15 = vshrl.u32 %v13842_v14, 16  ;;  %12409 = vmatprep.subr.bf16.mxu0 %v12633_v44  ;;  %12511 = vmatprep.subr.bf16.mxu1 %v12633_v44 }
 0x156   : > { %4063 = vrot.lane.b32.xlu1 %v11369_v54, %s13049_s8  ;;  %4061 = vrot.lane.b32.xlu0 %v11368_v48, %s13049_s8  ;;  %v2806_v58 = vor.u32 %v2805_v51, %v2801_v30  ;;  %v3365_v16 = vshll.u32 %v13842_v14, 16  ;;  %v13852_v35 = vrot.slane %v2803_v3, 5  ;;  %v2660_v2 = vld [vmem:[#allocation2 + $0x60] sm:$0xf]  ;;  %v3172_v56 = vsel %vm13353_vm6, %v11272_v50, %v3171_v55 }
 0x157   : > { %v2797_v45 = vrot.slane %v2796_v62, 4  ;;  %v3082_v59 = vld [vmem:[#allocation2 + $0x60] sm:$0xe]  ;;  %v3173_v6 = vrot.slane %v3171_v55, 4  ;;  %v2814_v37 = vshrl.u32 %v2660_v2, 16  ;;  %v2817_v28 = vshll.u32 %v2660_v2, 16  ;;  %12410 = vmatpush3.bf16.msra.mxu0 %v12633_v44  ;;  %12519 = vmatpush3.bf16.msra.mxu1 %v12633_v44 }
 0x158   : > { %v2807_v32 = vrot.slane %v2806_v58, 4  ;;  %v11273_v60 = vrot.slane %v3082_v59, 9  ;;  %v3385_v40 = vshrl.u32 %v3082_v59, 16  ;;  %v3388_v29 = vshll.u32 %v3082_v59, 16  ;;  %v1093_v7 = vld [vmem:[#allocation2 + $0x60] sm:$0xe] }
 0x159   : > { %v2662_v19 = vld [vmem:[#allocation2 + $0x68] sm:$0x1]  ;;  %v2802_v54 = vsel %vm13513_vm11, %v2797_v45, %v2801_v30  ;;  %v3175_v17 = vsel %vm13353_vm6, %v3173_v6, %v3174_v52  ;;  %v2661_v42 = vld [vmem:[#allocation2 + $0x64] sm:$0xf]  ;;  %v2816_v8 = vrot.slane %v2814_v37, 4  ;;  %v2819_v18 = vrot.slane %v2817_v28, 5 }
 0x15a   : > { %v2833_v10 = vshll.u32 %v2662_v19, 16  ;;  %v2812_v36 = vsel %vm13513_vm11, %v2807_v32, %v2811_v39  ;;  %v2823_v38 = vshll.u32 %v2661_v42, 16  ;;  %v2827_v3 = vshrl.u32 %v2661_v42, 16  ;;  %v3258_v51 = vld [vmem:[#allocation2 + $0x68] sm:$0x3]  ;;  %v12634_v52 = vld [vmem:[#allocation7 + $0x30] sm:$0xff]  }
 0x15b   : > { %v11384_v47 = vcombine.low %v2802_v54, %v2812_v36  ;;  %v3178_v61 = vrot.slane %v2661_v42, 5  ;;  %v2820_v53 = vor.u32 %v2819_v18, %v2816_v8  ;;  %v3181_v48 = vrot.slane %v2662_v19, 5  ;;  %12411 = vmatprep.subr.bf16.mxu0 %v12634_v52  ;;  %12512 = vmatprep.subr.bf16.mxu1 %v12634_v52 }
 0x15c   : > { %v2835_v20 = vrot.slane %v2833_v10, 5  ;;  %v11400_v30 = vcombine.low %v3172_v56, %v3175_v17  ;;  %v2825_v50 = vrot.slane %v2823_v38, 5  ;;  %v2829_v62 = vrot.slane %v2827_v3, 4  ;;  %v3257_v17 = vld [vmem:[#allocation2 + $0x5c] sm:$0x3]  ;;  %12412 = vmatpush3.bf16.msra.mxu0 %v12634_v52  ;;  %12520 = vmatpush3.bf16.msra.mxu1 %v12634_v52 }
 0x15d   : > { %4141 = vrot.lane.b32.xlu0 %v11384_v47, %s13050_s17  ;;  %v13865_v55 = vsel %vm13353_vm6, %v11273_v60, %v3178_v61  ;;  %v3180_v39 = vrot.slane %v3178_v61, 4  ;;  %v2821_v58 = vrot.slane %v2820_v53, 4  ;;  %v3387_v2 = vrot.slane %v3385_v40, 5  ;;  %v12635_v40 = vld [vmem:[#allocation7 + $0x38] sm:$0xff]  }
 0x15e   : > { %v3390_v45 = vrot.slane %v3388_v29, 6  ;;  %v3393_v59 = vrot.slane %v2827_v3, 5  ;;  %v2830_v56 = vor.u32 %v2829_v62, %v2825_v50  ;;  %v3394_v37 = vrot.slane %v2823_v38, 6  ;;  %v13877_v3 = vld [vmem:[#allocation2 + $0x64] sm:$0xf]  ;;  %12413 = vmatprep.subr.bf16.mxu0 %v12635_v40  ;;  %12513 = vmatprep.subr.bf16.mxu1 %v12635_v40 }
 0x15f   : > { %v3182_v6 = vsel %vm13353_vm6, %v3180_v39, %v3181_v48  ;;  %v3399_v28 = vshrl.u32 %v3258_v51, 16  ;;  %v2826_v32 = vsel %vm13513_vm11, %v2821_v58, %v2825_v50  ;;  %v3402_v54 = vshll.u32 %v3258_v51, 16 }
 0x160   : > { %v11401_v60 = vcombine.low %v13865_v55, %v3182_v6  ;;  %v3391_v19 = vor.u32 %v3390_v45, %v3387_v2  ;;  %v2831_v29 = vrot.slane %v2830_v56, 4  ;;  %v3395_v42 = vor.u32 %v3394_v37, %v3393_v59  ;;  %12414 = vmatpush3.bf16.msra.mxu0 %v12635_v40  ;;  %v671_v59 = vld [vmem:[#allocation2 + $0x5c] sm:$0x1]  ;;  %12521 = vmatpush3.bf16.msra.mxu1 %v12635_v40 }
 0x161   : > { %4221 = vrot.lane.b32.xlu0 %v11400_v30, %s13047_s15  ;;  %v3401_v8 = vrot.slane %v3399_v28, 5  ;;  %v3364_v18 = vrot.slane %v3362_v15, 5  ;;  %v3404_v36 = vrot.slane %v3402_v54, 6  ;;  %v3367_v44 = vrot.slane %v3365_v16, 6  ;;  %v674_v15 = vld [vmem:[#allocation2 + $0x68] sm:$0x1] }
 0x162   : > { %v3392_v10 = vrot.slane %v3391_v19, 4  ;;  %v3371_v38 = vrot.slane %v2799_v5, 6  ;;  %v2836_v47 = vsel %vm13513_vm11, %v2831_v29, %v2835_v20  ;;  %v3397_v61 = vrot.slane %v3395_v42, 4  ;;  %v13883_v5 = vld [vmem:[#allocation2 + $0x54] sm:$0xe] }
 0x163   : > { %v3376_v53 = vshrl.u32 %v3257_v17, 16  ;;  %v3379_v48 = vshll.u32 %v3257_v17, 16  ;;  %v11385_v30 = vcombine.low %v2826_v32, %v2836_v47  ;;  %v3405_v16 = vor.u32 %v3404_v36, %v3401_v8  ;;  %v13886_v20 = vld [vmem:[#allocation2 + $0x58] sm:$0xf]  ;;  %v1272_v8 = vld [vmem:[#allocation2 + $0x68] sm:$0x3] }
 0x164   : > { %v3396_v14 = vsel %vm13360_vm7, %v3392_v10, %v3395_v42  ;;  %v3368_v51 = vor.u32 %v3367_v44, %v3364_v18  ;;  %v3372_v50 = vor.u32 %v3371_v38, %v13852_v35  ;;  %v11243_v39 = vrot.slane %v1093_v7, 9 }
 0x165   : > { %v3378_v62 = vrot.slane %v3376_v53, 5  ;;  %v3381_v55 = vrot.slane %v3379_v48, 6  ;;  %4143 = vrot.lane.b32.xlu1 %v11385_v30, %s13050_s17  ;;  %v3406_v52 = vsel %vm13360_vm7, %v3397_v61, %v3405_v16  ;;  %v1204_v2 = vrot.slane %v13877_v3, 5 }
 0x166   : > { %v3369_v58 = vrot.slane %v3368_v51, 4  ;;  %v1207_v45 = vrot.slane %v674_v15, 5  ;;  %v11417_v56 = vcombine.low %v3396_v14, %v3406_v52  ;;  %v3374_v6 = vrot.slane %v3372_v50, 4 }
 0x167   : > { %v3382_v35 = vor.u32 %v3381_v55, %v3378_v62  ;;  %v11242_v37 = vrot.slane %v13883_v5, 9  ;;  %v1205_v32 = vsel %vm13353_vm6, %v11243_v39, %v1204_v2  ;;  %v1206_v19 = vrot.slane %v1204_v2, 4 }
 0x168   : > { %v3373_v28 = vsel %vm13360_vm7, %v3369_v58, %v3372_v50  ;;  %v1197_v54 = vrot.slane %v13886_v20, 5  ;;  %v1200_v29 = vrot.slane %v671_v59, 5  ;;  %v880_v40 = vshll.u32 %v13877_v3, 16 }
 0x169   : > { %v3383_v17 = vsel %vm13360_vm7, %v3374_v6, %v3382_v35  ;;  %v17830_v42 = vshrl.u32 %v13877_v3, 16  ;;  %4223 = vrot.lane.b32.xlu1 %v11401_v60, %s13047_s15  ;;  %v1208_v10 = vsel %vm13353_vm6, %v1206_v19, %v1207_v45  ;;  %v1446_v47 = vshrl.u32 %v1093_v7, 16  ;;  %v415_v6 = vld [vmem:[%s13326_s12 + $0x38] sm:$0xf] }
 0x16a   : > { %v11416_v18 = vcombine.low %v3373_v28, %v3383_v17  ;;  %v1198_v36 = vsel %vm13353_vm6, %v11242_v37, %v1197_v54  ;;  %v1199_v44 = vrot.slane %v1197_v54, 4  ;;  %v11307_v38 = vcombine.low %v1205_v32, %v1208_v10  ;;  %v416_v32 = vld [vmem:[%s13326_s12 + $0x3c] sm:$0xf] }
 0x16b   : > { %v1449_v61 = vshll.u32 %v1093_v7, 16  ;;  %v1454_v53 = vrot.slane %v17830_v42, 5  ;;  %v1455_v60 = vrot.slane %v880_v40, 6  ;;  %v1460_v15 = vshrl.u32 %v1272_v8, 16  ;;  %v1271_v7 = vld [vmem:[#allocation2 + $0x5c] sm:$0x3] }
 0x16c   : > { %4301 = vrot.lane.b32.xlu0 %v11416_v18, %s13051_s20  ;;  %v1201_v48 = vsel %vm13353_vm6, %v1199_v44, %v1200_v29  ;;  %v1463_v30 = vshll.u32 %v1272_v8, 16  ;;  %v1448_v16 = vrot.slane %v1446_v47, 5  ;;  %v17821_v50 = vshll.u32 %v13886_v20, 16  ;;  %v1670_v8 = vld [vmem:[#allocation2 + $0x60] sm:$0xf] }
 0x16d   : > { %v11306_v14 = vcombine.low %v1198_v36, %v1201_v48  ;;  %v1451_v51 = vrot.slane %v1449_v61, 6  ;;  %4303 = vrot.lane.b32.xlu1 %v11417_v56, %s13051_s20  ;;  %v1456_v62 = vor.u32 %v1455_v60, %v1454_v53  ;;  %v1462_v55 = vrot.slane %v1460_v15, 5  ;;  %v13931_v48 = vld [vmem:[#allocation2 + $0x64] sm:$0xf] }
 0x16e   : > { %v1465_v39 = vrot.slane %v1463_v30, 6  ;;  %v17820_v52 = vshrl.u32 %v13886_v20, 16  ;;  %v1423_v2 = vshrl.u32 %v13883_v5, 16  ;;  %v1426_v45 = vshll.u32 %v13883_v5, 16 }
 0x16f   : > { %v1452_v58 = vor.u32 %v1451_v51, %v1448_v16  ;;  %v1432_v59 = vrot.slane %v17821_v50, 6  ;;  %v1458_v35 = vrot.slane %v1456_v62, 4  ;;  %v1437_v28 = vshrl.u32 %v1271_v7, 16 }
 0x170   : > { %3745 = vrot.lane.b32.xlu0 %v11306_v14, %s13044_s30  ;;  %v1466_v37 = vor.u32 %v1465_v39, %v1462_v55  ;;  %v1431_v56 = vrot.slane %v17820_v52, 5  ;;  %v1425_v54 = vrot.slane %v1423_v2, 5  ;;  %v1428_v17 = vrot.slane %v1426_v45, 6  ;;  %v1672_v14 = vld [vmem:[#allocation2 + $0x68] sm:$0x1] }
 0x171   : > { %v1453_v19 = vrot.slane %v1452_v58, 4  ;;  %v1440_v29 = vshll.u32 %v1271_v7, 16  ;;  %3747 = vrot.lane.b32.xlu1 %v11307_v38, %s13044_s30  ;;  %v1439_v10 = vrot.slane %v1437_v28, 5  ;;  %v503_v36 = vrot.slane %v415_v6, 7 }
 0x172   : > { %v1467_v5 = vsel %vm13360_vm7, %v1458_v35, %v1466_v37  ;;  %v1433_v18 = vor.u32 %v1432_v59, %v1431_v56  ;;  %v1429_v47 = vor.u32 %v1428_v17, %v1425_v54  ;;  %v505_v53 = vrot.slane %v416_v32, 7  ;;  %v13942_v37 = vld [vmem:[#allocation2 + $0x60] sm:$0xe] }
 0x173   : > { %v1457_v44 = vsel %vm13360_vm7, %v1453_v19, %v1456_v62  ;;  %v1442_v61 = vrot.slane %v1440_v29, 6  ;;  %v504_v30 = vrot.slane %v503_v36, 4  ;;  %617 = vst [vmem:[#allocation2 + $0x6c] sm:$0xe] %v503_v36  ;;  %v1845_v38 = vshrl.u32 %v1670_v8, 16 }
 0x174   : > { %v11323_v60 = vcombine.low %v1457_v44, %v1467_v5  ;;  %v1435_v15 = vrot.slane %v1433_v18, 4  ;;  %v1430_v16 = vrot.slane %v1429_v47, 4  ;;  %v507_v7 = vrot.slane %v505_v53, 4 }
 0x175   : > { %v1443_v51 = vor.u32 %v1442_v61, %v1439_v10  ;;  %v1848_v55 = vshll.u32 %v1670_v8, 16  ;;  %v506_v62 = vsel %vm13368_vm8, %v504_v30, %v505_v53  ;;  %v1847_v39 = vrot.slane %v1845_v38, 4 }
 0x176   : > { %3827 = vrot.lane.b32.xlu1 %v11323_v60, %s13045_s9  ;;  %v1854_v58 = vshll.u32 %v13931_v48, 16  ;;  %v1858_v2 = vshrl.u32 %v13931_v48, 16  ;;  %v1434_v45 = vsel %vm13360_vm7, %v1430_v16, %v1433_v18  ;;  %618 = vst [vmem:[#allocation2 + $0x70] sm:$0xf] %v506_v62  ;;  %619 = vst [vmem:[#allocation2 + $0x74] sm:$0x1] %v507_v7 }
 0x177   : > { %v1444_v59 = vsel %vm13360_vm7, %v1435_v15, %v1443_v51  ;;  %v1850_v6 = vrot.slane %v1848_v55, 5  ;;  %v1864_v35 = vshll.u32 %v1672_v14, 16  ;;  %v11258_v19 = vrot.slane %v13942_v37, 9 }
 0x178   : > { %v11322_v56 = vcombine.low %v1434_v45, %v1444_v59  ;;  %v1856_v28 = vrot.slane %v1854_v58, 5  ;;  %v1860_v32 = vrot.slane %v1858_v2, 4  ;;  %v2192_v29 = vrot.slane %v13931_v48, 5  ;;  %v417_v48 = vld [vmem:[%s13326_s12 + $0x40] sm:$0xf] }
 0x179   : > { %v1851_v54 = vor.u32 %v1850_v6, %v1847_v39  ;;  %v1866_v17 = vrot.slane %v1864_v35, 5  ;;  %v2195_v8 = vrot.slane %v1672_v14, 5  ;;  %v2415_v18 = vshrl.u32 %v13942_v37, 16 }
 0x17a   : > { %3825 = vrot.lane.b32.xlu0 %v11322_v56, %s13045_s9  ;;  %v1861_v5 = vor.u32 %v1860_v32, %v1856_v28  ;;  %v2418_v10 = vshll.u32 %v13942_v37, 16  ;;  %v13951_v36 = vrot.slane %v1858_v2, 5  ;;  %v1673_v44 = vld [vmem:[#allocation2 + $0x6c] sm:$0xf]  ;;  %v2193_v53 = vsel %vm13353_vm6, %v11258_v19, %v2192_v29 }
 0x17b   : > { %v1852_v47 = vrot.slane %v1851_v54, 4  ;;  %v2091_v61 = vld [vmem:[#allocation2 + $0x6c] sm:$0xe]  ;;  %v2194_v60 = vrot.slane %v2192_v29, 4  ;;  %v1869_v15 = vshrl.u32 %v1673_v44, 16  ;;  %v1872_v30 = vshll.u32 %v1673_v44, 16 }
 0x17c   : > { %v1862_v38 = vrot.slane %v1861_v5, 4  ;;  %v11259_v14 = vrot.slane %v2091_v61, 9  ;;  %v2438_v7 = vshrl.u32 %v2091_v61, 16  ;;  %v2441_v55 = vshll.u32 %v2091_v61, 16 }
 0x17d   : > { %v1857_v16 = vsel %vm13513_vm11, %v1852_v47, %v1856_v28  ;;  %v2196_v51 = vsel %vm13353_vm6, %v2194_v60, %v2195_v8  ;;  %v1674_v62 = vld [vmem:[#allocation2 + $0x70] sm:$0xf]  ;;  %v1675_v39 = vld [vmem:[#allocation2 + $0x74] sm:$0x1]  ;;  %v1871_v2 = vrot.slane %v1869_v15, 4  ;;  %v1874_v45 = vrot.slane %v1872_v30, 5 }
 0x17e   : > { %v1867_v59 = vsel %vm13513_vm11, %v1862_v38, %v1866_v17  ;;  %v1878_v6 = vshll.u32 %v1674_v62, 16  ;;  %v1882_v35 = vshrl.u32 %v1674_v62, 16  ;;  %v1888_v37 = vshll.u32 %v1675_v39, 16  ;;  %v2267_v28 = vld [vmem:[#allocation2 + $0x74] sm:$0x3] }
 0x17f   : > { %v11338_v56 = vcombine.low %v1857_v16, %v1867_v59  ;;  %v1875_v32 = vor.u32 %v1874_v45, %v1871_v2  ;;  %v2199_v19 = vrot.slane %v1674_v62, 5  ;;  %v11354_v54 = vcombine.low %v2193_v53, %v2196_v51 }
 0x180   : > { %v2440_v29 = vrot.slane %v2438_v7, 5  ;;  %v1880_v5 = vrot.slane %v1878_v6, 5  ;;  %v1884_v8 = vrot.slane %v1882_v35, 4  ;;  %v2202_v44 = vrot.slane %v1675_v39, 5  ;;  %v2266_v7 = vld [vmem:[#allocation2 + $0x68] sm:$0x3] }
 0x181   : > { %3905 = vrot.lane.b32.xlu0 %v11338_v56, %s13048_s14  ;;  %v2443_v47 = vrot.slane %v2441_v55, 6  ;;  %v1876_v61 = vrot.slane %v1875_v32, 4  ;;  %v1890_v60 = vrot.slane %v1888_v37, 5  ;;  %v2201_v15 = vrot.slane %v2199_v19, 4 }
 0x182   : > { %v2446_v30 = vrot.slane %v1882_v35, 5  ;;  %v1885_v17 = vor.u32 %v1884_v8, %v1880_v5  ;;  %v2447_v52 = vrot.slane %v1878_v6, 6  ;;  %v2452_v50 = vshrl.u32 %v2267_v28, 16 }
 0x183   : > { %v2444_v38 = vor.u32 %v2443_v47, %v2440_v29  ;;  %v1881_v16 = vsel %vm13513_vm11, %v1876_v61, %v1880_v5  ;;  %v2200_v53 = vsel %vm13353_vm6, %v11259_v14, %v2199_v19  ;;  %v2455_v51 = vshll.u32 %v2267_v28, 16  ;;  %v651_v19 = vld [vmem:[#allocation2 + $0xc] sm:$0xf]  ;;  %v13976_v29 = vpop.permute.xlu1 %3813  ;;  %v418_v47 = vld [vmem:[%s13326_s12 + $0x44] sm:$0xf] }
 0x184   : > { %v2417_v62 = vrot.slane %v2415_v18, 5  ;;  %v1886_v2 = vrot.slane %v1885_v17, 4  ;;  %v2203_v55 = vsel %vm13353_vm6, %v2201_v15, %v2202_v44  ;;  %v2448_v45 = vor.u32 %v2447_v52, %v2446_v30  ;;  %v2663_v30 = vld [vmem:[#allocation2 + $0x6c] sm:$0xf] }
 0x185   : > { %3985 = vrot.lane.b32.xlu0 %v11354_v54, %s13046_s13  ;;  %v2445_v39 = vrot.slane %v2444_v38, 4  ;;  %v2454_v59 = vrot.slane %v2452_v50, 5  ;;  %v2457_v6 = vrot.slane %v2455_v51, 6  ;;  %v2420_v35 = vrot.slane %v2418_v10, 6  ;;  %v13978_v10 = vpop.permute.xlu0 %3733  ;;  %v13988_v51 = vld [vmem:[#allocation2 + $0x70] sm:$0xf] }
 0x186   : > { %v2424_v37 = vrot.slane %v1854_v58, 6  ;;  %v1891_v14 = vsel %vm13513_vm11, %v1886_v2, %v1890_v60  ;;  %v2450_v56 = vrot.slane %v2448_v45, 4  ;;  %v2429_v32 = vshrl.u32 %v2266_v7, 16 }
 0x187   : > { %v2449_v18 = vsel %vm13360_vm7, %v2445_v39, %v2448_v45  ;;  %v11339_v54 = vcombine.low %v1881_v16, %v1891_v14  ;;  %v2458_v28 = vor.u32 %v2457_v6, %v2454_v59  ;;  %v2421_v52 = vor.u32 %v2420_v35, %v2417_v62  ;;  %v654_v59 = vld [vmem:[#allocation2 + $0x18] sm:$0xf] }
 0x188   : > { %v2425_v50 = vor.u32 %v2424_v37, %v13951_v36  ;;  %v11355_v58 = vcombine.low %v2200_v53, %v2203_v55  ;;  %v2431_v5 = vrot.slane %v2429_v32, 5  ;;  %v2432_v8 = vshll.u32 %v2266_v7, 16 }
 0x189   : > { %v714_v44 = vrot.slane %v712_v4, 5  ;;  %3907 = vrot.lane.b32.xlu1 %v11339_v54, %s13048_s14  ;;  %v2459_v61 = vsel %vm13360_vm7, %v2450_v56, %v2458_v28  ;;  %v2422_v60 = vrot.slane %v2421_v52, 4  ;;  %v703_v36 = vshrl.u32 %v651_v19, 16  ;;  %v13998_v56 = vpop.permute.xlu0 %3735 }
 0x18a   : > { %v2427_v15 = vrot.slane %v2425_v50, 4  ;;  %v11371_v17 = vcombine.low %v2449_v18, %v2459_v61  ;;  %v2434_v38 = vrot.slane %v2432_v8, 6  ;;  %v706_v53 = vshll.u32 %v651_v19, 16  ;;  %v13996_v18 = vpop.permute.xlu1 %3975 }
 0x18b   : > { %v719_v16 = vor.u32 %v13788_v34, %v714_v44  ;;  %v2426_v1 = vsel %vm13360_vm7, %v2422_v60, %v2425_v50  ;;  %v705_v4 = vrot.slane %v703_v36, 4  ;;  %v508_v7 = vrot.slane %v417_v48, 7  ;;  %v13993_v34 = vld [vmem:[#allocation2 + $0x74] sm:$0x1] }
 0x18c   : > { %v510_v62 = vrot.slane %v418_v47, 7  ;;  %v2435_v2 = vor.u32 %v2434_v38, %v2431_v5  ;;  %v708_v39 = vrot.slane %v706_v53, 5  ;;  %v2838_v45 = vshrl.u32 %v2663_v30, 16 }
 0x18d   : > { %v720_v55 = vrot.slane %v719_v16, 4  ;;  %3987 = vrot.lane.b32.xlu1 %v11355_v58, %s13046_s13  ;;  %v509_v6 = vrot.slane %v508_v7, 4  ;;  %620 = vst [vmem:[#allocation2 + $0x78] sm:$0xe] %v508_v7  ;;  %v2841_v37 = vshll.u32 %v2663_v30, 16  ;;  %v2847_v14 = vshll.u32 %v13988_v51, 16 }
 0x18e   : > { %v512_v35 = vrot.slane %v510_v62, 4  ;;  %v2436_v32 = vsel %vm13360_vm7, %v2427_v15, %v2435_v2  ;;  %v709_v54 = vor.u32 %v708_v39, %v705_v4  ;;  %v2840_v28 = vrot.slane %v2838_v45, 4  ;;  %v14021_v7 = vld [vmem:[#allocation2 + $0x6c] sm:$0xe] }
 0x18f   : > { %v725_v19 = vsel %vm13513_vm11, %v720_v55, %v13793_v13  ;;  %v11370_v52 = vcombine.low %v2426_v1, %v2436_v32  ;;  %v511_v50 = vsel %vm13368_vm8, %v509_v6, %v510_v62  ;;  %v2843_v48 = vrot.slane %v2841_v37, 5  ;;  %v14023_v62 = vpop.permute.xlu1 %4215  ;;  %v12765_v55 = vld [vmem:[#allocation2 + $0x20] sm:$0x1] }
 0x190   : > { %622 = vst [vmem:[#allocation2 + $0x80] sm:$0x1] %v512_v35  ;;  %v2849_v58 = vrot.slane %v2847_v14, 5  ;;  %v710_v5 = vrot.slane %v709_v54, 4  ;;  %621 = vst [vmem:[#allocation2 + $0x7c] sm:$0xf] %v511_v50 }
 0x191   : > { %v2851_v8 = vshrl.u32 %v13988_v51, 16  ;;  %v2857_v47 = vshll.u32 %v13993_v34, 16  ;;  %v727_v61 = vshrl.u32 %v654_v59, 16  ;;  %4067 = vrot.lane.b32.xlu1 %v11371_v17, %s13049_s8  ;;  %4065 = vrot.lane.b32.xlu0 %v11370_v52, %s13049_s8  ;;  %v2844_v13 = vor.u32 %v2843_v48, %v2840_v28 }
 0x192   : > { %v730_v60 = vshll.u32 %v654_v59, 16  ;;  %v738_v15 = vrot.slane %v736_v12, 5  ;;  %v742_v36 = vrot.slane %v740_v22, 4  ;;  %vm4325_vm12 = vcmask 64512   ;;  %v14025_v12 = vpop.permute.xlu0 %3973 }
 0x193   : > { %v715_v30 = vsel %vm13513_vm11, %v710_v5, %v714_v44  ;;  %v2853_v38 = vrot.slane %v2851_v8, 4  ;;  %v729_v16 = vrot.slane %v727_v61, 4  ;;  %v2845_v17 = vrot.slane %v2844_v13, 4 }
 0x194   : > { %v11284_v53 = vcombine.low %v715_v30, %v725_v19  ;;  %v732_v1 = vrot.slane %v730_v60, 5  ;;  %v743_v4 = vor.u32 %v742_v36, %v738_v15  ;;  %v2666_v24 = vld [vmem:[#allocation2 + $0x78] sm:$0xf]  ;;  %v2859_v2 = vrot.slane %v2857_v47, 5 }
 0x195   : > { %v2854_v22 = vor.u32 %v2853_v38, %v2849_v58  ;;  %v746_v39 = vshll.u32 %v12765_v55, 16  ;;  %v11274_v44 = vrot.slane %v14021_v7, 9  ;;  %v2862_v59 = vshrl.u32 %v2666_v24, 16  ;;  %v3084_v37 = vld [vmem:[#allocation2 + $0x78] sm:$0xe] }
 0x196   : > { %v14030_v45 = vsel %vm4325_vm12, %v11284_v53, %v13978_v10  ;;  %v2865_v6 = vshll.u32 %v2666_v24, 16  ;;  %v2850_v35 = vsel %vm13513_vm11, %v2845_v17, %v2849_v58  ;;  %v733_v54 = vor.u32 %v732_v1, %v729_v16  ;;  %v14038_v16 = vpop.permute.xlu1 %3737  ;;  %v14040_v17 = vpop.permute.xlu0 %4213 }
 0x197   : > { %v2668_v32 = vld [vmem:[#allocation2 + $0x80] sm:$0x1]  ;;  %v2855_v19 = vrot.slane %v2854_v22, 4  ;;  %v744_v28 = vrot.slane %v743_v4, 4  ;;  %v748_v52 = vrot.slane %v746_v39, 5  ;;  %v2864_v48 = vrot.slane %v2862_v59, 4 }
 0x198   : > { %v2667_v50 = vld [vmem:[#allocation2 + $0x7c] sm:$0xf]  ;;  %v2867_v5 = vrot.slane %v2865_v6, 5  ;;  %v2881_v47 = vshll.u32 %v2668_v32, 16  ;;  %v11275_v61 = vrot.slane %v3084_v37, 9  ;;  %v734_v36 = vrot.slane %v733_v54, 4 }
 0x199   : > { %v2871_v13 = vshll.u32 %v2667_v50, 16  ;;  %v2875_v60 = vshrl.u32 %v2667_v50, 16  ;;  %v2860_v10 = vsel %vm13513_vm11, %v2855_v19, %v2859_v2  ;;  %v749_v53 = vsel %vm13513_vm11, %v744_v28, %v748_v52 }
 0x19a   : > { %v2868_v30 = vor.u32 %v2867_v5, %v2864_v48  ;;  %v2883_v38 = vrot.slane %v2881_v47, 5  ;;  %v11386_v58 = vcombine.low %v2850_v35, %v2860_v10  ;;  %v739_v24 = vsel %vm13513_vm11, %v734_v36, %v738_v15  ;;  %v3260_v5 = vld [vmem:[#allocation2 + $0x80] sm:$0x3] }
 0x19b   : > { %v2873_v1 = vrot.slane %v2871_v13, 5  ;;  %v2877_v4 = vrot.slane %v2875_v60, 4  ;;  %v3192_v22 = vrot.slane %v2667_v50, 5  ;;  %v11285_v2 = vcombine.low %v739_v24, %v749_v53 }
 0x19c   : > { %v2869_v55 = vrot.slane %v2868_v30, 4  ;;  %4145 = vrot.lane.b32.xlu0 %v11386_v58, %s13050_s17  ;;  %v3195_v39 = vrot.slane %v2668_v32, 5  ;;  %v3185_v59 = vrot.slane %v13988_v51, 5  ;;  %v3188_v54 = vrot.slane %v13993_v34, 5  ;;  %v14061_v58 = vpop.permute.xlu1 %3739  ;;  %v14081_v51 = vld [vmem:[#allocation2 + $0x7c] sm:$0xf] }
 0x19d   : > { %v2878_v6 = vor.u32 %v2877_v4, %v2873_v1  ;;  %v3193_v35 = vsel %vm13353_vm6, %v11275_v61, %v3192_v22  ;;  %v3194_v19 = vrot.slane %v3192_v22, 4  ;;  %v14053_v15 = vsel %vm4325_vm12, %v11285_v2, %v13998_v56  ;;  %v14063_v56 = vpop.permute.xlu0 %3893  ;;  %v3259_v2 = vld [vmem:[#allocation2 + $0x74] sm:$0x3] }
 0x19e   : > { %v2874_v28 = vsel %vm13513_vm11, %v2869_v55, %v2873_v1  ;;  %v3186_v52 = vsel %vm13353_vm6, %v11274_v44, %v3185_v59  ;;  %v3187_v32 = vrot.slane %v3185_v59, 4  ;;  %v3431_v47 = vshrl.u32 %v3084_v37, 16 }
 0x19f   : > { %v2879_v50 = vrot.slane %v2878_v6, 4  ;;  %v3196_v48 = vsel %vm13353_vm6, %v3194_v19, %v3195_v39  ;;  %v3434_v61 = vshll.u32 %v3084_v37, 16  ;;  %v3439_v36 = vrot.slane %v2875_v60, 5  ;;  %v657_v6 = vld [vmem:[#allocation2 + $0x24] sm:$0xf] }
 0x1a0   : > { %v11403_v10 = vcombine.low %v3193_v35, %v3196_v48  ;;  %v3189_v34 = vsel %vm13353_vm6, %v3187_v32, %v3188_v54  ;;  %v3440_v30 = vrot.slane %v2871_v13, 6  ;;  %v3433_v1 = vrot.slane %v3431_v47, 5 }
 0x1a1   : > { %v2884_v44 = vsel %vm13513_vm11, %v2879_v50, %v2883_v38  ;;  %v11402_v53 = vcombine.low %v3186_v52, %v3189_v34  ;;  %v3436_v4 = vrot.slane %v3434_v61, 6  ;;  %v3445_v55 = vshrl.u32 %v3260_v5, 16  ;;  %v14075_v61 = vpop.permute.xlu1 %3815 }
 0x1a2   : > { %v11387_v24 = vcombine.low %v2874_v28, %v2884_v44  ;;  %v3441_v22 = vor.u32 %v3440_v30, %v3439_v36  ;;  %v3448_v37 = vshll.u32 %v3260_v5, 16  ;;  %v3408_v13 = vshrl.u32 %v14021_v7, 16 }
 0x1a3   : > { %4225 = vrot.lane.b32.xlu0 %v11402_v53, %s13047_s15  ;;  %v3437_v39 = vor.u32 %v3436_v4, %v3433_v1  ;;  %v3411_v60 = vshll.u32 %v14021_v7, 16  ;;  %v3416_v59 = vrot.slane %v2851_v8, 5  ;;  %v3447_v35 = vrot.slane %v3445_v55, 5  ;;  %v14077_v8 = vpop.permute.xlu0 %4053 }
 0x1a4   : > { %4147 = vrot.lane.b32.xlu1 %v11387_v24, %s13050_s17  ;;  %v3443_v38 = vrot.slane %v3441_v22, 4  ;;  %v3450_v19 = vrot.slane %v3448_v37, 6  ;;  %v3417_v54 = vrot.slane %v2847_v14, 6  ;;  %v3410_v52 = vrot.slane %v3408_v13, 5  ;;  %v680_v24 = vld [vmem:[#allocation2 + $0x80] sm:$0x1] }
 0x1a5   : > { %v3438_v28 = vrot.slane %v3437_v39, 4  ;;  %v3413_v32 = vrot.slane %v3411_v60, 6  ;;  %v3422_v50 = vshrl.u32 %v3259_v2, 16  ;;  %v3425_v47 = vshll.u32 %v3259_v2, 16  ;;  %v14088_v39 = vld [vmem:[#allocation2 + $0x78] sm:$0xe] }
 0x1a6   : > { %v3451_v48 = vor.u32 %v3450_v19, %v3447_v35  ;;  %v3418_v5 = vor.u32 %v3417_v54, %v3416_v59  ;;  %v751_v7 = vshrl.u32 %v657_v6, 16  ;;  %v754_v44 = vshll.u32 %v657_v6, 16  ;;  %v660_v13 = vld [vmem:[#allocation2 + $0x30] sm:$0xf]  ;;  %v12766_v59 = vld [vmem:[#allocation2 + $0x2c] sm:$0x1] }
 0x1a7   : > { %v3442_v34 = vsel %vm13360_vm7, %v3438_v28, %v3441_v22  ;;  %v3414_v36 = vor.u32 %v3413_v32, %v3410_v52  ;;  %v3424_v30 = vrot.slane %v3422_v50, 5  ;;  %v3427_v1 = vrot.slane %v3425_v47, 6  ;;  %v14093_v35 = vld [vmem:[#allocation2 + $0x6c] sm:$0xe]  ;;  %v14098_v52 = vld [vmem:[#allocation2 + $0x70] sm:$0xf]  ;;  %v14104_v47 = vpop.permute.xlu1 %3895 }
 0x1a8   : > { %4227 = vrot.lane.b32.xlu1 %v11403_v10, %s13047_s15  ;;  %v3452_v14 = vsel %vm13360_vm7, %v3443_v38, %v3451_v48  ;;  %v3420_v53 = vrot.slane %v3418_v5, 4  ;;  %v753_v4 = vrot.slane %v751_v7, 4  ;;  %v756_v2 = vrot.slane %v754_v44, 5  ;;  %v677_v32 = vld [vmem:[#allocation2 + $0x74] sm:$0x1]  ;;  %v14106_v7 = vpop.permute.xlu0 %4133 }
 0x1a9   : > { %v11419_v55 = vcombine.low %v3442_v34, %v3452_v14  ;;  %v3415_v37 = vrot.slane %v3414_v36, 4  ;;  %v762_v22 = vrot.slane %v760_v41, 5  ;;  %v3428_v60 = vor.u32 %v3427_v1, %v3424_v30 }
 0x1aa   : > { %v766_v10 = vrot.slane %v764_v43, 4  ;;  %v770_v6 = vshll.u32 %v12766_v59, 16  ;;  %v11245_v38 = vrot.slane %v14088_v39, 9  ;;  %v757_v54 = vor.u32 %v756_v2, %v753_v4 }
 0x1ab   : > { %v3419_v19 = vsel %vm13360_vm7, %v3415_v37, %v3418_v5  ;;  %v1218_v28 = vrot.slane %v14081_v51, 5  ;;  %v1221_v41 = vrot.slane %v680_v24, 5  ;;  %v3429_v26 = vsel %vm13360_vm7, %v3420_v53, %v3428_v60 }
 0x1ac   : > { %4307 = vrot.lane.b32.xlu1 %v11419_v55, %s13051_s20  ;;  %v767_v43 = vor.u32 %v766_v10, %v762_v22  ;;  %v772_v50 = vrot.slane %v770_v6, 5  ;;  %v11244_v48 = vrot.slane %v14093_v35, 9  ;;  %v11418_v5 = vcombine.low %v3419_v19, %v3429_v26 }
 0x1ad   : > { %v758_v34 = vrot.slane %v757_v54, 4  ;;  %v1219_v36 = vsel %vm13353_vm6, %v11245_v38, %v1218_v28  ;;  %v1220_v30 = vrot.slane %v1218_v28, 4  ;;  %v1211_v14 = vrot.slane %v14098_v52, 5  ;;  %v14127_v28 = vpop.permute.xlu1 %4055 }
 0x1ae   : > { %v768_v44 = vrot.slane %v767_v43, 4  ;;  %v1214_v1 = vrot.slane %v677_v32, 5  ;;  %v775_v4 = vshrl.u32 %v660_v13, 16  ;;  %4305 = vrot.lane.b32.xlu0 %v11418_v5, %s13051_s20  ;;  %v778_v55 = vshll.u32 %v660_v13, 16  ;;  %v1274_v43 = vld [vmem:[#allocation2 + $0x80] sm:$0x3] }
 0x1af   : > { %v763_v53 = vsel %vm13513_vm11, %v758_v34, %v762_v22  ;;  %v1222_v24 = vsel %vm13353_vm6, %v1220_v30, %v1221_v41  ;;  %v786_v37 = vrot.slane %v784_v25, 5  ;;  %v1212_v10 = vsel %vm13353_vm6, %v11244_v48, %v1211_v14  ;;  %v12767_v25 = vld [vmem:[#allocation2 + $0x38] sm:$0x1]  ;;  %v14129_v41 = vpop.permute.xlu0 %4293 }
 0x1b0   : > { %v773_v2 = vsel %vm13513_vm11, %v768_v44, %v772_v50  ;;  %v11309_v60 = vcombine.low %v1219_v36, %v1222_v24  ;;  %v1213_v59 = vrot.slane %v1211_v14, 4  ;;  %v777_v38 = vrot.slane %v775_v4, 4 }
 0x1b1   : > { %v11286_v6 = vcombine.low %v763_v53, %v773_v2  ;;  %v780_v19 = vrot.slane %v778_v55, 5  ;;  %v790_v22 = vrot.slane %v788_v63, 4  ;;  %v794_v54 = vshll.u32 %v12767_v25, 16 }
 0x1b2   : > { %3751 = vrot.lane.b32.xlu1 %v11309_v60, %s13044_s30  ;;  %v1215_v13 = vsel %vm13353_vm6, %v1213_v59, %v1214_v1  ;;  %vm4374_vm13 = vcmask 130048   ;;  %vm4407_vm14 = vcmask 195584   ;;  %v17829_v5 = vshll.u32 %v14081_v51, 16 }
 0x1b3   : > { %v14133_v32 = vsel %vm4325_vm12, %v11286_v6, %v14038_v16  ;;  %v11308_v26 = vcombine.low %v1212_v10, %v1215_v13  ;;  %v781_v57 = vor.u32 %v780_v19, %v777_v38  ;;  %v791_v63 = vor.u32 %v790_v22, %v786_v37  ;;  %v14155_v59 = vpop.permute.xlu0 %4295  ;;  %v1273_v22 = vld [vmem:[#allocation2 + $0x74] sm:$0x3] }
 0x1b4   : > { %v796_v50 = vrot.slane %v794_v54, 5  ;;  %v4376_v48 = vsel %vm4374_vm13, %v14030_v45, %v13976_v29  ;;  %v17824_v34 = vshrl.u32 %v14081_v51, 16  ;;  %v1492_v44 = vshrl.u32 %v14088_v39, 16 }
 0x1b5   : > { %3749 = vrot.lane.b32.xlu0 %v11308_v26, %s13044_s30  ;;  %v782_v36 = vrot.slane %v781_v57, 4  ;;  %v792_v30 = vrot.slane %v791_v63, 4  ;;  %v4409_v16 = vsel %vm4407_vm14, %v4376_v48, %v14063_v56  ;;  %v1495_v14 = vshll.u32 %v14088_v39, 16  ;;  %v14153_v39 = vpop.permute.xlu1 %4135 }
 0x1b6   : > { %v1500_v1 = vrot.slane %v17824_v34, 5  ;;  %v1501_v29 = vrot.slane %v17829_v5, 6  ;;  %v1506_v45 = vshrl.u32 %v1274_v43, 16  ;;  %v1494_v24 = vrot.slane %v1492_v44, 5 }
 0x1b7   : > { %v787_v4 = vsel %vm13513_vm11, %v782_v36, %v786_v37  ;;  %v797_v53 = vsel %vm13513_vm11, %v792_v30, %v796_v50  ;;  %v1509_v55 = vshll.u32 %v1274_v43, 16  ;;  %v1497_v2 = vrot.slane %v1495_v14, 6 }
 0x1b8   : > { %v11287_v56 = vcombine.low %v787_v4, %v797_v53  ;;  %v1502_v60 = vor.u32 %v1501_v29, %v1500_v1  ;;  %v1508_v10 = vrot.slane %v1506_v45, 5  ;;  %v17823_v38 = vshll.u32 %v14098_v52, 16  ;;  %v419_v1 = vld [vmem:[%s13326_s12 + $0x48] sm:$0xf]  ;;  %v420_v29 = vld [vmem:[%s13326_s12 + $0x4c] sm:$0xf] }
 0x1b9   : > { %v1511_v6 = vrot.slane %v1509_v55, 6  ;;  %v17822_v19 = vshrl.u32 %v14098_v52, 16  ;;  %v1469_v37 = vshrl.u32 %v14093_v35, 16  ;;  %v1498_v25 = vor.u32 %v1497_v2, %v1494_v24  ;;  %v1676_v55 = vld [vmem:[#allocation2 + $0x78] sm:$0xf]  ;;  %v14180_v2 = vpop.permute.xlu1 %3819 }
 0x1ba   : > { %v14162_v13 = vsel %vm4325_vm12, %v11287_v56, %v14061_v58  ;;  %v1504_v54 = vrot.slane %v1502_v60, 4  ;;  %v1472_v26 = vshll.u32 %v14093_v35, 16  ;;  %v1478_v50 = vrot.slane %v17823_v38, 6  ;;  %v14178_v56 = vld [vmem:[#allocation2 + $0x7c] sm:$0xf] }
 0x1bb   : > { %v1512_v57 = vor.u32 %v1511_v6, %v1508_v10  ;;  %v1471_v63 = vrot.slane %v1469_v37, 5  ;;  %v1477_v43 = vrot.slane %v17822_v19, 5  ;;  %v1499_v48 = vrot.slane %v1498_v25, 4  ;;  %v14182_v10 = vpop.permute.xlu0 %3817 }
 0x1bc   : > { %v1474_v36 = vrot.slane %v1472_v26, 6  ;;  %v1483_v30 = vshrl.u32 %v1273_v22, 16  ;;  %v1486_v44 = vshll.u32 %v1273_v22, 16  ;;  %v4378_v35 = vsel %vm4374_vm13, %v14053_v15, %v14075_v61  ;;  %v1678_v26 = vld [vmem:[#allocation2 + $0x80] sm:$0x1] }
 0x1bd   : > { %v1513_v58 = vsel %vm13360_vm7, %v1504_v54, %v1512_v57  ;;  %v1479_v14 = vor.u32 %v1478_v50, %v1477_v43  ;;  %vm4440_vm15 = vcmask 261120   ;;  %v1503_v45 = vsel %vm13360_vm7, %v1499_v48, %v1502_v60 }
 0x1be   : > { %v1475_v4 = vor.u32 %v1474_v36, %v1471_v63  ;;  %v1485_v53 = vrot.slane %v1483_v30, 5  ;;  %v1488_v24 = vrot.slane %v1486_v44, 6  ;;  %v11325_v6 = vcombine.low %v1503_v45, %v1513_v58  ;;  %v14201_v45 = vld [vmem:[#allocation2 + $0x78] sm:$0xe] }
 0x1bf   : > { %v1481_v22 = vrot.slane %v1479_v14, 4  ;;  %vm4473_vm0 = vcmask 326656   ;;  %v4442_v15 = vsel %vm4440_vm15, %v4409_v16, %v14025_v12  ;;  %v513_v25 = vrot.slane %v419_v1, 7 }
 0x1c0   : > { %v1476_v61 = vrot.slane %v1475_v4, 4  ;;  %v1489_v37 = vor.u32 %v1488_v24, %v1485_v53  ;;  %v4475_v60 = vsel %vm4473_vm0, %v4442_v15, %v14077_v8  ;;  %3831 = vrot.lane.b32.xlu1 %v11325_v6, %s13045_s9  ;;  %v515_v54 = vrot.slane %v420_v29, 7  ;;  %v14203_v4 = vpop.permute.xlu1 %3899  ;;  %v14205_v53 = vpop.permute.xlu0 %3897 }
 0x1c1   : > { %v1893_v57 = vshrl.u32 %v1676_v55, 16  ;;  %v1896_v63 = vshll.u32 %v1676_v55, 16  ;;  %v1902_v43 = vshll.u32 %v14178_v56, 16  ;;  %v514_v16 = vrot.slane %v513_v25, 4  ;;  %623 = vst [vmem:[#allocation2 + $0x84] sm:$0xe] %v513_v25 }
 0x1c2   : > { %v1480_v50 = vsel %vm13360_vm7, %v1476_v61, %v1479_v14  ;;  %v1490_v12 = vsel %vm13360_vm7, %v1481_v22, %v1489_v37  ;;  %v1906_v48 = vshrl.u32 %v14178_v56, 16  ;;  %v517_v36 = vrot.slane %v515_v54, 4 }
 0x1c3   : > { %v11324_v8 = vcombine.low %v1480_v50, %v1490_v12  ;;  %v1895_v30 = vrot.slane %v1893_v57, 4  ;;  %v1898_v44 = vrot.slane %v1896_v63, 5  ;;  %v516_v58 = vsel %vm13368_vm8, %v514_v16, %v515_v54 }
 0x1c4   : > { %v1904_v1 = vrot.slane %v1902_v43, 5  ;;  %v1908_v14 = vrot.slane %v1906_v48, 4  ;;  %v1912_v29 = vshll.u32 %v1678_v26, 16  ;;  %624 = vst [vmem:[#allocation2 + $0x88] sm:$0xf] %v516_v58  ;;  %v4411_v55 = vsel %vm4407_vm14, %v4378_v35, %v14104_v47 }
 0x1c5   : > { %3829 = vrot.lane.b32.xlu0 %v11324_v8, %s13045_s9  ;;  %625 = vst [vmem:[#allocation2 + $0x8c] sm:$0x1] %v517_v36  ;;  %v1899_v24 = vor.u32 %v1898_v44, %v1895_v30  ;;  %vm4506_vm1 = vcmask 392192   ;;  %v11260_v6 = vrot.slane %v14201_v45, 9  ;;  %v2206_v37 = vrot.slane %v14178_v56, 5 }
 0x1c6   : > { %v1909_v22 = vor.u32 %v1908_v14, %v1904_v1  ;;  %v1914_v15 = vrot.slane %v1912_v29, 5  ;;  %v14213_v61 = vsel %vm4506_vm1, %v4475_v60, %v14106_v7  ;;  %v2209_v54 = vrot.slane %v1678_v26, 5  ;;  %v14236_v14 = vpop.permute.xlu0 %3977 }
 0x1c7   : > { %v1900_v25 = vrot.slane %v1899_v24, 4  ;;  %v4444_v57 = vsel %vm4440_vm15, %v4411_v55, %v13996_v18  ;;  %v2461_v63 = vshrl.u32 %v14201_v45, 16  ;;  %v2207_v47 = vsel %vm13353_vm6, %v11260_v6, %v2206_v37 }
 0x1c8   : > { %v1910_v50 = vrot.slane %v1909_v22, 4  ;;  %v2208_v35 = vrot.slane %v2206_v37, 4  ;;  %v4477_v12 = vsel %vm4473_vm0, %v4444_v57, %v14127_v28  ;;  %v1679_v16 = vld [vmem:[#allocation2 + $0x84] sm:$0xf]  ;;  %v2464_v26 = vshll.u32 %v14201_v45, 16  ;;  %v14234_v28 = vpop.permute.xlu1 %3979 }
 0x1c9   : > { %v1905_v7 = vsel %vm13513_vm11, %v1900_v25, %v1904_v1  ;;  %v2093_v60 = vld [vmem:[#allocation2 + $0x84] sm:$0xe]  ;;  %v14225_v8 = vrot.slane %v2461_v63, 5  ;;  %v14230_v18 = vsel %vm4506_vm1, %v4477_v12, %v14153_v39  ;;  %v1917_v36 = vshrl.u32 %v1679_v16, 16 }
 0x1ca   : > { %v1920_v30 = vshll.u32 %v1679_v16, 16  ;;  %v1915_v44 = vsel %vm13513_vm11, %v1910_v50, %v1914_v15  ;;  %v11261_v58 = vrot.slane %v2093_v60, 9  ;;  %v2210_v29 = vsel %vm13353_vm6, %v2208_v35, %v2209_v54  ;;  %v14250_v38 = vpop.permute.xlu0 %4057 }
 0x1cb   : > { %v11340_v1 = vcombine.low %v1905_v7, %v1915_v44  ;;  %v2484_v24 = vshrl.u32 %v2093_v60, 16  ;;  %v2487_v45 = vshll.u32 %v2093_v60, 16  ;;  %v1680_v55 = vld [vmem:[#allocation2 + $0x88] sm:$0xf]  ;;  %v1919_v39 = vrot.slane %v1917_v36, 4 }
 0x1cc   : > { %v1681_v6 = vld [vmem:[#allocation2 + $0x8c] sm:$0x1]  ;;  %v1922_v22 = vrot.slane %v1920_v30, 5  ;;  %v11356_v37 = vcombine.low %v2207_v47, %v2210_v29  ;;  %v14243_v15 = vsel %vm4374_vm13, %v14162_v13, %v14180_v2  ;;  %v1926_v25 = vshll.u32 %v1680_v55, 16  ;;  %v14248_v19 = vpop.permute.xlu1 %4059 }
 0x1cd   : > { %v1930_v57 = vshrl.u32 %v1680_v55, 16  ;;  %v1936_v63 = vshll.u32 %v1681_v6, 16  ;;  %3909 = vrot.lane.b32.xlu0 %v11340_v1, %s13048_s14  ;;  %v2213_v50 = vrot.slane %v1680_v55, 5  ;;  %v2216_v54 = vrot.slane %v1681_v6, 5  ;;  %v2269_v35 = vld [vmem:[#allocation2 + $0x8c] sm:$0x3] }
 0x1ce   : > { %v1923_v12 = vor.u32 %v1922_v22, %v1919_v39  ;;  %v2486_v16 = vrot.slane %v2484_v24, 5  ;;  %v2489_v7 = vrot.slane %v2487_v45, 6  ;;  %v1928_v60 = vrot.slane %v1926_v25, 5  ;;  %v2268_v22 = vld [vmem:[#allocation2 + $0x80] sm:$0x3] }
 0x1cf   : > { %v1932_v36 = vrot.slane %v1930_v57, 4  ;;  %v1938_v30 = vrot.slane %v1936_v63, 5  ;;  %v2214_v47 = vsel %vm13353_vm6, %v11261_v58, %v2213_v50  ;;  %v2215_v13 = vrot.slane %v2213_v50, 4 }
 0x1d0   : > { %v1924_v44 = vrot.slane %v1923_v12, 4  ;;  %v2490_v2 = vor.u32 %v2489_v7, %v2486_v16  ;;  %v2492_v29 = vrot.slane %v1930_v57, 5  ;;  %v2493_v55 = vrot.slane %v1926_v25, 6 }
 0x1d1   : > { %v1933_v1 = vor.u32 %v1932_v36, %v1928_v60  ;;  %3989 = vrot.lane.b32.xlu0 %v11356_v37, %s13046_s13  ;;  %v2498_v24 = vshrl.u32 %v2269_v35, 16  ;;  %v2501_v45 = vshll.u32 %v2269_v35, 16  ;;  %v2217_v58 = vsel %vm13353_vm6, %v2215_v13, %v2216_v54 }
 0x1d2   : > { %v1929_v6 = vsel %vm13513_vm11, %v1924_v44, %v1928_v60  ;;  %v2491_v39 = vrot.slane %v2490_v2, 4  ;;  %v2466_v63 = vrot.slane %v2464_v26, 6  ;;  %v11357_v50 = vcombine.low %v2214_v47, %v2217_v58  ;;  %v2670_v58 = vld [vmem:[#allocation2 + $0x88] sm:$0xf] }
 0x1d3   : > { %v1934_v57 = vrot.slane %v1933_v1, 4  ;;  %v2494_v12 = vor.u32 %v2493_v55, %v2492_v29  ;;  %v2500_v16 = vrot.slane %v2498_v24, 5  ;;  %v2503_v7 = vrot.slane %v2501_v45, 6  ;;  %v421_v29 = vld [vmem:[%s13326_s12 + $0x50] sm:$0xf]  ;;  %v14268_v1 = vpop.permute.xlu1 %4139 }
 0x1d4   : > { %v2467_v37 = vor.u32 %v2466_v63, %v14225_v8  ;;  %v2469_v25 = vrot.slane %v1906_v48, 5  ;;  %v2470_v35 = vrot.slane %v1902_v43, 6  ;;  %v2475_v36 = vshrl.u32 %v2268_v22, 16  ;;  %v422_v8 = vld [vmem:[%s13326_s12 + $0x54] sm:$0xf]  ;;  %v14270_v48 = vpop.permute.xlu0 %4137 }
 0x1d5   : > { %v1939_v54 = vsel %vm13513_vm11, %v1934_v57, %v1938_v30  ;;  %v2495_v26 = vsel %vm13360_vm7, %v2491_v39, %v2494_v12  ;;  %v2496_v60 = vrot.slane %v2494_v12, 4  ;;  %v2504_v44 = vor.u32 %v2503_v7, %v2500_v16  ;;  %v2669_v30 = vld [vmem:[#allocation2 + $0x84] sm:$0xf]  ;;  %v2671_v7 = vld [vmem:[#allocation2 + $0x8c] sm:$0x1] }
 0x1d6   : > { %v11341_v47 = vcombine.low %v1929_v6, %v1939_v54  ;;  %v2468_v13 = vrot.slane %v2467_v37, 4  ;;  %v2471_v2 = vor.u32 %v2470_v35, %v2469_v25  ;;  %v2477_v56 = vrot.slane %v2475_v36, 5 }
 0x1d7   : > { %v2478_v43 = vshll.u32 %v2268_v22, 16  ;;  %vm4539_vm2 = vcmask 457728   ;;  %vm4572_vm3 = vcmask 523264   ;;  %v2505_v55 = vsel %vm13360_vm7, %v2496_v60, %v2504_v44 }
 0x1d8   : > { %3911 = vrot.lane.b32.xlu1 %v11341_v47, %s13048_s14  ;;  %v2472_v24 = vsel %vm13360_vm7, %v2468_v13, %v2471_v2  ;;  %v2473_v45 = vrot.slane %v2471_v2, 4  ;;  %v4541_v6 = vsel %vm4539_vm2, %v14213_v61, %v14040_v17  ;;  %v11373_v39 = vcombine.low %v2495_v26, %v2505_v55 }
 0x1d9   : > { %v2480_v63 = vrot.slane %v2478_v43, 6  ;;  %v4574_v22 = vsel %vm4572_vm3, %v4541_v6, %v14129_v41  ;;  %vm4605_vm4 = vcmask 588800   ;;  %v4543_v57 = vsel %vm4539_vm2, %v14230_v18, %v14023_v62  ;;  %v14290_v62 = vpop.permute.xlu1 %4219  ;;  %v14292_v18 = vpop.permute.xlu0 %4217 }
 0x1da   : > { %12415 = vmatprep.mubr.msk.bf16.mxu0 %vm4605_vm4, %v4574_v22  ;;  %v518_v12 = vrot.slane %v421_v29, 7  ;;  %v520_v16 = vrot.slane %v422_v8, 7  ;;  %v2886_v37 = vshrl.u32 %v2669_v30, 16  ;;  %v4576_v17 = vsel %vm4572_vm3, %v4543_v57, %v14155_v59  ;;  %v14301_v8 = vld [vmem:[#allocation2 + $0x84] sm:$0xe] }
 0x1db   : > { %v2481_v25 = vor.u32 %v2480_v63, %v2477_v56  ;;  %v2889_v61 = vshll.u32 %v2669_v30, 16  ;;  %v2895_v35 = vshll.u32 %v2670_v58, 16  ;;  %v2899_v60 = vshrl.u32 %v2670_v58, 16  ;;  %12416 = vmatmul.mubr.msk.bf16.vlgmr.msra.gmra.mrb[0].mxu0 %vm4605_vm4, %v4576_v17 }
 0x1dc   : > { %3991 = vrot.lane.b32.xlu1 %v11357_v50, %s13046_s13  ;;  %v519_v41 = vrot.slane %v518_v12, 4  ;;  %v522_v54 = vrot.slane %v520_v16, 4  ;;  %626 = vst [vmem:[#allocation2 + $0x90] sm:$0xe] %v518_v12  ;;  %v2888_v26 = vrot.slane %v2886_v37, 4  ;;  %v2905_v44 = vshll.u32 %v2671_v7, 16 }
 0x1dd   : > { %v2482_v36 = vsel %vm13360_vm7, %v2473_v45, %v2481_v25  ;;  %v2891_v47 = vrot.slane %v2889_v61, 5  ;;  %v2897_v59 = vrot.slane %v2895_v35, 5  ;;  %v2901_v2 = vrot.slane %v2899_v60, 4 }
 0x1de   : > { %v11372_v13 = vcombine.low %v2472_v24, %v2482_v36  ;;  %v521_v50 = vsel %vm13368_vm8, %v519_v41, %v520_v16  ;;  %628 = vst [vmem:[#allocation2 + $0x98] sm:$0x1] %v522_v54  ;;  %v4380_v29 = vsel %vm4374_vm13, %v14133_v32, %v14182_v10  ;;  %v2907_v43 = vrot.slane %v2905_v44, 5  ;;  %v14315_v10 = vld [vmem:[#allocation2 + $0x8c] sm:$0x3] }
 0x1df   : > { %627 = vst [vmem:[#allocation2 + $0x94] sm:$0xf] %v521_v50  ;;  %v2892_v56 = vor.u32 %v2891_v47, %v2888_v26  ;;  %v11276_v30 = vrot.slane %v14301_v8, 9  ;;  %v3199_v55 = vrot.slane %v2670_v58, 5  ;;  %v2902_v24 = vor.u32 %v2901_v2, %v2897_v59 }
 0x1e0   : > { %4071 = vrot.lane.b32.xlu1 %v11373_v39, %s13049_s8  ;;  %4069 = vrot.lane.b32.xlu0 %v11372_v13, %s13049_s8  ;;  %v3202_v45 = vrot.slane %v2671_v7, 5  ;;  %v14309_v6 = vsel %vm4407_vm14, %v14243_v15, %v14203_v4  ;;  %v14313_v32 = vsel %vm4407_vm14, %v4380_v29, %v14205_v53  ;;  %v3454_v22 = vshrl.u32 %v14301_v8, 16  ;;  %v14321_v4 = vpop.permute.xlu1 %4299  ;;  %v14323_v15 = vpop.permute.xlu0 %4297 }
 0x1e1   : > { %v2893_v63 = vrot.slane %v2892_v56, 4  ;;  %v3200_v58 = vsel %vm13353_vm6, %v11276_v30, %v3199_v55  ;;  %v3201_v39 = vrot.slane %v3199_v55, 4  ;;  %v2903_v57 = vrot.slane %v2902_v24, 4 }
 0x1e2   : > { %v3457_v12 = vshll.u32 %v14301_v8, 16  ;;  %v3462_v16 = vrot.slane %v2899_v60, 5  ;;  %v3463_v7 = vrot.slane %v2895_v35, 6  ;;  %v14329_v61 = vrot.slane %v3454_v22, 5 }
 0x1e3   : > { %v2672_v53 = vld [vmem:[#allocation2 + $0x90] sm:$0xf]  ;;  %v2898_v37 = vsel %vm13513_vm11, %v2893_v63, %v2897_v59  ;;  %v3203_v17 = vsel %vm13353_vm6, %v3201_v39, %v3202_v45  ;;  %v3468_v41 = vshrl.u32 %v14315_v10, 16  ;;  %v2908_v35 = vsel %vm13513_vm11, %v2903_v57, %v2907_v43 }
 0x1e4   : > { %v3086_v25 = vld [vmem:[#allocation2 + $0x90] sm:$0xe]  ;;  %v2910_v54 = vshrl.u32 %v2672_v53, 16  ;;  %v2913_v26 = vshll.u32 %v2672_v53, 16  ;;  %v11388_v47 = vcombine.low %v2898_v37, %v2908_v35  ;;  %v11404_v44 = vcombine.low %v3200_v58, %v3203_v17  ;;  %v14335_v53 = vpop.permute.xlu1 %3743  ;;  %v14337_v58 = vpop.permute.xlu0 %3741 }
 0x1e5   : > { %v11277_v60 = vrot.slane %v3086_v25, 9  ;;  %v2674_v36 = vld [vmem:[#allocation2 + $0x98] sm:$0x1]  ;;  %v3477_v50 = vshrl.u32 %v3086_v25, 16  ;;  %v3480_v59 = vshll.u32 %v3086_v25, 16  ;;  %vm5560_vm5 = vcmask 1041408  }
 0x1e6   : > { %v3262_v13 = vld [vmem:[#allocation2 + $0x98] sm:$0x3]  ;;  %v2673_v2 = vld [vmem:[#allocation2 + $0x94] sm:$0xf]  ;;  %v2912_v29 = vrot.slane %v2910_v54, 4  ;;  %v2915_v8 = vrot.slane %v2913_v26, 5  ;;  %4149 = vrot.lane.b32.xlu0 %v11388_v47, %s13050_s17 }
 0x1e7   : > { %v2929_v56 = vshll.u32 %v2674_v36, 16  ;;  %v3209_v30 = vrot.slane %v2674_v36, 5  ;;  %v2919_v55 = vshll.u32 %v2673_v2, 16  ;;  %v2923_v24 = vshrl.u32 %v2673_v2, 16 }
 0x1e8   : > { %v3206_v45 = vrot.slane %v2673_v2, 5  ;;  %v3479_v63 = vrot.slane %v3477_v50, 5  ;;  %v2916_v39 = vor.u32 %v2915_v8, %v2912_v29  ;;  %v3482_v22 = vrot.slane %v3480_v59, 6 }
 0x1e9   : > { %v2931_v43 = vrot.slane %v2929_v56, 5  ;;  %v3491_v57 = vshrl.u32 %v3262_v13, 16  ;;  %v2921_v37 = vrot.slane %v2919_v55, 5  ;;  %v2925_v25 = vrot.slane %v2923_v24, 4 }
 0x1ea   : > { %v14341_v17 = vsel %vm13353_vm6, %v11277_v60, %v3206_v45  ;;  %v3208_v54 = vrot.slane %v3206_v45, 4  ;;  %v2917_v26 = vrot.slane %v2916_v39, 4  ;;  %v3483_v35 = vor.u32 %v3482_v22, %v3479_v63  ;;  %4229 = vrot.lane.b32.xlu0 %v11404_v44, %s13047_s15 }
 0x1eb   : > { %v3485_v36 = vrot.slane %v2923_v24, 5  ;;  %v3486_v47 = vrot.slane %v2919_v55, 6  ;;  %v2926_v50 = vor.u32 %v2925_v25, %v2921_v37  ;;  %v3493_v2 = vrot.slane %v3491_v57, 5  ;;  %v14352_v57 = vld [vmem:[#allocation2 + $0x94] sm:$0xf] }
 0x1ec   : > { %v3210_v59 = vsel %vm13353_vm6, %v3208_v54, %v3209_v30  ;;  %v3494_v29 = vshll.u32 %v3262_v13, 16  ;;  %v2922_v8 = vsel %vm13513_vm11, %v2917_v26, %v2921_v37  ;;  %v3484_v60 = vrot.slane %v3483_v35, 4  ;;  %v14354_v13 = vpop.permute.xlu1 %3823  ;;  %v14356_v37 = vpop.permute.xlu0 %3821  ;;  %v14361_v54 = vld [vmem:[#allocation2 + $0x84] sm:$0xe]  ;;  %v1097_v35 = vld [vmem:[#allocation2 + $0x90] sm:$0xe] }
 0x1ed   : > { %v11405_v56 = vcombine.low %v14341_v17, %v3210_v59  ;;  %v3487_v34 = vor.u32 %v3486_v47, %v3485_v36  ;;  %v2927_v45 = vrot.slane %v2926_v50, 4  ;;  %v3459_v63 = vrot.slane %v3457_v12, 6  ;;  %v14369_v36 = vld [vmem:[#allocation2 + $0x88] sm:$0xf]  ;;  %v683_v59 = vld [vmem:[#allocation2 + $0x8c] sm:$0x1] }
 0x1ee   : > { %v3496_v39 = vrot.slane %v3494_v29, 6  ;;  %v3464_v24 = vor.u32 %v3463_v7, %v3462_v16  ;;  %v3470_v30 = vrot.slane %v3468_v41, 5  ;;  %v3471_v44 = vshll.u32 %v14315_v10, 16  ;;  %v686_v7 = vld [vmem:[#allocation2 + $0x98] sm:$0x1] }
 0x1ef   : > { %v3488_v55 = vsel %vm13360_vm7, %v3484_v60, %v3487_v34  ;;  %v3489_v22 = vrot.slane %v3487_v34, 4  ;;  %v2932_v25 = vsel %vm13513_vm11, %v2927_v45, %v2931_v43  ;;  %v3460_v12 = vor.u32 %v3459_v63, %v14329_v61 }
 0x1f0   : > { %v3497_v17 = vor.u32 %v3496_v39, %v3493_v2  ;;  %v3466_v16 = vrot.slane %v3464_v24, 4  ;;  %v11389_v34 = vcombine.low %v2922_v8, %v2932_v25  ;;  %v3473_v41 = vrot.slane %v3471_v44, 6 }
 0x1f1   : > { %v4448_v10 = vsel %vm4440_vm15, %v14309_v6, %v14234_v28  ;;  %v4446_v26 = vsel %vm4440_vm15, %v14313_v32, %v14236_v14  ;;  %v3461_v43 = vrot.slane %v3460_v12, 4  ;;  %v11247_v47 = vrot.slane %v1097_v35, 9 }
 0x1f2   : > { %v3498_v61 = vsel %vm13360_vm7, %v3489_v22, %v3497_v17  ;;  %v1232_v50 = vrot.slane %v14352_v57, 5  ;;  %4151 = vrot.lane.b32.xlu1 %v11389_v34, %s13050_s17  ;;  %v3474_v29 = vor.u32 %v3473_v41, %v3470_v30  ;;  %v1235_v28 = vrot.slane %v686_v7, 5  ;;  %v1276_v22 = vld [vmem:[#allocation2 + $0x98] sm:$0x3]  ;;  %v14387_v30 = vpop.permute.xlu1 %3903 }
 0x1f3   : > { %v11421_v2 = vcombine.low %v3488_v55, %v3498_v61  ;;  %v11246_v6 = vrot.slane %v14361_v54, 9  ;;  %v3465_v14 = vsel %vm13360_vm7, %v3461_v43, %v3464_v24  ;;  %v1225_v60 = vrot.slane %v14369_v36, 5  ;;  %v14389_v24 = vpop.permute.xlu0 %3901 }
 0x1f4   : > { %v1233_v32 = vsel %vm13353_vm6, %v11247_v47, %v1232_v50  ;;  %v1234_v8 = vrot.slane %v1232_v50, 4  ;;  %v3475_v45 = vsel %vm13360_vm7, %v3466_v16, %v3474_v29  ;;  %v1228_v39 = vrot.slane %v683_v59, 5  ;;  %v1275_v50 = vld [vmem:[#allocation2 + $0x8c] sm:$0x3] }
 0x1f5   : > { %v4481_v63 = vsel %vm4473_vm0, %v4448_v10, %v14248_v19  ;;  %v4479_v55 = vsel %vm4473_vm0, %v4446_v26, %v14250_v38  ;;  %v11420_v44 = vcombine.low %v3465_v14, %v3475_v45  ;;  %v1226_v17 = vsel %vm13353_vm6, %v11246_v6, %v1225_v60 }
 0x1f6   : > { %v1236_v25 = vsel %vm13353_vm6, %v1234_v8, %v1235_v28  ;;  %v1227_v12 = vrot.slane %v1225_v60, 4  ;;  %4231 = vrot.lane.b32.xlu1 %v11405_v56, %s13047_s15  ;;  %v17828_v19 = vshll.u32 %v14352_v57, 16  ;;  %v17827_v38 = vshrl.u32 %v14352_v57, 16  ;;  %v14410_v60 = vpop.permute.xlu1 %3983 }
 0x1f7   : > { %v11311_v16 = vcombine.low %v1233_v32, %v1236_v25  ;;  %v1538_v7 = vshrl.u32 %v1097_v35, 16  ;;  %4309 = vrot.lane.b32.xlu0 %v11420_v44, %s13051_s20  ;;  %v1541_v41 = vshll.u32 %v1097_v35, 16  ;;  %v1552_v10 = vshrl.u32 %v1276_v22, 16  ;;  %v14412_v45 = vpop.permute.xlu0 %3981  ;;  %v423_v25 = vld [vmem:[%s13326_s12 + $0x58] sm:$0xf] }
 0x1f8   : > { %v1229_v34 = vsel %vm13353_vm6, %v1227_v12, %v1228_v39  ;;  %v1555_v26 = vshll.u32 %v1276_v22, 16  ;;  %v1546_v47 = vrot.slane %v17827_v38, 5  ;;  %v1547_v56 = vrot.slane %v17828_v19, 6 }
 0x1f9   : > { %v11310_v61 = vcombine.low %v1226_v17, %v1229_v34  ;;  %v1540_v43 = vrot.slane %v1538_v7, 5  ;;  %v1543_v59 = vrot.slane %v1541_v41, 6  ;;  %v1554_v29 = vrot.slane %v1552_v10, 5 }
 0x1fa   : > { %v1557_v28 = vrot.slane %v1555_v26, 6  ;;  %v17826_v6 = vshll.u32 %v14369_v36, 16  ;;  %4311 = vrot.lane.b32.xlu1 %v11421_v2, %s13051_s20  ;;  %v1548_v35 = vor.u32 %v1547_v56, %v1546_v47  ;;  %v17825_v14 = vshrl.u32 %v14369_v36, 16 }
 0x1fb   : > { %v1515_v32 = vshrl.u32 %v14361_v54, 16  ;;  %v1518_v8 = vshll.u32 %v14361_v54, 16  ;;  %3753 = vrot.lane.b32.xlu0 %v11310_v61, %s13044_s30  ;;  %v1544_v39 = vor.u32 %v1543_v59, %v1540_v43  ;;  %v1529_v2 = vshrl.u32 %v1275_v50, 16  ;;  %v424_v54 = vld [vmem:[%s13326_s12 + $0x5c] sm:$0xf] }
 0x1fc   : > { %v1558_v22 = vor.u32 %v1557_v28, %v1554_v29  ;;  %v1524_v44 = vrot.slane %v17826_v6, 6  ;;  %v1550_v17 = vrot.slane %v1548_v35, 4  ;;  %v1523_v34 = vrot.slane %v17825_v14, 5  ;;  %v1682_v43 = vld [vmem:[#allocation2 + $0x90] sm:$0xf]  ;;  %v14432_v6 = vpop.permute.xlu1 %4063 }
 0x1fd   : > { %v1517_v12 = vrot.slane %v1515_v32, 5  ;;  %v1520_v7 = vrot.slane %v1518_v8, 6  ;;  %v1545_v41 = vrot.slane %v1544_v39, 4  ;;  %v1531_v10 = vrot.slane %v1529_v2, 5  ;;  %v14430_v39 = vld [vmem:[#allocation2 + $0x94] sm:$0xf] }
 0x1fe   : > { %v1532_v26 = vshll.u32 %v1275_v50, 16  ;;  %v4514_v61 = vsel %vm4506_vm1, %v4481_v63, %v14268_v1  ;;  %3755 = vrot.lane.b32.xlu1 %v11311_v16, %s13044_s30  ;;  %v1559_v47 = vsel %vm13360_vm7, %v1550_v17, %v1558_v22  ;;  %v1525_v59 = vor.u32 %v1524_v44, %v1523_v34  ;;  %v1684_v16 = vld [vmem:[#allocation2 + $0x98] sm:$0x1]  ;;  %v14434_v22 = vpop.permute.xlu0 %4061 }
 0x1ff   : > { %v1521_v56 = vor.u32 %v1520_v7, %v1517_v12  ;;  %v4512_v29 = vsel %vm4506_vm1, %v4479_v55, %v14270_v48  ;;  %v1549_v28 = vsel %vm13360_vm7, %v1545_v41, %v1548_v35  ;;  %v523_v8 = vrot.slane %v423_v25, 7 }
 0x200   : > { %v1534_v32 = vrot.slane %v1532_v26, 6  ;;  %v525_v50 = vrot.slane %v424_v54, 7  ;;  %v11327_v1 = vcombine.low %v1549_v28, %v1559_v47  ;;  %v1527_v2 = vrot.slane %v1525_v59, 4 }
 0x201   : > { %v1522_v63 = vrot.slane %v1521_v56, 4  ;;  %v1941_v14 = vshrl.u32 %v1682_v43, 16  ;;  %v524_v17 = vrot.slane %v523_v8, 4  ;;  %629 = vst [vmem:[#allocation2 + $0x9c] sm:$0xe] %v523_v8  ;;  %v1944_v55 = vshll.u32 %v1682_v43, 16 }
 0x202   : > { %v1535_v44 = vor.u32 %v1534_v32, %v1531_v10  ;;  %v527_v48 = vrot.slane %v525_v50, 4  ;;  %3835 = vrot.lane.b32.xlu1 %v11327_v1, %s13045_s9  ;;  %v1950_v12 = vshll.u32 %v14430_v39, 16  ;;  %v1954_v7 = vshrl.u32 %v14430_v39, 16  ;;  %v14451_v56 = vld [vmem:[#allocation2 + $0x90] sm:$0xe] }
 0x203   : > { %v1526_v35 = vsel %vm13360_vm7, %v1522_v63, %v1525_v59  ;;  %v1943_v25 = vrot.slane %v1941_v14, 4  ;;  %v526_v54 = vsel %vm13368_vm8, %v524_v17, %v525_v50  ;;  %v1946_v41 = vrot.slane %v1944_v55, 5 }
 0x204   : > { %v1536_v34 = vsel %vm13360_vm7, %v1527_v2, %v1535_v44  ;;  %631 = vst [vmem:[#allocation2 + $0xa4] sm:$0x1] %v527_v48  ;;  %v1960_v10 = vshll.u32 %v1684_v16, 16  ;;  %630 = vst [vmem:[#allocation2 + $0xa0] sm:$0xf] %v526_v54  ;;  %v1952_v43 = vrot.slane %v1950_v12, 5  ;;  %v4547_v47 = vsel %vm4539_vm2, %v4514_v61, %v14290_v62  ;;  %v14460_v44 = vpop.permute.xlu1 %4143  ;;  %v14462_v62 = vpop.permute.xlu0 %4141 }
 0x205   : > { %v11326_v26 = vcombine.low %v1526_v35, %v1536_v34  ;;  %v1956_v14 = vrot.slane %v1954_v7, 4  ;;  %v1947_v59 = vor.u32 %v1946_v41, %v1943_v25  ;;  %v4545_v32 = vsel %vm4539_vm2, %v4512_v29, %v14292_v18 }
 0x206   : > { %v1962_v28 = vrot.slane %v1960_v10, 5  ;;  %v11262_v8 = vrot.slane %v14451_v56, 9  ;;  %v2220_v1 = vrot.slane %v14430_v39, 5  ;;  %v2223_v63 = vrot.slane %v1684_v16, 5 }
 0x207   : > { %3833 = vrot.lane.b32.xlu0 %v11326_v26, %s13045_s9  ;;  %v1957_v50 = vor.u32 %v1956_v14, %v1952_v43  ;;  %v4580_v2 = vsel %vm4572_vm3, %v4547_v47, %v14321_v4  ;;  %v1948_v61 = vrot.slane %v1947_v59, 4  ;;  %v4578_v17 = vsel %vm4572_vm3, %v4545_v32, %v14323_v15 }
 0x208   : > { %v2507_v18 = vshrl.u32 %v14451_v56, 16  ;;  %v2510_v29 = vshll.u32 %v14451_v56, 16  ;;  %v1685_v48 = vld [vmem:[#allocation2 + $0x9c] sm:$0xf]  ;;  %v2221_v16 = vsel %vm13353_vm6, %v11262_v8, %v2220_v1  ;;  %v2222_v25 = vrot.slane %v2220_v1, 4  ;;  %12419 = vmatprep.mubr.msk.bf16.mxu0 %vm4605_vm4, %v4578_v17 }
 0x209   : > { %v1958_v55 = vrot.slane %v1957_v50, 4  ;;  %v2095_v35 = vld [vmem:[#allocation2 + $0x9c] sm:$0xe]  ;;  %v1965_v4 = vshrl.u32 %v1685_v48, 16  ;;  %v1968_v34 = vshll.u32 %v1685_v48, 16  ;;  %v1953_v54 = vsel %vm13513_vm11, %v1948_v61, %v1952_v43  ;;  %12420 = vmatmul.mubr.msk.bf16.gmra.mrb[4].mxu0 %vm4605_vm4, %v4580_v2  ;;  %v14478_v48 = vpop.permute.xlu1 %4223  ;;  %v14480_v2 = vpop.permute.xlu0 %4221 }
 0x20a   : > { %v11263_v41 = vrot.slane %v2095_v35, 9  ;;  %v2224_v26 = vsel %vm13353_vm6, %v2222_v25, %v2223_v63  ;;  %v2530_v14 = vshrl.u32 %v2095_v35, 16  ;;  %v2533_v47 = vshll.u32 %v2095_v35, 16 }
 0x20b   : > { %v1687_v15 = vld [vmem:[#allocation2 + $0xa4] sm:$0x1]  ;;  %v1963_v10 = vsel %vm13513_vm11, %v1958_v55, %v1962_v28  ;;  %v1686_v56 = vld [vmem:[#allocation2 + $0xa0] sm:$0xf]  ;;  %v1967_v59 = vrot.slane %v1965_v4, 4  ;;  %v1970_v32 = vrot.slane %v1968_v34, 5  ;;  %v11358_v63 = vcombine.low %v2221_v16, %v2224_v26 }
 0x20c   : > { %v1984_v8 = vshll.u32 %v1687_v15, 16  ;;  %v11342_v50 = vcombine.low %v1953_v54, %v1963_v10  ;;  %v1974_v1 = vshll.u32 %v1686_v56, 16  ;;  %v1978_v17 = vshrl.u32 %v1686_v56, 16  ;;  %v2271_v55 = vld [vmem:[#allocation2 + $0xa4] sm:$0x3] }
 0x20d   : > { %v2227_v43 = vrot.slane %v1686_v56, 5  ;;  %v2230_v61 = vrot.slane %v1687_v15, 5  ;;  %v1971_v38 = vor.u32 %v1970_v32, %v1967_v59  ;;  %v2532_v35 = vrot.slane %v2530_v14, 5  ;;  %v14527_v0 = vld [vmem:[#allocation2 + $0xa0] sm:$0xf] }
 0x20e   : > { %v1986_v28 = vrot.slane %v1984_v8, 5  ;;  %3913 = vrot.lane.b32.xlu0 %v11342_v50, %s13048_s14  ;;  %v1976_v25 = vrot.slane %v1974_v1, 5  ;;  %v1980_v4 = vrot.slane %v1978_v17, 4  ;;  %v2535_v56 = vrot.slane %v2533_v47, 6 }
 0x20f   : > { %v2228_v34 = vsel %vm13353_vm6, %v11263_v41, %v2227_v43  ;;  %v2229_v54 = vrot.slane %v2227_v43, 4  ;;  %v1972_v10 = vrot.slane %v1971_v38, 4  ;;  %v2538_v15 = vrot.slane %v1978_v17, 5  ;;  %v2270_v41 = vld [vmem:[#allocation2 + $0x98] sm:$0x3] }
 0x210   : > { %v2539_v19 = vrot.slane %v1974_v1, 6  ;;  %v1981_v5 = vor.u32 %v1980_v4, %v1976_v25  ;;  %v2544_v32 = vshrl.u32 %v2271_v55, 16  ;;  %v2547_v8 = vshll.u32 %v2271_v55, 16  ;;  %v14490_v1 = vpop.permute.xlu1 %4303  ;;  %v14492_v4 = vpop.permute.xlu0 %4301 }
 0x211   : > { %v2231_v59 = vsel %vm13353_vm6, %v2229_v54, %v2230_v61  ;;  %v1977_v16 = vsel %vm13513_vm11, %v1972_v10, %v1976_v25  ;;  %v2536_v14 = vor.u32 %v2535_v56, %v2532_v35  ;;  %v2509_v17 = vrot.slane %v2507_v18, 5 }
 0x212   : > { %v11359_v26 = vcombine.low %v2228_v34, %v2231_v59  ;;  %3993 = vrot.lane.b32.xlu0 %v11358_v63, %s13046_s13  ;;  %v2540_v50 = vor.u32 %v2539_v19, %v2538_v15  ;;  %v1982_v43 = vrot.slane %v1981_v5, 4  ;;  %v2546_v38 = vrot.slane %v2544_v32, 5  ;;  %v666_v34 = vld [vmem:[#allocation2 + $0x48] sm:$0xf] }
 0x213   : > { %v2549_v47 = vrot.slane %v2547_v8, 6  ;;  %v2537_v61 = vrot.slane %v2536_v14, 4  ;;  %v2512_v55 = vrot.slane %v2510_v29, 6  ;;  %v2515_v25 = vrot.slane %v1954_v7, 5 }
 0x214   : > { %v2542_v54 = vrot.slane %v2540_v50, 4  ;;  %v1987_v63 = vsel %vm13513_vm11, %v1982_v43, %v1986_v28  ;;  %v2516_v5 = vrot.slane %v1950_v12, 6  ;;  %v2521_v35 = vshrl.u32 %v2270_v41, 16  ;;  %v663_v12 = vld [vmem:[#allocation2 + $0x3c] sm:$0xf] }
 0x215   : > { %v2550_v19 = vor.u32 %v2549_v47, %v2546_v38  ;;  %v11343_v18 = vcombine.low %v1977_v16, %v1987_v63  ;;  %v2541_v10 = vsel %vm13360_vm7, %v2537_v61, %v2540_v50  ;;  %v2513_v56 = vor.u32 %v2512_v55, %v2509_v17  ;;  %v14509_v38 = vpop.permute.xlu1 %3747  ;;  %v14511_v47 = vpop.permute.xlu0 %3745  ;;  %v12768_v55 = vld [vmem:[#allocation2 + $0x50] sm:$0x1] }
 0x216   : > { %v2524_v15 = vshll.u32 %v2270_v41, 16  ;;  %v2517_v59 = vor.u32 %v2516_v5, %v2515_v25  ;;  %v2523_v7 = vrot.slane %v2521_v35, 5  ;;  %v823_v32 = vshrl.u32 %v666_v34, 16 }
 0x217   : > { %v2551_v29 = vsel %vm13360_vm7, %v2542_v54, %v2550_v19  ;;  %3915 = vrot.lane.b32.xlu1 %v11343_v18, %s13048_s14  ;;  %v2514_v8 = vrot.slane %v2513_v56, 4  ;;  %v826_v39 = vshll.u32 %v666_v34, 16  ;;  %v834_v50 = vrot.slane %v832_v49, 5  ;;  %v2675_v56 = vld [vmem:[#allocation2 + $0x9c] sm:$0xf] }
 0x218   : > { %v11375_v28 = vcombine.low %v2541_v10, %v2551_v29  ;;  %v2526_v14 = vrot.slane %v2524_v15, 6  ;;  %v2519_v16 = vrot.slane %v2517_v59, 4  ;;  %v825_v43 = vrot.slane %v823_v32, 4  ;;  %v426_v10 = vld [vmem:[%s13326_s12 + $0x64] sm:$0xf] }
 0x219   : > { %v838_v41 = vrot.slane %v836_v33, 4  ;;  %v2518_v17 = vsel %vm13360_vm7, %v2514_v8, %v2517_v59  ;;  %v828_v54 = vrot.slane %v826_v39, 5  ;;  %v842_v25 = vshll.u32 %v12768_v55, 16 }
 0x21a   : > { %v2527_v61 = vor.u32 %v2526_v14, %v2523_v7  ;;  %v799_v63 = vshrl.u32 %v663_v12, 16  ;;  %v802_v19 = vshll.u32 %v663_v12, 16  ;;  %v810_v49 = vrot.slane %v808_v11, 5  ;;  %v12769_v11 = vld [vmem:[#allocation2 + $0x44] sm:$0x1] }
 0x21b   : > { %v839_v34 = vor.u32 %v838_v41, %v834_v50  ;;  %3995 = vrot.lane.b32.xlu1 %v11359_v26, %s13046_s13  ;;  %v829_v5 = vor.u32 %v828_v54, %v825_v43  ;;  %v844_v35 = vrot.slane %v842_v25, 5  ;;  %v814_v18 = vrot.slane %v812_v9, 4  ;;  %v14529_v43 = vpop.permute.xlu1 %3827  ;;  %v14531_v41 = vpop.permute.xlu0 %3825  ;;  %v2677_v25 = vld [vmem:[#allocation2 + $0xa4] sm:$0x1] }
 0x21c   : > { %v2528_v33 = vsel %vm13360_vm7, %v2519_v16, %v2527_v61  ;;  %v801_v59 = vrot.slane %v799_v63, 4  ;;  %v804_v7 = vrot.slane %v802_v19, 5  ;;  %v818_v14 = vshll.u32 %v12769_v11, 16 }
 0x21d   : > { %v11374_v15 = vcombine.low %v2518_v17, %v2528_v33  ;;  %v840_v29 = vrot.slane %v839_v34, 4  ;;  %v830_v32 = vrot.slane %v829_v5, 4  ;;  %v815_v8 = vor.u32 %v814_v18, %v810_v49 }
 0x21e   : > { %v528_v39 = vrot.slane %v425_v46, 7  ;;  %v805_v12 = vor.u32 %v804_v7, %v801_v59  ;;  %v530_v16 = vrot.slane %v426_v10, 7  ;;  %v2934_v9 = vshrl.u32 %v2675_v56, 16 }
 0x21f   : > { %4073 = vrot.lane.b32.xlu0 %v11374_v15, %s13049_s8  ;;  %v845_v26 = vsel %vm13513_vm11, %v840_v29, %v844_v35  ;;  %4075 = vrot.lane.b32.xlu1 %v11375_v28, %s13049_s8  ;;  %v835_v17 = vsel %vm13513_vm11, %v830_v32, %v834_v50  ;;  %v816_v61 = vrot.slane %v815_v8, 4  ;;  %v820_v54 = vrot.slane %v818_v14, 5  ;;  %v14550_v32 = vld [vmem:[#allocation2 + $0x9c] sm:$0xe]  ;;  %v14556_v14 = vpop.permute.xlu1 %3907 }
 0x220   : > { %v529_v55 = vrot.slane %v528_v39, 4  ;;  %632 = vst [vmem:[#allocation2 + $0xa8] sm:$0xe] %v528_v39  ;;  %v11289_v34 = vcombine.low %v835_v17, %v845_v26  ;;  %v806_v63 = vrot.slane %v805_v12, 4  ;;  %v532_v19 = vrot.slane %v530_v16, 4  ;;  %v14558_v39 = vpop.permute.xlu0 %3905 }
 0x221   : > { %v2936_v46 = vrot.slane %v2934_v9, 4  ;;  %v821_v33 = vsel %vm13513_vm11, %v816_v61, %v820_v54  ;;  %v2937_v35 = vshll.u32 %v2675_v56, 16  ;;  %v2943_v28 = vshll.u32 %v14527_v0, 16 }
 0x222   : > { %v531_v5 = vsel %vm13368_vm8, %v529_v55, %v530_v16  ;;  %v4343_v50 = vsel %vm4325_vm12, %v11289_v34, %v14335_v53  ;;  %v811_v18 = vsel %vm13513_vm11, %v806_v63, %v810_v49  ;;  %634 = vst [vmem:[#allocation2 + $0xb0] sm:$0x1] %v532_v19  ;;  %v2947_v10 = vshrl.u32 %v14527_v0, 16 }
 0x223   : > { %633 = vst [vmem:[#allocation2 + $0xac] sm:$0xf] %v531_v5  ;;  %v2953_v15 = vshll.u32 %v2677_v25, 16  ;;  %v11288_v29 = vcombine.low %v811_v18, %v821_v33  ;;  %v2939_v59 = vrot.slane %v2937_v35, 5  ;;  %v2945_v7 = vrot.slane %v2943_v28, 5 }
 0x224   : > { %v4386_v56 = vsel %vm4374_vm13, %v4343_v50, %v14354_v13  ;;  %v2949_v53 = vrot.slane %v2947_v10, 4  ;;  %v11278_v49 = vrot.slane %v14550_v32, 9  ;;  %v3213_v11 = vrot.slane %v14527_v0, 5 }
 0x225   : > { %v2955_v8 = vrot.slane %v2953_v15, 5  ;;  %v4340_v26 = vsel %vm4325_vm12, %v11288_v29, %v14337_v58  ;;  %v2940_v12 = vor.u32 %v2939_v59, %v2936_v46  ;;  %v3216_v16 = vrot.slane %v2677_v25, 5 }
 0x226   : > { %v14564_v13 = vsel %vm4407_vm14, %v4386_v56, %v14387_v30  ;;  %v2950_v17 = vor.u32 %v2949_v53, %v2945_v7  ;;  %v4384_v61 = vsel %vm4374_vm13, %v4340_v26, %v14356_v37  ;;  %v3214_v55 = vsel %vm13353_vm6, %v11278_v49, %v3213_v11  ;;  %v14582_v26 = vpop.permute.xlu0 %3985 }
 0x227   : > { %v2678_v9 = vld [vmem:[#allocation2 + $0xa8] sm:$0xf]  ;;  %v3215_v34 = vrot.slane %v3213_v11, 4  ;;  %v2941_v33 = vrot.slane %v2940_v12, 4  ;;  %v14574_v30 = vsel %vm4407_vm14, %v4384_v61, %v14389_v24  ;;  %v14580_v11 = vpop.permute.xlu1 %3987  ;;  %v4452_v0 = vsel %vm4440_vm15, %v14564_v13, %v14410_v60 }
 0x228   : > { %v3088_v54 = vld [vmem:[#allocation2 + $0xa8] sm:$0xe]  ;;  %v2958_v63 = vshrl.u32 %v2678_v9, 16  ;;  %v2961_v19 = vshll.u32 %v2678_v9, 16  ;;  %v2951_v46 = vrot.slane %v2950_v17, 4  ;;  %vm7100_vm10 = vcmask 654336  }
 0x229   : > { %v11279_v58 = vrot.slane %v3088_v54, 9  ;;  %v3217_v25 = vsel %vm13353_vm6, %v3215_v34, %v3216_v16  ;;  %v3523_v5 = vshrl.u32 %v3088_v54, 16  ;;  %v2680_v37 = vld [vmem:[#allocation2 + $0xb0] sm:$0x1]  ;;  %v2946_v15 = vsel %vm13513_vm11, %v2941_v33, %v2945_v7 }
 0x22a   : > { %v2679_v35 = vld [vmem:[#allocation2 + $0xac] sm:$0xf]  ;;  %v2960_v50 = vrot.slane %v2958_v63, 4  ;;  %v2963_v18 = vrot.slane %v2961_v19, 5  ;;  %v11406_v29 = vcombine.low %v3214_v55, %v3217_v25  ;;  %v2977_v53 = vshll.u32 %v2680_v37, 16 }
 0x22b   : > { %v2967_v59 = vshll.u32 %v2679_v35, 16  ;;  %v2971_v56 = vshrl.u32 %v2679_v35, 16  ;;  %v2956_v49 = vsel %vm13513_vm11, %v2951_v46, %v2955_v8  ;;  %v3220_v16 = vrot.slane %v2679_v35, 5  ;;  %v3264_v17 = vld [vmem:[#allocation2 + $0xb0] sm:$0x3] }
 0x22c   : > { %v2964_v24 = vor.u32 %v2963_v18, %v2960_v50  ;;  %v11390_v12 = vcombine.low %v2946_v15, %v2956_v49  ;;  %v3223_v9 = vrot.slane %v2680_v37, 5  ;;  %v2979_v63 = vrot.slane %v2977_v53, 5 }
 0x22d   : > { %v2969_v61 = vrot.slane %v2967_v59, 5  ;;  %v2973_v34 = vrot.slane %v2971_v56, 4  ;;  %v3525_v7 = vrot.slane %v3523_v5, 5  ;;  %v3221_v19 = vsel %vm13353_vm6, %v11279_v58, %v3220_v16  ;;  %v14593_v58 = vpop.permute.xlu0 %4065 }
 0x22e   : > { %v2965_v55 = vrot.slane %v2964_v24, 4  ;;  %4153 = vrot.lane.b32.xlu0 %v11390_v12, %s13050_s17  ;;  %v3222_v8 = vrot.slane %v3220_v16, 4  ;;  %v3526_v33 = vshll.u32 %v3088_v54, 16  ;;  %v3531_v25 = vrot.slane %v2971_v56, 5  ;;  %v14591_v12 = vpop.permute.xlu1 %4067  ;;  %v3263_v56 = vld [vmem:[#allocation2 + $0xa4] sm:$0x3] }
 0x22f   : > { %v2974_v46 = vor.u32 %v2973_v34, %v2969_v61  ;;  %v3532_v42 = vrot.slane %v2967_v59, 6  ;;  %v3537_v50 = vshrl.u32 %v3264_v17, 16  ;;  %v3540_v5 = vshll.u32 %v3264_v17, 16 }
 0x230   : > { %v2970_v35 = vsel %vm13513_vm11, %v2965_v55, %v2969_v61  ;;  %v3224_v37 = vsel %vm13353_vm6, %v3222_v8, %v3223_v9  ;;  %v3528_v18 = vrot.slane %v3526_v33, 6  ;;  %v3500_v16 = vshrl.u32 %v14550_v32, 16 }
 0x231   : > { %v2975_v15 = vrot.slane %v2974_v46, 4  ;;  %v11407_v53 = vcombine.low %v3221_v19, %v3224_v37  ;;  %v3533_v49 = vor.u32 %v3532_v42, %v3531_v25  ;;  %v3539_v24 = vrot.slane %v3537_v50, 5  ;;  %v672_v50 = vld [vmem:[#allocation2 + $0x60] sm:$0xf] }
 0x232   : > { %4233 = vrot.lane.b32.xlu0 %v11406_v29, %s13047_s15  ;;  %v3529_v54 = vor.u32 %v3528_v18, %v3525_v7  ;;  %v3542_v59 = vrot.slane %v3540_v5, 6  ;;  %v3503_v61 = vshll.u32 %v14550_v32, 16  ;;  %v3508_v42 = vrot.slane %v2947_v10, 5  ;;  %v14615_v5 = vpop.permute.xlu1 %4147 }
 0x233   : > { %v2980_v9 = vsel %vm13513_vm11, %v2975_v15, %v2979_v63  ;;  %v3535_v17 = vrot.slane %v3533_v49, 4  ;;  %v3509_v34 = vrot.slane %v2943_v28, 6  ;;  %v3502_v7 = vrot.slane %v3500_v16, 5  ;;  %v14617_v15 = vpop.permute.xlu0 %4145 }
 0x234   : > { %v11391_v55 = vcombine.low %v2970_v35, %v2980_v9  ;;  %v3530_v19 = vrot.slane %v3529_v54, 4  ;;  %v3543_v29 = vor.u32 %v3542_v59, %v3539_v24  ;;  %v3505_v8 = vrot.slane %v3503_v61, 6 }
 0x235   : > { %v3510_v33 = vor.u32 %v3509_v34, %v3508_v42  ;;  %v3514_v46 = vshrl.u32 %v3263_v56, 16  ;;  %v3517_v25 = vshll.u32 %v3263_v56, 16  ;;  %v4450_v28 = vsel %vm4440_vm15, %v14574_v30, %v14412_v45  ;;  %v12770_v34 = vld [vmem:[#allocation2 + $0x68] sm:$0x1] }
 0x236   : > { %4155 = vrot.lane.b32.xlu1 %v11391_v55, %s13050_s17  ;;  %v3534_v32 = vsel %vm13360_vm7, %v3530_v19, %v3533_v49  ;;  %v3544_v10 = vsel %vm13360_vm7, %v3535_v17, %v3543_v29  ;;  %v3506_v35 = vor.u32 %v3505_v8, %v3502_v7  ;;  %v4485_v24 = vsel %vm4473_vm0, %v4452_v0, %v14432_v6  ;;  %v14646_v7 = vpop.permute.xlu1 %4227 }
 0x237   : > { %v11423_v63 = vcombine.low %v3534_v32, %v3544_v10  ;;  %v3512_v37 = vrot.slane %v3510_v33, 4  ;;  %v3516_v18 = vrot.slane %v3514_v46, 5  ;;  %v3519_v49 = vrot.slane %v3517_v25, 6  ;;  %v14648_v8 = vpop.permute.xlu0 %4225  ;;  %v689_v10 = vld [vmem:[#allocation2 + $0xa4] sm:$0x1] }
 0x238   : > { %v4483_v54 = vsel %vm4473_vm0, %v4450_v28, %v14434_v22  ;;  %v871_v60 = vshrl.u32 %v672_v50, 16  ;;  %v3507_v13 = vrot.slane %v3506_v35, 4  ;;  %v4518_v45 = vsel %vm4506_vm1, %v4485_v24, %v14460_v44  ;;  %v669_v22 = vld [vmem:[#allocation2 + $0x54] sm:$0xf] }
 0x239   : > { %v4516_v30 = vsel %vm4506_vm1, %v4483_v54, %v14462_v62  ;;  %v874_v59 = vshll.u32 %v672_v50, 16  ;;  %v3520_v56 = vor.u32 %v3519_v49, %v3516_v18  ;;  %v4551_v16 = vsel %vm4539_vm2, %v4518_v45, %v14478_v48  ;;  %v14658_v49 = vld [vmem:[#allocation2 + $0x9c] sm:$0xe] }
 0x23a   : > { %4235 = vrot.lane.b32.xlu1 %v11407_v53, %s13047_s15  ;;  %v4549_v6 = vsel %vm4539_vm2, %v4516_v30, %v14480_v2  ;;  %v873_v61 = vrot.slane %v871_v60, 4  ;;  %v3511_v9 = vsel %vm13360_vm7, %v3507_v13, %v3510_v33  ;;  %v4584_v44 = vsel %vm4572_vm3, %v4551_v16, %v14490_v1  ;;  %v14650_v33 = vld [vmem:[#allocation2 + $0xa0] sm:$0xf]  ;;  %v14662_v13 = vld [vmem:[#allocation2 + $0xac] sm:$0xf] }
 0x23b   : > { %v4582_v62 = vsel %vm4572_vm3, %v4549_v6, %v14492_v4  ;;  %v876_v17 = vrot.slane %v874_v59, 5  ;;  %v3521_v53 = vsel %vm13360_vm7, %v3512_v37, %v3520_v56  ;;  %v882_v48 = vrot.slane %v880_v40, 5  ;;  %v12771_v37 = vld [vmem:[#allocation2 + $0x5c] sm:$0x1]  ;;  %v692_v56 = vld [vmem:[#allocation2 + $0xb0] sm:$0x1] }
 0x23c   : > { %12423 = vmatprep.mubr.msk.bf16.mxu0 %vm4605_vm4, %v4582_v62  ;;  %v17893_v2 = vshrl.u32 %v13877_v3, 16  ;;  %v890_v55 = vshll.u32 %v12770_v34, 16  ;;  %v11422_v19 = vcombine.low %v3511_v9, %v3521_v53  ;;  %v847_v29 = vshrl.u32 %v669_v22, 16  ;;  %v678_v16 = vld [vmem:[#allocation2 + $0x78] sm:$0xf]  ;;  %v4308_v53 = vpop.permute.xlu1 %4307 }
 0x23d   : > { %12424 = vmatmul.mubr.msk.bf16.gmra.mrb[8].mxu0 %vm4605_vm4, %v4584_v44  ;;  %v877_v1 = vor.u32 %v876_v17, %v873_v61  ;;  %v850_v4 = vshll.u32 %v669_v22, 16  ;;  %v17894_v3 = vshll.u32 %v13886_v20, 16  ;;  %v17895_v50 = vshrl.u32 %v13886_v20, 16  ;;  %v14670_v44 = vld [vmem:[#allocation2 + $0xa8] sm:$0xe] }
 0x23e   : > { %v886_v42 = vrot.slane %v17893_v2, 4  ;;  %4315 = vrot.lane.b32.xlu1 %v11423_v63, %s13051_s20  ;;  %v892_v46 = vrot.slane %v890_v55, 5  ;;  %4313 = vrot.lane.b32.xlu0 %v11422_v19, %s13051_s20  ;;  %v849_v28 = vrot.slane %v847_v29, 4  ;;  %v866_v18 = vshll.u32 %v12771_v37, 16  ;;  %v4306_v2 = vpop.permute.xlu0 %4305 }
 0x23f   : > { %v858_v25 = vrot.slane %v17894_v3, 5  ;;  %v862_v32 = vrot.slane %v17895_v50, 4  ;;  %v878_v0 = vrot.slane %v877_v1, 4  ;;  %v852_v35 = vrot.slane %v850_v4, 5 }
 0x240   : > { %v887_v40 = vor.u32 %v886_v42, %v882_v48  ;;  %v11248_v54 = vrot.slane %v14658_v49, 9  ;;  %v1239_v60 = vrot.slane %v14650_v33, 5  ;;  %v868_v30 = vrot.slane %v866_v18, 5 }
 0x241   : > { %v863_v63 = vor.u32 %v862_v32, %v858_v25  ;;  %v883_v20 = vsel %vm13513_vm11, %v878_v0, %v882_v48  ;;  %v853_v45 = vor.u32 %v852_v35, %v849_v28  ;;  %v1242_v59 = vrot.slane %v689_v10, 5 }
 0x242   : > { %v888_v24 = vrot.slane %v887_v40, 4  ;;  %v1240_v22 = vsel %vm13353_vm6, %v11248_v54, %v1239_v60  ;;  %v1241_v9 = vrot.slane %v1239_v60, 4  ;;  %v11249_v48 = vrot.slane %v14670_v44, 9  ;;  %v675_v54 = vld [vmem:[#allocation2 + $0x6c] sm:$0xf] }
 0x243   : > { %v864_v61 = vrot.slane %v863_v63, 4  ;;  %v854_v17 = vrot.slane %v853_v45, 4  ;;  %v1246_v42 = vrot.slane %v14662_v13, 5  ;;  %v1249_v19 = vrot.slane %v692_v56, 5  ;;  %v12772_v63 = vld [vmem:[#allocation2 + $0x80] sm:$0x1] }
 0x244   : > { %v893_v6 = vsel %vm13513_vm11, %v888_v24, %v892_v46  ;;  %v1243_v55 = vsel %vm13353_vm6, %v1241_v9, %v1242_v59  ;;  %v919_v1 = vshrl.u32 %v678_v16, 16  ;;  %v922_v28 = vshll.u32 %v678_v16, 16  ;;  %v14703_v59 = vpop.permute.xlu0 %3749 }
 0x245   : > { %v11291_v62 = vcombine.low %v883_v20, %v893_v6  ;;  %v869_v34 = vsel %vm13513_vm11, %v864_v61, %v868_v30  ;;  %v859_v4 = vsel %vm13513_vm11, %v854_v17, %v858_v25  ;;  %v11312_v40 = vcombine.low %v1240_v22, %v1243_v55  ;;  %v3752_v30 = vpop.permute.xlu1 %3751 }
 0x246   : > { %v1247_v46 = vsel %vm13353_vm6, %v11249_v48, %v1246_v42  ;;  %v11290_v3 = vcombine.low %v859_v4, %v869_v34  ;;  %v1248_v32 = vrot.slane %v1246_v42, 4  ;;  %v921_v10 = vrot.slane %v919_v1, 4  ;;  %v12773_v1 = vld [vmem:[#allocation2 + $0x74] sm:$0x1] }
 0x247   : > { %v4349_v29 = vsel %vm4325_vm12, %v11291_v62, %v14509_v38  ;;  %3757 = vrot.lane.b32.xlu0 %v11312_v40, %s13044_s30  ;;  %v17896_v38 = vshll.u32 %v14081_v51, 16  ;;  %v17897_v25 = vshrl.u32 %v14081_v51, 16  ;;  %v924_v45 = vrot.slane %v922_v28, 5 }
 0x248   : > { %v4390_v50 = vsel %vm4374_vm13, %v4349_v29, %v14529_v43  ;;  %v4346_v18 = vsel %vm4325_vm12, %v11290_v3, %v14511_v47  ;;  %v1250_v24 = vsel %vm13353_vm6, %v1248_v32, %v1249_v19  ;;  %v895_v61 = vshrl.u32 %v675_v54, 16 }
 0x249   : > { %v4423_v0 = vsel %vm4407_vm14, %v4390_v50, %v14556_v14  ;;  %v930_v35 = vrot.slane %v17896_v38, 5  ;;  %v934_v37 = vrot.slane %v17897_v25, 4  ;;  %v938_v14 = vshll.u32 %v12772_v63, 16  ;;  %v3832_v40 = vpop.permute.xlu1 %3831 }
 0x24a   : > { %v4456_v43 = vsel %vm4440_vm15, %v4423_v0, %v14580_v11  ;;  %v4388_v60 = vsel %vm4374_vm13, %v4346_v18, %v14531_v41  ;;  %v11313_v51 = vcombine.low %v1247_v46, %v1250_v24  ;;  %v898_v62 = vshll.u32 %v675_v54, 16  ;;  %v3830_v46 = vpop.permute.xlu0 %3829 }
 0x24b   : > { %v4489_v20 = vsel %vm4473_vm0, %v4456_v43, %v14591_v12  ;;  %v4421_v47 = vsel %vm4407_vm14, %v4388_v60, %v14558_v39  ;;  %v935_v56 = vor.u32 %v934_v37, %v930_v35  ;;  %v940_v16 = vrot.slane %v938_v14, 5 }
 0x24c   : > { %v4522_v11 = vsel %vm4506_vm1, %v4489_v20, %v14615_v5  ;;  %v4454_v6 = vsel %vm4440_vm15, %v4421_v47, %v14582_v26  ;;  %3759 = vrot.lane.b32.xlu1 %v11313_v51, %s13044_s30  ;;  %v925_v12 = vor.u32 %v924_v45, %v921_v10  ;;  %v897_v48 = vrot.slane %v895_v61, 4  ;;  %v1278_v47 = vld [vmem:[#allocation2 + $0xb0] sm:$0x3] }
 0x24d   : > { %v4555_v41 = vsel %vm4539_vm2, %v4522_v11, %v14646_v7  ;;  %v4487_v22 = vsel %vm4473_vm0, %v4454_v6, %v14593_v58  ;;  %v936_v9 = vrot.slane %v935_v56, 4  ;;  %v17898_v26 = vshll.u32 %v14098_v52, 16  ;;  %v3912_v11 = vpop.permute.xlu1 %3911 }
 0x24e   : > { %v4588_v39 = vsel %vm4572_vm3, %v4555_v41, %v4308_v53  ;;  %v4520_v5 = vsel %vm4506_vm1, %v4487_v22, %v14617_v15  ;;  %v926_v17 = vrot.slane %v925_v12, 4  ;;  %v900_v55 = vrot.slane %v898_v62, 5  ;;  %v3910_v56 = vpop.permute.xlu0 %3909 }
 0x24f   : > { %v906_v42 = vrot.slane %v17898_v26, 5  ;;  %v4553_v7 = vsel %vm4539_vm2, %v4520_v5, %v14648_v8  ;;  %v941_v34 = vsel %vm13513_vm11, %v936_v9, %v940_v16  ;;  %v17899_v58 = vshrl.u32 %v14098_v52, 16  ;;  %v1277_v52 = vld [vmem:[#allocation2 + $0xa4] sm:$0x3]  ;;  %v1688_v26 = vld [vmem:[#allocation2 + $0xa8] sm:$0xf] }
 0x250   : > { %v4586_v19 = vsel %vm4572_vm3, %v4553_v7, %v4306_v2  ;;  %v931_v15 = vsel %vm13513_vm11, %v926_v17, %v930_v35  ;;  %v914_v29 = vshll.u32 %v12773_v1, 16  ;;  %v1000_v4 = vshll.u32 %v14650_v33, 16 }
 0x251   : > { %v910_v53 = vrot.slane %v17899_v58, 4  ;;  %12427 = vmatprep.mubr.msk.bf16.mxu0 %vm4605_vm4, %v4586_v19  ;;  %v11293_v8 = vcombine.low %v931_v15, %v941_v34  ;;  %v901_v3 = vor.u32 %v900_v55, %v897_v48  ;;  %v1004_v32 = vshrl.u32 %v14650_v33, 16  ;;  %v1689_v34 = vld [vmem:[#allocation2 + $0xac] sm:$0xf]  ;;  %v1690_v15 = vld [vmem:[#allocation2 + $0xb0] sm:$0x1] }
 0x252   : > { %12428 = vmatmul.mubr.msk.bf16.gmra.mrb[12].mxu0 %vm4605_vm4, %v4588_v39  ;;  %v916_v2 = vrot.slane %v914_v29, 5  ;;  %v1561_v10 = vshrl.u32 %v14658_v49, 16  ;;  %v1564_v0 = vshll.u32 %v14658_v49, 16  ;;  %v1570_v28 = vrot.slane %v1000_v4, 6 }
 0x253   : > { %v911_v50 = vor.u32 %v910_v53, %v906_v42  ;;  %v4355_v38 = vsel %vm4325_vm12, %v11293_v8, %v3752_v30  ;;  %v902_v35 = vrot.slane %v901_v3, 4  ;;  %v1569_v37 = vrot.slane %v1004_v32, 5 }
 0x254   : > { %v1563_v18 = vrot.slane %v1561_v10, 5  ;;  %v1566_v43 = vrot.slane %v1564_v0, 6  ;;  %v1575_v24 = vshrl.u32 %v1277_v52, 16  ;;  %v1578_v63 = vshll.u32 %v1277_v52, 16  ;;  %v3992_v52 = vpop.permute.xlu1 %3991 }
 0x255   : > { %v912_v25 = vrot.slane %v911_v50, 4  ;;  %v907_v14 = vsel %vm13513_vm11, %v902_v35, %v906_v42  ;;  %v1571_v54 = vor.u32 %v1570_v28, %v1569_v37  ;;  %v1024_v60 = vshll.u32 %v14662_v13, 16  ;;  %v427_v50 = vld [vmem:[%s13326_s12 + $0x68] sm:$0xf] }
 0x256   : > { %v1567_v51 = vor.u32 %v1566_v43, %v1563_v18  ;;  %v1577_v45 = vrot.slane %v1575_v24, 5  ;;  %v1580_v30 = vrot.slane %v1578_v63, 6  ;;  %v1028_v6 = vshrl.u32 %v14662_v13, 16 }
 0x257   : > { %v917_v49 = vsel %vm13513_vm11, %v912_v25, %v916_v2  ;;  %v1573_v16 = vrot.slane %v1571_v54, 4  ;;  %v1584_v41 = vshrl.u32 %v14670_v44, 16  ;;  %v1587_v12 = vshll.u32 %v14670_v44, 16  ;;  %v3990_v2 = vpop.permute.xlu0 %3989 }
 0x258   : > { %v11292_v20 = vcombine.low %v907_v14, %v917_v49  ;;  %v1568_v22 = vrot.slane %v1567_v51, 4  ;;  %v1581_v39 = vor.u32 %v1580_v30, %v1577_v45  ;;  %v1593_v9 = vrot.slane %v1024_v60, 6 }
 0x259   : > { %v1586_v62 = vrot.slane %v1584_v41, 5  ;;  %v1589_v5 = vrot.slane %v1587_v12, 6  ;;  %v1592_v17 = vrot.slane %v1028_v6, 5  ;;  %v1598_v48 = vshrl.u32 %v1278_v47, 16 }
 0x25a   : > { %v4352_v61 = vsel %vm4325_vm12, %v11292_v20, %v14703_v59  ;;  %v1572_v42 = vsel %vm13360_vm7, %v1568_v22, %v1571_v54  ;;  %v1582_v44 = vsel %vm13360_vm7, %v1573_v16, %v1581_v39  ;;  %v1601_v59 = vshll.u32 %v1278_v47, 16  ;;  %v2096_v16 = vld [vmem:[#allocation2 + $0xa8] sm:$0xe]  ;;  %v4072_v39 = vpop.permute.xlu1 %4071 }
 0x25b   : > { %v4394_v7 = vsel %vm4374_vm13, %v4355_v38, %v3832_v40  ;;  %v11328_v55 = vcombine.low %v1572_v42, %v1582_v44  ;;  %v1590_v58 = vor.u32 %v1589_v5, %v1586_v62  ;;  %v1594_v53 = vor.u32 %v1593_v9, %v1592_v17  ;;  %v428_v38 = vld [vmem:[%s13326_s12 + $0x6c] sm:$0xf]  ;;  %v4070_v9 = vpop.permute.xlu0 %4069  ;;  %v2272_v42 = vld [vmem:[#allocation2 + $0xb0] sm:$0x3] }
 0x25c   : > { %v1600_v19 = vrot.slane %v1598_v48, 5  ;;  %v1603_v1 = vrot.slane %v1601_v59, 6  ;;  %v4392_v29 = vsel %vm4374_vm13, %v4352_v61, %v3830_v46  ;;  %v1989_v8 = vshrl.u32 %v1688_v26, 16 }
 0x25d   : > { %v1992_v3 = vshll.u32 %v1688_v26, 16  ;;  %3837 = vrot.lane.b32.xlu0 %v11328_v55, %s13045_s9  ;;  %v1591_v10 = vrot.slane %v1590_v58, 4  ;;  %v1596_v0 = vrot.slane %v1594_v53, 4  ;;  %v1998_v40 = vshll.u32 %v1689_v34, 16 }
 0x25e   : > { %v2002_v28 = vshrl.u32 %v1689_v34, 16  ;;  %v1604_v35 = vor.u32 %v1603_v1, %v1600_v19  ;;  %v1991_v25 = vrot.slane %v1989_v8, 4  ;;  %v2008_v18 = vshll.u32 %v1690_v15, 16 }
 0x25f   : > { %v1994_v37 = vrot.slane %v1992_v3, 5  ;;  %v1595_v43 = vsel %vm13360_vm7, %v1591_v10, %v1594_v53  ;;  %v2000_v46 = vrot.slane %v1998_v40, 5  ;;  %v533_v63 = vrot.slane %v427_v50, 7 }
 0x260   : > { %v2004_v24 = vrot.slane %v2002_v28, 4  ;;  %v1605_v14 = vsel %vm13360_vm7, %v1596_v0, %v1604_v35  ;;  %v2010_v54 = vrot.slane %v2008_v18, 5  ;;  %v535_v20 = vrot.slane %v428_v38, 7 }
 0x261   : > { %v1995_v49 = vor.u32 %v1994_v37, %v1991_v25  ;;  %v11329_v51 = vcombine.low %v1595_v43, %v1605_v14  ;;  %v534_v30 = vrot.slane %v533_v63, 4  ;;  %635 = vst [vmem:[#allocation2 + $0xb4] sm:$0xe] %v533_v63  ;;  %v4427_v47 = vsel %vm4407_vm14, %v4394_v7, %v3912_v11  ;;  %v4150_v25 = vpop.permute.xlu0 %4149 }
 0x262   : > { %v2005_v45 = vor.u32 %v2004_v24, %v2000_v46  ;;  %v537_v12 = vrot.slane %v535_v20, 4  ;;  %v4425_v61 = vsel %vm4407_vm14, %v4392_v29, %v3910_v56  ;;  %v11264_v22 = vrot.slane %v2096_v16, 9 }
 0x263   : > { %v1996_v41 = vrot.slane %v1995_v49, 4  ;;  %3839 = vrot.lane.b32.xlu1 %v11329_v51, %s13045_s9  ;;  %v536_v5 = vsel %vm13368_vm8, %v534_v30, %v535_v20  ;;  %v2234_v17 = vrot.slane %v1689_v34, 5  ;;  %v2237_v48 = vrot.slane %v1690_v15, 5 }
 0x264   : > { %v2006_v62 = vrot.slane %v2005_v45, 4  ;;  %636 = vst [vmem:[#allocation2 + $0xb8] sm:$0xf] %v536_v5  ;;  %637 = vst [vmem:[#allocation2 + $0xbc] sm:$0x1] %v537_v12  ;;  %v4460_v11 = vsel %vm4440_vm15, %v4427_v47, %v3992_v52  ;;  %v4458_v56 = vsel %vm4440_vm15, %v4425_v61, %v3990_v2  ;;  %v2553_v44 = vshrl.u32 %v2096_v16, 16  ;;  %v4152_v35 = vpop.permute.xlu1 %4151 }
 0x265   : > { %v2001_v26 = vsel %vm13513_vm11, %v1996_v41, %v2000_v46  ;;  %v2235_v7 = vsel %vm13353_vm6, %v11264_v22, %v2234_v17  ;;  %v2236_v55 = vrot.slane %v2234_v17, 4  ;;  %v2556_v34 = vshll.u32 %v2096_v16, 16 }
 0x266   : > { %v2011_v59 = vsel %vm13513_vm11, %v2006_v62, %v2010_v54  ;;  %v2555_v53 = vrot.slane %v2553_v44, 5  ;;  %v2561_v19 = vrot.slane %v2002_v28, 5  ;;  %v2562_v15 = vrot.slane %v1998_v40, 6 }
 0x267   : > { %v11344_v58 = vcombine.low %v2001_v26, %v2011_v59  ;;  %v2238_v1 = vsel %vm13353_vm6, %v2236_v55, %v2237_v48  ;;  %v2558_v29 = vrot.slane %v2556_v34, 6  ;;  %v2567_v8 = vshrl.u32 %v2272_v42, 16 }
 0x268   : > { %v2570_v3 = vshll.u32 %v2272_v42, 16  ;;  %v1691_v50 = vld [vmem:[#allocation2 + $0xb4] sm:$0xf]  ;;  %v11360_v52 = vcombine.low %v2235_v7, %v2238_v1  ;;  %v2563_v10 = vor.u32 %v2562_v15, %v2561_v19  ;;  %v4493_v0 = vsel %vm4473_vm0, %v4460_v11, %v4072_v39 }
 0x269   : > { %3917 = vrot.lane.b32.xlu0 %v11344_v58, %s13048_s14  ;;  %v2097_v2 = vld [vmem:[#allocation2 + $0xb4] sm:$0xe]  ;;  %v4491_v38 = vsel %vm4473_vm0, %v4458_v56, %v4070_v9  ;;  %v2013_v28 = vshrl.u32 %v1691_v50, 16  ;;  %v2016_v40 = vshll.u32 %v1691_v50, 16  ;;  %v2559_v18 = vor.u32 %v2558_v29, %v2555_v53 }
 0x26a   : > { %v11265_v37 = vrot.slane %v2097_v2, 9  ;;  %v2565_v43 = vrot.slane %v2563_v10, 4  ;;  %v2569_v46 = vrot.slane %v2567_v8, 5  ;;  %v2572_v24 = vrot.slane %v2570_v3, 6  ;;  %v2681_v34 = vld [vmem:[#allocation2 + $0xb4] sm:$0xf] }
 0x26b   : > { %v2576_v63 = vshrl.u32 %v2097_v2, 16  ;;  %v1692_v14 = vld [vmem:[#allocation2 + $0xb8] sm:$0xf]  ;;  %v1693_v49 = vld [vmem:[#allocation2 + $0xbc] sm:$0x1]  ;;  %v2015_v54 = vrot.slane %v2013_v28, 4  ;;  %v14787_v51 = vsel %vm4506_vm1, %v4493_v0, %v4152_v35  ;;  %v14790_v45 = vsel %vm4506_vm1, %v4491_v38, %v4150_v25 }
 0x26c   : > { %v2018_v20 = vrot.slane %v2016_v40, 5  ;;  %v2022_v30 = vshll.u32 %v1692_v14, 16  ;;  %v2026_v47 = vshrl.u32 %v1692_v14, 16  ;;  %v2032_v16 = vshll.u32 %v1693_v49, 16  ;;  %v2273_v42 = vld [vmem:[#allocation2 + $0xbc] sm:$0x3] }
 0x26d   : > { %3997 = vrot.lane.b32.xlu0 %v11360_v52, %s13046_s13  ;;  %v2241_v41 = vrot.slane %v1692_v14, 5  ;;  %v2244_v61 = vrot.slane %v1693_v49, 5  ;;  %v2560_v22 = vrot.slane %v2559_v18, 4  ;;  %v2573_v39 = vor.u32 %v2572_v24, %v2569_v46  ;;  %v2682_v1 = vld [vmem:[#allocation2 + $0xb8] sm:$0xf] }
 0x26e   : > { %v2019_v12 = vor.u32 %v2018_v20, %v2015_v54  ;;  %v2024_v9 = vrot.slane %v2022_v30, 5  ;;  %v2028_v62 = vrot.slane %v2026_v47, 4  ;;  %v2034_v5 = vrot.slane %v2032_v16, 5  ;;  %v429_v38 = vld [vmem:[%s13326_s12 + $0x70] sm:$0xf] }
 0x26f   : > { %v2242_v17 = vsel %vm13353_vm6, %v11265_v37, %v2241_v41  ;;  %v2243_v26 = vrot.slane %v2241_v41, 4  ;;  %v2564_v11 = vsel %vm13360_vm7, %v2560_v22, %v2563_v10  ;;  %v2574_v56 = vsel %vm13360_vm7, %v2565_v43, %v2573_v39  ;;  %v2683_v40 = vld [vmem:[#allocation2 + $0xbc] sm:$0x1]  ;;  %v430_v18 = vld [vmem:[%s13326_s12 + $0x74] sm:$0xf] }
 0x270   : > { %v2020_v48 = vrot.slane %v2019_v12, 4  ;;  %v2029_v44 = vor.u32 %v2028_v62, %v2024_v9  ;;  %v11376_v59 = vcombine.low %v2564_v11, %v2574_v56  ;;  %v2578_v7 = vrot.slane %v2576_v63, 5  ;;  %v3089_v12 = vld [vmem:[#allocation2 + $0xb4] sm:$0xe] }
 0x271   : > { %v2579_v55 = vshll.u32 %v2097_v2, 16  ;;  %v2245_v53 = vsel %vm13353_vm6, %v2243_v26, %v2244_v61  ;;  %v2584_v19 = vrot.slane %v2026_v47, 5  ;;  %v2585_v15 = vrot.slane %v2022_v30, 6  ;;  %v4232_v61 = vpop.permute.xlu1 %4231 }
 0x272   : > { %v2025_v58 = vsel %vm13513_vm11, %v2020_v48, %v2024_v9  ;;  %v2030_v29 = vrot.slane %v2029_v44, 4  ;;  %v11361_v8 = vcombine.low %v2242_v17, %v2245_v53  ;;  %4077 = vrot.lane.b32.xlu0 %v11376_v59, %s13049_s8  ;;  %v2590_v50 = vshrl.u32 %v2273_v42, 16  ;;  %v3265_v53 = vld [vmem:[#allocation2 + $0xbc] sm:$0x3] }
 0x273   : > { %v2581_v3 = vrot.slane %v2579_v55, 6  ;;  %v2586_v52 = vor.u32 %v2585_v15, %v2584_v19  ;;  %v2593_v2 = vshll.u32 %v2273_v42, 16  ;;  %v2982_v10 = vshrl.u32 %v2681_v34, 16 }
 0x274   : > { %v2985_v0 = vshll.u32 %v2681_v34, 16  ;;  %v2035_v35 = vsel %vm13513_vm11, %v2030_v29, %v2034_v5  ;;  %v2592_v28 = vrot.slane %v2590_v50, 5  ;;  %v2991_v37 = vshll.u32 %v2682_v1, 16  ;;  %v4230_v5 = vpop.permute.xlu0 %4229 }
 0x275   : > { %v2582_v25 = vor.u32 %v2581_v3, %v2578_v7  ;;  %v11345_v43 = vcombine.low %v2025_v58, %v2035_v35  ;;  %v2588_v46 = vrot.slane %v2586_v52, 4  ;;  %v2595_v24 = vrot.slane %v2593_v2, 6  ;;  %v4312_v2 = vpop.permute.xlu1 %4311 }
 0x276   : > { %v2984_v63 = vrot.slane %v2982_v10, 4  ;;  %v2987_v49 = vrot.slane %v2985_v0, 5  ;;  %v2993_v54 = vrot.slane %v2991_v37, 5  ;;  %v2995_v20 = vshrl.u32 %v2682_v1, 16 }
 0x277   : > { %v2583_v14 = vrot.slane %v2582_v25, 4  ;;  %3919 = vrot.lane.b32.xlu1 %v11345_v43, %s13048_s14  ;;  %v2596_v30 = vor.u32 %v2595_v24, %v2592_v28  ;;  %v3001_v47 = vshll.u32 %v2683_v40, 16  ;;  %v538_v16 = vrot.slane %v429_v38, 7 }
 0x278   : > { %v540_v41 = vrot.slane %v430_v18, 7  ;;  %v2988_v39 = vor.u32 %v2987_v49, %v2984_v63  ;;  %v2997_v9 = vrot.slane %v2995_v20, 4  ;;  %v11280_v62 = vrot.slane %v3089_v12, 9 }
 0x279   : > { %v2587_v22 = vsel %vm13360_vm7, %v2583_v14, %v2586_v52  ;;  %v2597_v17 = vsel %vm13360_vm7, %v2588_v46, %v2596_v30  ;;  %v3003_v48 = vrot.slane %v3001_v47, 5  ;;  %v539_v26 = vrot.slane %v538_v16, 4  ;;  %638 = vst [vmem:[#allocation2 + $0xc0] sm:$0xe] %v538_v16 }
 0x27a   : > { %v542_v11 = vrot.slane %v540_v41, 4  ;;  %v11377_v56 = vcombine.low %v2587_v22, %v2597_v17  ;;  %v2989_v42 = vrot.slane %v2988_v39, 4  ;;  %v2998_v44 = vor.u32 %v2997_v9, %v2993_v54 }
 0x27b   : > { %v3227_v59 = vrot.slane %v2682_v1, 5  ;;  %3999 = vrot.lane.b32.xlu1 %v11361_v8, %s13046_s13  ;;  %v541_v7 = vsel %vm13368_vm8, %v539_v26, %v540_v41  ;;  %v3230_v55 = vrot.slane %v2683_v40, 5  ;;  %v4559_v34 = vsel %vm4539_vm2, %v14787_v51, %v4232_v61  ;;  %v4310_v40 = vpop.permute.xlu0 %4309 }
 0x27c   : > { %640 = vst [vmem:[#allocation2 + $0xc8] sm:$0x1] %v542_v11  ;;  %v4557_v58 = vsel %vm4539_vm2, %v14790_v45, %v4230_v5  ;;  %v2994_v19 = vsel %vm13513_vm11, %v2989_v42, %v2993_v54  ;;  %v2999_v15 = vrot.slane %v2998_v44, 4  ;;  %639 = vst [vmem:[#allocation2 + $0xc4] sm:$0xf] %v541_v7  ;;  %v3546_v8 = vshrl.u32 %v3089_v12, 16 }
 0x27d   : > { %v3228_v1 = vsel %vm13353_vm6, %v11280_v62, %v3227_v59  ;;  %v3229_v29 = vrot.slane %v3227_v59, 4  ;;  %v3549_v3 = vshll.u32 %v3089_v12, 16  ;;  %v3554_v50 = vrot.slane %v2995_v20, 5 }
 0x27e   : > { %v3555_v52 = vrot.slane %v2991_v37, 6  ;;  %v3004_v51 = vsel %vm13513_vm11, %v2999_v15, %v3003_v48  ;;  %v3560_v10 = vshrl.u32 %v3265_v53, 16  ;;  %v3563_v0 = vshll.u32 %v3265_v53, 16 }
 0x27f   : > { %v3231_v45 = vsel %vm13353_vm6, %v3229_v29, %v3230_v55  ;;  %4079 = vrot.lane.b32.xlu1 %v11377_v56, %s13049_s8  ;;  %v11392_v38 = vcombine.low %v2994_v19, %v3004_v51  ;;  %v3548_v25 = vrot.slane %v3546_v8, 5  ;;  %v3551_v28 = vrot.slane %v3549_v3, 6 }
 0x280   : > { %v11408_v35 = vcombine.low %v3228_v1, %v3231_v45  ;;  %v2684_v18 = vld [vmem:[#allocation2 + $0xc0] sm:$0xf]  ;;  %v3556_v46 = vor.u32 %v3555_v52, %v3554_v50  ;;  %v3562_v37 = vrot.slane %v3560_v10, 5  ;;  %v3565_v24 = vrot.slane %v3563_v0, 6  ;;  %v14845_v52 = vld [vmem:[#allocation2 + $0xb8] sm:$0xf] }
 0x281   : > { %v3090_v43 = vld [vmem:[#allocation2 + $0xc0] sm:$0xe]  ;;  %v4592_v63 = vsel %vm4572_vm3, %v4559_v34, %v4312_v2  ;;  %4157 = vrot.lane.b32.xlu0 %v11392_v38, %s13050_s17  ;;  %v3006_v14 = vshrl.u32 %v2684_v18, 16  ;;  %v3009_v49 = vshll.u32 %v2684_v18, 16  ;;  %v3552_v20 = vor.u32 %v3551_v28, %v3548_v25  ;;  %v695_v2 = vld [vmem:[#allocation2 + $0xbc] sm:$0x1] }
 0x282   : > { %v11281_v54 = vrot.slane %v3090_v43, 9  ;;  %v3558_v47 = vrot.slane %v3556_v46, 4  ;;  %v3566_v16 = vor.u32 %v3565_v24, %v3562_v37  ;;  %v3569_v41 = vshrl.u32 %v3090_v43, 16  ;;  %v14850_v38 = vld [vmem:[#allocation2 + $0xb4] sm:$0xe] }
 0x283   : > { %v2686_v30 = vld [vmem:[#allocation2 + $0xc8] sm:$0x1]  ;;  %v4590_v12 = vsel %vm4572_vm3, %v4557_v58, %v4310_v40  ;;  %v2685_v61 = vld [vmem:[#allocation2 + $0xc4] sm:$0xf]  ;;  %v3008_v22 = vrot.slane %v3006_v14, 4  ;;  %v3011_v39 = vrot.slane %v3009_v49, 5 }
 0x284   : > { %v3025_v9 = vshll.u32 %v2686_v30, 16  ;;  %v3237_v62 = vrot.slane %v2686_v30, 5  ;;  %12431 = vmatprep.mubr.msk.bf16.mxu1 %vm4605_vm4, %v4590_v12  ;;  %v3015_v5 = vshll.u32 %v2685_v61, 16  ;;  %v3019_v17 = vshrl.u32 %v2685_v61, 16  ;;  %v3266_v58 = vld [vmem:[#allocation2 + $0xc8] sm:$0x3] }
 0x285   : > { %v3234_v48 = vrot.slane %v2685_v61, 5  ;;  %v3553_v26 = vrot.slane %v3552_v20, 4  ;;  %12432 = vmatmul.mubr.msk.bf16.vlgmr.msra.gmra.mrb[0].mxu1 %vm4605_vm4, %v4592_v63  ;;  %v3012_v11 = vor.u32 %v3011_v39, %v3008_v22  ;;  %4237 = vrot.lane.b32.xlu0 %v11408_v35, %s13047_s15  ;;  %v3567_v42 = vsel %vm13360_vm7, %v3558_v47, %v3566_v16  ;;  %v14852_v35 = vld [vmem:[#allocation2 + $0xc0] sm:$0xe]  ;;  %v684_v25 = vld [vmem:[#allocation2 + $0x90] sm:$0xf] }
 0x286   : > { %v3027_v56 = vrot.slane %v3025_v9, 5  ;;  %v3571_v44 = vrot.slane %v3569_v41, 5  ;;  %v3017_v59 = vrot.slane %v3015_v5, 5  ;;  %v3021_v7 = vrot.slane %v3019_v17, 4  ;;  %v698_v49 = vld [vmem:[#allocation2 + $0xc8] sm:$0x1] }
 0x287   : > { %v14839_v55 = vsel %vm13353_vm6, %v11281_v54, %v3234_v48  ;;  %v3236_v34 = vrot.slane %v3234_v48, 4  ;;  %v3013_v53 = vrot.slane %v3012_v11, 4  ;;  %v3557_v19 = vsel %vm13360_vm7, %v3553_v26, %v3556_v46  ;;  %v14856_v46 = vld [vmem:[#allocation2 + $0xc4] sm:$0xf] }
 0x288   : > { %v3572_v15 = vshll.u32 %v3090_v43, 16  ;;  %v3577_v1 = vrot.slane %v3019_v17, 5  ;;  %v3022_v29 = vor.u32 %v3021_v7, %v3017_v59  ;;  %v11424_v3 = vcombine.low %v3557_v19, %v3567_v42 }
 0x289   : > { %v3238_v8 = vsel %vm13353_vm6, %v3236_v34, %v3237_v62  ;;  %v3578_v50 = vrot.slane %v3015_v5, 6  ;;  %v3018_v51 = vsel %vm13513_vm11, %v3013_v53, %v3017_v59  ;;  %v3583_v0 = vshrl.u32 %v3266_v58, 16 }
 0x28a   : > { %v11409_v45 = vcombine.low %v14839_v55, %v3238_v8  ;;  %v3574_v10 = vrot.slane %v3572_v15, 6  ;;  %v3023_v28 = vrot.slane %v3022_v29, 4  ;;  %4317 = vrot.lane.b32.xlu0 %v11424_v3, %s13051_s20  ;;  %v3586_v18 = vshll.u32 %v3266_v58, 16 }
 0x28b   : > { %v3579_v40 = vor.u32 %v3578_v50, %v3577_v1  ;;  %v11250_v43 = vrot.slane %v14850_v38, 9  ;;  %v3585_v24 = vrot.slane %v3583_v0, 5  ;;  %v1253_v63 = vrot.slane %v14845_v52, 5  ;;  %v12774_v1 = vld [vmem:[#allocation2 + $0x98] sm:$0x1] }
 0x28c   : > { %v3575_v37 = vor.u32 %v3574_v10, %v3571_v44  ;;  %v1256_v14 = vrot.slane %v695_v2, 5  ;;  %v3028_v54 = vsel %vm13513_vm11, %v3023_v28, %v3027_v56  ;;  %v3588_v30 = vrot.slane %v3586_v18, 6  ;;  %v681_v56 = vld [vmem:[#allocation2 + $0x84] sm:$0xf] }
 0x28d   : > { %v3581_v20 = vrot.slane %v3579_v40, 4  ;;  %v11251_v47 = vrot.slane %v14852_v35, 9  ;;  %v11393_v16 = vcombine.low %v3018_v51, %v3028_v54  ;;  %v1254_v12 = vsel %vm13353_vm6, %v11250_v43, %v1253_v63 }
 0x28e   : > { %v3576_v41 = vrot.slane %v3575_v37, 4  ;;  %v1255_v61 = vrot.slane %v1253_v63, 4  ;;  %v3589_v22 = vor.u32 %v3588_v30, %v3585_v24  ;;  %v1260_v39 = vrot.slane %v14856_v46, 5  ;;  %v12775_v24 = vld [vmem:[#allocation2 + $0x8c] sm:$0x1] }
 0x28f   : > { %v1263_v9 = vrot.slane %v698_v49, 5  ;;  %v967_v62 = vshrl.u32 %v684_v25, 16  ;;  %4159 = vrot.lane.b32.xlu1 %v11393_v16, %s13050_s17  ;;  %v970_v48 = vshll.u32 %v684_v25, 16  ;;  %v17900_v26 = vshll.u32 %v14352_v57, 16  ;;  %v3756_v49 = vpop.permute.xlu1 %3755 }
 0x290   : > { %v3580_v5 = vsel %vm13360_vm7, %v3576_v41, %v3579_v40  ;;  %v1257_v17 = vsel %vm13353_vm6, %v1255_v61, %v1256_v14  ;;  %v3590_v42 = vsel %vm13360_vm7, %v3581_v20, %v3589_v22  ;;  %v1261_v59 = vsel %vm13353_vm6, %v11251_v47, %v1260_v39  ;;  %v3754_v20 = vpop.permute.xlu0 %3753  ;;  %v1279_v47 = vld [vmem:[#allocation2 + $0xbc] sm:$0x3] }
 0x291   : > { %v978_v11 = vrot.slane %v17900_v26, 5  ;;  %v11314_v44 = vcombine.low %v1254_v12, %v1257_v17  ;;  %v1262_v7 = vrot.slane %v1260_v39, 4  ;;  %v11425_v55 = vcombine.low %v3580_v5, %v3590_v42 }
 0x292   : > { %v969_v34 = vrot.slane %v967_v62, 4  ;;  %v972_v58 = vrot.slane %v970_v48, 5  ;;  %v17901_v53 = vshrl.u32 %v14352_v57, 16  ;;  %v986_v29 = vshll.u32 %v12774_v1, 16 }
 0x293   : > { %3761 = vrot.lane.b32.xlu0 %v11314_v44, %s13044_s30  ;;  %v1264_v15 = vsel %vm13353_vm6, %v1262_v7, %v1263_v9  ;;  %v943_v8 = vshrl.u32 %v681_v56, 16  ;;  %v946_v3 = vshll.u32 %v681_v56, 16  ;;  %4239 = vrot.lane.b32.xlu1 %v11409_v45, %s13047_s15  ;;  %v17902_v10 = vshll.u32 %v14369_v36, 16  ;;  %v3836_v1 = vpop.permute.xlu1 %3835 }
 0x294   : > { %v982_v19 = vrot.slane %v17901_v53, 4  ;;  %v11315_v50 = vcombine.low %v1261_v59, %v1264_v15  ;;  %v973_v2 = vor.u32 %v972_v58, %v969_v34  ;;  %v988_v25 = vrot.slane %v986_v29, 5  ;;  %v3834_v29 = vpop.permute.xlu0 %3833 }
 0x295   : > { %v954_v0 = vrot.slane %v17902_v10, 5  ;;  %v945_v57 = vrot.slane %v943_v8, 4  ;;  %v948_v28 = vrot.slane %v946_v3, 5  ;;  %v17903_v40 = vshrl.u32 %v14369_v36, 16 }
 0x296   : > { %v983_v51 = vor.u32 %v982_v19, %v978_v11  ;;  %v974_v43 = vrot.slane %v973_v2, 4  ;;  %v962_v63 = vshll.u32 %v12775_v24, 16  ;;  %v1048_v14 = vshll.u32 %v14845_v52, 16  ;;  %v1280_v19 = vld [vmem:[#allocation2 + $0xc8] sm:$0x3] }
 0x297   : > { %v958_v18 = vrot.slane %v17903_v40, 4  ;;  %v949_v45 = vor.u32 %v948_v28, %v945_v57  ;;  %v1052_v30 = vshrl.u32 %v14845_v52, 16  ;;  %v1607_v16 = vshrl.u32 %v14850_v38, 16  ;;  %4319 = vrot.lane.b32.xlu1 %v11425_v55, %s13051_s20  ;;  %v1694_v57 = vld [vmem:[#allocation2 + $0xc0] sm:$0xf] }
 0x298   : > { %v984_v37 = vrot.slane %v983_v51, 4  ;;  %v979_v36 = vsel %vm13513_vm11, %v974_v43, %v978_v11  ;;  %v964_v12 = vrot.slane %v962_v63, 5  ;;  %v1610_v61 = vshll.u32 %v14850_v38, 16 }
 0x299   : > { %v959_v54 = vor.u32 %v958_v18, %v954_v0  ;;  %v950_v39 = vrot.slane %v949_v45, 4  ;;  %v1609_v62 = vrot.slane %v1607_v16, 5  ;;  %v1615_v17 = vrot.slane %v1052_v30, 5  ;;  %v1696_v45 = vld [vmem:[#allocation2 + $0xc8] sm:$0x1] }
 0x29a   : > { %v989_v41 = vsel %vm13513_vm11, %v984_v37, %v988_v25  ;;  %v1612_v5 = vrot.slane %v1610_v61, 6  ;;  %v1616_v48 = vrot.slane %v1048_v14, 6  ;;  %v1621_v26 = vshrl.u32 %v1279_v47, 16  ;;  %v1695_v37 = vld [vmem:[#allocation2 + $0xc4] sm:$0xf] }
 0x29b   : > { %v11295_v22 = vcombine.low %v979_v36, %v989_v41  ;;  %v960_v9 = vrot.slane %v959_v54, 4  ;;  %v955_v56 = vsel %vm13513_vm11, %v950_v39, %v954_v0  ;;  %v1624_v42 = vshll.u32 %v1279_v47, 16  ;;  %3763 = vrot.lane.b32.xlu1 %v11315_v50, %s13044_s30  ;;  %v431_v36 = vld [vmem:[%s13326_s12 + $0x78] sm:$0xf]  ;;  %v3916_v39 = vpop.permute.xlu1 %3915  ;;  %s13054_s30 = smov 112  }
 0x29c   : > { %v1613_v59 = vor.u32 %v1612_v5, %v1609_v62  ;;  %v1617_v7 = vor.u32 %v1616_v48, %v1615_v17  ;;  %v1623_v55 = vrot.slane %v1621_v26, 5  ;;  %v1072_v58 = vshll.u32 %v14856_v46, 16  ;;  %v432_v26 = vld [vmem:[%s13326_s12 + $0x7c] sm:$0xf]  ;;  %s13053_s12 = smov 80  }
 0x29d   : > { %v4361_v11 = vsel %vm4325_vm12, %v11295_v22, %v3756_v49  ;;  %v965_v38 = vsel %vm13513_vm11, %v960_v9, %v964_v12  ;;  %v1626_v34 = vrot.slane %v1624_v42, 6  ;;  %v1076_v53 = vshrl.u32 %v14856_v46, 16  ;;  %v3914_v9 = vpop.permute.xlu0 %3913 }
 0x29e   : > { %v11294_v44 = vcombine.low %v955_v56, %v965_v38  ;;  %v1630_v15 = vshrl.u32 %v14852_v35, 16  ;;  %v1614_v3 = vrot.slane %v1613_v59, 4  ;;  %v1619_v2 = vrot.slane %v1617_v7, 4 }
 0x29f   : > { %v1633_v50 = vshll.u32 %v14852_v35, 16  ;;  %v1627_v51 = vor.u32 %v1626_v34, %v1623_v55  ;;  %v1638_v0 = vrot.slane %v1076_v53, 5  ;;  %v1639_v25 = vrot.slane %v1072_v58, 6 }
 0x2a0   : > { %v4358_v8 = vsel %vm4325_vm12, %v11294_v44, %v3754_v20  ;;  %v1632_v10 = vrot.slane %v1630_v15, 5  ;;  %v1618_v28 = vsel %vm13360_vm7, %v1614_v3, %v1617_v7  ;;  %v1644_v18 = vshrl.u32 %v1280_v19, 16 }
 0x2a1   : > { %v1635_v40 = vrot.slane %v1633_v50, 6  ;;  %v1647_v43 = vshll.u32 %v1280_v19, 16  ;;  %v1628_v35 = vsel %vm13360_vm7, %v1619_v2, %v1627_v51  ;;  %v1640_v24 = vor.u32 %v1639_v25, %v1638_v0 }
 0x2a2   : > { %v4398_v63 = vsel %vm4374_vm13, %v4361_v11, %v3836_v1  ;;  %v4396_v49 = vsel %vm4374_vm13, %v4358_v8, %v3834_v29  ;;  %v11330_v54 = vcombine.low %v1618_v28, %v1628_v35  ;;  %v1646_v47 = vrot.slane %v1644_v18, 5  ;;  %v2098_v29 = vld [vmem:[#allocation2 + $0xc0] sm:$0xe]  ;;  %v3994_v28 = vpop.permute.xlu0 %3993 }
 0x2a3   : > { %v1636_v20 = vor.u32 %v1635_v40, %v1632_v10  ;;  %v1649_v16 = vrot.slane %v1647_v43, 6  ;;  %v1642_v41 = vrot.slane %v1640_v24, 4  ;;  %v2037_v12 = vshrl.u32 %v1694_v57, 16 }
 0x2a4   : > { %v2040_v61 = vshll.u32 %v1694_v57, 16  ;;  %v2046_v22 = vshll.u32 %v1695_v37, 16  ;;  %3841 = vrot.lane.b32.xlu0 %v11330_v54, %s13045_s9  ;;  %v2050_v17 = vshrl.u32 %v1695_v37, 16  ;;  %v2056_v48 = vshll.u32 %v1696_v45, 16  ;;  %v3996_v57 = vpop.permute.xlu1 %3995 }
 0x2a5   : > { %v1637_v62 = vrot.slane %v1636_v20, 4  ;;  %v1650_v5 = vor.u32 %v1649_v16, %v1646_v47  ;;  %v2039_v11 = vrot.slane %v2037_v12, 4  ;;  %v543_v42 = vrot.slane %v431_v36, 7 }
 0x2a6   : > { %v2042_v56 = vrot.slane %v2040_v61, 5  ;;  %v2048_v38 = vrot.slane %v2046_v22, 5  ;;  %v2052_v7 = vrot.slane %v2050_v17, 4  ;;  %v2058_v55 = vrot.slane %v2056_v48, 5 }
 0x2a7   : > { %v1641_v44 = vsel %vm13360_vm7, %v1637_v62, %v1640_v24  ;;  %v1651_v59 = vsel %vm13360_vm7, %v1642_v41, %v1650_v5  ;;  %v544_v15 = vrot.slane %v543_v42, 4  ;;  %v545_v1 = vrot.slane %v432_v26, 7  ;;  %641 = vst [vmem:[#allocation2 + $0xcc] sm:$0xe] %v543_v42  ;;  %v2274_v24 = vld [vmem:[#allocation2 + $0xc8] sm:$0x3] }
 0x2a8   : > { %v11331_v34 = vcombine.low %v1641_v44, %v1651_v59  ;;  %v2043_v19 = vor.u32 %v2042_v56, %v2039_v11  ;;  %v2053_v8 = vor.u32 %v2052_v7, %v2048_v38  ;;  %v4431_v3 = vsel %vm4407_vm14, %v4398_v63, %v3916_v39  ;;  %v4076_v7 = vpop.permute.xlu1 %4075 }
 0x2a9   : > { %v4429_v2 = vsel %vm4407_vm14, %v4396_v49, %v3914_v9  ;;  %v11266_v50 = vrot.slane %v2098_v29, 9  ;;  %v546_v10 = vsel %vm13368_vm8, %v544_v15, %v545_v1  ;;  %v547_v0 = vrot.slane %v545_v1, 4 }
 0x2aa   : > { %3843 = vrot.lane.b32.xlu1 %v11331_v34, %s13045_s9  ;;  %v2044_v51 = vrot.slane %v2043_v19, 4  ;;  %v2248_v25 = vrot.slane %v1695_v37, 5  ;;  %v2054_v40 = vrot.slane %v2053_v8, 4  ;;  %642 = vst [vmem:[#allocation2 + $0xd0] sm:$0xf] %v546_v10  ;;  %v2251_v18 = vrot.slane %v1696_v45, 5 }
 0x2ab   : > { %v4464_v43 = vsel %vm4440_vm15, %v4431_v3, %v3996_v57  ;;  %v14934_v35 = vsel %vm4440_vm15, %v4429_v2, %v3994_v28  ;;  %643 = vst [vmem:[#allocation2 + $0xd4] sm:$0x1] %v547_v0  ;;  %v2599_v37 = vshrl.u32 %v2098_v29, 16  ;;  %v2602_v47 = vshll.u32 %v2098_v29, 16 }
 0x2ac   : > { %v2049_v63 = vsel %vm13513_vm11, %v2044_v51, %v2048_v38  ;;  %v2249_v49 = vsel %vm13353_vm6, %v11266_v50, %v2248_v25  ;;  %v2250_v54 = vrot.slane %v2248_v25, 4  ;;  %v2059_v20 = vsel %vm13513_vm11, %v2054_v40, %v2058_v55 }
 0x2ad   : > { %v2607_v45 = vrot.slane %v2050_v17, 5  ;;  %v2608_v16 = vrot.slane %v2046_v22, 6  ;;  %v11346_v36 = vcombine.low %v2049_v63, %v2059_v20  ;;  %v2601_v12 = vrot.slane %v2599_v37, 5 }
 0x2ae   : > { %v2252_v41 = vsel %vm13353_vm6, %v2250_v54, %v2251_v18  ;;  %v2613_v61 = vshrl.u32 %v2274_v24, 16  ;;  %v1697_v39 = vld [vmem:[#allocation2 + $0xcc] sm:$0xf]  ;;  %v2604_v5 = vrot.slane %v2602_v47, 6  ;;  %v2616_v26 = vshll.u32 %v2274_v24, 16 }
 0x2af   : > { %v11362_v9 = vcombine.low %v2249_v49, %v2252_v41  ;;  %v2099_v62 = vld [vmem:[#allocation2 + $0xcc] sm:$0xe]  ;;  %v2609_v48 = vor.u32 %v2608_v16, %v2607_v45  ;;  %3921 = vrot.lane.b32.xlu0 %v11346_v36, %s13048_s14  ;;  %v2061_v11 = vshrl.u32 %v1697_v39, 16  ;;  %v2064_v56 = vshll.u32 %v1697_v39, 16 }
 0x2b0   : > { %v11267_v38 = vrot.slane %v2099_v62, 9  ;;  %v2615_v42 = vrot.slane %v2613_v61, 5  ;;  %v2605_v17 = vor.u32 %v2604_v5, %v2601_v12  ;;  %v2618_v44 = vrot.slane %v2616_v26, 6  ;;  %v2687_v41 = vld [vmem:[#allocation2 + $0xcc] sm:$0xf] }
 0x2b1   : > { %v2611_v22 = vrot.slane %v2609_v48, 4  ;;  %v2622_v59 = vshrl.u32 %v2099_v62, 16  ;;  %v1698_v55 = vld [vmem:[#allocation2 + $0xd0] sm:$0xf]  ;;  %v2063_v34 = vrot.slane %v2061_v11, 4  ;;  %v2066_v19 = vrot.slane %v2064_v56, 5 }
 0x2b2   : > { %v2625_v15 = vshll.u32 %v2099_v62, 16  ;;  %v14946_v1 = vsel %vm4473_vm0, %v4464_v43, %v4076_v7  ;;  %v1699_v29 = vld [vmem:[#allocation2 + $0xd4] sm:$0x1]  ;;  %v2070_v8 = vshll.u32 %v1698_v55, 16  ;;  %v2074_v3 = vshrl.u32 %v1698_v55, 16  ;;  %v14953_v43 = vpop.f32.mrb[0].mxu0 }
 0x2b3   : > { %v2255_v2 = vrot.slane %v1698_v55, 5  ;;  %v2606_v50 = vrot.slane %v2605_v17, 4  ;;  %v2067_v51 = vor.u32 %v2066_v19, %v2063_v34  ;;  %v2080_v10 = vshll.u32 %v1699_v29, 16  ;;  %4001 = vrot.lane.b32.xlu0 %v11362_v9, %s13046_s13  ;;  %v2275_v37 = vld [vmem:[#allocation2 + $0xd4] sm:$0x3]  ;;  %v14959_v20 = vpop.f32.mrb[1].mxu0 }
 0x2b4   : > { %v2258_v0 = vrot.slane %v1699_v29, 5  ;;  %v2619_v25 = vor.u32 %v2618_v44, %v2615_v42  ;;  %v2072_v57 = vrot.slane %v2070_v8, 5  ;;  %v2076_v28 = vrot.slane %v2074_v3, 4  ;;  %v14963_v12 = vpop.f32.mrb[2].mxu0  ;;  %v2690_v29 = vld [vmem:[#allocation2 + $0xd8] sm:$0xf] }
 0x2b5   : > { %v14951_v40 = vsel %vm13353_vm6, %v11267_v38, %v2255_v2  ;;  %v2257_v18 = vrot.slane %v2255_v2, 4  ;;  %v2068_v24 = vrot.slane %v2067_v51, 4  ;;  %v2082_v63 = vrot.slane %v2080_v10, 5  ;;  %v14968_v5 = vpop.f32.mrb[3].mxu0  ;;  %v4074_v38 = vpop.permute.xlu0 %4073 }
 0x2b6   : > { %v2610_v49 = vsel %vm13360_vm7, %v2606_v50, %v2609_v48  ;;  %v2620_v54 = vsel %vm13360_vm7, %v2611_v22, %v2619_v25  ;;  %v2077_v47 = vor.u32 %v2076_v28, %v2072_v57  ;;  %v2624_v36 = vrot.slane %v2622_v59, 5  ;;  %v14973_v22 = vld [vmem:[#allocation2 + $0xd0] sm:$0xf] }
 0x2b7   : > { %v2259_v45 = vsel %vm13353_vm6, %v2257_v18, %v2258_v0  ;;  %v11378_v16 = vcombine.low %v2610_v49, %v2620_v54  ;;  %v2073_v61 = vsel %vm13513_vm11, %v2068_v24, %v2072_v57  ;;  %v2627_v9 = vrot.slane %v2625_v15, 6  ;;  %v14977_v15 = vld [vmem:[#allocation2 + $0xd4] sm:$0x1]  ;;  %v4156_v24 = vpop.permute.xlu1 %4155 }
 0x2b8   : > { %v11363_v39 = vcombine.low %v14951_v40, %v2259_v45  ;;  %v2630_v62 = vrot.slane %v2074_v3, 5  ;;  %v2078_v48 = vrot.slane %v2077_v47, 4  ;;  %v2631_v26 = vrot.slane %v2070_v8, 6  ;;  %v14985_v40 = vld [vmem:[#allocation2 + $0xdc] sm:$0xf] }
 0x2b9   : > { %4081 = vrot.lane.b32.xlu0 %v11378_v16, %s13049_s8  ;;  %v2636_v11 = vshrl.u32 %v2275_v37, 16  ;;  %v2639_v56 = vshll.u32 %v2275_v37, 16  ;;  %v2628_v42 = vor.u32 %v2627_v9, %v2624_v36  ;;  %v4495_v17 = vsel %vm4473_vm0, %v14934_v35, %v4074_v38  ;;  %v2692_v37 = vld [vmem:[#allocation2 + $0xe0] sm:$0x1]  ;;  %v4154_v45 = vpop.permute.xlu0 %4153 }
 0x2ba   : > { %v3030_v44 = vshrl.u32 %v2687_v41, 16  ;;  %v3033_v59 = vshll.u32 %v2687_v41, 16  ;;  %v2083_v7 = vsel %vm13513_vm11, %v2078_v48, %v2082_v63  ;;  %v2632_v55 = vor.u32 %v2631_v26, %v2630_v62 }
 0x2bb   : > { %v2638_v34 = vrot.slane %v2636_v11, 5  ;;  %v2641_v19 = vrot.slane %v2639_v56, 6  ;;  %v11347_v8 = vcombine.low %v2073_v61, %v2083_v7  ;;  %v2629_v3 = vrot.slane %v2628_v42, 4 }
 0x2bc   : > { %v3032_v2 = vrot.slane %v3030_v44, 4  ;;  %v3035_v50 = vrot.slane %v3033_v59, 5  ;;  %v2634_v51 = vrot.slane %v2632_v55, 4  ;;  %v3039_v35 = vshll.u32 %v14973_v22, 16 }
 0x2bd   : > { %v2642_v10 = vor.u32 %v2641_v19, %v2638_v34  ;;  %v3043_v0 = vshrl.u32 %v14973_v22, 16  ;;  %3923 = vrot.lane.b32.xlu1 %v11347_v8, %s13048_s14  ;;  %v2633_v25 = vsel %vm13360_vm7, %v2629_v3, %v2632_v55  ;;  %v3049_v28 = vshll.u32 %v14977_v15, 16  ;;  %v3091_v34 = vld [vmem:[#allocation2 + $0xcc] sm:$0xe]  ;;  %v3092_v3 = vld [vmem:[#allocation2 + $0xd8] sm:$0xe] }
 0x2be   : > { %v3036_v57 = vor.u32 %v3035_v50, %v3032_v2  ;;  %v3054_v18 = vshrl.u32 %v2690_v29, 16  ;;  %v3041_v49 = vrot.slane %v3039_v35, 5  ;;  %v3057_v47 = vshll.u32 %v2690_v29, 16  ;;  %v4236_v2 = vpop.permute.xlu1 %4235 }
 0x2bf   : > { %v2643_v63 = vsel %vm13360_vm7, %v2634_v51, %v2642_v10  ;;  %v3045_v54 = vrot.slane %v3043_v0, 4  ;;  %v3051_v41 = vrot.slane %v3049_v28, 5  ;;  %v3063_v48 = vshll.u32 %v14985_v40, 16 }
 0x2c0   : > { %v11379_v16 = vcombine.low %v2633_v25, %v2643_v63  ;;  %v3037_v36 = vrot.slane %v3036_v57, 4  ;;  %v3056_v61 = vrot.slane %v3054_v18, 4  ;;  %v3059_v62 = vrot.slane %v3057_v47, 5 }
 0x2c1   : > { %v3046_v9 = vor.u32 %v3045_v54, %v3041_v49  ;;  %v3067_v26 = vshrl.u32 %v14985_v40, 16  ;;  %4003 = vrot.lane.b32.xlu1 %v11363_v39, %s13046_s13  ;;  %v3073_v56 = vshll.u32 %v2692_v37, 16  ;;  %v4530_v38 = vsel %vm4506_vm1, %v14946_v1, %v4156_v24 }
 0x2c2   : > { %v3042_v11 = vsel %vm13513_vm11, %v3037_v36, %v3041_v49  ;;  %v4528_v42 = vsel %vm4506_vm1, %v4495_v17, %v4154_v45  ;;  %v3060_v59 = vor.u32 %v3059_v62, %v3056_v61  ;;  %v3065_v7 = vrot.slane %v3063_v48, 5  ;;  %v4234_v17 = vpop.permute.xlu0 %4233  ;;  %v3267_v36 = vld [vmem:[#allocation2 + $0xd4] sm:$0x3] }
 0x2c3   : > { %v3047_v44 = vrot.slane %v3046_v9, 4  ;;  %v3069_v55 = vrot.slane %v3067_v26, 4  ;;  %v3075_v19 = vrot.slane %v3073_v56, 5  ;;  %v11282_v29 = vrot.slane %v3091_v34, 9 }
 0x2c4   : > { %v3241_v8 = vrot.slane %v14973_v22, 5  ;;  %v3244_v39 = vrot.slane %v14977_v15, 5  ;;  %v3061_v51 = vrot.slane %v3060_v59, 4  ;;  %v11283_v10 = vrot.slane %v3092_v3, 9 }
 0x2c5   : > { %v3052_v50 = vsel %vm13513_vm11, %v3047_v44, %v3051_v41  ;;  %v3070_v1 = vor.u32 %v3069_v55, %v3065_v7  ;;  %4083 = vrot.lane.b32.xlu1 %v11379_v16, %s13049_s8  ;;  %v3248_v18 = vrot.slane %v14985_v40, 5  ;;  %v3251_v63 = vrot.slane %v2692_v37, 5  ;;  %s353_s8 = scalar_lea.vmem [#allocation13], %s13322_s21 }
 0x2c6   : > { %v11394_v25 = vcombine.low %v3042_v11, %v3052_v50  ;;  %v3242_v57 = vsel %vm13353_vm6, %v11282_v29, %v3241_v8  ;;  %v3243_v28 = vrot.slane %v3241_v8, 4  ;;  %v3066_v15 = vsel %vm13513_vm11, %v3061_v51, %v3065_v7  ;;  %v4316_v50 = vpop.permute.xlu1 %4315  ;;  %v4314_v22 = vpop.permute.xlu0 %4313  ;;  %s11116_s10 = sshll.u32 %s353_s8, 4  ;;  %s17766_s10 = int_to_ptr.vmem [resolvable:$true] %s11116_s10 }
 0x2c7   : > { %v3071_v24 = vrot.slane %v3070_v1, 4  ;;  %v4563_v49 = vsel %vm4539_vm2, %v4530_v38, %v4236_v2  ;;  %v3249_v47 = vsel %vm13353_vm6, %v11283_v10, %v3248_v18  ;;  %v3250_v45 = vrot.slane %v3248_v18, 4  ;;  %v687_v18 = vld [vmem:[#allocation2 + $0x9c] sm:$0xf]  ;;  %s12958_s14 = scalar_lea.vmem %s17766_s10, 16 }
 0x2c8   : > { %4161 = vrot.lane.b32.xlu0 %v11394_v25, %s13050_s17  ;;  %v3245_v54 = vsel %vm13353_vm6, %v3243_v28, %v3244_v39  ;;  %v4561_v16 = vsel %vm4539_vm2, %v4528_v42, %v4234_v17  ;;  %v3592_v61 = vshrl.u32 %v3091_v34, 16  ;;  %v3595_v37 = vshll.u32 %v3091_v34, 16  ;;  %v3268_v34 = vld [vmem:[#allocation2 + $0xe0] sm:$0x3]  ;;  %p12959_p10 = scmp.ne.s32.totalorder %s17766_s10, %s12958_s14 }
 0x2c9   : > { %v3076_v40 = vsel %vm13513_vm11, %v3071_v24, %v3075_v19  ;;  %v11410_v41 = vcombine.low %v3242_v57, %v3245_v54  ;;  %v3252_v62 = vsel %vm13353_vm6, %v3250_v45, %v3251_v63  ;;  %v3600_v11 = vrot.slane %v3043_v0, 5 }
 0x2ca   : > { %v11395_v9 = vcombine.low %v3066_v15, %v3076_v40  ;;  %v3601_v56 = vrot.slane %v3039_v35, 6  ;;  %v11411_v38 = vcombine.low %v3249_v47, %v3252_v62  ;;  %v3594_v44 = vrot.slane %v3592_v61, 5  ;;  %p12960_p5 = pnand %p12959_p10, %p13270_p3 }
 0x2cb   : > { %v3597_v42 = vrot.slane %v3595_v37, 6  ;;  %v3606_v59 = vshrl.u32 %v3267_v36, 16  ;;  %v3609_v55 = vshll.u32 %v3267_v36, 16  ;;  %v3615_v19 = vshrl.u32 %v3092_v3, 16 }
 0x2cc   : > { %4163 = vrot.lane.b32.xlu1 %v11395_v9, %s13050_s17  ;;  %4241 = vrot.lane.b32.xlu0 %v11410_v41, %s13047_s15  ;;  %v3602_v7 = vor.u32 %v3601_v56, %v3600_v11  ;;  %v3618_v29 = vshll.u32 %v3092_v3, 16  ;;  %v3623_v2 = vrot.slane %v3067_v26, 5  ;;  %v3624_v0 = vrot.slane %v3063_v48, 6  ;;  %p12961_p7 = pneg %p12960_p5 }
 0x2cd   : > { %v3598_v8 = vor.u32 %v3597_v42, %v3594_v44  ;;  %v3608_v39 = vrot.slane %v3606_v59, 5  ;;  %v3611_v51 = vrot.slane %v3609_v55, 6  ;;  %v3617_v1 = vrot.slane %v3615_v19, 5  ;;  %v12776_v44 = vld [vmem:[#allocation2 + $0xa4] sm:$0x1] }
 0x2ce   : > { %v3604_v35 = vrot.slane %v3602_v7, 4  ;;  %v3620_v10 = vrot.slane %v3618_v29, 6  ;;  %v3625_v25 = vor.u32 %v3624_v0, %v3623_v2  ;;  %v3629_v57 = vshrl.u32 %v3268_v34, 16  ;;  %v690_v59 = vld [vmem:[#allocation2 + $0xa8] sm:$0xf] }
 0x2cf   : > { %v3599_v17 = vrot.slane %v3598_v8, 4  ;;  %v3632_v28 = vshll.u32 %v3268_v34, 16  ;;  %v3612_v15 = vor.u32 %v3611_v51, %v3608_v39  ;;  %v4596_v3 = vsel %vm4572_vm3, %v4563_v49, %v4316_v50  ;;  %v15056_v55 = vld [vmem:[%s17812_s4 + $0x1] ss:$0 sm:$0xff] }
 0x2d0   : > { %4243 = vrot.lane.b32.xlu1 %v11411_v38, %s13047_s15  ;;  %v3621_v24 = vor.u32 %v3620_v10, %v3617_v1  ;;  %v4594_v26 = vsel %vm4572_vm3, %v4561_v16, %v4314_v22  ;;  %v3627_v63 = vrot.slane %v3625_v25, 4  ;;  %v3631_v54 = vrot.slane %v3629_v57, 5  ;;  %s11104_s15 = scalar_lea.sflag [#allocation6], %s13322_s21 }
 0x2d1   : > { %v3603_v48 = vsel %vm13360_vm7, %v3599_v17, %v3602_v7  ;;  %v3634_v47 = vrot.slane %v3632_v28, 6  ;;  %12435 = vmatprep.mubr.msk.bf16.mxu1 %vm4605_vm4, %v4594_v26  ;;  %v3613_v45 = vsel %vm13360_vm7, %v3604_v35, %v3612_v15  ;;  %v991_v40 = vshrl.u32 %v687_v18, 16  ;;  %v15051_v7 = vpop.permute.xlu0 %3757  ;;  %v5273_v15 = vld [vmem:[#allocation2 + $0x4] sm:$0xf] }
 0x2d2   : > { %v3622_v36 = vrot.slane %v3621_v24, 4  ;;  %12436 = vmatmul.mubr.msk.bf16.gmra.mrb[4].mxu1 %vm4605_vm4, %v4596_v3  ;;  %v994_v41 = vshll.u32 %v687_v18, 16  ;;  %v11426_v61 = vcombine.low %v3603_v48, %v3613_v45  ;;  %v1002_v16 = vrot.slane %v1000_v4, 5  ;;  %v15049_v4 = vld [vmem:[%s17812_s4] ss:$0 sm:$0xff] }
 0x2d3   : > { %v3635_v49 = vor.u32 %v3634_v47, %v3631_v54  ;;  %v1006_v37 = vrot.slane %v1004_v32, 4  ;;  %v993_v62 = vrot.slane %v991_v40, 4  ;;  %v1010_v42 = vshll.u32 %v12776_v44, 16  ;;  %v5497_v24 = vld [vmem:[#allocation2 + $0x8] sm:$0x3] }
 0x2d4   : > { %v3626_v9 = vsel %vm13360_vm7, %v3622_v36, %v3625_v25  ;;  %v996_v11 = vrot.slane %v994_v41, 5  ;;  %4321 = vrot.lane.b32.xlu0 %v11426_v61, %s13051_s20  ;;  %v1015_v23 = vshrl.u32 %v690_v59, 16  ;;  %v4902_v34 = vmul.f32 %v14953_v43, %v15049_v4  ;;  %v5305_v54 = vld [vmem:[#allocation2 + $0x8] sm:$0x1]  ;;  %v15101_v47 = vld [vmem:[#allocation2 + $0xb0] sm:$0x1] }
 0x2d5   : > { %v3636_v56 = vsel %vm13360_vm7, %v3627_v63, %v3635_v49  ;;  %v1007_v38 = vor.u32 %v1006_v37, %v1002_v16  ;;  %v4900_v19 = vmul.f32 %v15049_v4, %v14959_v20  ;;  %v1012_v8 = vrot.slane %v1010_v42, 5  ;;  %v15084_v25 = vpop.permute.xlu0 %3837  ;;  %v5304_v63 = vld [vmem:[#allocation2] sm:$0xe]  ;;  %v5306_v61 = vld [vmem:[#allocation2 + $0xc] sm:$0xe] }
 0x2d6   : > { %v11427_v33 = vcombine.low %v3626_v9, %v3636_v56  ;;  %v997_v32 = vor.u32 %v996_v11, %v993_v62  ;;  %v1018_v39 = vshll.u32 %v690_v59, 16  ;;  %v4903_v2 = vmul.f32 %v14963_v12, %v15049_v4  ;;  %v5275_v62 = vld [vmem:[#allocation2 + $0x10] sm:$0xf]  ;;  %v5307_v11 = vld [vmem:[#allocation2 + $0x14] sm:$0x1] }
 0x2d7   : > { %v1008_v29 = vrot.slane %v1007_v38, 4  ;;  %v4938_v50 = vadd.f32 %v15056_v55, %v4902_v34  ;;  %v4936_v22 = vadd.f32 %v15056_v55, %v4900_v19  ;;  %v15070_v51 = vrot.slane %v1024_v60, 5  ;;  %v5496_v60 = vld [vmem:[#allocation2] sm:$0xc] }
 0x2d8   : > { %4323 = vrot.lane.b32.xlu1 %v11427_v33, %s13051_s20  ;;  %v998_v0 = vrot.slane %v997_v32, 4  ;;  %v4939_v35 = vadd.f32 %v15056_v55, %v4903_v2  ;;  %v4901_v1 = vmul.f32 %v15049_v4, %v14968_v5  ;;  %v15080_v10 = vrot.slane %v1015_v23, 4 }
 0x2d9   : > { %v15072_v43 = vmax.f32 %v4938_v50, 0.0  ;;  %v15074_v20 = vmax.f32 %v4936_v22, 0.0  ;;  %v1013_v12 = vsel %vm13513_vm11, %v1008_v29, %v1012_v8  ;;  %v15082_v17 = vrot.slane %v1018_v39, 5  ;;  %v5498_v8 = vld [vmem:[#allocation2 + $0xc] sm:$0xc] }
 0x2da   : > { %v15086_v57 = vmax.f32 %v4939_v35, 0.0  ;;  %v1003_v28 = vsel %vm13513_vm11, %v998_v0, %v1002_v16  ;;  %v15096_v3 = vrot.slane %v1028_v6, 4  ;;  %v4937_v48 = vadd.f32 %v15056_v55, %v4901_v1  ;;  %v15127_v35 = vpop.permute.xlu1 %3759 }
 0x2db   : > { %17904 = vst [vmem:[#allocation20_spill] sm:$0xff] %v15072_v43  ;;  %17905 = vst [vmem:[#allocation21_spill] sm:$0xff] %v15074_v20  ;;  %v12024_v18 = vpack.c.bf16 %v15072_v43, %v15072_v43  ;;  %v12022_v5 = vpack.c.bf16 %v15074_v20, %v15074_v20  ;;  %vm5561_vm7 = vcmask 1045508   ;;  %v1034_v45 = vshll.u32 %v15101_v47, 16  ;;  %v3918_v32 = vpop.permute.xlu0 %3917 }
 0x2dc   : > { %17906 = vst [vmem:[#allocation22_spill] sm:$0xff] %v15086_v57  ;;  %v12025_v26 = vpack.c.bf16 %v15086_v57, %v15086_v57  ;;  %v11486_v41 = vrot.slane %v5496_v60, 10  ;;  %v15104_v49 = vpop.f32.mrb[4].mxu0  ;;  %v11296_v13 = vcombine.low %v1003_v28, %v1013_v12  ;;  %v1021_v6 = vor.u32 %v15082_v17, %v15080_v10  ;;  %vm15111_vm9 = vmor %vm5560_vm5, %vm5561_vm7 }
 0x2dd   : > { %v5101_v36 = vrot.slane %v12024_v18, 7  ;;  %v5096_v40 = vrot.slane %v12022_v5, 7  ;;  %v15108_v37 = vmax.f32 %v4937_v48, 0.0  ;;  %v15115_v56 = vpop.f32.mrb[5].mxu0  ;;  %v5565_v42 = vrot.slane %v5273_v15, 6 }
 0x2de   : > { %v5103_v16 = vrot.slane %v12025_v26, 7  ;;  %v5568_v59 = vrot.slane %v5497_v24, 6  ;;  %v15117_v33 = vpop.f32.mrb[6].mxu0  ;;  %v11470_v19 = vrot.slane %v5304_v63, 9  ;;  %v5386_v29 = vrot.slane %v5273_v15, 5 }
 0x2df   : > { %17907 = vst [vmem:[#allocation23_spill] sm:$0xff] %v15108_v37  ;;  %v5102_v38 = vrot.slane %v5101_v36, 4  ;;  %5227 = vst [vmem:[#allocation2 + $0x24] sm:$0xe] %v5101_v36  ;;  %v5097_v44 = vrot.slane %v5096_v40, 4  ;;  %v12023_v34 = vpack.c.bf16 %v15108_v37, %v15108_v37  ;;  %v15121_v39 = vpop.f32.mrb[7].mxu0  ;;  %v5566_v0 = vsel %vm15111_vm9, %v11486_v41, %v5565_v42 }
 0x2e0   : > { %5224 = vst [vmem:[#allocation2 + $0x18] sm:$0xe] %v5096_v40  ;;  %v5105_v23 = vrot.slane %v5103_v16, 4  ;;  %v5567_v50 = vrot.slane %v5565_v42, 4  ;;  %v5389_v22 = vrot.slane %v5305_v54, 5  ;;  %v5387_v12 = vsel %vm13353_vm6, %v11470_v19, %v5386_v29 }
 0x2e1   : > { %v5104_v2 = vsel %vm13368_vm8, %v5102_v38, %v5103_v16  ;;  %v5098_v1 = vrot.slane %v12023_v34, 7  ;;  %v5388_v10 = vrot.slane %v5386_v29, 4  ;;  %v11471_v17 = vrot.slane %v5306_v61, 9  ;;  %v5499_v5 = vld [vmem:[#allocation2 + $0x14] sm:$0x3]  ;;  %v3998_v61 = vpop.permute.xlu0 %3997 }
 0x2e2   : > { %5228 = vst [vmem:[#allocation2 + $0x28] sm:$0xf] %v5104_v2  ;;  %5229 = vst [vmem:[#allocation2 + $0x2c] sm:$0x1] %v5105_v23  ;;  %v5569_v60 = vsel %vm15111_vm9, %v5567_v50, %v5568_v59  ;;  %v5393_v28 = vrot.slane %v5275_v62, 5  ;;  %v5396_v18 = vrot.slane %v5307_v11, 5  ;;  %v1031_v24 = vor.u32 %v15096_v3, %v15070_v51  ;;  %v3840_v23 = vpop.permute.xlu1 %3839 }
 0x2e3   : > { %v11487_v15 = vrot.slane %v5498_v8, 10  ;;  %v5099_v26 = vsel %vm13368_vm8, %v5097_v44, %v5098_v1  ;;  %v5100_v48 = vrot.slane %v5098_v1, 4  ;;  %v11582_v63 = vcombine.low %v5566_v0, %v5569_v60 }
 0x2e4   : > { %5225 = vst [vmem:[#allocation2 + $0x1c] sm:$0xf] %v5099_v26  ;;  %v5390_v54 = vsel %vm13353_vm6, %v5388_v10, %v5389_v22  ;;  %v5394_v36 = vsel %vm13353_vm6, %v11471_v17, %v5393_v28  ;;  %v5395_v40 = vrot.slane %v5393_v28, 4  ;;  %v5572_v41 = vrot.slane %v5275_v62, 6 }
 0x2e5   : > { %5226 = vst [vmem:[#allocation2 + $0x20] sm:$0x1] %v5100_v48  ;;  %6492 = vrot.lane.b32.xlu1 %v11582_v63, %s13046_s13  ;;  %v11566_v16 = vcombine.low %v5387_v12, %v5390_v54  ;;  %v5575_v3 = vrot.slane %v5499_v5, 6  ;;  %v4364_v11 = vsel %vm4325_vm12, %v11296_v13, %v15051_v7  ;;  %v1022_v59 = vrot.slane %v1021_v6, 4  ;;  %v4078_v47 = vpop.permute.xlu0 %4077 }
 0x2e6   : > { %v5397_v38 = vsel %vm13353_vm6, %v5395_v40, %v5396_v18  ;;  %v5573_v44 = vsel %vm15111_vm9, %v11487_v15, %v5572_v41  ;;  %v5574_v42 = vrot.slane %v5572_v41, 4  ;;  %v1032_v34 = vrot.slane %v1031_v24, 4  ;;  %v5677_v7 = vld [vmem:[#allocation2 + $0x24] sm:$0xf] }
 0x2e7   : > { %6412 = vrot.lane.b32.xlu0 %v11566_v16, %s13045_s9  ;;  %v11567_v62 = vcombine.low %v5394_v36, %v5397_v38  ;;  %v1036_v19 = vrot.slane %v1034_v45, 5  ;;  %v4400_v8 = vsel %vm4374_vm13, %v4364_v11, %v15084_v25  ;;  %v1027_v0 = vsel %vm13513_vm11, %v1022_v59, %v15070_v51  ;;  %v5675_v45 = vld [vmem:[#allocation2 + $0x18] sm:$0xf] }
 0x2e8   : > { %v5576_v29 = vsel %vm15111_vm9, %v5574_v42, %v5575_v3  ;;  %v4433_v25 = vsel %vm4407_vm14, %v4400_v8, %v3918_v32  ;;  %v4906_v12 = vmul.f32 %v15104_v49, %v15049_v4  ;;  %v4904_v17 = vmul.f32 %v15049_v4, %v15115_v56 }
 0x2e9   : > { %v15153_v13 = vld [vmem:[#allocation2 + $0x28] sm:$0xf]  ;;  %6414 = vrot.lane.b32.xlu1 %v11567_v62, %s13045_s9  ;;  %v11583_v6 = vcombine.low %v5573_v44, %v5576_v29  ;;  %v1037_v22 = vsel %vm13513_vm11, %v1032_v34, %v1036_v19  ;;  %v3920_v10 = vpop.permute.xlu1 %3919  ;;  %v4466_v28 = vsel %vm4440_vm15, %v4433_v25, %v3998_v61  ;;  %v4907_v32 = vmul.f32 %v15117_v33, %v15049_v4 }
 0x2ea   : > { %v11599_v2 = vcombine.low %v5677_v7, %v15153_v13  ;;  %v4942_v51 = vadd.f32 %v15056_v55, %v4906_v12  ;;  %v11297_v60 = vcombine.low %v1027_v0, %v1037_v22  ;;  %v4905_v18 = vmul.f32 %v15049_v4, %v15121_v39 }
 0x2eb   : > { %6494 = vrot.lane.b32.xlu0 %v11583_v6, %s13046_s13  ;;  %v15163_v50 = vld [vmem:[#allocation2 + $0x1c] sm:$0xf]  ;;  %v4940_v5 = vadd.f32 %v15056_v55, %v4904_v17  ;;  %v4943_v24 = vadd.f32 %v15056_v55, %v4907_v32  ;;  %v4499_v26 = vsel %vm4473_vm0, %v4466_v28, %v4078_v47 }
 0x2ec   : > { %v11598_v1 = vcombine.low %v5675_v45, %v15163_v50  ;;  %v15181_v49 = vmax.f32 %v4942_v51, 0.0  ;;  %v4941_v56 = vadd.f32 %v15056_v55, %v4905_v18  ;;  %v4367_v33 = vsel %vm4325_vm12, %v11297_v60, %v15127_v35 }
 0x2ed   : > { %6590 = vrot.lane.b32.xlu1 %v11599_v2, %s13050_s17  ;;  %v15189_v63 = vmax.f32 %v4940_v5, 0.0  ;;  %v4000_v39 = vpop.permute.xlu1 %3999  ;;  %v15193_v54 = vmax.f32 %v4943_v24, 0.0  ;;  %v4402_v35 = vsel %vm4374_vm13, %v4367_v33, %v3840_v23  ;;  %v693_v5 = vld [vmem:[#allocation2 + $0xb4] sm:$0xf] }
 0x2ee   : > { %17910 = vst [vmem:[#allocation24_spill] sm:$0xff] %v15181_v49  ;;  %v12028_v48 = vpack.c.bf16 %v15181_v49, %v15181_v49  ;;  %v15195_v36 = vmax.f32 %v4941_v56, 0.0  ;;  %v4435_v19 = vsel %vm4407_vm14, %v4402_v35, %v3920_v10 }
 0x2ef   : > { %6588 = vrot.lane.b32.xlu0 %v11598_v1, %s13050_s17  ;;  %17911 = vst [vmem:[#allocation25_spill] sm:$0xff] %v15189_v63  ;;  %17912 = vst [vmem:[#allocation26_spill] sm:$0xff] %v15193_v54  ;;  %v12026_v41 = vpack.c.bf16 %v15189_v63, %v15189_v63  ;;  %v12029_v3 = vpack.c.bf16 %v15193_v54, %v15193_v54  ;;  %v4468_v47 = vsel %vm4440_vm15, %v4435_v19, %v4000_v39 }
 0x2f0   : > { %17913 = vst [vmem:[#allocation27_spill] sm:$0xff] %v15195_v36  ;;  %v5111_v40 = vrot.slane %v12028_v48, 7  ;;  %v12027_v11 = vpack.c.bf16 %v15195_v36, %v15195_v36 }
 0x2f1   : > { %v5106_v44 = vrot.slane %v12026_v41, 7  ;;  %v5113_v42 = vrot.slane %v12029_v3, 7  ;;  %v4080_v29 = vpop.permute.xlu1 %4079  ;;  %v1042_v41 = vshll.u32 %v693_v5, 16 }
 0x2f2   : > { %v5112_v38 = vrot.slane %v5111_v40, 4  ;;  %5233 = vst [vmem:[#allocation2 + $0x3c] sm:$0xe] %v5111_v40  ;;  %v5108_v59 = vrot.slane %v12027_v11, 7  ;;  %v4501_v45 = vsel %vm4473_vm0, %v4468_v47, %v4080_v29  ;;  %v1039_v40 = vshrl.u32 %v693_v5, 16 }
 0x2f3   : > { %v4158_v15 = vpop.permute.xlu0 %4157  ;;  %v5107_v34 = vrot.slane %v5106_v44, 4  ;;  %5230 = vst [vmem:[#allocation2 + $0x30] sm:$0xe] %v5106_v44  ;;  %v5115_v8 = vrot.slane %v5113_v42, 4  ;;  %v696_v44 = vld [vmem:[#allocation2 + $0xc0] sm:$0xf] }
 0x2f4   : > { %v4532_v61 = vsel %vm4506_vm1, %v4499_v26, %v4158_v15  ;;  %v5114_v7 = vsel %vm13368_vm8, %v5112_v38, %v5113_v42  ;;  %v5110_v6 = vrot.slane %v5108_v59, 4  ;;  %v1066_v47 = vshll.u32 %v696_v44, 16 }
 0x2f5   : > { %5234 = vst [vmem:[#allocation2 + $0x40] sm:$0xf] %v5114_v7  ;;  %v5109_v23 = vsel %vm13368_vm8, %v5107_v34, %v5108_v59  ;;  %5235 = vst [vmem:[#allocation2 + $0x44] sm:$0x1] %v5115_v8  ;;  %v1044_v34 = vrot.slane %v1042_v41, 5  ;;  %v1050_v8 = vrot.slane %v1048_v14, 5 }
 0x2f6   : > { %5231 = vst [vmem:[#allocation2 + $0x34] sm:$0xf] %v5109_v23  ;;  %5232 = vst [vmem:[#allocation2 + $0x38] sm:$0x1] %v5110_v6  ;;  %v1054_v6 = vrot.slane %v1052_v30, 4 }
 0x2f7   : > { %v4238_v16 = vpop.permute.xlu0 %4237  ;;  %v12778_v30 = vld [vmem:[#allocation2 + $0xbc] sm:$0x1] }
 0x2f8   : > { %v4565_v62 = vsel %vm4539_vm2, %v4532_v61, %v4238_v16  ;;  %v1055_v52 = vor.u32 %v1054_v6, %v1050_v8 }
 0x2fc   : > { %v4318_v2 = vpop.permute.xlu0 %4317 }
 0x2fd   : > { %v4598_v0 = vsel %vm4572_vm3, %v4565_v62, %v4318_v2  ;;  %v1041_v62 = vrot.slane %v1039_v40, 4 }
 0x2fe   : > { %12439 = vmatprep.mubr.msk.bf16.mxu1 %vm4605_vm4, %v4598_v0  ;;  %v1063_v0 = vshrl.u32 %v696_v44, 16 }
 0x301   : > { %v4160_v22 = vpop.permute.xlu1 %4159 }
 0x302   : > { %v4534_v25 = vsel %vm4506_vm1, %v4501_v45, %v4160_v22 }
 0x305   : > { %v4240_v1 = vpop.permute.xlu1 %4239  ;;  %v15241_v19 = vpop.permute.xlu0 %3761 }
 0x306   : > { %v4567_v12 = vsel %vm4539_vm2, %v4534_v25, %v4240_v1 }
 0x309   : > { %v4320_v10 = vpop.permute.xlu1 %4319 }
 0x30a   : > { %v4600_v51 = vsel %vm4572_vm3, %v4567_v12, %v4320_v10  ;;  %v1045_v12 = vor.u32 %v1044_v34, %v1041_v62 }
 0x30b   : > { %12440 = vmatmul.mubr.msk.bf16.gmra.mrb[8].mxu1 %vm4605_vm4, %v4600_v51  ;;  %v1058_v51 = vshll.u32 %v12778_v30, 16 }
 0x30d   : > { %v3764_v5 = vpop.permute.xlu1 %3763 }
 0x310   : > { %v12425_v17 = vpop.f32.mrb[8].mxu0 }
 0x311   : > { %v4910_v60 = vmul.f32 %v12425_v17, %v15049_v4  ;;  %v4801_v28 = vpop.f32.mrb[9].mxu0  ;;  %v1065_v17 = vrot.slane %v1063_v0, 4 }
 0x312   : > { %v4908_v32 = vmul.f32 %v15049_v4, %v4801_v28  ;;  %v12426_v18 = vpop.f32.mrb[10].mxu0  ;;  %v1074_v28 = vrot.slane %v1072_v58, 5 }
 0x313   : > { %v4946_v15 = vadd.f32 %v15056_v55, %v4910_v60  ;;  %v4911_v24 = vmul.f32 %v12426_v18, %v15049_v4  ;;  %v4804_v56 = vpop.f32.mrb[11].mxu0  ;;  %v1068_v60 = vrot.slane %v1066_v47, 5 }
 0x314   : > { %v4944_v26 = vadd.f32 %v15056_v55, %v4908_v32  ;;  %v4909_v48 = vmul.f32 %v15049_v4, %v4804_v56  ;;  %v1078_v32 = vrot.slane %v1076_v53, 4  ;;  %v1060_v56 = vrot.slane %v1058_v51, 5 }
 0x315   : > { %v15225_v33 = vmax.f32 %v4946_v15, 0.0  ;;  %v4947_v39 = vadd.f32 %v15056_v55, %v4911_v24  ;;  %v1046_v15 = vrot.slane %v1045_v12, 4  ;;  %v1056_v24 = vrot.slane %v1055_v52, 4 }
 0x316   : > { %v15228_v61 = vmax.f32 %v4944_v26, 0.0  ;;  %v4945_v16 = vadd.f32 %v15056_v55, %v4909_v48  ;;  %v3842_v18 = vpop.permute.xlu0 %3841  ;;  %v12779_v26 = vld [vmem:[#allocation2 + $0xc8] sm:$0x1]  ;;  %v1079_v40 = vor.u32 %v1078_v32, %v1074_v28 }
 0x317   : > { %17914 = vst [vmem:[#allocation28_spill] sm:$0xff] %v15225_v33  ;;  %v12032_v3 = vpack.c.bf16 %v15225_v33, %v15225_v33  ;;  %v15233_v11 = vmax.f32 %v4947_v39, 0.0  ;;  %v1082_v48 = vshll.u32 %v12779_v26, 16  ;;  %v1069_v39 = vor.u32 %v1068_v60, %v1065_v17 }
 0x318   : > { %17915 = vst [vmem:[#allocation29_spill] sm:$0xff] %v15228_v61  ;;  %v12030_v35 = vpack.c.bf16 %v15228_v61, %v15228_v61  ;;  %v15237_v38 = vmax.f32 %v4945_v16, 0.0  ;;  %v1051_v58 = vsel %vm13513_vm11, %v1046_v15, %v1050_v8  ;;  %v1061_v44 = vsel %vm13513_vm11, %v1056_v24, %v1060_v56 }
 0x319   : > { %17916 = vst [vmem:[#allocation30_spill] sm:$0xff] %v15233_v11  ;;  %v5121_v42 = vrot.slane %v12032_v3, 7  ;;  %v12033_v59 = vpack.c.bf16 %v15233_v11, %v15233_v11  ;;  %v1080_v6 = vrot.slane %v1079_v40, 4 }
 0x31a   : > { %17917 = vst [vmem:[#allocation31_spill] sm:$0xff] %v15237_v38  ;;  %v5116_v29 = vrot.slane %v12030_v35, 7  ;;  %v12031_v7 = vpack.c.bf16 %v15237_v38, %v15237_v38 }
 0x31b   : > { %v5122_v2 = vrot.slane %v5121_v42, 4  ;;  %5239 = vst [vmem:[#allocation2 + $0x54] sm:$0xe] %v5121_v42  ;;  %v5123_v23 = vrot.slane %v12033_v59, 7  ;;  %v1084_v42 = vrot.slane %v1082_v48, 5 }
 0x31c   : > { %v5117_v45 = vrot.slane %v5116_v29, 4  ;;  %5236 = vst [vmem:[#allocation2 + $0x48] sm:$0xe] %v5116_v29  ;;  %v5118_v22 = vrot.slane %v12031_v7, 7  ;;  %v3844_v59 = vpop.permute.xlu1 %3843  ;;  %v1070_v7 = vrot.slane %v1069_v39, 4 }
 0x31d   : > { %v5124_v25 = vsel %vm13368_vm8, %v5122_v2, %v5123_v23  ;;  %v5125_v1 = vrot.slane %v5123_v23, 4 }
 0x31e   : > { %5240 = vst [vmem:[#allocation2 + $0x58] sm:$0xf] %v5124_v25  ;;  %v5119_v14 = vsel %vm13368_vm8, %v5117_v45, %v5118_v22  ;;  %v5120_v10 = vrot.slane %v5118_v22, 4  ;;  %v11298_v22 = vcombine.low %v1051_v58, %v1061_v44  ;;  %v1075_v12 = vsel %vm13513_vm11, %v1070_v7, %v1074_v28 }
 0x31f   : > { %5241 = vst [vmem:[#allocation2 + $0x5c] sm:$0x1] %v5125_v1  ;;  %5237 = vst [vmem:[#allocation2 + $0x4c] sm:$0xf] %v5119_v14  ;;  %v1085_v14 = vsel %vm13513_vm11, %v1080_v6, %v1084_v42  ;;  %vm7133_vm11 = vcmask 785408  }
 0x320   : > { %5238 = vst [vmem:[#allocation2 + $0x50] sm:$0x1] %v5120_v10  ;;  %v11299_v24 = vcombine.low %v1075_v12, %v1085_v14  ;;  %v4370_v56 = vsel %vm4325_vm12, %v11298_v22, %v15241_v19 }
 0x321   : > { %v3922_v35 = vpop.permute.xlu0 %3921 }
 0x325   : > { %v12429_v41 = vpop.f32.mrb[12].mxu0  ;;  %v4002_v10 = vpop.permute.xlu0 %4001 }
 0x326   : > { %v4914_v16 = vmul.f32 %v12429_v41, %v15049_v4  ;;  %v4817_v3 = vpop.f32.mrb[13].mxu0 }
 0x327   : > { %v4912_v46 = vmul.f32 %v15049_v4, %v4817_v3  ;;  %v12430_v53 = vpop.f32.mrb[14].mxu0 }
 0x328   : > { %v4950_v62 = vadd.f32 %v15056_v55, %v4914_v16  ;;  %v4915_v34 = vmul.f32 %v12430_v53, %v15049_v4  ;;  %v4820_v29 = vpop.f32.mrb[15].mxu0  ;;  %v4404_v53 = vsel %vm4374_vm13, %v4370_v56, %v3842_v18 }
 0x329   : > { %v4948_v2 = vadd.f32 %v15056_v55, %v4912_v46  ;;  %v4913_v8 = vmul.f32 %v15049_v4, %v4820_v29  ;;  %v4373_v46 = vsel %vm4325_vm12, %v11299_v24, %v3764_v5  ;;  %v4437_v42 = vsel %vm4407_vm14, %v4404_v53, %v3922_v35 }
 0x32a   : > { %v15267_v23 = vmax.f32 %v4950_v62, 0.0  ;;  %v4951_v0 = vadd.f32 %v15056_v55, %v4915_v34  ;;  %v4406_v44 = vsel %vm4374_vm13, %v4373_v46, %v3844_v59  ;;  %v7232_v34 = vld [vmem:[#allocation2 + $0x34] sm:$0xf]  ;;  %v4470_v7 = vsel %vm4440_vm15, %v4437_v42, %v4002_v10 }
 0x32b   : > { %v15270_v47 = vmax.f32 %v4948_v2, 0.0  ;;  %v4949_v45 = vadd.f32 %v15056_v55, %v4913_v8  ;;  %v4082_v16 = vpop.permute.xlu0 %4081  ;;  %v7329_v2 = vrot.slane %v7232_v34, 6  ;;  %v7233_v8 = vld [vmem:[#allocation2 + $0x38] sm:$0x3]  ;;  %vm7166_vm12 = vcmask 916480  }
 0x32c   : > { %17918 = vst [vmem:[#allocation32_spill] sm:$0xff] %v15267_v23  ;;  %v12036_v25 = vpack.c.bf16 %v15267_v23, %v15267_v23  ;;  %v15275_v1 = vmax.f32 %v4951_v0, 0.0  ;;  %v4503_v18 = vsel %vm4473_vm0, %v4470_v7, %v4082_v16  ;;  %v7332_v35 = vrot.slane %v7233_v8, 6 }
 0x32d   : > { %17919 = vst [vmem:[#allocation33_spill] sm:$0xff] %v15270_v47  ;;  %v12034_v52 = vpack.c.bf16 %v15270_v47, %v15270_v47  ;;  %v15283_v30 = vmax.f32 %v4949_v45, 0.0  ;;  %v7331_v22 = vrot.slane %v7329_v2, 4 }
 0x32e   : > { %17920 = vst [vmem:[#allocation34_spill] sm:$0xff] %v15275_v1  ;;  %v5131_v17 = vrot.slane %v12036_v25, 7  ;;  %v12037_v60 = vpack.c.bf16 %v15275_v1, %v15275_v1  ;;  %v7231_v25 = vld [vmem:[#allocation2 + $0x30] sm:$0xc] }
 0x32f   : > { %17921 = vst [vmem:[#allocation35_spill] sm:$0xff] %v15283_v30  ;;  %v3924_v51 = vpop.permute.xlu1 %3923  ;;  %v5126_v32 = vrot.slane %v12034_v52, 7  ;;  %v12035_v15 = vpack.c.bf16 %v15283_v30, %v15283_v30  ;;  %v11678_v52 = vrot.slane %v7231_v25, 10  ;;  %v5972_v25 = vrot.slane %v15153_v13, 6 }
 0x330   : > { %v5132_v28 = vrot.slane %v5131_v17, 4  ;;  %5245 = vst [vmem:[#allocation2 + $0x6c] sm:$0xe] %v5131_v17  ;;  %v5133_v27 = vrot.slane %v12037_v60, 7  ;;  %v4439_v29 = vsel %vm4407_vm14, %v4406_v44, %v3924_v51  ;;  %v7333_v51 = vsel %vm15111_vm9, %v7331_v22, %v7332_v35 }
 0x331   : > { %v5127_v26 = vrot.slane %v5126_v32, 4  ;;  %5242 = vst [vmem:[#allocation2 + $0x60] sm:$0xe] %v5126_v32  ;;  %v5128_v48 = vrot.slane %v12035_v15, 7  ;;  %v7330_v15 = vsel %vm15111_vm9, %v11678_v52, %v7329_v2  ;;  %v5710_v52 = vld [vmem:[#allocation2 + $0x2c] sm:$0x1] }
 0x332   : > { %v5134_v40 = vsel %vm13368_vm8, %v5132_v28, %v5133_v27  ;;  %v5135_v41 = vrot.slane %v5133_v27, 4  ;;  %v11694_v24 = vcombine.low %v7330_v15, %v7333_v51  ;;  %v15347_v51 = vld [vmem:[#allocation2 + $0x28] sm:$0xf] }
 0x333   : > { %v4004_v39 = vpop.permute.xlu1 %4003  ;;  %5246 = vst [vmem:[#allocation2 + $0x70] sm:$0xf] %v5134_v40  ;;  %v5129_v3 = vsel %vm13368_vm8, %v5127_v26, %v5128_v48  ;;  %v5130_v58 = vrot.slane %v5128_v48, 4 }
 0x334   : > { %5247 = vst [vmem:[#allocation2 + $0x74] sm:$0x1] %v5135_v41  ;;  %5243 = vst [vmem:[#allocation2 + $0x64] sm:$0xf] %v5129_v3  ;;  %v4472_v5 = vsel %vm4440_vm15, %v4439_v29, %v4004_v39 }
 0x335   : > { %5244 = vst [vmem:[#allocation2 + $0x68] sm:$0x1] %v5130_v58 }
 0x337   : > { %v4084_v19 = vpop.permute.xlu1 %4083 }
 0x338   : > { %v4505_v45 = vsel %vm4473_vm0, %v4472_v5, %v4084_v19 }
 0x33a   : > { %v4162_v62 = vpop.permute.xlu0 %4161 }
 0x33b   : > { %v4536_v59 = vsel %vm4506_vm1, %v4503_v18, %v4162_v62 }
 0x33e   : > { %v4164_v6 = vpop.permute.xlu1 %4163  ;;  %v4242_v0 = vpop.permute.xlu0 %4241 }
 0x33f   : > { %v4538_v14 = vsel %vm4506_vm1, %v4505_v45, %v4164_v6  ;;  %v4569_v10 = vsel %vm4539_vm2, %v4536_v59, %v4242_v0 }
 0x342   : > { %v4244_v12 = vpop.permute.xlu1 %4243 }
 0x343   : > { %v4571_v60 = vsel %vm4539_vm2, %v4538_v14, %v4244_v12  ;;  %v5902_v12 = vld [vmem:[#allocation2 + $0x2c] sm:$0x3]  ;;  %v5796_v14 = vrot.slane %v15153_v13, 5 }
 0x344   : > { %v5311_v13 = vld [vmem:[#allocation2 + $0x2c] sm:$0x1] }
 0x346   : > { %v4322_v17 = vpop.permute.xlu0 %4321 }
 0x347   : > { %v4602_v32 = vsel %vm4572_vm3, %v4569_v10, %v4322_v17  ;;  %v5901_v10 = vld [vmem:[#allocation2 + $0x24] sm:$0xc] }
 0x348   : > { %12443 = vmatprep.mubr.msk.bf16.mxu1 %vm4605_vm4, %v4602_v32  ;;  %v5975_v32 = vrot.slane %v5902_v12, 6  ;;  %v5707_v12 = vld [vmem:[#allocation2 + $0x18] sm:$0xe] }
 0x34a   : > { %v4324_v28 = vpop.permute.xlu1 %4323 }
 0x34b   : > { %v4604_v27 = vsel %vm4572_vm3, %v4571_v60, %v4324_v28  ;;  %v5974_v60 = vrot.slane %v5972_v25, 4 }
 0x34c   : > { %12444 = vmatmul.mubr.msk.bf16.gmra.mrb[12].mxu1 %vm4605_vm4, %v4604_v27 }
 0x34d   : > { %12102 = vmatprep.mubr.msk.bf16.mxu1 %vm4374_vm13, %v11694_v24 }
 0x358   : > { %v12433_v56 = vpop.f32.mrb[0].mxu1 }
 0x359   : > { %v4918_v26 = vmul.f32 %v12433_v56, %v15049_v4  ;;  %v4833_v48 = vpop.f32.mrb[1].mxu1 }
 0x35a   : > { %v4916_v39 = vmul.f32 %v15049_v4, %v4833_v48  ;;  %v12434_v40 = vpop.f32.mrb[2].mxu1  ;;  %v5798_v48 = vrot.slane %v5796_v14, 4 }
 0x35b   : > { %v4954_v41 = vadd.f32 %v15056_v55, %v4918_v26  ;;  %v4919_v16 = vmul.f32 %v12434_v40, %v15049_v4  ;;  %v4836_v3 = vpop.f32.mrb[3].mxu1  ;;  %v5709_v26 = vld [vmem:[#allocation2 + $0x24] sm:$0xe] }
 0x35c   : > { %v4952_v58 = vadd.f32 %v15056_v55, %v4916_v39  ;;  %v4917_v46 = vmul.f32 %v15049_v4, %v4836_v3  ;;  %v5799_v39 = vrot.slane %v5710_v52, 5  ;;  %v5407_v3 = vrot.slane %v15347_v51, 5 }
 0x35d   : > { %v15323_v53 = vmax.f32 %v4954_v41, 0.0  ;;  %v4955_v19 = vadd.f32 %v15056_v55, %v4919_v16  ;;  %v5310_v16 = vld [vmem:[#allocation2 + $0x24] sm:$0xe] }
 0x35e   : > { %v15326_v44 = vmax.f32 %v4952_v58, 0.0  ;;  %v4953_v42 = vadd.f32 %v15056_v55, %v4917_v46  ;;  %v5586_v58 = vrot.slane %v15347_v51, 6  ;;  %v11519_v46 = vrot.slane %v5901_v10, 10 }
 0x35f   : > { %17922 = vst [vmem:[#allocation36_spill] sm:$0xff] %v15323_v53  ;;  %v12040_v62 = vpack.c.bf16 %v15323_v53, %v15323_v53  ;;  %v15331_v34 = vmax.f32 %v4955_v19, 0.0  ;;  %v5503_v19 = vld [vmem:[#allocation2 + $0x2c] sm:$0x3]  ;;  %v5965_v10 = vrot.slane %v15163_v50, 6 }
 0x360   : > { %17923 = vst [vmem:[#allocation37_spill] sm:$0xff] %v15326_v44  ;;  %v12038_v29 = vpack.c.bf16 %v15326_v44, %v15326_v44  ;;  %v15335_v7 = vmax.f32 %v4953_v42, 0.0  ;;  %v15363_v42 = vld [vmem:[#allocation2 + $0x1c] sm:$0xf]  ;;  %v5973_v52 = vsel %vm15111_vm9, %v11519_v46, %v5972_v25  ;;  %v11502_v25 = vrot.slane %v5707_v12, 9 }
 0x361   : > { %17924 = vst [vmem:[#allocation38_spill] sm:$0xff] %v15331_v34  ;;  %v5141_v6 = vrot.slane %v12040_v62, 7  ;;  %v12041_v4 = vpack.c.bf16 %v15331_v34, %v15331_v34  ;;  %v5309_v46 = vld [vmem:[#allocation2 + $0x20] sm:$0x1] }
 0x362   : > { %17925 = vst [vmem:[#allocation39_spill] sm:$0xff] %v15335_v7  ;;  %v5136_v2 = vrot.slane %v12038_v29, 7  ;;  %v12039_v5 = vpack.c.bf16 %v15335_v7, %v15335_v7 }
 0x363   : > { %v5142_v18 = vrot.slane %v5141_v6, 4  ;;  %5251 = vst [vmem:[#allocation2 + $0x84] sm:$0xe] %v5141_v6  ;;  %v5143_v55 = vrot.slane %v12041_v4, 7  ;;  %v5976_v6 = vsel %vm15111_vm9, %v5974_v60, %v5975_v32  ;;  %v11503_v4 = vrot.slane %v5709_v26, 9 }
 0x364   : > { %v5137_v8 = vrot.slane %v5136_v2, 4  ;;  %5248 = vst [vmem:[#allocation2 + $0x78] sm:$0xe] %v5136_v2  ;;  %v5138_v0 = vrot.slane %v12039_v5, 7  ;;  %v5789_v2 = vrot.slane %v15163_v50, 5  ;;  %v5400_v50 = vrot.slane %v15363_v42, 5 }
 0x365   : > { %v5144_v45 = vsel %vm13368_vm8, %v5142_v18, %v5143_v55  ;;  %v5145_v59 = vrot.slane %v5143_v55, 4  ;;  %v5800_v55 = vsel %vm13353_vm6, %v5798_v48, %v5799_v39  ;;  %v5797_v51 = vsel %vm13353_vm6, %v11503_v4, %v5796_v14  ;;  %v5899_v60 = vld [vmem:[#allocation2 + $0x18] sm:$0xc]  ;;  %v5900_v32 = vld [vmem:[#allocation2 + $0x20] sm:$0x3] }
 0x366   : > { %5252 = vst [vmem:[#allocation2 + $0x88] sm:$0xf] %v5144_v45  ;;  %v5139_v22 = vsel %vm13368_vm8, %v5137_v8, %v5138_v0  ;;  %v5140_v35 = vrot.slane %v5138_v0, 4  ;;  %v5410_v8 = vrot.slane %v5311_v13, 5  ;;  %v5502_v0 = vld [vmem:[#allocation2 + $0x24] sm:$0xc]  ;;  %v11615_v39 = vcombine.low %v5797_v51, %v5800_v55 }
 0x367   : > { %5253 = vst [vmem:[#allocation2 + $0x8c] sm:$0x1] %v5145_v59  ;;  %5249 = vst [vmem:[#allocation2 + $0x7c] sm:$0xf] %v5139_v22  ;;  %v5708_v45 = vld [vmem:[#allocation2 + $0x20] sm:$0x1] }
 0x368   : > { %5250 = vst [vmem:[#allocation2 + $0x80] sm:$0x1] %v5140_v35  ;;  %v5409_v59 = vrot.slane %v5407_v3, 4  ;;  %v5588_v22 = vrot.slane %v5586_v58, 4  ;;  %v5589_v35 = vrot.slane %v5503_v19, 6  ;;  %v5792_v26 = vrot.slane %v5708_v45, 5 }
 0x369   : > { %v5501_v48 = vld [vmem:[#allocation2 + $0x20] sm:$0x3]  ;;  %v11489_v19 = vrot.slane %v5502_v0, 10  ;;  %v5402_v0 = vrot.slane %v5400_v50, 4  ;;  %v5403_v45 = vrot.slane %v5309_v46, 5 }
 0x36a   : > { %v5693_v17 = vld [vmem:[#allocation2 + $0x84] sm:$0xf]  ;;  %v5411_v14 = vsel %vm13353_vm6, %v5409_v59, %v5410_v8  ;;  %v5308_v8 = vld [vmem:[#allocation2 + $0x18] sm:$0xe] }
 0x36b   : > { %v6090_v24 = vld [vmem:[#allocation2 + $0x84] sm:$0xf]  ;;  %v6088_v62 = vld [vmem:[#allocation2 + $0x78] sm:$0xf] }
 0x36c   : > { %v5691_v29 = vld [vmem:[#allocation2 + $0x78] sm:$0xf] }
 0x36d   : > { %v15349_v15 = vld [vmem:[#allocation2 + $0x88] sm:$0xf] }
 0x36e   : > { %v15351_v28 = vld [vmem:[#allocation2 + $0x88] sm:$0xf]  ;;  %v11607_v27 = vcombine.low %v5693_v17, %v15349_v15  ;;  %v15355_v40 = vld [vmem:[#allocation2 + $0x7c] sm:$0xf]  ;;  %v11473_v17 = vrot.slane %v5310_v16, 9  ;;  %v5590_v16 = vsel %vm15111_vm9, %v5588_v22, %v5589_v35  ;;  %v5852_v12 = vrot.slane %v15349_v15, 5 }
 0x36f   : > { %v11653_v56 = vcombine.low %v6090_v24, %v15351_v28  ;;  %v15357_v41 = vld [vmem:[#allocation2 + $0x7c] sm:$0xf]  ;;  %v11652_v5 = vcombine.low %v6088_v62, %v15355_v40  ;;  %v5579_v24 = vrot.slane %v15363_v42, 6  ;;  %v5967_v62 = vrot.slane %v5965_v10, 4  ;;  %v6123_v35 = vld [vmem:[#allocation2 + $0x8c] sm:$0x1] }
 0x370   : > { %6606 = vrot.lane.b32.xlu1 %v11607_v27, %s13050_s17  ;;  %v11606_v18 = vcombine.low %v5691_v29, %v15357_v41  ;;  %v11631_v27 = vcombine.low %v5973_v52, %v5976_v6  ;;  %v5408_v13 = vsel %vm13353_vm6, %v11473_v17, %v5407_v3  ;;  %v5968_v29 = vrot.slane %v5900_v32, 6  ;;  %v5500_v6 = vld [vmem:[#allocation2 + $0x18] sm:$0xc]  ;;  %v5726_v51 = vld [vmem:[#allocation2 + $0x8c] sm:$0x1] }
 0x371   : > { %6858 = vrot.lane.b32.xlu0 %v11653_v56, %s13052_s22  ;;  %v5791_v56 = vrot.slane %v5789_v2, 4  ;;  %v5587_v42 = vsel %vm15111_vm9, %v11489_v19, %v5586_v58  ;;  %v11518_v3 = vrot.slane %v5899_v60, 10  ;;  %v5581_v4 = vrot.slane %v5579_v24, 4 }
 0x372   : > { %v11569_v59 = vcombine.low %v5408_v13, %v5411_v14  ;;  %v11585_v22 = vcombine.low %v5587_v42, %v5590_v16  ;;  %v5790_v58 = vsel %vm13353_vm6, %v11502_v25, %v5789_v2  ;;  %v11488_v60 = vrot.slane %v5500_v6, 10  ;;  %v5918_v14 = vld [vmem:[#allocation2 + $0x8c] sm:$0x3] }
 0x373   : > { %v5793_v55 = vsel %vm13353_vm6, %v5791_v56, %v5792_v26  ;;  %v5966_v52 = vsel %vm15111_vm9, %v11518_v3, %v5965_v10  ;;  %v6122_v56 = vld [vmem:[#allocation2 + $0x84] sm:$0xe]  ;;  %v5404_v2 = vsel %vm13353_vm6, %v5402_v0, %v5403_v45  ;;  %v6242_v10 = vrot.slane %v6123_v35, 5 }
 0x374   : > { %6856 = vrot.lane.b32.xlu1 %v11652_v5, %s13052_s22  ;;  %v5582_v5 = vrot.slane %v5501_v48, 6  ;;  %v11614_v17 = vcombine.low %v5790_v58, %v5793_v55  ;;  %v5725_v48 = vld [vmem:[#allocation2 + $0x84] sm:$0xe]  ;;  %v6232_v13 = vrot.slane %v15355_v40, 5  ;;  %v5854_v25 = vrot.slane %v5852_v12, 4 }
 0x375   : > { %6604 = vrot.lane.b32.xlu0 %v11606_v18, %s13050_s17  ;;  %v6239_v18 = vrot.slane %v15351_v28, 5  ;;  %v5969_v28 = vsel %vm15111_vm9, %v5967_v62, %v5968_v29  ;;  %v5855_v46 = vrot.slane %v5726_v51, 5  ;;  %v5580_v16 = vsel %vm15111_vm9, %v11488_v60, %v5579_v24  ;;  %v6121_v29 = vld [vmem:[#allocation2 + $0x80] sm:$0x1] }
 0x376   : > { %v5583_v32 = vsel %vm15111_vm9, %v5581_v4, %v5582_v5  ;;  %v11630_v19 = vcombine.low %v5966_v52, %v5969_v28  ;;  %v11511_v6 = vrot.slane %v5725_v48, 9  ;;  %v5917_v4 = vld [vmem:[#allocation2 + $0x84] sm:$0xc]  ;;  %v6031_v55 = vrot.slane %v5918_v14, 6  ;;  %v5916_v52 = vld [vmem:[#allocation2 + $0x80] sm:$0x3] }
 0x377   : > { %v6241_v26 = vrot.slane %v6239_v18, 4  ;;  %v11584_v42 = vcombine.low %v5580_v16, %v5583_v32  ;;  %v5856_v24 = vsel %vm13353_vm6, %v5854_v25, %v5855_v46  ;;  %v6235_v0 = vrot.slane %v6121_v29, 5  ;;  %v5293_v28 = vld [vmem:[#allocation2 + $0x7c] sm:$0xf]  ;;  %v5325_v14 = vld [vmem:[#allocation2 + $0x80] sm:$0x1] }
 0x378   : > { %6750 = vrot.lane.b32.xlu1 %v11631_v27, %s13053_s12  ;;  %v11472_v27 = vrot.slane %v5308_v8, 9  ;;  %v6120_v8 = vld [vmem:[#allocation2 + $0x78] sm:$0xe]  ;;  %v5845_v45 = vrot.slane %v15357_v41, 5  ;;  %v5853_v58 = vsel %vm13353_vm6, %v11511_v6, %v5852_v12  ;;  %v11527_v60 = vrot.slane %v5917_v4, 10 }
 0x379   : > { %6670 = vrot.lane.b32.xlu0 %v11615_v39, %s13051_s20  ;;  %v6028_v39 = vrot.slane %v15349_v15, 6  ;;  %v11541_v15 = vrot.slane %v6122_v56, 9  ;;  %v6243_v40 = vsel %vm13353_vm6, %v6241_v26, %v6242_v10  ;;  %v11540_v32 = vrot.slane %v6120_v8, 9  ;;  %v5723_v56 = vld [vmem:[#allocation2 + $0x78] sm:$0xe] }
 0x37a   : > { %v5401_v62 = vsel %vm13353_vm6, %v11472_v27, %v5400_v50  ;;  %v6234_v50 = vrot.slane %v6232_v13, 4  ;;  %v5915_v10 = vld [vmem:[#allocation2 + $0x78] sm:$0xc]  ;;  %v6024_v48 = vrot.slane %v5916_v52, 6  ;;  %v5635_v12 = vrot.slane %v5293_v28, 6 }
 0x37b   : > { %v11568_v3 = vcombine.low %v5401_v62, %v5404_v2  ;;  %v6030_v5 = vrot.slane %v6028_v39, 4  ;;  %v6240_v35 = vsel %vm13353_vm6, %v11541_v15, %v6239_v18  ;;  %v5847_v2 = vrot.slane %v5845_v45, 4 }
 0x37c   : > { %6418 = vrot.lane.b32.xlu1 %v11569_v59, %s13045_s9  ;;  %v5724_v59 = vld [vmem:[#allocation2 + $0x80] sm:$0x1]  ;;  %v11669_v51 = vcombine.low %v6240_v35, %v6243_v40  ;;  %v5456_v25 = vrot.slane %v5293_v28, 5  ;;  %v6029_v46 = vsel %vm15111_vm9, %v11527_v60, %v6028_v39  ;;  %v6233_v62 = vsel %vm13353_vm6, %v11540_v32, %v6232_v13  ;;  %v5516_v39 = vld [vmem:[#allocation2 + $0x78] sm:$0xc] }
 0x37d   : > { %6498 = vrot.lane.b32.xlu0 %v11585_v22, %s13046_s13  ;;  %v6021_v22 = vrot.slane %v15357_v41, 6  ;;  %v6032_v27 = vsel %vm15111_vm9, %v6030_v5, %v6031_v55  ;;  %v6236_v41 = vsel %vm13353_vm6, %v6234_v50, %v6235_v0  ;;  %v5848_v26 = vrot.slane %v5724_v59, 5  ;;  %v15459_v60 = vld [vmem:[#allocation2 + $0x40] sm:$0xf]  ;;  %v5681_v32 = vld [vmem:[#allocation2 + $0x3c] sm:$0xf] }
 0x37e   : > { %v11639_v16 = vcombine.low %v6029_v46, %v6032_v27  ;;  %v11510_v29 = vrot.slane %v5723_v56, 9  ;;  %v11526_v15 = vrot.slane %v5915_v10, 10  ;;  %v5637_v4 = vrot.slane %v5635_v12, 4  ;;  %v6078_v27 = vld [vmem:[#allocation2 + $0x3c] sm:$0xf] }
 0x37f   : > { %v6023_v18 = vrot.slane %v6021_v22, 4  ;;  %v5458_v5 = vrot.slane %v5456_v25, 4  ;;  %v5459_v55 = vrot.slane %v5325_v14, 5  ;;  %v11496_v59 = vrot.slane %v5516_v39, 10  ;;  %v6076_v10 = vld [vmem:[#allocation2 + $0x30] sm:$0xf] }
 0x380   : > { %6668 = vrot.lane.b32.xlu1 %v11614_v17, %s13051_s20  ;;  %v11623_v17 = vcombine.low %v5853_v58, %v5856_v24  ;;  %v5324_v24 = vld [vmem:[#allocation2 + $0x78] sm:$0xe]  ;;  %v5846_v13 = vsel %vm13353_vm6, %v11510_v29, %v5845_v45  ;;  %v6022_v8 = vsel %vm15111_vm9, %v11526_v15, %v6021_v22  ;;  %v11647_v56 = vcombine.low %v6078_v27, %v15459_v60  ;;  %v15485_v29 = vld [vmem:[%s17812_s4 + $0x1] ss:$0 sm:$0xff] }
 0x381   : > { %6748 = vrot.lane.b32.xlu0 %v11630_v19, %s13053_s12  ;;  %v5517_v19 = vld [vmem:[#allocation2 + $0x80] sm:$0x3]  ;;  %v6025_v6 = vsel %vm15111_vm9, %v6023_v18, %v6024_v48  ;;  %v11480_v58 = vrot.slane %v5324_v24, 9  ;;  %v5460_v52 = vsel %vm13353_vm6, %v5458_v5, %v5459_v55  ;;  %v5636_v45 = vsel %vm15111_vm9, %v11496_v59, %v5635_v12  ;;  %v5679_v18 = vld [vmem:[#allocation2 + $0x30] sm:$0xf] }
 0x382   : > { %v5638_v40 = vrot.slane %v5517_v19, 6  ;;  %v11638_v0 = vcombine.low %v6022_v8, %v6025_v6 }
 0x383   : > { %v5457_v22 = vsel %vm13353_vm6, %v11480_v58, %v5456_v25  ;;  %v15478_v25 = vld [vmem:[%s17812_s4] ss:$0 sm:$0xff] }
 0x384   : > { %6496 = vrot.lane.b32.xlu1 %v11584_v42, %s13046_s13  ;;  %v11668_v42 = vcombine.low %v6233_v62, %v6236_v41  ;;  %v5639_v35 = vsel %vm15111_vm9, %v5637_v4, %v5638_v40 }
 0x385   : > { %6416 = vrot.lane.b32.xlu0 %v11568_v3, %s13045_s9  ;;  %v5849_v3 = vsel %vm13353_vm6, %v5847_v2, %v5848_v26  ;;  %v11592_v28 = vcombine.low %v5636_v45, %v5639_v35  ;;  %v15465_v2 = vld [vmem:[#allocation2 + $0x34] sm:$0xf] }
 0x386   : > { %v11622_v50 = vcombine.low %v5846_v13, %v5849_v3  ;;  %v15467_v26 = vld [vmem:[#allocation2 + $0x34] sm:$0xf]  ;;  %v11646_v48 = vcombine.low %v6076_v10, %v15465_v2  ;;  %v12666_v10 = vld [vmem:[#allocation9 + $0x8] sm:$0xff]  }
 0x387   : > { %v11600_v19 = vcombine.low %v5679_v18, %v15467_v26  ;;  %v12664_v45 = vld [vmem:[#allocation9] sm:$0xff]  }
 0x388   : > { %6938 = vrot.lane.b32.xlu1 %v11669_v51, %s13054_s30  ;;  %v11576_v51 = vcombine.low %v5457_v22, %v5460_v52  ;;  %v12663_v52 = vld [vmem:[#allocation9 + $0x40] sm:$0xff]   ;;  %v12665_v22 = vld [vmem:[#allocation9 + $0x48] sm:$0xff]  }
 0x389   : > { %6686 = vrot.lane.b32.xlu0 %v11623_v17, %s13051_s20  ;;  %v15457_v17 = vld [vmem:[#allocation2 + $0x40] sm:$0xf]  ;;  %12158 = vmatprep.subr.bf16.mxu1 %v12663_v52 }
 0x38a   : > { %v11601_v41 = vcombine.low %v5681_v32, %v15457_v17  ;;  %12159 = vmatpush3.bf16.msra.mxu1 %v12664_v45  ;;  %v5506_v45 = vld [vmem:[#allocation2 + $0x3c] sm:$0xc] }
 0x38b   : > { %12160 = vmatprep.subr.bf16.mxu1 %v12665_v22  ;;  %v5507_v22 = vld [vmem:[#allocation2 + $0x44] sm:$0x3] }
 0x38c   : > { %6766 = vrot.lane.b32.xlu1 %v11639_v16, %s13053_s12 }
 0x38d   : > { %6936 = vrot.lane.b32.xlu0 %v11668_v42, %s13054_s30 }
 0x38e   : > { %12161 = vmatpush3.bf16.msra.mxu1 %v12666_v10 }
 0x390   : > { %6684 = vrot.lane.b32.xlu1 %v11622_v50, %s13051_s20 }
 0x391   : > { %6764 = vrot.lane.b32.xlu0 %v11638_v0, %s13053_s12 }
 0x394   : > { %6512 = vrot.lane.b32.xlu1 %v11592_v28, %s13046_s13 }
 0x395   : > { %6432 = vrot.lane.b32.xlu0 %v11576_v51, %s13045_s9 }
 0x398   : > { %6594 = vrot.lane.b32.xlu1 %v11601_v41, %s13050_s17 }
 0x399   : > { %6846 = vrot.lane.b32.xlu0 %v11647_v56, %s13052_s22 }
 0x39c   : > { %6844 = vrot.lane.b32.xlu1 %v11646_v48, %s13052_s22 }
 0x39d   : > { %6592 = vrot.lane.b32.xlu0 %v11600_v19, %s13050_s17  ;;  %v6197_v19 = vrot.slane %v15459_v60, 5 }
 0x3a5   : > { %v12437_v12 = vpop.f32.mrb[4].mxu1 }
 0x3a6   : > { %v4922_v46 = vmul.f32 %v15478_v25, %v12437_v12  ;;  %v4849_v14 = vpop.f32.mrb[5].mxu1  ;;  %v5810_v12 = vrot.slane %v15457_v17, 5 }
 0x3a7   : > { %v4920_v16 = vmul.f32 %v15478_v25, %v4849_v14  ;;  %v12438_v62 = vpop.f32.mrb[6].mxu1  ;;  %v6111_v14 = vld [vmem:[#allocation2 + $0x44] sm:$0x1] }
 0x3a8   : > { %v4958_v42 = vadd.f32 %v15485_v29, %v4922_v46  ;;  %v4923_v3 = vmul.f32 %v15478_v25, %v12438_v62  ;;  %v4852_v15 = vpop.f32.mrb[7].mxu1  ;;  %v12668_v46 = vld [vmem:[#allocation9 + $0x50] sm:$0xff]   ;;  %v6110_v62 = vld [vmem:[#allocation2 + $0x3c] sm:$0xe]  ;;  %v6200_v60 = vrot.slane %v6111_v14, 5  ;;  %v12673_v14 = vld [vmem:[#allocation9 + $0x60] sm:$0xff]  }
 0x3a9   : > { %v4956_v40 = vadd.f32 %v15485_v29, %v4920_v16  ;;  %v4921_v6 = vmul.f32 %v15478_v25, %v4852_v15  ;;  %v5714_v16 = vld [vmem:[#allocation2 + $0x44] sm:$0x1]  ;;  %v5713_v15 = vld [vmem:[#allocation2 + $0x3c] sm:$0xe]  ;;  %12162 = vmatprep.subr.bf16.mxu1 %v12668_v46 }
 0x3aa   : > { %v15491_v4 = vmax.f32 %v4958_v42, 0.0  ;;  %v4959_v5 = vadd.f32 %v15485_v29, %v4923_v3  ;;  %v17831_v42 = vrot.slane %v15457_v17, 6  ;;  %v15516_v3 = vld [vmem:[#allocation2 + $0x40] sm:$0xf] }
 0x3ab   : > { %v15494_v55 = vmax.f32 %v4956_v40, 0.0  ;;  %v4957_v39 = vadd.f32 %v15485_v29, %v4921_v6  ;;  %v5906_v40 = vld [vmem:[#allocation2 + $0x44] sm:$0x3]  ;;  %v5421_v46 = vrot.slane %v15516_v3, 5 }
 0x3ac   : > { %17926 = vst [vmem:[#allocation40_spill] sm:$0xff] %v15491_v4  ;;  %v12044_v24 = vpack.c.bf16 %v15491_v4, %v15491_v4  ;;  %v15499_v13 = vmax.f32 %v4959_v5, 0.0  ;;  %v12670_v6 = vld [vmem:[#allocation9 + $0x10] sm:$0xff]   ;;  %v6199_v5 = vrot.slane %v6197_v19, 4  ;;  %v5988_v52 = vrot.slane %v17831_v42, 4 }
 0x3ad   : > { %17927 = vst [vmem:[#allocation41_spill] sm:$0xff] %v15494_v55  ;;  %v12042_v8 = vpack.c.bf16 %v15494_v55, %v15494_v55  ;;  %v15503_v50 = vmax.f32 %v4957_v39, 0.0  ;;  %v5812_v39 = vrot.slane %v5810_v12, 4  ;;  %12163 = vmatpush3.bf16.msra.mxu1 %v12670_v6  ;;  %v5315_v6 = vld [vmem:[#allocation2 + $0x44] sm:$0x1] }
 0x3ae   : > { %17928 = vst [vmem:[#allocation42_spill] sm:$0xff] %v15499_v13  ;;  %v5151_v0 = vrot.slane %v12044_v24, 7  ;;  %v12045_v59 = vpack.c.bf16 %v15499_v13, %v15499_v13  ;;  %v5813_v24 = vrot.slane %v5714_v16, 5  ;;  %v6190_v16 = vrot.slane %v15465_v2, 5  ;;  %v6108_v13 = vld [vmem:[#allocation2 + $0x30] sm:$0xe] }
 0x3af   : > { %17929 = vst [vmem:[#allocation43_spill] sm:$0xff] %v15503_v50  ;;  %v5146_v35 = vrot.slane %v12042_v8, 7  ;;  %v12043_v58 = vpack.c.bf16 %v15503_v50, %v15503_v50  ;;  %v12671_v8 = vld [vmem:[#allocation9 + $0x58] sm:$0xff]   ;;  %v11491_v2 = vrot.slane %v5506_v45, 10  ;;  %v5424_v42 = vrot.slane %v5315_v6, 5 }
 0x3b0   : > { %v5152_v28 = vrot.slane %v5151_v0, 4  ;;  %5257 = vst [vmem:[#allocation2 + $0x9c] sm:$0xe] %v5151_v0  ;;  %v5153_v51 = vrot.slane %v12045_v59, 7  ;;  %v5600_v0 = vrot.slane %v15516_v3, 6  ;;  %v11535_v59 = vrot.slane %v6110_v62, 9  ;;  %12164 = vmatprep.subr.bf16.mxu1 %v12671_v8 }
 0x3b1   : > { %v5147_v32 = vrot.slane %v5146_v35, 4  ;;  %5254 = vst [vmem:[#allocation2 + $0x90] sm:$0xe] %v5146_v35  ;;  %v5148_v27 = vrot.slane %v12043_v58, 7  ;;  %v11505_v35 = vrot.slane %v5713_v15, 9  ;;  %v5979_v45 = vrot.slane %v15467_v26, 6 }
 0x3b2   : > { %v5154_v41 = vsel %vm13368_vm8, %v5152_v28, %v5153_v51  ;;  %v5155_v56 = vrot.slane %v5153_v51, 4  ;;  %v5905_v58 = vld [vmem:[#allocation2 + $0x3c] sm:$0xc]  ;;  %v5602_v15 = vrot.slane %v5600_v0, 4  ;;  %v5514_v4 = vld [vmem:[#allocation2 + $0x6c] sm:$0xc] }
 0x3b3   : > { %5258 = vst [vmem:[#allocation2 + $0xa0] sm:$0xf] %v5154_v41  ;;  %v5149_v18 = vsel %vm13368_vm8, %v5147_v32, %v5148_v27  ;;  %v5150_v48 = vrot.slane %v5148_v27, 4  ;;  %v5989_v32 = vrot.slane %v5906_v40, 6  ;;  %v12672_v27 = vld [vmem:[#allocation9 + $0x18] sm:$0xff]   ;;  %v5603_v40 = vrot.slane %v5507_v22, 6 }
 0x3b4   : > { %5259 = vst [vmem:[#allocation2 + $0xa4] sm:$0x1] %v5155_v56  ;;  %5255 = vst [vmem:[#allocation2 + $0x94] sm:$0xf] %v5149_v18  ;;  %v6201_v18 = vsel %vm13353_vm6, %v6199_v5, %v6200_v60  ;;  %v5811_v5 = vsel %vm13353_vm6, %v11505_v35, %v5810_v12  ;;  %v6109_v60 = vld [vmem:[#allocation2 + $0x38] sm:$0x1]  ;;  %12165 = vmatpush3.bf16.msra.mxu1 %v12672_v27 }
 0x3b5   : > { %5256 = vst [vmem:[#allocation2 + $0x98] sm:$0x1] %v5150_v48  ;;  %v5814_v48 = vsel %vm13353_vm6, %v5812_v39, %v5813_v24  ;;  %v11521_v24 = vrot.slane %v5905_v58, 10  ;;  %v5314_v8 = vld [vmem:[#allocation2 + $0x3c] sm:$0xe]  ;;  %v5990_v22 = vsel %vm15111_vm9, %v5988_v52, %v5989_v32  ;;  %12166 = vmatprep.subr.bf16.mxu1 %v12673_v14  ;;  %v6192_v35 = vrot.slane %v6190_v16, 4 }
 0x3b6   : > { %v11617_v39 = vcombine.low %v5811_v5, %v5814_v48  ;;  %v12676_v12 = vld [vmem:[#allocation9 + $0x68] sm:$0xff]   ;;  %v17930_v27 = vrot.slane %v15457_v17, 6  ;;  %v15550_v48 = vld [vmem:[#allocation2 + $0x34] sm:$0xf] }
 0x3b7   : > { %v6094_v28 = vld [vmem:[#allocation2 + $0x9c] sm:$0xf]  ;;  %v5712_v58 = vld [vmem:[#allocation2 + $0x38] sm:$0x1] }
 0x3b8   : > { %v6092_v41 = vld [vmem:[#allocation2 + $0x90] sm:$0xf]  ;;  %v5987_v52 = vsel %vm15111_vm9, %v11521_v24, %v17930_v27  ;;  %v5904_v32 = vld [vmem:[#allocation2 + $0x38] sm:$0x3]  ;;  %v5729_v38 = vld [vmem:[#allocation2 + $0x9c] sm:$0xe] }
 0x3b9   : > { %v11633_v14 = vcombine.low %v5987_v52, %v5990_v22  ;;  %v5903_v24 = vld [vmem:[#allocation2 + $0x30] sm:$0xc]  ;;  %v5981_v22 = vrot.slane %v5979_v45, 4  ;;  %v5982_v27 = vrot.slane %v5904_v32, 6  ;;  %v11513_v36 = vrot.slane %v5729_v38, 9 }
 0x3ba   : > { %v15521_v51 = vld [vmem:[#allocation2 + $0xa0] sm:$0xf]  ;;  %v5520_v54 = vld [vmem:[#allocation2 + $0x90] sm:$0xc] }
 0x3bb   : > { %v15523_v56 = vld [vmem:[#allocation2 + $0x94] sm:$0xf]  ;;  %v11655_v10 = vcombine.low %v6094_v28, %v15521_v51  ;;  %v6198_v28 = vsel %vm13353_vm6, %v11535_v59, %v6197_v19  ;;  %v5803_v19 = vrot.slane %v15467_v26, 5  ;;  %v5604_v59 = vsel %vm15111_vm9, %v5602_v15, %v5603_v40  ;;  %v12678_v26 = vld [vmem:[#allocation9 + $0x28] sm:$0xff]  }
 0x3bc   : > { %v11654_v62 = vcombine.low %v6092_v41, %v15523_v56  ;;  %v11663_v3 = vcombine.low %v6198_v28, %v6201_v18  ;;  %v12675_v41 = vld [vmem:[#allocation9 + $0x20] sm:$0xff]   ;;  %v6193_v18 = vrot.slane %v6109_v60, 5  ;;  %v11475_v15 = vrot.slane %v5314_v8, 9 }
 0x3bd   : > { %6862 = vrot.lane.b32.xlu0 %v11655_v10, %s13052_s22  ;;  %v5423_v10 = vrot.slane %v5421_v46, 4  ;;  %v11534_v40 = vrot.slane %v6108_v13, 9  ;;  %12167 = vmatpush3.bf16.msra.mxu1 %v12675_v41  ;;  %v5711_v28 = vld [vmem:[#allocation2 + $0x30] sm:$0xe]  ;;  %v5805_v5 = vrot.slane %v5803_v19, 4  ;;  %v5806_v60 = vrot.slane %v5712_v58, 5 }
 0x3be   : > { %6860 = vrot.lane.b32.xlu1 %v11654_v62, %s13052_s22  ;;  %v5601_v62 = vsel %vm15111_vm9, %v11491_v2, %v5600_v0  ;;  %12168 = vmatprep.subr.bf16.mxu1 %v12676_v12  ;;  %v5414_v0 = vrot.slane %v15550_v48, 5  ;;  %v5422_v13 = vsel %vm13353_vm6, %v11475_v15, %v5421_v46  ;;  %v5313_v2 = vld [vmem:[#allocation2 + $0x38] sm:$0x1]  ;;  %v12680_v12 = vld [vmem:[#allocation9 + $0x30] sm:$0xff]   ;;  %v11520_v58 = vrot.slane %v5903_v24, 10  ;;  %v12681_v46 = vld [vmem:[#allocation9 + $0x78] sm:$0xff]  }
 0x3bf   : > { %v11587_v6 = vcombine.low %v5601_v62, %v5604_v59  ;;  %v5425_v17 = vsel %vm13353_vm6, %v5423_v10, %v5424_v42  ;;  %v5593_v42 = vrot.slane %v15550_v48, 6  ;;  %v6191_v41 = vsel %vm13353_vm6, %v11534_v40, %v6190_v16  ;;  %v5505_v10 = vld [vmem:[#allocation2 + $0x38] sm:$0x3]  ;;  %v5312_v48 = vld [vmem:[#allocation2 + $0x30] sm:$0xe] }
 0x3c0   : > { %v11571_v8 = vcombine.low %v5422_v13, %v5425_v17  ;;  %v6246_v52 = vrot.slane %v15523_v56, 5  ;;  %v5983_v32 = vsel %vm15111_vm9, %v5981_v22, %v5982_v27  ;;  %v5417_v62 = vrot.slane %v5313_v2, 5  ;;  %v5504_v17 = vld [vmem:[#allocation2 + $0x30] sm:$0xc] }
 0x3c1   : > { %6674 = vrot.lane.b32.xlu0 %v11617_v39, %s13051_s20  ;;  %v12679_v39 = vld [vmem:[#allocation9 + $0x70] sm:$0xff]   ;;  %12169 = vmatpush3.bf16.msra.mxu1 %v12678_v26  ;;  %v6253_v16 = vrot.slane %v15521_v51, 5  ;;  %v5595_v15 = vrot.slane %v5593_v42, 4  ;;  %v5596_v40 = vrot.slane %v5505_v10, 6  ;;  %v6125_v26 = vld [vmem:[#allocation2 + $0x98] sm:$0x1]  ;;  %v5980_v56 = vsel %vm15111_vm9, %v11520_v58, %v5979_v45 }
 0x3c2   : > { %6926 = vrot.lane.b32.xlu1 %v11663_v3, %s13054_s30  ;;  %v6194_v3 = vsel %vm13353_vm6, %v6192_v35, %v6193_v18  ;;  %v11504_v35 = vrot.slane %v5711_v28, 9  ;;  %v5807_v18 = vsel %vm13353_vm6, %v5805_v5, %v5806_v60  ;;  %12170 = vmatprep.subr.bf16.mxu1 %v12679_v39  ;;  %v6127_v28 = vld [vmem:[#allocation2 + $0xa4] sm:$0x1]  ;;  %v12683_v5 = vld [vmem:[#allocation9 + $0x38] sm:$0xff]   ;;  %v11632_v39 = vcombine.low %v5980_v56, %v5983_v32  ;;  %v6124_v2 = vld [vmem:[#allocation2 + $0x90] sm:$0xe] }
 0x3c3   : > { %v11662_v59 = vcombine.low %v6191_v41, %v6194_v3  ;;  %v11474_v51 = vrot.slane %v5312_v48, 9  ;;  %v6248_v24 = vrot.slane %v6246_v52, 4  ;;  %v6249_v22 = vrot.slane %v6125_v26, 5  ;;  %v6126_v41 = vld [vmem:[#allocation2 + $0x9c] sm:$0xe] }
 0x3c4   : > { %v11490_v27 = vrot.slane %v5504_v17, 10  ;;  %v6255_v45 = vrot.slane %v6253_v16, 4  ;;  %v6256_v13 = vrot.slane %v6127_v28, 5  ;;  %v6083_v58 = vld [vmem:[#allocation2 + $0x58] sm:$0xf] }
 0x3c5   : > { %6502 = vrot.lane.b32.xlu0 %v11587_v6, %s13046_s13  ;;  %v5804_v6 = vsel %vm13353_vm6, %v11504_v35, %v5803_v19  ;;  %12171 = vmatpush3.bf16.msra.mxu1 %v12680_v12  ;;  %v5597_v19 = vsel %vm15111_vm9, %v5595_v15, %v5596_v40  ;;  %v11542_v35 = vrot.slane %v6124_v2, 9  ;;  %v5686_v48 = vld [vmem:[#allocation2 + $0x58] sm:$0xf]  ;;  %v5685_v26 = vld [vmem:[#allocation2 + $0x54] sm:$0xf]  ;;  %v15608_v2 = vpop.permute.xlu1 %6492 }
 0x3c6   : > { %6754 = vrot.lane.b32.xlu1 %v11633_v14, %s13053_s12  ;;  %v5416_v14 = vrot.slane %v5414_v0, 4  ;;  %v11616_v60 = vcombine.low %v5804_v6, %v5807_v18  ;;  %12172 = vmatprep.subr.bf16.mxu1 %v12681_v46  ;;  %v5594_v10 = vsel %vm15111_vm9, %v11490_v27, %v5593_v42  ;;  %v6250_v18 = vsel %vm13353_vm6, %v6248_v24, %v6249_v22  ;;  %v15599_v15 = vld [vmem:[#allocation2 + $0x58] sm:$0xf]  ;;  %v6082_v6 = vld [vmem:[#allocation2 + $0x54] sm:$0xf] }
 0x3c7   : > { %v11543_v46 = vrot.slane %v6126_v41, 9  ;;  %v6257_v32 = vsel %vm13353_vm6, %v6255_v45, %v6256_v13  ;;  %v6115_v56 = vld [vmem:[#allocation2 + $0x5c] sm:$0x1]  ;;  %v5824_v17 = vrot.slane %v5686_v48, 5  ;;  %v6000_v28 = vrot.slane %v5686_v48, 6 }
 0x3c8   : > { %v5418_v3 = vsel %vm13353_vm6, %v5416_v14, %v5417_v62  ;;  %v6211_v62 = vrot.slane %v6083_v58, 5  ;;  %v11603_v24 = vcombine.low %v5685_v26, %v5686_v48  ;;  %v11649_v22 = vcombine.low %v6082_v6, %v6083_v58  ;;  %v5909_v45 = vld [vmem:[#allocation2 + $0x54] sm:$0xc]  ;;  %v5511_v13 = vld [vmem:[#allocation2 + $0x5c] sm:$0x3] }
 0x3c9   : > { %6924 = vrot.lane.b32.xlu0 %v11662_v59, %s13054_s30  ;;  %12173 = vmatpush3.bf16.msra.mxu1 %v12683_v5  ;;  %v11586_v59 = vcombine.low %v5594_v10, %v5597_v19  ;;  %v6254_v42 = vsel %vm13353_vm6, %v11543_v46, %v6253_v16  ;;  %v6114_v5 = vld [vmem:[#allocation2 + $0x54] sm:$0xe]  ;;  %v6214_v19 = vrot.slane %v6115_v56, 5  ;;  %v15610_v41 = vld [vmem:[#allocation2 + $0x4c] sm:$0xf]  ;;  %v5826_v10 = vrot.slane %v5824_v17, 4 }
 0x3ca   : > { %6422 = vrot.lane.b32.xlu1 %v11571_v8, %s13045_s9  ;;  %v5415_v8 = vsel %vm13353_vm6, %v11474_v51, %v5414_v0  ;;  %v6247_v0 = vsel %vm13353_vm6, %v11542_v35, %v6246_v52  ;;  %v11671_v40 = vcombine.low %v6254_v42, %v6257_v32  ;;  %v15603_v52 = vld [vmem:[#allocation2 + $0x4c] sm:$0xf]  ;;  %v5717_v16 = vld [vmem:[#allocation2 + $0x54] sm:$0xe]  ;;  %v5614_v51 = vrot.slane %v15599_v15, 6 }
 0x3cb   : > { %v11570_v12 = vcombine.low %v5415_v8, %v5418_v3  ;;  %v11670_v14 = vcombine.low %v6247_v0, %v6250_v18  ;;  %v15606_v3 = vpop.permute.xlu0 %6412  ;;  %v6213_v27 = vrot.slane %v6211_v62, 4  ;;  %v6080_v8 = vld [vmem:[#allocation2 + $0x48] sm:$0xf]  ;;  %v6204_v18 = vrot.slane %v15603_v52, 5  ;;  %v5510_v0 = vld [vmem:[#allocation2 + $0x54] sm:$0xc] }
 0x3cc   : > { %v5683_v46 = vld [vmem:[#allocation2 + $0x48] sm:$0xf]  ;;  %v11537_v32 = vrot.slane %v6114_v5, 9  ;;  %v11507_v58 = vrot.slane %v5717_v16, 9  ;;  %v5435_v48 = vrot.slane %v15599_v15, 5  ;;  %v5616_v42 = vrot.slane %v5614_v51, 4 }
 0x3cd   : > { %6752 = vrot.lane.b32.xlu0 %v11632_v39, %s13053_s12  ;;  %v5910_v39 = vld [vmem:[#allocation2 + $0x5c] sm:$0x3]  ;;  %v11648_v26 = vcombine.low %v6080_v8, %v15603_v52  ;;  %v11602_v6 = vcombine.low %v5683_v46, %v15610_v41  ;;  %v6215_v5 = vsel %vm13353_vm6, %v6213_v27, %v6214_v19  ;;  %v6112_v27 = vld [vmem:[#allocation2 + $0x48] sm:$0xe]  ;;  %v15633_v19 = vpop.permute.xlu1 %6414 }
 0x3ce   : > { %6672 = vrot.lane.b32.xlu1 %v11616_v60, %s13051_s20  ;;  %v5718_v60 = vld [vmem:[#allocation2 + $0x5c] sm:$0x1]  ;;  %v6003_v35 = vrot.slane %v5910_v39, 6  ;;  %v6212_v56 = vsel %vm13353_vm6, %v11537_v32, %v6211_v62  ;;  %v5318_v39 = vld [vmem:[#allocation2 + $0x54] sm:$0xe]  ;;  %v5825_v15 = vsel %vm13353_vm6, %v11507_v58, %v5824_v17 }
 0x3cf   : > { %v11665_v46 = vcombine.low %v6212_v56, %v6215_v5 }
 0x3d1   : > { %6420 = vrot.lane.b32.xlu0 %v11570_v12, %s13045_s9  ;;  %v5827_v12 = vrot.slane %v5718_v60, 5  ;;  %v11523_v60 = vrot.slane %v5909_v45, 10  ;;  %v11493_v45 = vrot.slane %v5510_v0, 10  ;;  %v17833_v0 = vrot.slane %v15610_v41, 5 }
 0x3d2   : > { %6500 = vrot.lane.b32.xlu1 %v11586_v59, %s13046_s13  ;;  %v6002_v59 = vrot.slane %v6000_v28, 4 }
 0x3d3   : > { %v5828_v16 = vsel %vm13353_vm6, %v5826_v10, %v5827_v12  ;;  %v6001_v62 = vsel %vm15111_vm9, %v11523_v60, %v6000_v28  ;;  %v11477_v10 = vrot.slane %v5318_v39, 9  ;;  %v6206_v12 = vrot.slane %v6204_v18, 4  ;;  %v5716_v28 = vld [vmem:[#allocation2 + $0x50] sm:$0x1] }
 0x3d4   : > { %v6004_v52 = vsel %vm15111_vm9, %v6002_v59, %v6003_v35  ;;  %v15638_v35 = vld [vmem:[#allocation2 + $0x48] sm:$0xe]  ;;  %v11619_v32 = vcombine.low %v5825_v15, %v5828_v16  ;;  %v11536_v60 = vrot.slane %v6112_v27, 9  ;;  %v5908_v15 = vld [vmem:[#allocation2 + $0x50] sm:$0x3] }
 0x3d5   : > { %6940 = vrot.lane.b32.xlu0 %v11670_v14, %s13054_s30  ;;  %v5617_v14 = vrot.slane %v5511_v13, 6  ;;  %v5437_v13 = vrot.slane %v5435_v48, 4  ;;  %v11635_v58 = vcombine.low %v6001_v62, %v6004_v52 }
 0x3d6   : > { %6942 = vrot.lane.b32.xlu1 %v11671_v40, %s13054_s30  ;;  %v5319_v40 = vld [vmem:[#allocation2 + $0x5c] sm:$0x1]  ;;  %v6205_v52 = vsel %vm13353_vm6, %v11536_v60, %v6204_v18 }
 0x3d7   : > { %v5438_v8 = vrot.slane %v5319_v40, 5  ;;  %v5618_v17 = vsel %vm15111_vm9, %v5616_v42, %v5617_v14  ;;  %v5615_v40 = vsel %vm15111_vm9, %v11493_v45, %v5614_v51  ;;  %v5993_v42 = vrot.slane %v15610_v41, 6  ;;  %v15646_v14 = vld [vmem:[#allocation2 + $0x4c] sm:$0xf] }
 0x3d8   : > { %v11589_v56 = vcombine.low %v5615_v40, %v5618_v17  ;;  %v11506_v51 = vrot.slane %v15638_v35, 9  ;;  %v5820_v45 = vrot.slane %v5716_v28, 5  ;;  %v5907_v35 = vld [vmem:[#allocation2 + $0x48] sm:$0xc]  ;;  %v5996_v28 = vrot.slane %v5908_v15, 6 }
 0x3d9   : > { %6850 = vrot.lane.b32.xlu0 %v11649_v22, %s13052_s22  ;;  %v6113_v22 = vld [vmem:[#allocation2 + $0x50] sm:$0x1]  ;;  %v5439_v5 = vsel %vm13353_vm6, %v5437_v13, %v5438_v8 }
 0x3da   : > { %6598 = vrot.lane.b32.xlu1 %v11603_v24, %s13050_s17  ;;  %v15628_v24 = vpop.permute.xlu0 %6494  ;;  %v6207_v59 = vrot.slane %v6113_v22, 5 }
 0x3dc   : > { %v6208_v62 = vsel %vm13353_vm6, %v6206_v12, %v6207_v59  ;;  %v5995_v59 = vrot.slane %v5993_v42, 4 }
 0x3dd   : > { %6596 = vrot.lane.b32.xlu0 %v11602_v6, %s13050_s17 }
 0x3de   : > { %6848 = vrot.lane.b32.xlu1 %v11648_v26, %s13052_s22  ;;  %v12441_v6 = vpop.f32.mrb[8].mxu1  ;;  %v5436_v26 = vsel %vm13353_vm6, %v11477_v10, %v5435_v48  ;;  %v15659_v27 = vpop.permute.xlu0 %6588  ;;  %v5819_v10 = vrot.slane %v17833_v0, 4  ;;  %v11664_v0 = vcombine.low %v6205_v52, %v6208_v62  ;;  %v5997_v52 = vsel %vm15111_vm9, %v5995_v59, %v5996_v28  ;;  %v5316_v62 = vld [vmem:[#allocation2 + $0x48] sm:$0xe] }
 0x3df   : > { %v4926_v39 = vmul.f32 %v15478_v25, %v12441_v6  ;;  %v4865_v22 = vpop.f32.mrb[9].mxu1  ;;  %v11573_v60 = vcombine.low %v5436_v26, %v5439_v5  ;;  %v17935_v59 = vrot.slane %v15610_v41, 5  ;;  %v15711_v41 = vld [vmem:[#allocation2 + $0x70] sm:$0xf] }
 0x3e0   : > { %v4924_v48 = vmul.f32 %v15478_v25, %v4865_v22  ;;  %v12442_v16 = vpop.f32.mrb[10].mxu1  ;;  %v5317_v22 = vld [vmem:[#allocation2 + $0x50] sm:$0x1]  ;;  %v5821_v26 = vsel %vm13353_vm6, %v5819_v10, %v5820_v45 }
 0x3e1   : > { %6678 = vrot.lane.b32.xlu0 %v11619_v32, %s13051_s20  ;;  %v4962_v17 = vadd.f32 %v15485_v29, %v4926_v39  ;;  %v4927_v13 = vmul.f32 %v15478_v25, %v12442_v16  ;;  %v4868_v8 = vpop.f32.mrb[11].mxu1  ;;  %v15666_v32 = vpop.permute.xlu1 %6590  ;;  %v5607_v39 = vrot.slane %v15646_v14, 6  ;;  %v5818_v28 = vsel %vm13353_vm6, %v11506_v51, %v17935_v59 }
 0x3e2   : > { %6930 = vrot.lane.b32.xlu1 %v11665_v46, %s13054_s30  ;;  %v17834_v46 = vrot.slane %v15646_v14, 5  ;;  %v4960_v18 = vadd.f32 %v15485_v29, %v4924_v48  ;;  %v4925_v12 = vmul.f32 %v15478_v25, %v4868_v8  ;;  %v11522_v25 = vrot.slane %v5907_v35, 10  ;;  %v5509_v8 = vld [vmem:[#allocation2 + $0x50] sm:$0x3] }
 0x3e3   : > { %v15671_v40 = vmax.f32 %v4962_v17, 0.0  ;;  %v4963_v6 = vadd.f32 %v15485_v29, %v4927_v13  ;;  %v15687_v17 = vpop.permute.xlu0 %6858  ;;  %v5431_v13 = vrot.slane %v5317_v22, 5  ;;  %v5609_v10 = vrot.slane %v5607_v39, 4 }
 0x3e4   : > { %v15676_v16 = vmax.f32 %v4960_v18, 0.0  ;;  %v4961_v48 = vadd.f32 %v15485_v29, %v4925_v12  ;;  %v5430_v5 = vrot.slane %v17834_v46, 4  ;;  %v5610_v12 = vrot.slane %v5509_v8, 6 }
 0x3e5   : > { %6506 = vrot.lane.b32.xlu0 %v11589_v56, %s13046_s13  ;;  %17931 = vst [vmem:[#allocation44_spill] sm:$0xff] %v15671_v40  ;;  %v12048_v56 = vpack.c.bf16 %v15671_v40, %v15671_v40  ;;  %v15681_v15 = vmax.f32 %v4963_v6, 0.0  ;;  %v15695_v35 = vpop.permute.xlu1 %6606  ;;  %v5994_v22 = vsel %vm15111_vm9, %v11522_v25, %v5993_v42  ;;  %v11476_v8 = vrot.slane %v5316_v62, 9 }
 0x3e6   : > { %6758 = vrot.lane.b32.xlu1 %v11635_v58, %s13053_s12  ;;  %17932 = vst [vmem:[#allocation45_spill] sm:$0xff] %v15676_v16  ;;  %v12046_v58 = vpack.c.bf16 %v15676_v16, %v15676_v16  ;;  %v15691_v29 = vmax.f32 %v4961_v48, 0.0  ;;  %v5611_v25 = vsel %vm15111_vm9, %v5609_v10, %v5610_v12  ;;  %v6225_v10 = vrot.slane %v15711_v41, 5 }
 0x3e7   : > { %17933 = vst [vmem:[#allocation46_spill] sm:$0xff] %v15681_v15  ;;  %v5161_v18 = vrot.slane %v12048_v56, 7  ;;  %v12049_v45 = vpack.c.bf16 %v15681_v15, %v15681_v15  ;;  %v5508_v56 = vld [vmem:[#allocation2 + $0x48] sm:$0xc]  ;;  %v11634_v15 = vcombine.low %v5994_v22, %v5997_v52  ;;  %v15718_v52 = vld [vmem:[#allocation2 + $0x70] sm:$0xf]  ;;  %v15720_v62 = vpop.permute.xlu0 %6604 }
 0x3e8   : > { %17934 = vst [vmem:[#allocation47_spill] sm:$0xff] %v15691_v29  ;;  %v5156_v6 = vrot.slane %v12046_v58, 7  ;;  %v12047_v48 = vpack.c.bf16 %v15691_v29, %v15691_v29  ;;  %v11618_v29 = vcombine.low %v5818_v28, %v5821_v26  ;;  %v11492_v42 = vrot.slane %v5508_v56, 10  ;;  %v6086_v28 = vld [vmem:[#allocation2 + $0x6c] sm:$0xf] }
 0x3e9   : > { %6928 = vrot.lane.b32.xlu0 %v11664_v0, %s13054_s30  ;;  %v5162_v46 = vrot.slane %v5161_v18, 4  ;;  %5263 = vst [vmem:[#allocation2 + $0xb4] sm:$0xe] %v5161_v18  ;;  %v5163_v0 = vrot.slane %v12049_v45, 7  ;;  %v6118_v22 = vld [vmem:[#allocation2 + $0x6c] sm:$0xe]  ;;  %v11651_v56 = vcombine.low %v6086_v28, %v15711_v41 }
 0x3ea   : > { %6426 = vrot.lane.b32.xlu1 %v11573_v60, %s13045_s9  ;;  %v5157_v58 = vrot.slane %v5156_v6, 4  ;;  %5260 = vst [vmem:[#allocation2 + $0xa8] sm:$0xe] %v5156_v6  ;;  %v5158_v40 = vrot.slane %v12047_v48, 7  ;;  %v5432_v60 = vsel %vm13353_vm6, %v5430_v5, %v5431_v13  ;;  %v15729_v13 = vpop.permute.xlu1 %6856  ;;  %v5608_v18 = vsel %vm15111_vm9, %v11492_v42, %v5607_v39  ;;  %v15736_v6 = vld [vmem:[#allocation2 + $0x70] sm:$0xf] }
 0x3eb   : > { %v5164_v51 = vsel %vm13368_vm8, %v5162_v46, %v5163_v0  ;;  %v5165_v59 = vrot.slane %v5163_v0, 4  ;;  %v17936_v46 = vrot.slane %v15646_v14, 5  ;;  %v11588_v12 = vcombine.low %v5608_v18, %v5611_v25  ;;  %v6119_v14 = vld [vmem:[#allocation2 + $0x74] sm:$0x1]  ;;  %v5689_v48 = vld [vmem:[#allocation2 + $0x6c] sm:$0xf] }
 0x3ec   : > { %5264 = vst [vmem:[#allocation2 + $0xb8] sm:$0xf] %v5164_v51  ;;  %v5159_v26 = vsel %vm13368_vm8, %v5157_v58, %v5158_v40  ;;  %v5160_v5 = vrot.slane %v5158_v40, 4  ;;  %v5838_v40 = vrot.slane %v15718_v52, 5  ;;  %v11605_v39 = vcombine.low %v5689_v48, %v15718_v52  ;;  %v15741_v0 = vld [vmem:[#allocation2 + $0x64] sm:$0xf] }
 0x3ed   : > { %6756 = vrot.lane.b32.xlu0 %v11634_v15, %s13053_s12  ;;  %v5429_v15 = vsel %vm13353_vm6, %v11476_v8, %v17936_v46  ;;  %5265 = vst [vmem:[#allocation2 + $0xbc] sm:$0x1] %v5165_v59  ;;  %5261 = vst [vmem:[#allocation2 + $0xac] sm:$0xf] %v5159_v26  ;;  %v6227_v8 = vrot.slane %v6225_v10, 4  ;;  %v6228_v59 = vrot.slane %v6119_v14, 5 }
 0x3ee   : > { %6676 = vrot.lane.b32.xlu1 %v11618_v29, %s13051_s20  ;;  %v11572_v45 = vcombine.low %v5429_v15, %v5432_v60  ;;  %5262 = vst [vmem:[#allocation2 + $0xb0] sm:$0x1] %v5160_v5  ;;  %v5722_v29 = vld [vmem:[#allocation2 + $0x74] sm:$0x1]  ;;  %v5721_v58 = vld [vmem:[#allocation2 + $0x6c] sm:$0xe]  ;;  %v15743_v60 = vpop.permute.xlu0 %6670  ;;  %v15748_v5 = vpop.permute.xlu1 %6750 }
 0x3ef   : > { %v15745_v51 = vld [vmem:[#allocation2 + $0x64] sm:$0xf]  ;;  %v5840_v42 = vrot.slane %v5838_v40, 4  ;;  %v5841_v25 = vrot.slane %v5722_v29, 5  ;;  %v5628_v26 = vrot.slane %v15736_v6, 6  ;;  %v6014_v41 = vrot.slane %v15718_v52, 6 }
 0x3f0   : > { %v6084_v46 = vld [vmem:[#allocation2 + $0x60] sm:$0xf]  ;;  %v5515_v15 = vld [vmem:[#allocation2 + $0x74] sm:$0x3]  ;;  %v6218_v18 = vrot.slane %v15741_v0, 5  ;;  %v11539_v48 = vrot.slane %v6118_v22, 9  ;;  %v6229_v16 = vsel %vm13353_vm6, %v6227_v8, %v6228_v59 }
 0x3f1   : > { %6424 = vrot.lane.b32.xlu0 %v11572_v45, %s13045_s9  ;;  %v5687_v45 = vld [vmem:[#allocation2 + $0x60] sm:$0xf]  ;;  %v11650_v14 = vcombine.low %v6084_v46, %v15741_v0  ;;  %v11509_v28 = vrot.slane %v5721_v58, 9  ;;  %v5913_v52 = vld [vmem:[#allocation2 + $0x6c] sm:$0xc]  ;;  %v5630_v50 = vrot.slane %v5628_v26, 4 }
 0x3f2   : > { %6504 = vrot.lane.b32.xlu1 %v11588_v12, %s13046_s13  ;;  %v5914_v12 = vld [vmem:[#allocation2 + $0x74] sm:$0x3]  ;;  %v11604_v29 = vcombine.low %v5687_v45, %v15745_v51  ;;  %v6016_v55 = vrot.slane %v6014_v41, 4  ;;  %v5449_v0 = vrot.slane %v15736_v6, 5  ;;  %v6117_v46 = vld [vmem:[#allocation2 + $0x68] sm:$0x1]  ;;  %v15762_v45 = vpop.permute.xlu0 %6498  ;;  %v6226_v22 = vsel %vm13353_vm6, %v11539_v48, %v6225_v10 }
 0x3f3   : > { %v6017_v34 = vrot.slane %v5914_v12, 6  ;;  %v5839_v8 = vsel %vm13353_vm6, %v11509_v28, %v5838_v40  ;;  %v5323_v58 = vld [vmem:[#allocation2 + $0x74] sm:$0x1]  ;;  %v11525_v12 = vrot.slane %v5913_v52, 10  ;;  %v11495_v6 = vrot.slane %v5514_v4, 10 }
 0x3f4   : > { %v15769_v59 = vld [vmem:[#allocation2 + $0x94] sm:$0xf]  ;;  %v6220_v53 = vrot.slane %v6218_v18, 4  ;;  %v5451_v40 = vrot.slane %v5449_v0, 4  ;;  %v5452_v48 = vrot.slane %v5323_v58, 5 }
 0x3f5   : > { %6854 = vrot.lane.b32.xlu0 %v11651_v56, %s13052_s22  ;;  %v5842_v56 = vsel %vm13353_vm6, %v5840_v42, %v5841_v25  ;;  %v15771_v42 = vpop.permute.xlu1 %6418  ;;  %v11667_v25 = vcombine.low %v6226_v22, %v6229_v16  ;;  %v6018_v10 = vsel %vm15111_vm9, %v6016_v55, %v6017_v34  ;;  %v6116_v28 = vld [vmem:[#allocation2 + $0x60] sm:$0xe]  ;;  %v5859_v7 = vrot.slane %v15769_v59, 5  ;;  %v5322_v16 = vld [vmem:[#allocation2 + $0x6c] sm:$0xe] }
 0x3f6   : > { %6602 = vrot.lane.b32.xlu1 %v11605_v39, %s13050_s17  ;;  %v5631_v39 = vrot.slane %v5515_v15, 6  ;;  %v11621_v15 = vcombine.low %v5839_v8, %v5842_v56  ;;  %v5629_v4 = vsel %vm15111_vm9, %v11495_v6, %v5628_v26  ;;  %v5728_v56 = vld [vmem:[#allocation2 + $0x98] sm:$0x1]  ;;  %v11538_v34 = vrot.slane %v6116_v28, 9  ;;  %v5727_v6 = vld [vmem:[#allocation2 + $0x90] sm:$0xe] }
 0x3f7   : > { %v6035_v22 = vrot.slane %v15769_v59, 6  ;;  %v11479_v26 = vrot.slane %v5322_v16, 9  ;;  %v5453_v58 = vsel %vm13353_vm6, %v5451_v40, %v5452_v48  ;;  %v5912_v28 = vld [vmem:[#allocation2 + $0x68] sm:$0x3]  ;;  %v6129_v23 = vld [vmem:[#allocation2 + $0xb0] sm:$0x1] }
 0x3f8   : > { %v5734_v31 = vld [vmem:[#allocation2 + $0xbc] sm:$0x1] }
 0x3f9   : > { %6600 = vrot.lane.b32.xlu0 %v11604_v29, %s13050_s17  ;;  %v5632_v29 = vsel %vm15111_vm9, %v5630_v50, %v5631_v39  ;;  %v6015_v50 = vsel %vm15111_vm9, %v11525_v12, %v6014_v41  ;;  %v15784_v39 = vpop.permute.xlu0 %6748  ;;  %v15789_v8 = vpop.permute.xlu1 %6668  ;;  %v5862_v41 = vrot.slane %v5728_v56, 5  ;;  %v6219_v12 = vsel %vm13353_vm6, %v11538_v34, %v6218_v18  ;;  %v15801_v56 = vld [vmem:[#allocation2 + $0x88] sm:$0xf] }
 0x3fa   : > { %6852 = vrot.lane.b32.xlu1 %v11650_v14, %s13052_s22  ;;  %v6221_v14 = vrot.slane %v6117_v46, 5  ;;  %v11591_v52 = vcombine.low %v5629_v4, %v5632_v29  ;;  %v11637_v46 = vcombine.low %v6015_v50, %v6018_v10  ;;  %v5450_v29 = vsel %vm13353_vm6, %v11479_v26, %v5449_v0  ;;  %v5720_v10 = vld [vmem:[#allocation2 + $0x68] sm:$0x1]  ;;  %v5695_v0 = vld [vmem:[#allocation2 + $0x90] sm:$0xf] }
 0x3fb   : > { %v6007_v4 = vrot.slane %v15745_v51, 6  ;;  %v11575_v40 = vcombine.low %v5450_v29, %v5453_v58  ;;  %v6037_v48 = vrot.slane %v6035_v22, 4  ;;  %v11512_v50 = vrot.slane %v5727_v6, 9  ;;  %v5719_v6 = vld [vmem:[#allocation2 + $0x60] sm:$0xe] }
 0x3fc   : > { %v6222_v55 = vsel %vm13353_vm6, %v6220_v53, %v6221_v14  ;;  %v5831_v53 = vrot.slane %v15745_v51, 5  ;;  %v5834_v51 = vrot.slane %v5720_v10, 5  ;;  %v6010_v26 = vrot.slane %v5912_v28, 6  ;;  %v5911_v29 = vld [vmem:[#allocation2 + $0x60] sm:$0xc] }
 0x3fd   : > { %6682 = vrot.lane.b32.xlu0 %v11621_v15, %s13051_s20  ;;  %v5920_v15 = vld [vmem:[#allocation2 + $0x98] sm:$0x3]  ;;  %v11666_v14 = vcombine.low %v6219_v12, %v6222_v55  ;;  %v15806_v34 = vpop.permute.xlu0 %6416  ;;  %v15809_v58 = vpop.permute.xlu1 %6496  ;;  %v11608_v12 = vcombine.low %v5695_v0, %v15769_v59  ;;  %v6096_v10 = vld [vmem:[#allocation2 + $0xa8] sm:$0xf]  ;;  %v11508_v59 = vrot.slane %v5719_v6, 9 }
 0x3fe   : > { %6934 = vrot.lane.b32.xlu1 %v11667_v25, %s13054_s30  ;;  %v5861_v25 = vrot.slane %v5859_v7, 4  ;;  %v6038_v16 = vrot.slane %v5920_v15, 6  ;;  %v5833_v55 = vrot.slane %v5831_v53, 4  ;;  %v5860_v15 = vsel %vm13353_vm6, %v11512_v50, %v5859_v7  ;;  %v6128_v28 = vld [vmem:[#allocation2 + $0xa8] sm:$0xe] }
 0x3ff   : > { %v11524_v50 = vrot.slane %v5911_v29, 10  ;;  %v5327_v0 = vld [vmem:[#allocation2 + $0x8c] sm:$0x1] }
 0x400   : > { %v5863_v18 = vsel %vm13353_vm6, %v5861_v25, %v5862_v41  ;;  %v6009_v25 = vrot.slane %v6007_v4, 4  ;;  %v5463_v41 = vrot.slane %v15801_v56, 5  ;;  %v5466_v29 = vrot.slane %v5327_v0, 5  ;;  %v5518_v0 = vld [vmem:[#allocation2 + $0x84] sm:$0xc] }
 0x401   : > { %6510 = vrot.lane.b32.xlu0 %v11591_v52, %s13046_s13  ;;  %v6097_v52 = vld [vmem:[#allocation2 + $0xac] sm:$0xf] }
 0x402   : > { %6762 = vrot.lane.b32.xlu1 %v11637_v46, %s13053_s12  ;;  %v5919_v46 = vld [vmem:[#allocation2 + $0x90] sm:$0xc]  ;;  %v6260_v44 = vrot.slane %v6097_v52, 5  ;;  %v5465_v6 = vrot.slane %v5463_v41, 4 }
 0x403   : > { %v11528_v1 = vrot.slane %v5919_v46, 10  ;;  %v5642_v46 = vrot.slane %v15801_v56, 6  ;;  %v6008_v56 = vsel %vm15111_vm9, %v11524_v50, %v6007_v4 }
 0x404   : > { %v6262_v47 = vrot.slane %v6260_v44, 4  ;;  %v5467_v50 = vsel %vm13353_vm6, %v5465_v6, %v5466_v29 }
 0x405   : > { %6932 = vrot.lane.b32.xlu0 %v11666_v14, %s13054_s30  ;;  %v11624_v14 = vcombine.low %v5860_v15, %v5863_v18  ;;  %v6036_v7 = vsel %vm15111_vm9, %v11528_v1, %v6035_v22  ;;  %v5835_v18 = vsel %vm13353_vm6, %v5833_v55, %v5834_v51  ;;  %v15828_v15 = vld [vmem:[#allocation2 + $0x64] sm:$0xf]  ;;  %v6263_v1 = vrot.slane %v6129_v23, 5  ;;  %v15830_v22 = vpop.permute.xlu1 %6938  ;;  %v5519_v55 = vld [vmem:[#allocation2 + $0x8c] sm:$0x3] }
 0x406   : > { %6430 = vrot.lane.b32.xlu1 %v11575_v40, %s13045_s9  ;;  %v6039_v40 = vsel %vm15111_vm9, %v6037_v48, %v6038_v16  ;;  %v6011_v48 = vsel %vm15111_vm9, %v6009_v25, %v6010_v26  ;;  %v15825_v16 = vpop.permute.xlu0 %6686  ;;  %v5832_v51 = vsel %vm13353_vm6, %v11508_v59, %v5831_v53  ;;  %v5326_v26 = vld [vmem:[#allocation2 + $0x84] sm:$0xe]  ;;  %v5644_v53 = vrot.slane %v5642_v46, 4 }
 0x407   : > { %v11640_v30 = vcombine.low %v6036_v7, %v6039_v40  ;;  %17937 = vst [vmem:[#allocation48_spill] sm:$0xff] %v15825_v16  ;;  %v11620_v25 = vcombine.low %v5832_v51, %v5835_v18  ;;  %v11636_v23 = vcombine.low %v6008_v56, %v6011_v48  ;;  %v5513_v40 = vld [vmem:[#allocation2 + $0x68] sm:$0x3]  ;;  %v6264_v7 = vsel %vm13353_vm6, %v6262_v47, %v6263_v1  ;;  %v15847_v18 = vld [vmem:[#allocation2 + $0xa0] sm:$0xf] }
 0x408   : > { %v5645_v59 = vrot.slane %v5519_v55, 6  ;;  %v11481_v4 = vrot.slane %v5326_v26, 9  ;;  %v11497_v55 = vrot.slane %v5518_v0, 10  ;;  %v5512_v51 = vld [vmem:[#allocation2 + $0x60] sm:$0xc]  ;;  %v5866_v11 = vrot.slane %v15847_v18, 5 }
 0x409   : > { %6608 = vrot.lane.b32.xlu0 %v11608_v12, %s13050_s17  ;;  %v11656_v12 = vcombine.low %v6096_v10, %v6097_v52  ;;  %v5621_v52 = vrot.slane %v15828_v15, 6  ;;  %v5321_v10 = vld [vmem:[#allocation2 + $0x68] sm:$0x1]  ;;  %v5320_v56 = vld [vmem:[#allocation2 + $0x60] sm:$0xe] }
 0x40a   : > { %6688 = vrot.lane.b32.xlu1 %v11624_v14, %s13051_s20  ;;  %v11544_v14 = vrot.slane %v6128_v28, 9  ;;  %v15849_v48 = vpop.permute.xlu0 %6936  ;;  %v5445_v47 = vrot.slane %v5321_v10, 5  ;;  %v5646_v29 = vsel %vm15111_vm9, %v5644_v53, %v5645_v59  ;;  %v15861_v10 = vld [vmem:[#allocation2 + $0x94] sm:$0xf]  ;;  %v11478_v53 = vrot.slane %v5320_v56, 9 }
 0x40b   : > { %v15868_v59 = vld [vmem:[#allocation2 + $0xb8] sm:$0xf]  ;;  %v17940_v38 = vrot.slane %v15861_v10, 5 }
 0x40c   : > { %v6261_v28 = vsel %vm13353_vm6, %v11544_v14, %v6260_v44  ;;  %v5623_v44 = vrot.slane %v5621_v52, 4  ;;  %v5464_v14 = vsel %vm13353_vm6, %v11481_v4, %v5463_v41  ;;  %v5697_v41 = vld [vmem:[#allocation2 + $0x9c] sm:$0xf]  ;;  %v5329_v56 = vld [vmem:[#allocation2 + $0x98] sm:$0x1] }
 0x40d   : > { %6768 = vrot.lane.b32.xlu0 %v11640_v30, %s13053_s12  ;;  %v5442_v30 = vrot.slane %v15828_v15, 5  ;;  %v15852_v15 = vpop.permute.xlu1 %6766  ;;  %v11672_v1 = vcombine.low %v6261_v28, %v6264_v7  ;;  %v11577_v6 = vcombine.low %v5464_v14, %v5467_v50  ;;  %v5643_v28 = vsel %vm15111_vm9, %v11497_v55, %v5642_v46 }
 0x40e   : > { %6864 = vrot.lane.b32.xlu1 %v11656_v12, %s13052_s22  ;;  %17938 = vst [vmem:[#allocation49_spill] sm:$0xff] %v15852_v15  ;;  %v5624_v12 = vrot.slane %v5513_v40, 6  ;;  %v5730_v40 = vld [vmem:[#allocation2 + $0xa4] sm:$0x1]  ;;  %v11494_v7 = vrot.slane %v5512_v51, 10  ;;  %v11609_v4 = vcombine.low %v5697_v41, %v15847_v18  ;;  %v11593_v50 = vcombine.low %v5643_v28, %v5646_v29 }
 0x40f   : > { %v5444_v26 = vrot.slane %v5442_v30, 4  ;;  %v5868_v55 = vrot.slane %v5866_v11, 4  ;;  %v5869_v51 = vrot.slane %v5730_v40, 5  ;;  %v15883_v29 = vld [vmem:[#allocation2 + $0x40] sm:$0xf]  ;;  %v5443_v40 = vsel %vm13353_vm6, %v11478_v53, %v5442_v30 }
 0x410   : > { %v5625_v0 = vsel %vm15111_vm9, %v5623_v44, %v5624_v12  ;;  %v5521_v44 = vld [vmem:[#allocation2 + $0x98] sm:$0x3]  ;;  %v5649_v12 = vrot.slane %v15861_v10, 6  ;;  %v6130_v41 = vld [vmem:[#allocation2 + $0xb4] sm:$0xe] }
 0x411   : > { %6760 = vrot.lane.b32.xlu0 %v11636_v23, %s13053_s12  ;;  %v5922_v23 = vld [vmem:[#allocation2 + $0xa4] sm:$0x3]  ;;  %v5446_v14 = vsel %vm13353_vm6, %v5444_v26, %v5445_v47  ;;  %v15875_v61 = vpop.permute.xlu1 %6684  ;;  %v6267_v47 = vrot.slane %v15868_v59, 5  ;;  %v6131_v28 = vld [vmem:[#allocation2 + $0xbc] sm:$0x1]  ;;  %v5870_v26 = vsel %vm13353_vm6, %v5868_v55, %v5869_v51  ;;  %v11545_v53 = vrot.slane %v6130_v41, 9 }
 0x412   : > { %6680 = vrot.lane.b32.xlu1 %v11620_v25, %s13051_s20  ;;  %v6042_v25 = vrot.slane %v15847_v18, 6  ;;  %v6045_v33 = vrot.slane %v5922_v23, 6  ;;  %v5622_v18 = vsel %vm15111_vm9, %v11494_v7, %v5621_v52  ;;  %v5652_v52 = vrot.slane %v5521_v44, 6  ;;  %v5328_v7 = vld [vmem:[#allocation2 + $0x90] sm:$0xe] }
 0x413   : > { %v11590_v23 = vcombine.low %v5622_v18, %v5625_v0  ;;  %v5651_v57 = vrot.slane %v5649_v12, 4  ;;  %v15892_v0 = vld [vmem:[#allocation2 + $0xac] sm:$0xf]  ;;  %v5472_v44 = vrot.slane %v17940_v38, 4  ;;  %v11498_v55 = vrot.slane %v5520_v54, 10 }
 0x414   : > { %v6044_v46 = vrot.slane %v6042_v25, 4  ;;  %v11482_v51 = vrot.slane %v5328_v7, 9  ;;  %v5873_v38 = vrot.slane %v15892_v0, 5  ;;  %v5732_v18 = vld [vmem:[#allocation2 + $0xb0] sm:$0x1] }
 0x415   : > { %6944 = vrot.lane.b32.xlu0 %v11672_v1, %s13054_s30  ;;  %v15873_v1 = vpop.permute.xlu0 %6764  ;;  %v5650_v54 = vsel %vm15111_vm9, %v11498_v55, %v5649_v12  ;;  %v5653_v7 = vsel %vm15111_vm9, %v5651_v57, %v5652_v52  ;;  %v12783_v12 = vld [vmem:[%s17812_s4 + $0x1] ss:$0 sm:$0xff] }
 0x416   : > { %6434 = vrot.lane.b32.xlu1 %v11577_v6, %s13045_s9  ;;  %v5921_v6 = vld [vmem:[#allocation2 + $0x9c] sm:$0xc]  ;;  %v6046_v63 = vsel %vm15111_vm9, %v6044_v46, %v6045_v33  ;;  %v5867_v33 = vsel %vm13353_vm6, %v11513_v36, %v5866_v11  ;;  %v15902_v46 = vpop.permute.xlu1 %6512 }
 0x417   : > { %v11529_v49 = vrot.slane %v5921_v6, 10  ;;  %v6270_v6 = vrot.slane %v6131_v28, 5  ;;  %17941 = vst [vmem:[#allocation51_spill] sm:$0xff] %v15902_v46  ;;  %v11625_v41 = vcombine.low %v5867_v33, %v5870_v26  ;;  %v6098_v28 = vld [vmem:[#allocation2 + $0xb4] sm:$0xf]  ;;  %v6268_v26 = vsel %vm13353_vm6, %v11545_v53, %v6267_v47 }
 0x418   : > { %v16041_v46 = vld [vmem:[#allocation2 + $0xac] sm:$0xf] }
 0x419   : > { %6514 = vrot.lane.b32.xlu0 %v11593_v50, %s13046_s13  ;;  %v11574_v50 = vcombine.low %v5443_v40, %v5446_v14  ;;  %v15895_v30 = vpop.permute.xlu0 %6432  ;;  %v6269_v14 = vrot.slane %v6267_v47, 4  ;;  %v6043_v40 = vsel %vm15111_vm9, %v11529_v49, %v6042_v25 }
 0x41a   : > { %6610 = vrot.lane.b32.xlu1 %v11609_v4, %s13050_s17  ;;  %v5473_v4 = vrot.slane %v5329_v56, 5  ;;  %17939 = vst [vmem:[#allocation50_spill] sm:$0xff] %v15895_v30  ;;  %v11641_v43 = vcombine.low %v6043_v40, %v6046_v63  ;;  %v15931_v20 = vpop.permute.xlu1 %6594 }
 0x41b   : > { %v6271_v33 = vsel %vm13353_vm6, %v6269_v14, %v6270_v6  ;;  %v5875_v14 = vrot.slane %v5873_v38, 4  ;;  %v5876_v6 = vrot.slane %v5732_v18, 5 }
 0x41c   : > { %v5474_v63 = vsel %vm13353_vm6, %v5472_v44, %v5473_v4  ;;  %v11673_v37 = vcombine.low %v6268_v26, %v6271_v33 }
 0x41d   : > { %6428 = vrot.lane.b32.xlu0 %v11574_v50, %s13045_s9  ;;  %v5731_v50 = vld [vmem:[#allocation2 + $0xa8] sm:$0xe]  ;;  %v15927_v53 = vpop.permute.xlu0 %6846 }
 0x41e   : > { %6508 = vrot.lane.b32.xlu1 %v11590_v23, %s13046_s13  ;;  %v12782_v23 = vld [vmem:[%s17812_s4] ss:$0 sm:$0xff]  ;;  %v11514_v40 = vrot.slane %v5731_v50, 9  ;;  %v5924_v50 = vld [vmem:[#allocation2 + $0xb0] sm:$0x3] }
 0x41f   : > { %v12445_v56 = vpop.f32.mrb[12].mxu1 }
 0x420   : > { %v4930_v36 = vmul.f32 %v12782_v23, %v12445_v56  ;;  %v4881_v11 = vpop.f32.mrb[13].mxu1  ;;  %v11657_v56 = vcombine.low %v6098_v28, %v15868_v59  ;;  %v11594_v59 = vcombine.low %v5650_v54, %v5653_v7  ;;  %v17944_v28 = vrot.slane %v15861_v10, 5  ;;  %v7236_v7 = vld [vmem:[#allocation2 + $0x44] sm:$0x3] }
 0x421   : > { %v4928_v49 = vmul.f32 %v12782_v23, %v4881_v11  ;;  %v12446_v25 = vpop.f32.mrb[14].mxu1  ;;  %6690 = vrot.lane.b32.xlu0 %v11625_v41, %s13051_s20  ;;  %v5923_v11 = vld [vmem:[#allocation2 + $0xa8] sm:$0xc]  ;;  %v5874_v10 = vsel %vm13353_vm6, %v11514_v40, %v5873_v38  ;;  %v15959_v38 = vpop.permute.xlu0 %6592 }
 0x422   : > { %v4966_v55 = vadd.f32 %v12783_v12, %v4930_v36  ;;  %v4931_v57 = vmul.f32 %v12782_v23, %v12446_v25  ;;  %v4884_v52 = vpop.f32.mrb[15].mxu1  ;;  %6770 = vrot.lane.b32.xlu1 %v11641_v43, %s13053_s12  ;;  %v6049_v36 = vrot.slane %v15892_v0, 6  ;;  %v5471_v18 = vsel %vm13353_vm6, %v11482_v51, %v17944_v28 }
 0x423   : > { %v4964_v41 = vadd.f32 %v12783_v12, %v4928_v49  ;;  %v4929_v47 = vmul.f32 %v12782_v23, %v4884_v52  ;;  %v5272_v23 = vld [vmem:[#allocation2] sm:$0xf]  ;;  %v11578_v33 = vcombine.low %v5471_v18, %v5474_v63  ;;  %v5877_v51 = vsel %vm13353_vm6, %v5875_v14, %v5876_v6  ;;  %v15962_v6 = vpop.permute.xlu1 %6844 }
 0x424   : > { %v15929_v4 = vmax.f32 %v4966_v55, 0.0  ;;  %v4967_v44 = vadd.f32 %v12783_v12, %v4931_v57  ;;  %v11530_v55 = vrot.slane %v5923_v11, 10  ;;  %v6052_v63 = vrot.slane %v5924_v50, 6 }
 0x425   : > { %v15934_v25 = vmax.f32 %v4964_v41, 0.0  ;;  %v4965_v43 = vadd.f32 %v12783_v12, %v4929_v47  ;;  %6866 = vrot.lane.b32.xlu0 %v11657_v56, %s13052_s22  ;;  %v5699_v56 = vld [vmem:[#allocation2 + $0xa8] sm:$0xf]  ;;  %v12784_v41 = vld [vmem:[#allocation2 + $0x4] sm:$0xf]  ;;  %v7339_v18 = vrot.slane %v7236_v7, 6 }
 0x426   : > { %17942 = vst [vmem:[#allocation52_spill] sm:$0xff] %v15929_v4  ;;  %v12052_v49 = vpack.c.bf16 %v15929_v4, %v15929_v4  ;;  %v15943_v26 = vmax.f32 %v4967_v44, 0.0  ;;  %6946 = vrot.lane.b32.xlu1 %v11673_v37, %s13054_s30  ;;  %v6051_v37 = vrot.slane %v6049_v36, 4  ;;  %v11550_v47 = vcombine.low %v5272_v23, %v12784_v41  ;;  %v5274_v7 = vld [vmem:[#allocation2 + $0xc] sm:$0xf] }
 0x427   : > { %17943 = vst [vmem:[#allocation53_spill] sm:$0xff] %v15934_v25  ;;  %v12050_v12 = vpack.c.bf16 %v15934_v25, %v15934_v25  ;;  %v15948_v54 = vmax.f32 %v4965_v43, 0.0  ;;  %v17947_v43 = vrot.slane %v15883_v29, 6 }
 0x428   : > { %17945 = vst [vmem:[#allocation54_spill] sm:$0xff] %v15943_v26  ;;  %v5171_v57 = vrot.slane %v12052_v49, 7  ;;  %v12053_v52 = vpack.c.bf16 %v15943_v26, %v15943_v26  ;;  %v11626_v49 = vcombine.low %v5874_v10, %v5877_v51  ;;  %v6053_v41 = vsel %vm15111_vm9, %v6051_v37, %v6052_v63 }
 0x429   : > { %17946 = vst [vmem:[#allocation55_spill] sm:$0xff] %v15948_v54  ;;  %v5166_v11 = vrot.slane %v12050_v12, 7  ;;  %v12051_v44 = vpack.c.bf16 %v15948_v54, %v15948_v54  ;;  %6436 = vrot.lane.b32.xlu0 %v11578_v33, %s13045_s9  ;;  %v7338_v28 = vrot.slane %v17947_v43, 4  ;;  %v11610_v12 = vcombine.low %v5699_v56, %v15892_v0  ;;  %v15967_v33 = vld [vmem:[#allocation2 + $0xa0] sm:$0xf] }
 0x42a   : > { %v5172_v40 = vrot.slane %v5171_v57, 4  ;;  %5269 = vst [vmem:[#allocation2 + $0xcc] sm:$0xe] %v5171_v57  ;;  %v5173_v14 = vrot.slane %v12053_v52, 7  ;;  %6516 = vrot.lane.b32.xlu1 %v11594_v59, %s13046_s13  ;;  %v6050_v59 = vsel %vm15111_vm9, %v11530_v55, %v6049_v36  ;;  %v7238_v43 = vld [vmem:[#allocation2 + $0x4c] sm:$0xf]  ;;  %v6958_v56 = vsel %vm4374_vm13, %v11550_v47, %v15606_v3 }
 0x42b   : > { %v5167_v50 = vrot.slane %v5166_v11, 4  ;;  %5266 = vst [vmem:[#allocation2 + $0xc0] sm:$0xe] %v5166_v11  ;;  %v5168_v23 = vrot.slane %v12051_v44, 7  ;;  %v7234_v0 = vld [vmem:[#allocation2 + $0x3c] sm:$0xc]  ;;  %v11642_v63 = vcombine.low %v6050_v59, %v6053_v41  ;;  %v15988_v3 = vsel %vm15111_vm9, %v7338_v28, %v7339_v18 }
 0x42c   : > { %v5174_v57 = vsel %vm13368_vm8, %v5172_v40, %v5173_v14  ;;  %v5175_v52 = vrot.slane %v5173_v14, 4  ;;  %v5477_v36 = vrot.slane %v15967_v33, 5  ;;  %v7237_v55 = vld [vmem:[#allocation2 + $0x48] sm:$0xc]  ;;  %v5331_v11 = vld [vmem:[#allocation2 + $0xa4] sm:$0x1] }
 0x42d   : > { %5270 = vst [vmem:[#allocation2 + $0xd0] sm:$0xf] %v5174_v57  ;;  %v5169_v10 = vsel %vm13368_vm8, %v5167_v50, %v5168_v23  ;;  %v5170_v51 = vrot.slane %v5168_v23, 4  ;;  %6612 = vrot.lane.b32.xlu0 %v11610_v12, %s13050_s17  ;;  %v7343_v44 = vrot.slane %v7238_v43, 6  ;;  %v12785_v40 = vld [vmem:[#allocation2 + $0x10] sm:$0xf] }
 0x42e   : > { %5271 = vst [vmem:[#allocation2 + $0xd4] sm:$0x1] %v5175_v52  ;;  %5267 = vst [vmem:[#allocation2 + $0xc4] sm:$0xf] %v5169_v10  ;;  %6692 = vrot.lane.b32.xlu1 %v11626_v49, %s13051_s20  ;;  %v11551_v14 = vcombine.low %v5274_v7, %v12785_v40  ;;  %v11679_v23 = vrot.slane %v7234_v0, 10  ;;  %v7005_v49 = vsel %vm4440_vm15, %v6958_v56, %v15608_v2  ;;  %v11680_v52 = vrot.slane %v7237_v55, 10 }
 0x42f   : > { %5268 = vst [vmem:[#allocation2 + $0xc8] sm:$0x1] %v5170_v51  ;;  %v15982_v37 = vpop.permute.xlu0 %6862  ;;  %v15990_v47 = vld [vmem:[#allocation2 + $0x50] sm:$0x3]  ;;  %v5330_v12 = vld [vmem:[#allocation2 + $0x9c] sm:$0xe] }
 0x430   : > { %17948 = vst [vmem:[#allocation56_spill] sm:$0xff] %v15982_v37  ;;  %v15984_v50 = vpop.permute.xlu1 %6860  ;;  %v5523_v57 = vld [vmem:[#allocation2 + $0xa4] sm:$0x3]  ;;  %v5479_v59 = vrot.slane %v5477_v36, 4  ;;  %v5480_v41 = vrot.slane %v5331_v11, 5  ;;  %v17949_v10 = vrot.slane %v15883_v29, 6  ;;  %v16008_v0 = vsel %vm15111_vm9, %v11680_v52, %v7343_v44 }
 0x431   : > { %6772 = vrot.lane.b32.xlu0 %v11642_v63, %s13053_s12  ;;  %v6961_v55 = vsel %vm4374_vm13, %v11551_v14, %v15633_v19  ;;  %v7037_v29 = vsel %vm4506_vm1, %v7005_v49, %v15659_v27  ;;  %v16017_v40 = vld [vmem:[#allocation2 + $0xb8] sm:$0xf]  ;;  %v11483_v52 = vrot.slane %v5330_v12, 9  ;;  %v5659_v7 = vrot.slane %v5523_v57, 6  ;;  %v5925_v12 = vld [vmem:[#allocation2 + $0xb4] sm:$0xc] }
 0x432   : > { %v6132_v43 = vld [vmem:[#allocation2 + $0xc0] sm:$0xe]  ;;  %v16000_v28 = vsel %vm15111_vm9, %v11679_v23, %v17949_v10  ;;  %v5522_v23 = vld [vmem:[#allocation2 + $0x9c] sm:$0xc]  ;;  %v7345_v10 = vrot.slane %v7343_v44, 4  ;;  %v5481_v19 = vsel %vm13353_vm6, %v5479_v59, %v5480_v41  ;;  %v17950_v27 = vrot.slane %v15967_v33, 6 }
 0x433   : > { %v6100_v18 = vld [vmem:[#allocation2 + $0xc0] sm:$0xf]  ;;  %v16002_v51 = vpop.permute.xlu0 %6674  ;;  %v11546_v11 = vrot.slane %v6132_v43, 9  ;;  %v7069_v43 = vsel %vm4572_vm3, %v7037_v29, %v15789_v8  ;;  %v11499_v25 = vrot.slane %v5522_v23, 10  ;;  %v6056_v57 = vrot.slane %v16017_v40, 6 }
 0x434   : > { %v16015_v63 = vpop.permute.xlu1 %6926  ;;  %v5658_v49 = vrot.slane %v17950_v27, 4  ;;  %v16023_v4 = vld [vmem:[#allocation2 + $0xd0] sm:$0xf]  ;;  %v5478_v59 = vsel %vm13353_vm6, %v11483_v52, %v5477_v36  ;;  %v5926_v27 = vld [vmem:[#allocation2 + $0xbc] sm:$0x3]  ;;  %v5880_v29 = vrot.slane %v16017_v40, 5  ;;  %v7007_v23 = vsel %vm4440_vm15, %v6961_v55, %v15628_v24 }
 0x435   : > { %v6101_v2 = vld [vmem:[#allocation2 + $0xc4] sm:$0xf]  ;;  %v5733_v8 = vld [vmem:[#allocation2 + $0xb4] sm:$0xe]  ;;  %v7102_v36 = vsel %vm7100_vm10, %v7069_v43, %v15784_v39  ;;  %v11531_v52 = vrot.slane %v5925_v12, 10  ;;  %v6058_v15 = vrot.slane %v6056_v57, 4 }
 0x436   : > { %v6274_v26 = vrot.slane %v6101_v2, 5  ;;  %v11658_v56 = vcombine.low %v6100_v18, %v6101_v2  ;;  %v6133_v14 = vld [vmem:[#allocation2 + $0xc8] sm:$0x1]  ;;  %v6134_v37 = vld [vmem:[#allocation2 + $0xcc] sm:$0xe]  ;;  %v7135_v24 = vsel %vm7133_vm11, %v7102_v36, %v15962_v6  ;;  %v6059_v16 = vrot.slane %v5926_v27, 6 }
 0x437   : > { %v6277_v44 = vrot.slane %v6133_v14, 5  ;;  %v16027_v54 = vpop.permute.xlu0 %6502  ;;  %v11579_v14 = vcombine.low %v5478_v59, %v5481_v19  ;;  %v6135_v30 = vld [vmem:[#allocation2 + $0xd4] sm:$0x1]  ;;  %v5663_v36 = vrot.slane %v16041_v46, 6  ;;  %v7039_v27 = vsel %vm4506_vm1, %v7007_v23, %v15666_v32 }
 0x438   : > { %6868 = vrot.lane.b32.xlu1 %v11658_v56, %s13052_s22  ;;  %v6275_v41 = vsel %vm13353_vm6, %v11546_v11, %v6274_v26  ;;  %v6276_v18 = vrot.slane %v6274_v26, 4  ;;  %v16035_v2 = vpop.permute.xlu1 %6754  ;;  %v6281_v56 = vrot.slane %v16023_v4, 5  ;;  %v5660_v11 = vsel %vm15111_vm9, %v5658_v49, %v5659_v7  ;;  %v5701_v19 = vld [vmem:[#allocation2 + $0xb4] sm:$0xf] }
 0x439   : > { %v5883_v7 = vrot.slane %v5734_v31, 5  ;;  %v11547_v49 = vrot.slane %v6134_v37, 9  ;;  %v6284_v6 = vrot.slane %v6135_v30, 5  ;;  %v17952_v31 = vcombine.low %v16000_v28, %v15988_v3 }
 0x43a   : > { %v6278_v26 = vsel %vm13353_vm6, %v6276_v18, %v6277_v44  ;;  %v11515_v44 = vrot.slane %v5733_v8, 9  ;;  %v5882_v18 = vrot.slane %v5880_v29, 4  ;;  %v6283_v12 = vrot.slane %v6281_v56, 4 }
 0x43b   : > { %v11674_v55 = vcombine.low %v6275_v41, %v6278_v26  ;;  %v6925_v59 = vpop.permute.xlu0 %6924  ;;  %v5524_v41 = vld [vmem:[#allocation2 + $0xa8] sm:$0xc]  ;;  %v17951_v26 = vrot.slane %v15967_v33, 6  ;;  %v17953_v30 = vrot.slane %v15990_v47, 6  ;;  %v7071_v32 = vsel %vm4572_vm3, %v7039_v27, %v15743_v60  ;;  %v5525_v60 = vld [vmem:[#allocation2 + $0xb0] sm:$0x3] }
 0x43c   : > { %6438 = vrot.lane.b32.xlu1 %v11579_v14, %s13045_s9  ;;  %v16052_v39 = vpop.permute.xlu1 %6422  ;;  %v7168_v43 = vsel %vm7166_vm12, %v7135_v24, %v6925_v59  ;;  %v11611_v14 = vcombine.low %v5701_v19, %v16017_v40  ;;  %v16072_v24 = vld [vmem:[#allocation2 + $0xc4] sm:$0xf]  ;;  %v6057_v33 = vsel %vm15111_vm9, %v11531_v52, %v6056_v57  ;;  %v5881_v47 = vsel %vm13353_vm6, %v11515_v44, %v5880_v29  ;;  %v5333_v29 = vld [vmem:[#allocation2 + $0xb0] sm:$0x1] }
 0x43d   : > { %6948 = vrot.lane.b32.xlu0 %v11674_v55, %s13054_s30  ;;  %7744 = vmatmul.mubr.bf16.vlgmr.msra.gmra.mrb[16].mxu1 %v7168_v43  ;;  %v5657_v8 = vsel %vm15111_vm9, %v11499_v25, %v17951_v26  ;;  %v7347_v37 = vsel %vm15111_vm9, %v7345_v10, %v17953_v30  ;;  %v6060_v25 = vsel %vm15111_vm9, %v6058_v15, %v6059_v16  ;;  %v11500_v23 = vrot.slane %v5524_v41, 10  ;;  %v6102_v43 = vld [vmem:[#allocation2 + $0xcc] sm:$0xf]  ;;  %v16111_v30 = vld [vmem:[#allocation2 + $0xdc] sm:$0xf] }
 0x43e   : > { %12103 = vmatprep.mubr.msk.bf16.mxu1 %vm4374_vm13, %v17952_v31  ;;  %v11595_v40 = vcombine.low %v5657_v8, %v5660_v11  ;;  %v5884_v28 = vsel %vm13353_vm6, %v5882_v18, %v5883_v7  ;;  %v5332_v11 = vld [vmem:[#allocation2 + $0xa8] sm:$0xe]  ;;  %v5484_v57 = vrot.slane %v16041_v46, 5  ;;  %v6282_v16 = vsel %vm13353_vm6, %v11547_v49, %v6281_v56  ;;  %v5735_v46 = vld [vmem:[#allocation2 + $0xc0] sm:$0xe] }
 0x43f   : > { %v16080_v3 = vpop.permute.xlu0 %6752  ;;  %v6285_v15 = vsel %vm13353_vm6, %v6283_v12, %v6284_v6  ;;  %v5665_v52 = vrot.slane %v5663_v36, 4  ;;  %v5887_v55 = vrot.slane %v16072_v24, 5  ;;  %v7104_v19 = vsel %vm7100_vm10, %v7071_v32, %v15748_v5  ;;  %v5736_v18 = vld [vmem:[#allocation2 + $0xc8] sm:$0x1] }
 0x440   : > { %6614 = vrot.lane.b32.xlu1 %v11611_v14, %s13050_s17  ;;  %v16087_v10 = vpop.permute.xlu1 %6672  ;;  %v11643_v59 = vcombine.low %v6057_v33, %v6060_v25  ;;  %v11696_v44 = vcombine.low %v16008_v0, %v7347_v37  ;;  %v7137_v7 = vsel %vm7133_vm11, %v7104_v19, %v15927_v53  ;;  %v11627_v56 = vcombine.low %v5881_v47, %v5884_v28  ;;  %v5927_v33 = vld [vmem:[#allocation2 + $0xc0] sm:$0xc] }
 0x441   : > { %6518 = vrot.lane.b32.xlu0 %v11595_v40, %s13046_s13  ;;  %v5666_v12 = vrot.slane %v5525_v60, 6  ;;  %v11484_v6 = vrot.slane %v5332_v11, 9  ;;  %v11675_v41 = vcombine.low %v6282_v16, %v6285_v15  ;;  %v5486_v5 = vrot.slane %v5484_v57, 4  ;;  %v16127_v60 = vld [vmem:[#allocation2 + $0xb8] sm:$0xf] }
 0x442   : > { %v5487_v14 = vrot.slane %v5333_v29, 5  ;;  %v7171_v0 = vsel %vm7166_vm12, %v7137_v7, %v16015_v63  ;;  %v11659_v26 = vcombine.low %v6102_v43, %v16023_v4  ;;  %v11516_v53 = vrot.slane %v5735_v46, 9  ;;  %v5928_v4 = vld [vmem:[#allocation2 + $0xc8] sm:$0x3]  ;;  %17955 = vst [vmem:[#allocation58_spill] sm:$0xff] %v16127_v60 }
 0x443   : > { %v16101_v49 = vpop.permute.xlu0 %6420  ;;  %v5889_v8 = vrot.slane %v5887_v55, 4  ;;  %v5890_v31 = vrot.slane %v5736_v18, 5  ;;  %v6063_v37 = vrot.slane %v16072_v24, 6  ;;  %v5664_v32 = vsel %vm15111_vm9, %v11500_v23, %v5663_v36  ;;  %v16135_v16 = vld [vmem:[#allocation2 + $0x58] sm:$0xf] }
 0x444   : > { %6774 = vrot.lane.b32.xlu1 %v11643_v59, %s13053_s12  ;;  %v16104_v27 = vpop.permute.xlu1 %6500  ;;  %v5667_v63 = vsel %vm15111_vm9, %v5665_v52, %v5666_v12  ;;  %v5485_v25 = vsel %vm13353_vm6, %v11484_v6, %v5484_v57  ;;  %v5488_v47 = vsel %vm13353_vm6, %v5486_v5, %v5487_v14  ;;  %v5888_v36 = vsel %vm13353_vm6, %v11516_v53, %v5887_v55  ;;  %v5703_v15 = vld [vmem:[#allocation2 + $0xc0] sm:$0xf]  ;;  %v6136_v46 = vld [vmem:[#allocation2 + $0xd8] sm:$0xe]  ;;  %v5335_v12 = vld [vmem:[#allocation2 + $0xbc] sm:$0x1] }
 0x445   : > { %6694 = vrot.lane.b32.xlu0 %v11627_v56, %s13051_s20  ;;  %7752 = vmatmul.mubr.bf16.gmra.mrb[20].mxu1 %v7171_v0  ;;  %v5891_v23 = vsel %vm13353_vm6, %v5889_v8, %v5890_v31  ;;  %v6288_v11 = vrot.slane %v16111_v30, 5  ;;  %v11596_v57 = vcombine.low %v5664_v32, %v5667_v63  ;;  %v11532_v52 = vrot.slane %v5927_v33, 10  ;;  %v6137_v18 = vld [vmem:[#allocation2 + $0xe0] sm:$0x1]  ;;  %v5334_v56 = vld [vmem:[#allocation2 + $0xb4] sm:$0xe] }
 0x446   : > { %12104 = vmatprep.mubr.msk.bf16.mxu1 %vm4374_vm13, %v11696_v44  ;;  %v6065_v29 = vrot.slane %v6063_v37, 4  ;;  %v6066_v19 = vrot.slane %v5928_v4, 6  ;;  %v11580_v59 = vcombine.low %v5485_v25, %v5488_v47  ;;  %v5491_v44 = vrot.slane %v16127_v60, 5  ;;  %v5276_v6 = vld [vmem:[#allocation2 + $0x18] sm:$0xf] }
 0x447   : > { %v16118_v40 = vpop.permute.xlu0 %6940  ;;  %v11628_v55 = vcombine.low %v5888_v36, %v5891_v23  ;;  %v6104_v5 = vld [vmem:[#allocation2 + $0xd8] sm:$0xf]  ;;  %v6290_v14 = vrot.slane %v6288_v11, 4  ;;  %v7350_v0 = vrot.slane %v16135_v16, 6  ;;  %v11548_v8 = vrot.slane %v6136_v46, 9 }
 0x448   : > { %6950 = vrot.lane.b32.xlu1 %v11675_v41, %s13054_s30  ;;  %v16125_v28 = vpop.permute.xlu1 %6942  ;;  %v11612_v41 = vcombine.low %v5703_v15, %v16072_v24  ;;  %v6067_v53 = vsel %vm15111_vm9, %v6065_v29, %v6066_v19  ;;  %v6291_v31 = vrot.slane %v6137_v18, 5  ;;  %v7240_v32 = vld [vmem:[#allocation2 + $0x54] sm:$0xc]  ;;  %v7242_v63 = vld [vmem:[#allocation2 + $0x5c] sm:$0x3]  ;;  %v11485_v4 = vrot.slane %v5334_v56, 9 }
 0x449   : > { %17954 = vst [vmem:[#allocation57_spill] sm:$0xff] %v16125_v28  ;;  %6870 = vrot.lane.b32.xlu0 %v11659_v26, %s13052_s22  ;;  %v6064_v26 = vsel %vm15111_vm9, %v11532_v52, %v6063_v37  ;;  %v5493_v25 = vrot.slane %v5491_v44, 4  ;;  %v5494_v47 = vrot.slane %v5335_v12, 5  ;;  %v5526_v24 = vld [vmem:[#allocation2 + $0xb4] sm:$0xc]  ;;  %v11660_v16 = vcombine.low %v6104_v5, %v16111_v30 }
 0x44a   : > { %v12786_v36 = vld [vmem:[#allocation2 + $0x1c] sm:$0xf]  ;;  %v5670_v52 = vrot.slane %v16127_v60, 6  ;;  %v11644_v29 = vcombine.low %v6064_v26, %v6067_v53  ;;  %v11681_v19 = vrot.slane %v7240_v32, 10  ;;  %v7353_v46 = vrot.slane %v7242_v63, 6 }
 0x44b   : > { %v16137_v43 = vpop.permute.xlu0 %6850  ;;  %v11552_v23 = vcombine.low %v5276_v6, %v12786_v36  ;;  %v5527_v15 = vld [vmem:[#allocation2 + $0xbc] sm:$0x3]  ;;  %v6292_v30 = vsel %vm13353_vm6, %v6290_v14, %v6291_v31  ;;  %v11501_v56 = vrot.slane %v5526_v24, 10  ;;  %v16166_v12 = vld [vmem:[#allocation2 + $0xe8] sm:$0xf]  ;;  %v5492_v6 = vsel %vm13353_vm6, %v11485_v4, %v5491_v44 }
 0x44c   : > { %6520 = vrot.lane.b32.xlu1 %v11596_v57, %s13046_s13  ;;  %v16141_v7 = vpop.permute.xlu1 %6598  ;;  %v16156_v57 = vld [vmem:[#allocation2 + $0xd0] sm:$0xf]  ;;  %v5673_v26 = vrot.slane %v5527_v15, 6  ;;  %v5672_v53 = vrot.slane %v5670_v52, 4  ;;  %v5929_v14 = vld [vmem:[#allocation2 + $0xcc] sm:$0xc] }
 0x44d   : > { %6440 = vrot.lane.b32.xlu0 %v11580_v59, %s13045_s9  ;;  %v7352_v59 = vrot.slane %v7350_v0, 4  ;;  %v6964_v18 = vsel %vm4374_vm13, %v11552_v23, %v15806_v34  ;;  %v6070_v34 = vrot.slane %v16156_v57, 6  ;;  %v5894_v31 = vrot.slane %v16156_v57, 5  ;;  %v5737_v63 = vld [vmem:[#allocation2 + $0xcc] sm:$0xe] }
 0x44e   : > { %v7009_v44 = vsel %vm4440_vm15, %v6964_v18, %v15809_v58  ;;  %v5738_v4 = vld [vmem:[#allocation2 + $0xd4] sm:$0x1]  ;;  %v5671_v23 = vsel %vm15111_vm9, %v11501_v56, %v5670_v52  ;;  %v6139_v15 = vld [vmem:[#allocation2 + $0xec] sm:$0x1]  ;;  %v5674_v52 = vsel %vm15111_vm9, %v5672_v53, %v5673_v26  ;;  %v12787_v60 = vld [vmem:[#allocation2 + $0x28] sm:$0xf] }
 0x44f   : > { %v16150_v33 = vpop.permute.xlu0 %6596  ;;  %v7041_v24 = vsel %vm4506_vm1, %v7009_v44, %v15959_v38  ;;  %v7354_v58 = vsel %vm15111_vm9, %v7352_v59, %v7353_v46  ;;  %v5896_v59 = vrot.slane %v5894_v31, 4  ;;  %v5897_v46 = vrot.slane %v5738_v4, 5  ;;  %v7245_v28 = vld [vmem:[#allocation2 + $0x68] sm:$0x3] }
 0x450   : > { %6696 = vrot.lane.b32.xlu1 %v11628_v55, %s13051_s20  ;;  %v16154_v37 = vpop.permute.xlu1 %6848  ;;  %v6289_v55 = vsel %vm13353_vm6, %v11548_v8, %v6288_v11  ;;  %v5930_v8 = vld [vmem:[#allocation2 + $0xd4] sm:$0x3]  ;;  %v7073_v18 = vsel %vm4572_vm3, %v7041_v24, %v16087_v10  ;;  %v6298_v24 = vrot.slane %v6139_v15, 5  ;;  %v11597_v4 = vcombine.low %v5671_v23, %v5674_v52 }
 0x451   : > { %6616 = vrot.lane.b32.xlu0 %v11612_v41, %s13050_s17  ;;  %v5495_v41 = vsel %vm13353_vm6, %v5493_v25, %v5494_v47  ;;  %v11676_v32 = vcombine.low %v6289_v55, %v6292_v30  ;;  %v6295_v25 = vrot.slane %v16166_v12, 5  ;;  %v7351_v47 = vsel %vm15111_vm9, %v11681_v19, %v7350_v0  ;;  %v5705_v55 = vld [vmem:[#allocation2 + $0xcc] sm:$0xf] }
 0x452   : > { %v11581_v36 = vcombine.low %v5492_v6, %v5495_v41  ;;  %v11533_v0 = vrot.slane %v5929_v14, 10  ;;  %v6072_v19 = vrot.slane %v6070_v34, 4  ;;  %v6073_v38 = vrot.slane %v5930_v8, 6  ;;  %v5278_v41 = vld [vmem:[#allocation2 + $0x24] sm:$0xf] }
 0x453   : > { %v16172_v5 = vpop.permute.xlu0 %6678  ;;  %v11517_v6 = vrot.slane %v5737_v63, 9  ;;  %v6297_v10 = vrot.slane %v6295_v25, 4  ;;  %v11553_v8 = vcombine.low %v5278_v41, %v12787_v60  ;;  %v11613_v26 = vcombine.low %v5705_v55, %v16156_v57 }
 0x454   : > { %6872 = vrot.lane.b32.xlu1 %v11660_v16, %s13052_s22  ;;  %v16176_v11 = vpop.permute.xlu1 %6930  ;;  %v6138_v16 = vld [vmem:[#allocation2 + $0xe4] sm:$0xe]  ;;  %v11697_v53 = vcombine.low %v7351_v47, %v7354_v58  ;;  %v5898_v57 = vsel %vm13353_vm6, %v5896_v59, %v5897_v46  ;;  %v7360_v58 = vrot.slane %v7245_v28, 6 }
 0x455   : > { %6776 = vrot.lane.b32.xlu0 %v11644_v29, %s13053_s12  ;;  %v16191_v29 = vld [vmem:[#allocation2 + $0x64] sm:$0xf]  ;;  %v11549_v44 = vrot.slane %v6138_v16, 9  ;;  %v6074_v16 = vsel %vm15111_vm9, %v6072_v19, %v6073_v38  ;;  %v6967_v60 = vsel %vm4374_vm13, %v11553_v8, %v15771_v42  ;;  %v6299_v42 = vsel %vm13353_vm6, %v6297_v10, %v6298_v24  ;;  %v7247_v24 = vld [vmem:[#allocation2 + $0x70] sm:$0xf] }
 0x456   : > { %v7357_v14 = vrot.slane %v16191_v29, 6  ;;  %v7011_v55 = vsel %vm4440_vm15, %v6967_v60, %v15762_v45  ;;  %v5280_v8 = vld [vmem:[#allocation2 + $0x30] sm:$0xf] }
 0x457   : > { %v16195_v30 = vpop.permute.xlu0 %6506  ;;  %v7043_v38 = vsel %vm4506_vm1, %v7011_v55, %v15931_v20 }
 0x458   : > { %6442 = vrot.lane.b32.xlu1 %v11581_v36, %s13045_s9  ;;  %v16200_v56 = vpop.permute.xlu1 %6758  ;;  %v7106_v36 = vsel %vm7100_vm10, %v7073_v18, %v16080_v3  ;;  %v5895_v3 = vsel %vm13353_vm6, %v11517_v6, %v5894_v31  ;;  %v7359_v23 = vrot.slane %v7357_v14, 4  ;;  %v6106_v31 = vld [vmem:[#allocation2 + $0xe4] sm:$0xf]  ;;  %v7243_v18 = vld [vmem:[#allocation2 + $0x60] sm:$0xc]  ;;  %v7075_v28 = vsel %vm4572_vm3, %v7043_v38, %v16002_v51 }
 0x459   : > { %6952 = vrot.lane.b32.xlu0 %v11676_v32, %s13054_s30  ;;  %v7139_v63 = vsel %vm7133_vm11, %v7106_v36, %v16154_v37  ;;  %v6071_v32 = vsel %vm15111_vm9, %v11533_v0, %v6070_v34  ;;  %v6296_v34 = vsel %vm13353_vm6, %v11549_v44, %v6295_v25  ;;  %v11629_v0 = vcombine.low %v5895_v3, %v5898_v57  ;;  %v7251_v38 = vld [vmem:[#allocation2 + $0x80] sm:$0x3] }
 0x45a   : > { %v11645_v29 = vcombine.low %v6071_v32, %v6074_v16  ;;  %v11677_v25 = vcombine.low %v6296_v34, %v6299_v42  ;;  %v11661_v6 = vcombine.low %v6106_v31, %v16166_v12  ;;  %v11682_v59 = vrot.slane %v7243_v18, 10  ;;  %v7250_v34 = vld [vmem:[#allocation2 + $0x7c] sm:$0xf] }
 0x45b   : > { %v6929_v15 = vpop.permute.xlu0 %6928  ;;  %v7361_v45 = vsel %vm15111_vm9, %v7359_v23, %v7360_v58  ;;  %v7108_v46 = vsel %vm7100_vm10, %v7075_v28, %v16035_v2  ;;  %v7371_v18 = vrot.slane %v7250_v34, 6 }
 0x45c   : > { %6618 = vrot.lane.b32.xlu1 %v11613_v26, %s13050_s17  ;;  %v16220_v37 = vpop.permute.xlu1 %6426  ;;  %v7174_v47 = vsel %vm7166_vm12, %v7139_v63, %v6929_v15  ;;  %v7141_v20 = vsel %vm7133_vm11, %v7108_v46, %v16137_v43  ;;  %v7358_v10 = vsel %vm15111_vm9, %v11682_v59, %v7357_v14  ;;  %v12788_v14 = vld [vmem:[#allocation2 + $0x34] sm:$0xf]  ;;  %v7364_v63 = vrot.slane %v7247_v24, 6 }
 0x45d   : > { %6522 = vrot.lane.b32.xlu0 %v11597_v4, %s13046_s13  ;;  %7760 = vmatmul.mubr.bf16.gmra.mrb[24].mxu1 %v7174_v47  ;;  %v7177_v12 = vsel %vm7166_vm12, %v7141_v20, %v16176_v11  ;;  %v11698_v44 = vcombine.low %v7358_v10, %v7361_v45  ;;  %v11554_v26 = vcombine.low %v5280_v8, %v12788_v14  ;;  %v7248_v4 = vld [vmem:[#allocation2 + $0x74] sm:$0x3]  ;;  %v7246_v47 = vld [vmem:[#allocation2 + $0x6c] sm:$0xc]  ;;  %v7373_v46 = vrot.slane %v7371_v18, 4 }
 0x45e   : > { %12105 = vmatprep.mubr.msk.bf16.mxu1 %vm4374_vm13, %v11697_v53  ;;  %v7366_v60 = vrot.slane %v7364_v63, 4  ;;  %v7367_v3 = vrot.slane %v7248_v4, 6  ;;  %v7374_v20 = vrot.slane %v7251_v38, 6  ;;  %v7253_v10 = vld [vmem:[#allocation2 + $0x88] sm:$0xf] }
 0x45f   : > { %v6757_v19 = vpop.permute.xlu0 %6756  ;;  %v6970_v11 = vsel %vm4374_vm13, %v11554_v26, %v16101_v49  ;;  %v5282_v49 = vld [vmem:[#allocation2 + $0x3c] sm:$0xf]  ;;  %v5284_v14 = vld [vmem:[#allocation2 + $0x48] sm:$0xf] }
 0x460   : > { %6778 = vrot.lane.b32.xlu1 %v11645_v29, %s13053_s12  ;;  %v6677_v52 = vpop.permute.xlu1 %6676  ;;  %v7013_v15 = vsel %vm4440_vm15, %v6970_v11, %v16104_v27  ;;  %v11683_v29 = vrot.slane %v7246_v47, 10  ;;  %v7368_v31 = vsel %vm15111_vm9, %v7366_v60, %v7367_v3  ;;  %v12789_v27 = vld [vmem:[#allocation2 + $0x40] sm:$0xf] }
 0x461   : > { %6698 = vrot.lane.b32.xlu0 %v11629_v0, %s13051_s20  ;;  %v7045_v57 = vsel %vm4506_vm1, %v7013_v15, %v16150_v33  ;;  %v11555_v55 = vcombine.low %v5282_v49, %v12789_v27  ;;  %v7254_v15 = vld [vmem:[#allocation2 + $0x8c] sm:$0x3]  ;;  %v7256_v27 = vld [vmem:[#allocation2 + $0x94] sm:$0xf] }
 0x462   : > { %v7077_v42 = vsel %vm4572_vm3, %v7045_v57, %v6677_v52  ;;  %v7365_v52 = vsel %vm15111_vm9, %v11683_v29, %v7364_v63  ;;  %v7378_v63 = vrot.slane %v7253_v10, 6  ;;  %v7381_v49 = vrot.slane %v7254_v15, 6  ;;  %v12791_v29 = vld [vmem:[#allocation2 + $0x58] sm:$0xf] }
 0x463   : > { %v16244_v41 = vpop.permute.xlu0 %6424  ;;  %v7110_v0 = vsel %vm7100_vm10, %v7077_v42, %v6757_v19  ;;  %v6973_v28 = vsel %vm4374_vm13, %v11555_v55, %v16052_v39  ;;  %v11699_v45 = vcombine.low %v7365_v52, %v7368_v31  ;;  %v7249_v19 = vld [vmem:[#allocation2 + $0x78] sm:$0xc]  ;;  %v5286_v42 = vld [vmem:[#allocation2 + $0x54] sm:$0xf]  ;;  %v7385_v52 = vrot.slane %v7256_v27, 6 }
 0x464   : > { %6954 = vrot.lane.b32.xlu1 %v11677_v25, %s13054_s30  ;;  %v16249_v51 = vpop.permute.xlu1 %6504  ;;  %v11684_v26 = vrot.slane %v7249_v19, 10  ;;  %v11557_v31 = vcombine.low %v5286_v42, %v12791_v29 }
 0x465   : > { %6874 = vrot.lane.b32.xlu0 %v11661_v6, %s13052_s22  ;;  %7768 = vmatmul.mubr.bf16.gmra.mrb[28].mxu1 %v7177_v12  ;;  %v7015_v12 = vsel %vm4440_vm15, %v6973_v28, %v16027_v54  ;;  %v12790_v54 = vld [vmem:[#allocation2 + $0x4c] sm:$0xf] }
 0x466   : > { %12106 = vmatprep.mubr.msk.bf16.mxu1 %vm4374_vm13, %v11698_v44  ;;  %v7047_v39 = vsel %vm4506_vm1, %v7015_v12, %v16141_v7  ;;  %v11556_v4 = vcombine.low %v5284_v14, %v12790_v54  ;;  %v7372_v3 = vsel %vm15111_vm9, %v11684_v26, %v7371_v18  ;;  %v7259_v12 = vld [vmem:[#allocation2 + $0xa0] sm:$0xf]  ;;  %v7255_v14 = vld [vmem:[#allocation2 + $0x90] sm:$0xc] }
 0x467   : > { %v6855_v2 = vpop.permute.xlu0 %6854  ;;  %v7079_v8 = vsel %vm4572_vm3, %v7047_v39, %v16172_v5  ;;  %v7387_v39 = vrot.slane %v7385_v52, 4  ;;  %v5288_v54 = vld [vmem:[#allocation2 + $0x60] sm:$0xf] }
 0x468   : > { %v16255_v43 = vpop.permute.xlu1 %6602  ;;  %v7112_v11 = vsel %vm7100_vm10, %v7079_v8, %v16200_v56  ;;  %v6976_v5 = vsel %vm4374_vm13, %v11556_v4, %v16244_v41  ;;  %v7380_v56 = vrot.slane %v7378_v63, 4  ;;  %v6979_v41 = vsel %vm4374_vm13, %v11557_v31, %v16220_v37  ;;  %v7258_v31 = vld [vmem:[#allocation2 + $0x9c] sm:$0xc] }
 0x469   : > { %v7145_v60 = vsel %vm7133_vm11, %v7112_v11, %v6855_v2  ;;  %v7252_v2 = vld [vmem:[#allocation2 + $0x84] sm:$0xc]  ;;  %v7017_v18 = vsel %vm4440_vm15, %v6976_v5, %v16249_v51  ;;  %v7019_v51 = vsel %vm4440_vm15, %v6979_v41, %v16195_v30  ;;  %v11686_v4 = vrot.slane %v7255_v14, 10  ;;  %v7264_v14 = vld [vmem:[#allocation2 + $0xb4] sm:$0xc] }
 0x46b   : > { %v16257_v36 = vpop.permute.xlu0 %6600 }
 0x46c   : > { %v6853_v53 = vpop.permute.xlu1 %6852 }
 0x46d   : > { %v7143_v33 = vsel %vm7133_vm11, %v7110_v0, %v6853_v53  ;;  %v7375_v53 = vsel %vm15111_vm9, %v7373_v46, %v7374_v20  ;;  %v7051_v46 = vsel %vm4506_vm1, %v7019_v51, %v16255_v43  ;;  %v5290_v43 = vld [vmem:[#allocation2 + $0x6c] sm:$0xf]  ;;  %v17956_v51 = vld [vmem:[#allocation48_spill] sm:$0xff] }
 0x46e   : > { %v11700_v34 = vcombine.low %v7372_v3, %v7375_v53  ;;  %v7392_v53 = vrot.slane %v7259_v12, 6  ;;  %v12793_v3 = vld [vmem:[#allocation2 + $0x64] sm:$0xf]  ;;  %v5292_v12 = vld [vmem:[#allocation2 + $0x78] sm:$0xf] }
 0x46f   : > { %v16261_v32 = vpop.permute.xlu0 %6682  ;;  %v11558_v5 = vcombine.low %v5288_v54, %v12793_v3  ;;  %v7266_v54 = vld [vmem:[#allocation2 + $0xbc] sm:$0x3]  ;;  %v12795_v3 = vld [vmem:[#allocation2 + $0x88] sm:$0xf] }
 0x470   : > { %v6935_v16 = vpop.permute.xlu1 %6934  ;;  %v7083_v30 = vsel %vm4572_vm3, %v7051_v46, %v16261_v32  ;;  %v7394_v42 = vrot.slane %v7392_v53, 4 }
 0x471   : > { %v7183_v47 = vsel %vm7166_vm12, %v7145_v60, %v6935_v16  ;;  %v7049_v16 = vsel %vm4506_vm1, %v7017_v18, %v16257_v36  ;;  %v7262_v18 = vld [vmem:[#allocation2 + $0xac] sm:$0xf] }
 0x473   : > { %v16268_v23 = vpop.permute.xlu0 %6510 }
 0x474   : > { %v16270_v58 = vpop.permute.xlu1 %6762 }
 0x477   : > { %v6933_v25 = vpop.permute.xlu0 %6932 }
 0x478   : > { %v16280_v6 = vpop.permute.xlu1 %6430  ;;  %v7180_v59 = vsel %vm7166_vm12, %v7143_v33, %v6933_v25  ;;  %v11685_v33 = vrot.slane %v7252_v2, 10  ;;  %v7382_v25 = vsel %vm15111_vm9, %v7380_v56, %v7381_v49 }
 0x479   : > { %7776 = vmatmul.mubr.bf16.gmra.mrb[32].mxu1 %v7180_v59  ;;  %v7257_v59 = vld [vmem:[#allocation2 + $0x98] sm:$0x3] }
 0x47a   : > { %12107 = vmatprep.mubr.msk.bf16.mxu1 %vm4374_vm13, %v11699_v45  ;;  %v7379_v36 = vsel %vm15111_vm9, %v11685_v33, %v7378_v63  ;;  %v7388_v8 = vrot.slane %v7257_v59, 6  ;;  %v12792_v63 = vld [vmem:[#allocation2 + $0x70] sm:$0xf] }
 0x47b   : > { %v16286_v44 = vpop.permute.xlu0 %6608  ;;  %v11701_v10 = vcombine.low %v7379_v36, %v7382_v25 }
 0x47c   : > { %v16290_v24 = vpop.permute.xlu1 %6688  ;;  %v7389_v15 = vsel %vm15111_vm9, %v7387_v39, %v7388_v8  ;;  %v17957_v8 = vld [vmem:[#allocation49_spill] sm:$0xff] }
 0x47f   : > { %v16299_v7 = vpop.permute.xlu0 %6768 }
 0x480   : > { %v16305_v57 = vpop.permute.xlu1 %6864 }
 0x481   : > { %7784 = vmatmul.mubr.bf16.gmra.mrb[36].mxu1 %v7183_v47 }
 0x482   : > { %12108 = vmatprep.mubr.msk.bf16.mxu1 %vm4374_vm13, %v11700_v34  ;;  %v7386_v34 = vsel %vm15111_vm9, %v11686_v4, %v7385_v52  ;;  %v7261_v52 = vld [vmem:[#allocation2 + $0xa8] sm:$0xc] }
 0x483   : > { %v6761_v55 = vpop.permute.xlu0 %6760  ;;  %v11702_v29 = vcombine.low %v7386_v34, %v7389_v15  ;;  %v11688_v46 = vrot.slane %v7261_v52, 10  ;;  %v17959_v15 = vld [vmem:[#allocation56_spill] sm:$0xff]  ;;  %v11689_v34 = vrot.slane %v7264_v14, 10 }
 0x484   : > { %v6681_v0 = vpop.permute.xlu1 %6680 }
 0x485   : > { %v7081_v38 = vsel %vm4572_vm3, %v7049_v16, %v6681_v0  ;;  %v11687_v16 = vrot.slane %v7258_v31, 10 }
 0x486   : > { %v7114_v28 = vsel %vm7100_vm10, %v7081_v38, %v6761_v55 }
 0x487   : > { %v16321_v45 = vpop.permute.xlu0 %6944  ;;  %v7147_v37 = vsel %vm7133_vm11, %v7114_v28, %v15729_v13  ;;  %v7116_v13 = vsel %vm7100_vm10, %v7083_v30, %v16270_v58  ;;  %v7260_v58 = vld [vmem:[#allocation2 + $0xa4] sm:$0x3]  ;;  %v7263_v28 = vld [vmem:[#allocation2 + $0xb0] sm:$0x3]  ;;  %v12794_v30 = vld [vmem:[#allocation2 + $0x7c] sm:$0xf] }
 0x488   : > { %v16329_v20 = vpop.permute.xlu1 %6434  ;;  %v7186_v19 = vsel %vm7166_vm12, %v7147_v37, %v15849_v48  ;;  %v11559_v48 = vcombine.low %v5290_v43, %v12792_v63  ;;  %v7149_v32 = vsel %vm7133_vm11, %v7116_v13, %v15687_v17  ;;  %v7395_v2 = vrot.slane %v7260_v58, 6 }
 0x489   : > { %7792 = vmatmul.mubr.bf16.gmra.mrb[40].mxu1 %v7186_v19  ;;  %v7189_v17 = vsel %vm7166_vm12, %v7149_v32, %v15830_v22  ;;  %v11560_v39 = vcombine.low %v5292_v12, %v12794_v30  ;;  %v5294_v32 = vld [vmem:[#allocation2 + $0x84] sm:$0xf] }
 0x48a   : > { %12109 = vmatprep.mubr.msk.bf16.mxu1 %vm4374_vm13, %v11701_v10  ;;  %v6985_v60 = vsel %vm4374_vm13, %v11559_v48, %v16280_v6  ;;  %v7396_v33 = vsel %vm15111_vm9, %v7394_v42, %v7395_v2  ;;  %v7402_v10 = vrot.slane %v7263_v28, 6  ;;  %v17960_v42 = vld [vmem:[#allocation51_spill] sm:$0xff] }
 0x48b   : > { %v16338_v26 = vpop.permute.xlu0 %6514  ;;  %v7023_v27 = vsel %vm4440_vm15, %v6985_v60, %v16268_v23  ;;  %v7268_v60 = vld [vmem:[#allocation2 + $0xc4] sm:$0xf] }
 0x48c   : > { %v16340_v11 = vpop.permute.xlu1 %6610  ;;  %v7055_v0 = vsel %vm4506_vm1, %v7023_v27, %v15695_v35  ;;  %v17961_v27 = vld [vmem:[#allocation57_spill] sm:$0xff] }
 0x48d   : > { %v7087_v37 = vsel %vm4572_vm3, %v7055_v0, %v17956_v51  ;;  %v16407_v0 = vld [vmem:[#allocation2 + $0xd0] sm:$0xf]  ;;  %v16424_v51 = vld [vmem:[#allocation2 + $0xcc] sm:$0xc] }
 0x48e   : > { %v7120_v13 = vsel %vm7100_vm10, %v7087_v37, %v17957_v8  ;;  %v8280_v8 = vld [vmem:[#allocation2] sm:$0xe] }
 0x48f   : > { %v6429_v47 = vpop.permute.xlu0 %6428  ;;  %v7153_v58 = vsel %vm7133_vm11, %v7120_v13, %v17959_v15  ;;  %v8281_v13 = vld [vmem:[#allocation2 + $0x8] sm:$0x1]  ;;  %v11760_v14 = vrot.slane %v8280_v8, 9  ;;  %v8475_v15 = vld [vmem:[#allocation2 + $0x14] sm:$0x3] }
 0x490   : > { %v6509_v56 = vpop.permute.xlu1 %6508  ;;  %v6982_v49 = vsel %vm4374_vm13, %v11558_v5, %v6429_v47  ;;  %v11561_v5 = vcombine.low %v5294_v32, %v12795_v3  ;;  %v8474_v32 = vld [vmem:[#allocation2 + $0xc] sm:$0xc]  ;;  %v7273_v8 = vld [vmem:[#allocation2 + $0xd8] sm:$0xc] }
 0x491   : > { %v7021_v6 = vsel %vm4440_vm15, %v6982_v49, %v6509_v56  ;;  %7800 = vmatmul.mubr.bf16.gmra.mrb[44].mxu1 %v7189_v17 }
 0x492   : > { %v7053_v55 = vsel %vm4506_vm1, %v7021_v6, %v15720_v62  ;;  %12110 = vmatprep.mubr.msk.bf16.mxu1 %vm4374_vm13, %v11702_v29  ;;  %v7399_v62 = vrot.slane %v7262_v18, 6  ;;  %v7409_v29 = vrot.slane %v7266_v54, 6  ;;  %v6991_v2 = vsel %vm4374_vm13, %v11561_v5, %v16329_v20  ;;  %v7267_v18 = vld [vmem:[#allocation2 + $0xc0] sm:$0xc]  ;;  %v7272_v54 = vld [vmem:[#allocation2 + $0xd4] sm:$0x3] }
 0x493   : > { %v16359_v41 = vpop.permute.xlu0 %6690  ;;  %v7085_v22 = vsel %vm4572_vm3, %v7053_v55, %v15875_v61  ;;  %v7393_v61 = vsel %vm15111_vm9, %v11687_v16, %v7392_v53  ;;  %v17958_v53 = vld [vmem:[#allocation50_spill] sm:$0xff]  ;;  %v7195_v6 = vsel %vm7166_vm12, %v7153_v58, %v17961_v27  ;;  %v7413_v55 = vrot.slane %v7268_v60, 6  ;;  %v7269_v16 = vld [vmem:[#allocation2 + $0xc8] sm:$0x3] }
 0x494   : > { %v16365_v38 = vpop.permute.xlu1 %6770  ;;  %v7118_v23 = vsel %vm7100_vm10, %v7085_v22, %v15873_v1  ;;  %v11703_v35 = vcombine.low %v7393_v61, %v7396_v33  ;;  %v7401_v19 = vrot.slane %v7399_v62, 4  ;;  %v6988_v63 = vsel %vm4374_vm13, %v11560_v39, %v17958_v53  ;;  %v8249_v39 = vld [vmem:[#allocation2 + $0x4] sm:$0xf] }
 0x495   : > { %v7151_v25 = vsel %vm7133_vm11, %v7118_v23, %v15984_v50  ;;  %v7265_v50 = vld [vmem:[#allocation2 + $0xb8] sm:$0xf]  ;;  %v7025_v56 = vsel %vm4440_vm15, %v6988_v63, %v17960_v42  ;;  %v7027_v22 = vsel %vm4440_vm15, %v6991_v2, %v16338_v26  ;;  %v7415_v28 = vrot.slane %v7413_v55, 4  ;;  %v8251_v63 = vld [vmem:[#allocation2 + $0x10] sm:$0xf] }
 0x496   : > { %v7192_v1 = vsel %vm7166_vm12, %v7151_v25, %v16118_v40  ;;  %v7406_v43 = vrot.slane %v7265_v50, 6  ;;  %v7400_v40 = vsel %vm15111_vm9, %v11688_v46, %v7399_v62  ;;  %v7403_v48 = vsel %vm15111_vm9, %v7401_v19, %v7402_v10  ;;  %v5296_v10 = vld [vmem:[#allocation2 + $0x90] sm:$0xf] }
 0x497   : > { %v16375_v59 = vpop.permute.xlu0 %6866  ;;  %v11704_v49 = vcombine.low %v7400_v40, %v7403_v48  ;;  %v7057_v31 = vsel %vm4506_vm1, %v7025_v56, %v16286_v44  ;;  %v11690_v62 = vrot.slane %v7267_v18, 10  ;;  %v7059_v25 = vsel %vm4506_vm1, %v7027_v22, %v16340_v11  ;;  %v8472_v56 = vld [vmem:[#allocation2] sm:$0xc]  ;;  %v8282_v22 = vld [vmem:[#allocation2 + $0xc] sm:$0xe] }
 0x498   : > { %v16379_v36 = vpop.permute.xlu1 %6946  ;;  %v7408_v17 = vrot.slane %v7406_v43, 4  ;;  %v7089_v44 = vsel %vm4572_vm3, %v7057_v31, %v16290_v24  ;;  %v7407_v20 = vsel %vm15111_vm9, %v11689_v34, %v7406_v43  ;;  %v7416_v61 = vrot.slane %v7269_v16, 6  ;;  %v8283_v16 = vld [vmem:[#allocation2 + $0x14] sm:$0x1] }
 0x499   : > { %7808 = vmatmul.mubr.bf16.gmra.mrb[48].mxu1 %v7192_v1  ;;  %v7122_v26 = vsel %vm7100_vm10, %v7089_v44, %v16299_v7  ;;  %v7091_v24 = vsel %vm4572_vm3, %v7059_v25, %v16359_v41  ;;  %v7414_v46 = vsel %vm15111_vm9, %v11690_v62, %v7413_v55  ;;  %v8362_v43 = vrot.slane %v8249_v39, 5 }
 0x49a   : > { %12111 = vmatprep.mubr.msk.bf16.mxu1 %vm4374_vm13, %v11703_v35  ;;  %v7410_v33 = vsel %vm15111_vm9, %v7408_v17, %v7409_v29  ;;  %v7420_v35 = vrot.slane %v16407_v0, 6  ;;  %v7155_v37 = vsel %vm7133_vm11, %v7122_v26, %v16305_v57  ;;  %v7124_v7 = vsel %vm7100_vm10, %v7091_v24, %v16365_v38  ;;  %v8473_v29 = vld [vmem:[#allocation2 + $0x8] sm:$0x3]  ;;  %v5298_v26 = vld [vmem:[#allocation2 + $0x9c] sm:$0xf] }
 0x49b   : > { %v6437_v4 = vpop.permute.xlu0 %6436  ;;  %v11705_v1 = vcombine.low %v7407_v20, %v7410_v33  ;;  %v7198_v11 = vsel %vm7166_vm12, %v7155_v37, %v16321_v45  ;;  %v7417_v41 = vsel %vm15111_vm9, %v7415_v28, %v7416_v61  ;;  %v7157_v19 = vsel %vm7133_vm11, %v7124_v7, %v16375_v59  ;;  %v12796_v45 = vld [vmem:[#allocation2 + $0x94] sm:$0xf]  ;;  %v7274_v20 = vld [vmem:[#allocation2 + $0xdc] sm:$0xf]  ;;  %v12797_v37 = vld [vmem:[#allocation2 + $0xa0] sm:$0xf] }
 0x49c   : > { %v16394_v47 = vpop.permute.xlu1 %6516  ;;  %v11691_v57 = vrot.slane %v16424_v51, 10  ;;  %v16443_v38 = vrot.slane %v7420_v35, 4  ;;  %v11562_v12 = vcombine.low %v5296_v10, %v12796_v45  ;;  %v11706_v59 = vcombine.low %v7414_v46, %v7417_v41 }
 0x49d   : > { %v8365_v53 = vrot.slane %v8281_v13, 5  ;;  %v7201_v48 = vsel %vm7166_vm12, %v7157_v19, %v16379_v36  ;;  %v8545_v58 = vrot.slane %v8251_v63, 6  ;;  %v8538_v60 = vrot.slane %v8249_v39, 6  ;;  %v7275_v13 = vld [vmem:[#allocation2 + $0xe0] sm:$0x3] }
 0x49e   : > { %v6994_v40 = vsel %vm4374_vm13, %v11562_v12, %v6437_v4  ;;  %v8363_v3 = vsel %vm13353_vm6, %v11760_v14, %v8362_v43  ;;  %v8364_v5 = vrot.slane %v8362_v43, 4  ;;  %v11777_v34 = vrot.slane %v8474_v32, 10 }
 0x49f   : > { %v6613_v23 = vpop.permute.xlu0 %6612  ;;  %v8548_v42 = vrot.slane %v8475_v15, 6  ;;  %v8547_v17 = vrot.slane %v8545_v58, 4  ;;  %v11776_v31 = vrot.slane %v8472_v56, 10  ;;  %v8540_v4 = vrot.slane %v8538_v60, 4  ;;  %v12798_v56 = vld [vmem:[#allocation2 + $0xac] sm:$0xf] }
 0x4a0   : > { %v16419_v52 = vpop.permute.xlu1 %6692  ;;  %v8369_v2 = vrot.slane %v8251_v63, 5  ;;  %v7029_v36 = vsel %vm4440_vm15, %v6994_v40, %v16394_v47  ;;  %v8546_v18 = vsel %vm15111_vm9, %v11777_v34, %v8545_v58  ;;  %v8541_v55 = vrot.slane %v8473_v29, 6  ;;  %v5300_v58 = vld [vmem:[#allocation2 + $0xa8] sm:$0xf] }
 0x4a1   : > { %7816 = vmatmul.mubr.bf16.gmra.mrb[52].mxu1 %v7195_v6  ;;  %v8366_v6 = vsel %vm13353_vm6, %v8364_v5, %v8365_v53  ;;  %v7061_v44 = vsel %vm4506_vm1, %v7029_v36, %v6613_v23  ;;  %v8549_v62 = vsel %vm15111_vm9, %v8547_v17, %v8548_v42  ;;  %v8539_v47 = vsel %vm15111_vm9, %v11776_v31, %v8538_v60  ;;  %v7277_v5 = vld [vmem:[#allocation2 + $0xe8] sm:$0xf]  ;;  %v7276_v36 = vld [vmem:[#allocation2 + $0xe4] sm:$0xc] }
 0x4a2   : > { %12112 = vmatprep.mubr.msk.bf16.mxu1 %vm4374_vm13, %v11704_v49  ;;  %v11856_v33 = vcombine.low %v8363_v3, %v8366_v6  ;;  %v7423_v25 = vrot.slane %v7272_v54, 6  ;;  %v8542_v28 = vsel %vm15111_vm9, %v8540_v4, %v8541_v55  ;;  %v11761_v61 = vrot.slane %v8282_v22, 9 }
 0x4a3   : > { %v16438_v50 = vpop.permute.xlu0 %6772  ;;  %v8371_v24 = vrot.slane %v8369_v2, 4  ;;  %v11873_v23 = vcombine.low %v8546_v18, %v8549_v62  ;;  %v8372_v46 = vrot.slane %v8283_v16, 5  ;;  %v7093_v41 = vsel %vm4572_vm3, %v7061_v44, %v16419_v52 }
 0x4a4   : > { %9384 = vrot.lane.b32.xlu0 %v11856_v33, %s13045_s9  ;;  %v7427_v10 = vrot.slane %v7274_v20, 6  ;;  %v8370_v45 = vsel %vm13353_vm6, %v11761_v61, %v8369_v2  ;;  %v7126_v12 = vsel %vm7100_vm10, %v7093_v41, %v16438_v50  ;;  %v7421_v52 = vsel %vm15111_vm9, %v11691_v57, %v7420_v35  ;;  %v5302_v61 = vld [vmem:[#allocation2 + $0xb4] sm:$0xf] }
 0x4a5   : > { %v7424_v50 = vsel %vm15111_vm9, %v16443_v38, %v7423_v25  ;;  %v7430_v0 = vrot.slane %v7275_v13, 6  ;;  %v7434_v31 = vrot.slane %v7277_v5, 6  ;;  %v11693_v22 = vrot.slane %v7276_v36, 10 }
 0x4a6   : > { %v7429_v54 = vrot.slane %v7427_v10, 4  ;;  %v11707_v35 = vcombine.low %v7421_v52, %v7424_v50 }
 0x4a7   : > { %v7436_v16 = vrot.slane %v7434_v31, 4 }
 0x4a8   : > { %9466 = vrot.lane.b32.xlu0 %v11873_v23, %s13046_s13  ;;  %v7431_v60 = vsel %vm15111_vm9, %v7429_v54, %v7430_v0  ;;  %v16532_v0 = vld [vmem:[%s17812_s4 + $0x3] ss:$0 sm:$0xff] }
 0x4a9   : > { %7824 = vmatmul.mubr.bf16.gmra.mrb[56].mxu1 %v7198_v11  ;;  %v11872_v11 = vcombine.low %v8539_v47, %v8542_v28 }
 0x4aa   : > { %v16445_v30 = vpop.permute.xlu1 %6868  ;;  %12113 = vmatprep.mubr.msk.bf16.mxu1 %vm4374_vm13, %v11705_v1  ;;  %v11563_v1 = vcombine.low %v5298_v26, %v12797_v37  ;;  %v7435_v26 = vsel %vm15111_vm9, %v11693_v22, %v7434_v31 }
 0x4ab   : > { %9464 = vrot.lane.b32.xlu1 %v11872_v11, %s13046_s13  ;;  %v7159_v40 = vsel %vm7133_vm11, %v7126_v12, %v16445_v30  ;;  %v17962_v11 = vld [vmem:[#allocation58_spill] sm:$0xff] }
 0x4ae   : > { %v6439_v49 = vpop.permute.xlu1 %6438 }
 0x4af   : > { %v6949_v27 = vpop.permute.xlu0 %6948  ;;  %v6997_v39 = vsel %vm4374_vm13, %v11563_v1, %v6439_v49  ;;  %v11564_v49 = vcombine.low %v5300_v58, %v12798_v56 }
 0x4b0   : > { %v7204_v32 = vsel %vm7166_vm12, %v7159_v40, %v6949_v27  ;;  %v7278_v27 = vld [vmem:[#allocation2 + $0xec] sm:$0x3] }
 0x4b1   : > { %7832 = vmatmul.mubr.bf16.gmra.mrb[60].mxu1 %v7201_v48  ;;  %v11692_v48 = vrot.slane %v7273_v8, 10  ;;  %v7437_v44 = vrot.slane %v7278_v27, 6 }
 0x4b2   : > { %v6615_v7 = vpop.permute.xlu1 %6614  ;;  %12114 = vmatprep.mubr.msk.bf16.mxu1 %vm4374_vm13, %v11706_v59  ;;  %v8373_v59 = vsel %vm13353_vm6, %v8371_v24, %v8372_v46  ;;  %v11565_v46 = vcombine.low %v5302_v61, %v17962_v11 }
 0x4b3   : > { %v6519_v19 = vpop.permute.xlu0 %6518  ;;  %v11857_v43 = vcombine.low %v8370_v45, %v8373_v59  ;;  %v7428_v30 = vsel %vm15111_vm9, %v11692_v48, %v7427_v10  ;;  %v7438_v25 = vsel %vm15111_vm9, %v7436_v16, %v7437_v44 }
 0x4b4   : > { %v7031_v14 = vsel %vm4440_vm15, %v6997_v39, %v6519_v19  ;;  %v11708_v17 = vcombine.low %v7428_v30, %v7431_v60  ;;  %v11709_v37 = vcombine.low %v7435_v26, %v7438_v25 }
 0x4b5   : > { %v7063_v51 = vsel %vm4506_vm1, %v7031_v14, %v6615_v7  ;;  %9386 = vrot.lane.b32.xlu1 %v11857_v43, %s13045_s9 }
 0x4b6   : > { %v6775_v53 = vpop.permute.xlu1 %6774 }
 0x4b7   : > { %v6695_v63 = vpop.permute.xlu0 %6694 }
 0x4b8   : > { %v7095_v57 = vsel %vm4572_vm3, %v7063_v51, %v6695_v63  ;;  %v16527_v63 = vld [vmem:[%s17812_s4 + $0x2] ss:$0 sm:$0xff] }
 0x4b9   : > { %7840 = vmatmul.mubr.bf16.gmra.mrb[64].mxu1 %v7204_v32  ;;  %v7128_v3 = vsel %vm7100_vm10, %v7095_v57, %v6775_v53 }
 0x4ba   : > { %v6951_v38 = vpop.permute.xlu1 %6950  ;;  %12115 = vmatprep.mubr.msk.bf16.mxu1 %vm4374_vm13, %v11707_v35 }
 0x4bb   : > { %v6871_v15 = vpop.permute.xlu0 %6870 }
 0x4bc   : > { %v7161_v34 = vsel %vm7133_vm11, %v7128_v3, %v6871_v15 }
 0x4bd   : > { %v7207_v2 = vsel %vm7166_vm12, %v7161_v34, %v6951_v38 }
 0x4be   : > { %v6521_v42 = vpop.permute.xlu1 %6520 }
 0x4bf   : > { %v6441_v29 = vpop.permute.xlu0 %6440 }
 0x4c0   : > { %v7000_v4 = vsel %vm4374_vm13, %v11564_v49, %v6441_v29 }
 0x4c1   : > { %7848 = vmatmul.mubr.bf16.gmra.mrb[68].mxu1 %v7207_v2  ;;  %v7033_v18 = vsel %vm4440_vm15, %v7000_v4, %v6521_v42 }
 0x4c2   : > { %v6697_v6 = vpop.permute.xlu1 %6696  ;;  %12116 = vmatprep.mubr.msk.bf16.mxu1 %vm4374_vm13, %v11708_v17 }
 0x4c3   : > { %v6617_v55 = vpop.permute.xlu0 %6616 }
 0x4c4   : > { %v7065_v20 = vsel %vm4506_vm1, %v7033_v18, %v6617_v55 }
 0x4c5   : > { %v7097_v62 = vsel %vm4572_vm3, %v7065_v20, %v6697_v6 }
 0x4c6   : > { %v6873_v33 = vpop.permute.xlu1 %6872 }
 0x4c7   : > { %v6777_v47 = vpop.permute.xlu0 %6776 }
 0x4c8   : > { %v7130_v28 = vsel %vm7100_vm10, %v7097_v62, %v6777_v47 }
 0x4c9   : > { %v7163_v7 = vsel %vm7133_vm11, %v7130_v28, %v6873_v33 }
 0x4ca   : > { %v6443_v24 = vpop.permute.xlu1 %6442 }
 0x4cb   : > { %v6953_v1 = vpop.permute.xlu0 %6952  ;;  %v7003_v19 = vsel %vm4374_vm13, %v11565_v46, %v6443_v24 }
 0x4cc   : > { %v7210_v23 = vsel %vm7166_vm12, %v7163_v7, %v6953_v1 }
 0x4cd   : > { %7856 = vmatmul.mubr.bf16.gmra.mrb[72].mxu1 %v7210_v23 }
 0x4ce   : > { %v6619_v41 = vpop.permute.xlu1 %6618  ;;  %12117 = vmatprep.mubr.msk.bf16.mxu1 %vm4374_vm13, %v11709_v37 }
 0x4cf   : > { %v6523_v10 = vpop.permute.xlu0 %6522 }
 0x4d0   : > { %v7035_v45 = vsel %vm4440_vm15, %v7003_v19, %v6523_v10 }
 0x4d1   : > { %v7067_v39 = vsel %vm4506_vm1, %v7035_v45, %v6619_v41 }
 0x4d2   : > { %v6779_v12 = vpop.permute.xlu1 %6778 }
 0x4d3   : > { %v6699_v8 = vpop.permute.xlu0 %6698 }
 0x4d4   : > { %v7099_v13 = vsel %vm4572_vm3, %v7067_v39, %v6699_v8 }
 0x4d5   : > { %v7132_v14 = vsel %vm7100_vm10, %v7099_v13, %v6779_v12 }
 0x4d6   : > { %v6955_v59 = vpop.permute.xlu1 %6954 }
 0x4d7   : > { %v6875_v52 = vpop.permute.xlu0 %6874 }
 0x4d8   : > { %v7165_v50 = vsel %vm7133_vm11, %v7132_v14, %v6875_v52 }
 0x4d9   : > { %v7213_v43 = vsel %vm7166_vm12, %v7165_v50, %v6955_v59 }
 0x4da   : > { %7864 = vmatmul.mubr.bf16.gmra.mrb[76].mxu1 %v7213_v43 }
 0x510   : > { %v12174_v53 = vpop.f32.mrb[16].mxu1 }
 0x511   : > { %v12175_v40 = vpop.f32.mrb[17].mxu1 }
 0x512   : > { %v12176_v48 = vadd.f32 %v12175_v40, %v12174_v53  ;;  %v12177_v54 = vpop.f32.mrb[18].mxu1 }
 0x513   : > { %v12178_v51 = vpop.f32.mrb[19].mxu1 }
 0x514   : > { %v7876_v32 = vmul.f32 %v12176_v48, %v16527_v63  ;;  %v12179_v35 = vadd.f32 %v12178_v51, %v12177_v54 }
 0x516   : > { %v7912_v57 = vadd.f32 %v16532_v0, %v7876_v32  ;;  %v7877_v38 = vmul.f32 %v12179_v35, %v16527_v63 }
 0x518   : > { %v7944_v15 = vmax.f32 %v7912_v57, 0.0  ;;  %v7913_v58 = vadd.f32 %v16532_v0, %v7877_v38  ;;  %v12180_v30 = vpop.f32.mrb[20].mxu1 }
 0x519   : > { %v12181_v60 = vpop.f32.mrb[21].mxu1 }
 0x51a   : > { %v12054_v3 = vpack.c.bf16 %v7944_v15, %v7944_v15  ;;  %v7945_v5 = vmax.f32 %v7913_v58, 0.0  ;;  %v12182_v34 = vadd.f32 %v12181_v60, %v12180_v30  ;;  %v12183_v42 = vpop.f32.mrb[22].mxu1 }
 0x51b   : > { %v12184_v56 = vpop.f32.mrb[23].mxu1 }
 0x51c   : > { %v8072_v49 = vrot.slane %v12054_v3, 7  ;;  %v12055_v17 = vpack.c.bf16 %v7945_v5, %v7945_v5  ;;  %v7878_v29 = vmul.f32 %v12182_v34, %v16527_v63  ;;  %v12185_v31 = vadd.f32 %v12184_v56, %v12183_v42 }
 0x51e   : > { %v8073_v4 = vrot.slane %v8072_v49, 4  ;;  %8200 = vst [vmem:[#allocation2 + $0x18] sm:$0xe] %v8072_v49  ;;  %v8074_v2 = vrot.slane %v12055_v17, 7  ;;  %v7914_v36 = vadd.f32 %v16532_v0, %v7878_v29  ;;  %v7879_v27 = vmul.f32 %v12185_v31, %v16527_v63 }
 0x520   : > { %v8075_v18 = vsel %vm13368_vm8, %v8073_v4, %v8074_v2  ;;  %v8076_v55 = vrot.slane %v8074_v2, 4  ;;  %v7946_v22 = vmax.f32 %v7914_v36, 0.0  ;;  %v7915_v16 = vadd.f32 %v16532_v0, %v7879_v27 }
 0x521   : > { %8201 = vst [vmem:[#allocation2 + $0x1c] sm:$0xf] %v8075_v18 }
 0x522   : > { %8202 = vst [vmem:[#allocation2 + $0x20] sm:$0x1] %v8076_v55  ;;  %v12056_v44 = vpack.c.bf16 %v7946_v22, %v7946_v22  ;;  %v7947_v20 = vmax.f32 %v7915_v16, 0.0 }
 0x524   : > { %v8077_v33 = vrot.slane %v12056_v44, 7  ;;  %v12057_v62 = vpack.c.bf16 %v7947_v20, %v7947_v20 }
 0x525   : > { %v8872_v47 = vld [vmem:[#allocation2 + $0x18] sm:$0xc] }
 0x526   : > { %v8680_v26 = vld [vmem:[#allocation2 + $0x18] sm:$0xe]  ;;  %v8078_v25 = vrot.slane %v8077_v33, 4  ;;  %8203 = vst [vmem:[#allocation2 + $0x24] sm:$0xe] %v8077_v33  ;;  %v8079_v28 = vrot.slane %v12057_v62, 7 }
 0x527   : > { %v8648_v61 = vld [vmem:[#allocation2 + $0x18] sm:$0xf]  ;;  %v11808_v24 = vrot.slane %v8872_v47, 10  ;;  %v11792_v23 = vrot.slane %v8680_v26, 9 }
 0x528   : > { %v8080_v37 = vsel %vm13368_vm8, %v8078_v25, %v8079_v28  ;;  %v8081_v1 = vrot.slane %v8079_v28, 4  ;;  %v8649_v7 = vld [vmem:[#allocation2 + $0x1c] sm:$0xf]  ;;  %v8476_v50 = vld [vmem:[#allocation2 + $0x18] sm:$0xc] }
 0x529   : > { %v8253_v11 = vld [vmem:[#allocation2 + $0x1c] sm:$0xf]  ;;  %8204 = vst [vmem:[#allocation2 + $0x28] sm:$0xf] %v8080_v37  ;;  %v11888_v46 = vcombine.low %v8648_v61, %v8649_v7  ;;  %v8762_v41 = vrot.slane %v8649_v7, 5  ;;  %v8938_v19 = vrot.slane %v8649_v7, 6 }
 0x52a   : > { %v8873_v10 = vld [vmem:[#allocation2 + $0x20] sm:$0x3]  ;;  %8205 = vst [vmem:[#allocation2 + $0x2c] sm:$0x1] %v8081_v1  ;;  %v8552_v13 = vrot.slane %v8253_v11, 6  ;;  %v8376_v59 = vrot.slane %v8253_v11, 5 }
 0x52b   : > { %v8681_v45 = vld [vmem:[#allocation2 + $0x20] sm:$0x1]  ;;  %v8941_v12 = vrot.slane %v8873_v10, 6  ;;  %9560 = vrot.lane.b32.xlu0 %v11888_v46, %s13050_s17  ;;  %v8940_v14 = vrot.slane %v8938_v19, 4  ;;  %v8764_v52 = vrot.slane %v8762_v41, 4  ;;  %v8939_v53 = vsel %vm15111_vm9, %v11808_v24, %v8938_v19  ;;  %v12718_v19 = vld [vmem:[#allocation10 + $0x40] sm:$0xff]  }
 0x52c   : > { %v8765_v39 = vrot.slane %v8681_v45, 5  ;;  %v8477_v8 = vld [vmem:[#allocation2 + $0x20] sm:$0x3]  ;;  %v8763_v40 = vsel %vm13353_vm6, %v11792_v23, %v8762_v41  ;;  %v8554_v48 = vrot.slane %v8552_v13, 4  ;;  %v8284_v51 = vld [vmem:[#allocation2 + $0x18] sm:$0xe]  ;;  %12270 = vmatprep.subr.bf16.mxu0 %v12718_v19 }
 0x52d   : > { %v8285_v43 = vld [vmem:[#allocation2 + $0x20] sm:$0x1]  ;;  %v8555_v54 = vrot.slane %v8477_v8, 6  ;;  %v8942_v32 = vsel %vm15111_vm9, %v8940_v14, %v8941_v12  ;;  %v8378_v57 = vrot.slane %v8376_v59, 4  ;;  %v8682_v15 = vld [vmem:[#allocation2 + $0x24] sm:$0xe] }
 0x52e   : > { %v8766_v35 = vsel %vm13353_vm6, %v8764_v52, %v8765_v39  ;;  %v8379_v38 = vrot.slane %v8285_v43, 5  ;;  %v11920_v58 = vcombine.low %v8939_v53, %v8942_v32  ;;  %v11778_v60 = vrot.slane %v8476_v50, 10  ;;  %v8874_v3 = vld [vmem:[#allocation2 + $0x24] sm:$0xc]  ;;  %v12719_v10 = vld [vmem:[#allocation10] sm:$0xff]  }
 0x52f   : > { %v11904_v30 = vcombine.low %v8763_v40, %v8766_v35  ;;  %v8556_v5 = vsel %vm15111_vm9, %v8554_v48, %v8555_v54  ;;  %v11762_v34 = vrot.slane %v8284_v51, 9  ;;  %v11793_v56 = vrot.slane %v8682_v15, 9  ;;  %v8478_v49 = vld [vmem:[#allocation2 + $0x24] sm:$0xc]  ;;  %12271 = vmatpush3.bf16.msra.mxu0 %v12719_v10 }
 0x530   : > { %v8380_v42 = vsel %vm13353_vm6, %v8378_v57, %v8379_v38  ;;  %v12186_v17 = vpop.f32.mrb[24].mxu1  ;;  %9720 = vrot.lane.b32.xlu0 %v11920_v58, %s13053_s12  ;;  %v8553_v29 = vsel %vm15111_vm9, %v11778_v60, %v8552_v13  ;;  %v8650_v31 = vld [vmem:[#allocation2 + $0x24] sm:$0xf]  ;;  %v8651_v4 = vld [vmem:[#allocation2 + $0x28] sm:$0xf]  ;;  %v11809_v2 = vrot.slane %v8874_v3, 10 }
 0x531   : > { %9640 = vrot.lane.b32.xlu1 %v11904_v30, %s13051_s20  ;;  %v8255_v36 = vld [vmem:[#allocation2 + $0x28] sm:$0xf]  ;;  %v12187_v27 = vpop.f32.mrb[25].mxu1  ;;  %v8377_v18 = vsel %vm13353_vm6, %v11762_v34, %v8376_v59  ;;  %v8769_v55 = vrot.slane %v8651_v4, 5  ;;  %v8945_v22 = vrot.slane %v8651_v4, 6  ;;  %v11874_v62 = vcombine.low %v8553_v29, %v8556_v5 }
 0x532   : > { %v8683_v16 = vld [vmem:[#allocation2 + $0x2c] sm:$0x1]  ;;  %v8559_v44 = vrot.slane %v8255_v36, 6  ;;  %v12188_v20 = vadd.f32 %v12187_v27, %v12186_v17  ;;  %v12189_v33 = vpop.f32.mrb[26].mxu1  ;;  %v11858_v47 = vcombine.low %v8377_v18, %v8380_v42  ;;  %v11889_v24 = vcombine.low %v8650_v31, %v8651_v4  ;;  %v8286_v43 = vld [vmem:[#allocation2 + $0x24] sm:$0xe] }
 0x533   : > { %v8772_v26 = vrot.slane %v8683_v16, 5  ;;  %v8875_v25 = vld [vmem:[#allocation2 + $0x2c] sm:$0x3]  ;;  %v12190_v61 = vpop.f32.mrb[27].mxu1  ;;  %v8771_v37 = vrot.slane %v8769_v55, 4  ;;  %v8947_v1 = vrot.slane %v8945_v22, 4  ;;  %v8770_v46 = vsel %vm13353_vm6, %v11793_v56, %v8769_v55 }
 0x534   : > { %v8479_v28 = vld [vmem:[#allocation2 + $0x2c] sm:$0x3]  ;;  %v11779_v7 = vrot.slane %v8478_v49, 10  ;;  %v7880_v23 = vmul.f32 %v12188_v20, %v16527_v63  ;;  %v12191_v11 = vadd.f32 %v12190_v61, %v12189_v33  ;;  %9388 = vrot.lane.b32.xlu0 %v11858_v47, %s13045_s9  ;;  %v8948_v41 = vrot.slane %v8875_v25, 6  ;;  %v12722_v16 = vld [vmem:[#allocation10 + $0x8] sm:$0xff]  }
 0x535   : > { %9468 = vrot.lane.b32.xlu1 %v11874_v62, %s13046_s13  ;;  %v8773_v45 = vsel %vm13353_vm6, %v8771_v37, %v8772_v26  ;;  %v8561_v12 = vrot.slane %v8559_v44, 4  ;;  %v8562_v39 = vrot.slane %v8479_v28, 6  ;;  %v8287_v8 = vld [vmem:[#allocation2 + $0x2c] sm:$0x1]  ;;  %v8383_v13 = vrot.slane %v8255_v36, 5  ;;  %v12725_v28 = vld [vmem:[#allocation10 + $0x10] sm:$0xff]  }
 0x536   : > { %v7916_v59 = vadd.f32 %v16532_v0, %v7880_v23  ;;  %v7881_v14 = vmul.f32 %v12191_v11, %v16527_v63  ;;  %v11905_v52 = vcombine.low %v8770_v46, %v8773_v45  ;;  %v8949_v50 = vsel %vm15111_vm9, %v8947_v1, %v8948_v41  ;;  %v12726_v61 = vld [vmem:[#allocation10 + $0x58] sm:$0xff]  }
 0x537   : > { %v8946_v53 = vsel %vm15111_vm9, %v11809_v2, %v8945_v22  ;;  %v8563_v40 = vsel %vm15111_vm9, %v8561_v12, %v8562_v39  ;;  %v8385_v48 = vrot.slane %v8383_v13, 4  ;;  %v8560_v35 = vsel %vm15111_vm9, %v11779_v7, %v8559_v44  ;;  %v12721_v22 = vld [vmem:[#allocation10 + $0x48] sm:$0xff]   ;;  %v12723_v44 = vld [vmem:[#allocation10 + $0x50] sm:$0xff]   ;;  %v12728_v7 = vld [vmem:[#allocation10 + $0x18] sm:$0xff]  }
 0x538   : > { %v7948_v54 = vmax.f32 %v7916_v59, 0.0  ;;  %v7917_v51 = vadd.f32 %v16532_v0, %v7881_v14  ;;  %v12192_v32 = vpop.f32.mrb[28].mxu1  ;;  %9642 = vrot.lane.b32.xlu0 %v11905_v52, %s13051_s20  ;;  %v8386_v57 = vrot.slane %v8287_v8, 5  ;;  %v11921_v15 = vcombine.low %v8946_v53, %v8949_v50  ;;  %12272 = vmatprep.subr.bf16.mxu0 %v12721_v22  ;;  %v12730_v39 = vld [vmem:[#allocation10 + $0x60] sm:$0xff]  }
 0x539   : > { %9562 = vrot.lane.b32.xlu1 %v11889_v24, %s13050_s17  ;;  %v12193_v38 = vpop.f32.mrb[29].mxu1  ;;  %v11875_v58 = vcombine.low %v8560_v35, %v8563_v40  ;;  %v11763_v30 = vrot.slane %v8286_v43, 9  ;;  %12273 = vmatpush3.bf16.msra.mxu0 %v12722_v16  ;;  %v12731_v50 = vld [vmem:[#allocation10 + $0x20] sm:$0xff]  }
 0x53a   : > { %v12058_v60 = vpack.c.bf16 %v7948_v54, %v7948_v54  ;;  %v7949_v3 = vmax.f32 %v7917_v51, 0.0  ;;  %v12194_v5 = vadd.f32 %v12193_v38, %v12192_v32  ;;  %v12195_v34 = vpop.f32.mrb[30].mxu1  ;;  %v8387_v42 = vsel %vm13353_vm6, %v8385_v48, %v8386_v57  ;;  %12274 = vmatprep.subr.bf16.mxu0 %v12723_v44  ;;  %v12732_v51 = vld [vmem:[#allocation10 + $0x68] sm:$0xff]  }
 0x53b   : > { %v12196_v56 = vpop.f32.mrb[31].mxu1  ;;  %v8384_v49 = vsel %vm13353_vm6, %v11763_v30, %v8383_v13 }
 0x53c   : > { %v8082_v17 = vrot.slane %v12058_v60, 7  ;;  %v12059_v29 = vpack.c.bf16 %v7949_v3, %v7949_v3  ;;  %v7882_v31 = vmul.f32 %v12194_v5, %v16527_v63  ;;  %v12197_v4 = vadd.f32 %v12196_v56, %v12195_v34  ;;  %9470 = vrot.lane.b32.xlu0 %v11875_v58, %s13046_s13 }
 0x53d   : > { %9722 = vrot.lane.b32.xlu1 %v11921_v15, %s13053_s12  ;;  %v11859_v2 = vcombine.low %v8384_v49, %v8387_v42  ;;  %12275 = vmatpush3.bf16.msra.mxu0 %v12725_v28 }
 0x53e   : > { %v8083_v36 = vrot.slane %v8082_v17, 4  ;;  %8206 = vst [vmem:[#allocation2 + $0x30] sm:$0xe] %v8082_v17  ;;  %v8084_v27 = vrot.slane %v12059_v29, 7  ;;  %v7918_v18 = vadd.f32 %v16532_v0, %v7882_v31  ;;  %v7883_v55 = vmul.f32 %v12197_v4, %v16527_v63  ;;  %12276 = vmatprep.subr.bf16.mxu0 %v12726_v61 }
 0x540   : > { %v8085_v20 = vsel %vm13368_vm8, %v8083_v36, %v8084_v27  ;;  %v8086_v33 = vrot.slane %v8084_v27, 4  ;;  %v7950_v62 = vmax.f32 %v7918_v18, 0.0  ;;  %v7919_v47 = vadd.f32 %v16532_v0, %v7883_v55 }
 0x541   : > { %9390 = vrot.lane.b32.xlu1 %v11859_v2, %s13045_s9  ;;  %8207 = vst [vmem:[#allocation2 + $0x34] sm:$0xf] %v8085_v20  ;;  %12277 = vmatpush3.bf16.msra.mxu0 %v12728_v7 }
 0x542   : > { %8208 = vst [vmem:[#allocation2 + $0x38] sm:$0x1] %v8086_v33  ;;  %v12060_v26 = vpack.c.bf16 %v7950_v62, %v7950_v62  ;;  %v7951_v25 = vmax.f32 %v7919_v47, 0.0  ;;  %12278 = vmatprep.subr.bf16.mxu0 %v12730_v39 }
 0x544   : > { %v8087_v24 = vrot.slane %v12060_v26, 7  ;;  %v12061_v37 = vpack.c.bf16 %v7951_v25, %v7951_v25 }
 0x545   : > { %v10200_v1 = vld [vmem:[#allocation2 + $0x30] sm:$0xc]  ;;  %12279 = vmatpush3.bf16.msra.mxu0 %v12731_v50 }
 0x546   : > { %v8088_v23 = vrot.slane %v8087_v24, 4  ;;  %8209 = vst [vmem:[#allocation2 + $0x3c] sm:$0xe] %v8087_v24  ;;  %v8089_v11 = vrot.slane %v12061_v37, 7  ;;  %v9048_v46 = vld [vmem:[#allocation2 + $0x30] sm:$0xf]  ;;  %12280 = vmatprep.subr.bf16.mxu0 %v12732_v51 }
 0x547   : > { %v8684_v41 = vld [vmem:[#allocation2 + $0x30] sm:$0xe]  ;;  %v11968_v10 = vrot.slane %v10200_v1, 10  ;;  %v12733_v37 = vld [vmem:[#allocation10 + $0x28] sm:$0xff]  }
 0x548   : > { %v8652_v19 = vld [vmem:[#allocation2 + $0x30] sm:$0xf]  ;;  %v8090_v8 = vsel %vm13368_vm8, %v8088_v23, %v8089_v11  ;;  %v8091_v13 = vrot.slane %v8089_v11, 4  ;;  %v9049_v59 = vld [vmem:[#allocation2 + $0x34] sm:$0xf]  ;;  %v11794_v52 = vrot.slane %v8684_v41, 9 }
 0x549   : > { %v9080_v45 = vld [vmem:[#allocation2 + $0x30] sm:$0xe]  ;;  %v16600_v14 = vld [vmem:[#allocation2 + $0x34] sm:$0xf]  ;;  %8210 = vst [vmem:[#allocation2 + $0x40] sm:$0xf] %v8090_v8  ;;  %v11936_v53 = vcombine.low %v9048_v46, %v9049_v59  ;;  %12281 = vmatpush3.bf16.msra.mxu0 %v12733_v37 }
 0x54a   : > { %v8480_v12 = vld [vmem:[#allocation2 + $0x30] sm:$0xc]  ;;  %v9162_v43 = vrot.slane %v9049_v59, 5  ;;  %v8776_v40 = vrot.slane %v16600_v14, 5  ;;  %v8952_v48 = vrot.slane %v16600_v14, 6  ;;  %v11890_v32 = vcombine.low %v8652_v19, %v16600_v14  ;;  %v12734_v19 = vld [vmem:[#allocation10 + $0x70] sm:$0xff]  }
 0x54b   : > { %v10201_v54 = vld [vmem:[#allocation2 + $0x34] sm:$0xf]  ;;  %8211 = vst [vmem:[#allocation2 + $0x44] sm:$0x1] %v8091_v13  ;;  %v10202_v35 = vld [vmem:[#allocation2 + $0x38] sm:$0x3]  ;;  %9816 = vrot.lane.b32.xlu1 %v11936_v53, %s13052_s22  ;;  %12282 = vmatprep.subr.bf16.mxu0 %v12734_v19 }
 0x54c   : > { %v10298_v57 = vrot.slane %v10201_v54, 6  ;;  %v8685_v38 = vld [vmem:[#allocation2 + $0x38] sm:$0x1]  ;;  %v11824_v15 = vrot.slane %v9080_v45, 9  ;;  %v9164_v58 = vrot.slane %v9162_v43, 4  ;;  %v10301_v30 = vrot.slane %v10202_v35, 6  ;;  %9564 = vrot.lane.b32.xlu0 %v11890_v32, %s13050_s17 }
 0x54d   : > { %v8778_v60 = vrot.slane %v8776_v40, 4  ;;  %v9081_v3 = vld [vmem:[#allocation2 + $0x38] sm:$0x1]  ;;  %v11780_v5 = vrot.slane %v8480_v12, 10  ;;  %v12198_v34 = vpop.f32.mrb[32].mxu1  ;;  %v8777_v49 = vsel %vm13353_vm6, %v11794_v52, %v8776_v40  ;;  %v8779_v17 = vrot.slane %v8685_v38, 5 }
 0x54e   : > { %v10299_v42 = vsel %vm15111_vm9, %v11968_v10, %v10298_v57  ;;  %v10300_v56 = vrot.slane %v10298_v57, 4  ;;  %v16611_v29 = vld [vmem:[#allocation2 + $0x34] sm:$0xf]  ;;  %v12199_v31 = vpop.f32.mrb[33].mxu1  ;;  %v9163_v4 = vsel %vm13353_vm6, %v11824_v15, %v9162_v43  ;;  %v9165_v2 = vrot.slane %v9081_v3, 5  ;;  %v12737_v57 = vld [vmem:[#allocation10 + $0x30] sm:$0xff]  }
 0x54f   : > { %v8481_v36 = vld [vmem:[#allocation2 + $0x38] sm:$0x3]  ;;  %v8566_v27 = vrot.slane %v16611_v29, 6  ;;  %v8954_v18 = vrot.slane %v8952_v48, 4  ;;  %v12200_v55 = vadd.f32 %v12199_v31, %v12198_v34  ;;  %v12201_v22 = vpop.f32.mrb[34].mxu1  ;;  %v8780_v44 = vsel %vm13353_vm6, %v8778_v60, %v8779_v17  ;;  %v12738_v3 = vld [vmem:[#allocation10 + $0x78] sm:$0xff]   ;;  %12283 = vmatpush3.bf16.msra.mxu0 %v12737_v57 }
 0x550   : > { %v10302_v16 = vsel %vm15111_vm9, %v10300_v56, %v10301_v30  ;;  %v8569_v20 = vrot.slane %v8481_v36, 6  ;;  %v8876_v33 = vld [vmem:[#allocation2 + $0x30] sm:$0xc]  ;;  %v8877_v62 = vld [vmem:[#allocation2 + $0x38] sm:$0x3]  ;;  %v12202_v47 = vpop.f32.mrb[35].mxu1  ;;  %v11906_v25 = vcombine.low %v8777_v49, %v8780_v44  ;;  %v9166_v28 = vsel %vm13353_vm6, %v9164_v58, %v9165_v2  ;;  %12284 = vmatprep.subr.bf16.mxu0 %v12738_v3 }
 0x551   : > { %v11984_v26 = vcombine.low %v10299_v42, %v10302_v16  ;;  %v8567_v61 = vsel %vm15111_vm9, %v11780_v5, %v8566_v27  ;;  %v16626_v24 = vld [vmem:[#allocation2 + $0x3c] sm:$0xf]  ;;  %v7884_v1 = vmul.f32 %v12200_v55, %v16527_v63  ;;  %v12203_v7 = vadd.f32 %v12202_v47, %v12201_v22  ;;  %v16629_v46 = vld [vmem:[#allocation2 + $0x40] sm:$0xf]  ;;  %v8288_v41 = vld [vmem:[#allocation2 + $0x30] sm:$0xe] }
 0x552   : > { %v11952_v23 = vcombine.low %v9163_v4, %v9166_v28  ;;  %v8568_v11 = vrot.slane %v8566_v27, 4  ;;  %9644 = vrot.lane.b32.xlu1 %v11906_v25, %s13051_s20  ;;  %v11810_v10 = vrot.slane %v8876_v33, 10  ;;  %v8955_v45 = vrot.slane %v8877_v62, 6  ;;  %v8289_v8 = vld [vmem:[#allocation2 + $0x38] sm:$0x1]  ;;  %v12739_v16 = vld [vmem:[#allocation10 + $0x38] sm:$0xff]  }
 0x553   : > { %12118 = vmatprep.mubr.msk.bf16.mxu0 %vm4374_vm13, %v11984_v26  ;;  %v8783_v12 = vrot.slane %v16629_v46, 5  ;;  %v8959_v39 = vrot.slane %v16629_v46, 6  ;;  %v7920_v13 = vadd.f32 %v16532_v0, %v7884_v1  ;;  %v7885_v59 = vmul.f32 %v12203_v7, %v16527_v63  ;;  %v16642_v43 = vld [vmem:[#allocation2 + $0x40] sm:$0xf]  ;;  %v9082_v53 = vld [vmem:[#allocation2 + $0x3c] sm:$0xe]  ;;  %12285 = vmatpush3.bf16.msra.mxu0 %v12739_v16 }
 0x554   : > { %9896 = vrot.lane.b32.xlu0 %v11952_v23, %s13054_s30  ;;  %v8570_v52 = vsel %vm15111_vm9, %v8568_v11, %v8569_v20  ;;  %v11891_v50 = vcombine.low %v16626_v24, %v16629_v46  ;;  %v9083_v40 = vld [vmem:[#allocation2 + $0x44] sm:$0x1]  ;;  %v8953_v51 = vsel %vm15111_vm9, %v11810_v10, %v8952_v48  ;;  %v8956_v32 = vsel %vm15111_vm9, %v8954_v18, %v8955_v45  ;;  %v12204_v58 = vpop.f32.mrb[36].mxu1  ;;  %v8878_v2 = vld [vmem:[#allocation2 + $0x3c] sm:$0xc] }
 0x555   : > { %v11876_v54 = vcombine.low %v8567_v61, %v8570_v52  ;;  %v11764_v35 = vrot.slane %v8288_v41, 9  ;;  %v7952_v38 = vmax.f32 %v7920_v13, 0.0  ;;  %v7921_v15 = vadd.f32 %v16532_v0, %v7885_v59  ;;  %v12205_v14 = vpop.f32.mrb[37].mxu1  ;;  %v8879_v47 = vld [vmem:[#allocation2 + $0x44] sm:$0x3] }
 0x556   : > { %v11922_v30 = vcombine.low %v8953_v51, %v8956_v32  ;;  %v8390_v60 = vrot.slane %v16611_v29, 5  ;;  %v8393_v5 = vrot.slane %v8289_v8, 5  ;;  %v11825_v48 = vrot.slane %v9082_v53, 9  ;;  %v12207_v31 = vpop.f32.mrb[38].mxu1  ;;  %v16657_v29 = vld [vmem:[#allocation2 + $0x3c] sm:$0xf] }
 0x557   : > { %9472 = vrot.lane.b32.xlu1 %v11876_v54, %s13046_s13  ;;  %v9169_v34 = vrot.slane %v16642_v43, 5  ;;  %v9172_v42 = vrot.slane %v9083_v40, 5  ;;  %v12062_v56 = vpack.c.bf16 %v7952_v38, %v7952_v38  ;;  %v7953_v49 = vmax.f32 %v7921_v15, 0.0  ;;  %v12208_v36 = vpop.f32.mrb[39].mxu1  ;;  %v8686_v23 = vld [vmem:[#allocation2 + $0x3c] sm:$0xe] }
 0x558   : > { %9724 = vrot.lane.b32.xlu0 %v11922_v30, %s13053_s12  ;;  %v12206_v17 = vadd.f32 %v12205_v14, %v12204_v58  ;;  %v8391_v4 = vsel %vm13353_vm6, %v11764_v35, %v8390_v60  ;;  %v8392_v27 = vrot.slane %v8390_v60, 4  ;;  %v11937_v22 = vcombine.low %v16657_v29, %v16642_v43  ;;  %v8687_v11 = vld [vmem:[#allocation2 + $0x44] sm:$0x1]  ;;  %v8259_v8 = vld [vmem:[#allocation2 + $0x40] sm:$0xf] }
 0x559   : > { %v9170_v18 = vsel %vm13353_vm6, %v11825_v48, %v9169_v34  ;;  %v9171_v55 = vrot.slane %v9169_v34, 4  ;;  %v8092_v44 = vrot.slane %v12062_v56, 7  ;;  %v12063_v20 = vpack.c.bf16 %v7953_v49, %v7953_v49  ;;  %v8290_v53 = vld [vmem:[#allocation2 + $0x3c] sm:$0xe]  ;;  %v8291_v30 = vld [vmem:[#allocation2 + $0x44] sm:$0x1] }
 0x55a   : > { %v7886_v33 = vmul.f32 %v12206_v17, %v16527_v63  ;;  %v12209_v62 = vadd.f32 %v12208_v36, %v12207_v31  ;;  %v8394_v26 = vsel %vm13353_vm6, %v8392_v27, %v8393_v5  ;;  %v11811_v28 = vrot.slane %v8878_v2, 10  ;;  %v8482_v17 = vld [vmem:[#allocation2 + $0x3c] sm:$0xc]  ;;  %v8483_v31 = vld [vmem:[#allocation2 + $0x44] sm:$0x3] }
 0x55b   : > { %9566 = vrot.lane.b32.xlu1 %v11891_v50, %s13050_s17  ;;  %v9173_v25 = vsel %vm13353_vm6, %v9171_v55, %v9172_v42  ;;  %v8961_v61 = vrot.slane %v8959_v39, 4  ;;  %v8093_v24 = vrot.slane %v8092_v44, 4  ;;  %8212 = vst [vmem:[#allocation2 + $0x48] sm:$0xe] %v8092_v44  ;;  %v8094_v37 = vrot.slane %v12063_v20, 7 }
 0x55c   : > { %v7922_v1 = vadd.f32 %v16532_v0, %v7886_v33  ;;  %v7887_v7 = vmul.f32 %v12209_v62, %v16527_v63  ;;  %v11860_v41 = vcombine.low %v8391_v4, %v8394_v26  ;;  %v11953_v19 = vcombine.low %v9170_v18, %v9173_v25  ;;  %v12210_v43 = vpop.f32.mrb[40].mxu1 }
 0x55d   : > { %v8960_v10 = vsel %vm15111_vm9, %v11811_v28, %v8959_v39  ;;  %v8962_v45 = vrot.slane %v8879_v47, 6  ;;  %v8095_v13 = vsel %vm13368_vm8, %v8093_v24, %v8094_v37  ;;  %v8096_v59 = vrot.slane %v8094_v37, 4  ;;  %v12211_v40 = vpop.f32.mrb[41].mxu1 }
 0x55e   : > { %v7954_v52 = vmax.f32 %v7922_v1, 0.0  ;;  %v7923_v50 = vadd.f32 %v16532_v0, %v7887_v7  ;;  %8213 = vst [vmem:[#allocation2 + $0x4c] sm:$0xf] %v8095_v13  ;;  %9392 = vrot.lane.b32.xlu0 %v11860_v41, %s13045_s9  ;;  %v11795_v54 = vrot.slane %v8686_v23, 9  ;;  %v8785_v51 = vrot.slane %v8783_v12, 4  ;;  %v12213_v15 = vpop.f32.mrb[42].mxu1 }
 0x55f   : > { %9898 = vrot.lane.b32.xlu1 %v11953_v19, %s13054_s30  ;;  %v8963_v39 = vsel %vm15111_vm9, %v8961_v61, %v8962_v45  ;;  %v8786_v32 = vrot.slane %v8687_v11, 5  ;;  %8214 = vst [vmem:[#allocation2 + $0x50] sm:$0x1] %v8096_v59  ;;  %v12212_v38 = vadd.f32 %v12211_v40, %v12210_v43  ;;  %v12214_v60 = vpop.f32.mrb[43].mxu1  ;;  %v11765_v5 = vrot.slane %v8290_v53, 9 }
 0x560   : > { %v12064_v35 = vpack.c.bf16 %v7954_v52, %v7954_v52  ;;  %v7955_v57 = vmax.f32 %v7923_v50, 0.0  ;;  %v11923_v58 = vcombine.low %v8960_v10, %v8963_v39  ;;  %v8784_v3 = vsel %vm13353_vm6, %v11795_v54, %v8783_v12 }
 0x561   : > { %v8787_v14 = vsel %vm13353_vm6, %v8785_v51, %v8786_v32  ;;  %v8397_v48 = vrot.slane %v8259_v8, 5  ;;  %v7888_v56 = vmul.f32 %v12212_v38, %v16527_v63  ;;  %v12215_v49 = vadd.f32 %v12214_v60, %v12213_v15 }
 0x562   : > { %v8097_v34 = vrot.slane %v12064_v35, 7  ;;  %v12065_v42 = vpack.c.bf16 %v7955_v57, %v7955_v57  ;;  %9818 = vrot.lane.b32.xlu0 %v11937_v22, %s13052_s22  ;;  %v11907_v46 = vcombine.low %v8784_v3, %v8787_v14  ;;  %v8400_v29 = vrot.slane %v8291_v30, 5  ;;  %v9052_v20 = vld [vmem:[#allocation2 + $0x48] sm:$0xf] }
 0x563   : > { %9726 = vrot.lane.b32.xlu1 %v11923_v58, %s13053_s12  ;;  %v8398_v12 = vsel %vm13353_vm6, %v11765_v5, %v8397_v48  ;;  %v8399_v4 = vrot.slane %v8397_v48, 4  ;;  %v7924_v27 = vadd.f32 %v16532_v0, %v7888_v56  ;;  %v7889_v18 = vmul.f32 %v12215_v49, %v16527_v63  ;;  %v8688_v13 = vld [vmem:[#allocation2 + $0x48] sm:$0xe] }
 0x564   : > { %v8098_v2 = vrot.slane %v8097_v34, 4  ;;  %8215 = vst [vmem:[#allocation2 + $0x54] sm:$0xe] %v8097_v34  ;;  %v8099_v36 = vrot.slane %v12065_v42, 7  ;;  %v11781_v16 = vrot.slane %v8482_v17, 10  ;;  %v8573_v22 = vrot.slane %v8259_v8, 6 }
 0x565   : > { %v8401_v55 = vsel %vm13353_vm6, %v8399_v4, %v8400_v29  ;;  %v8576_v44 = vrot.slane %v8483_v31, 6  ;;  %v7956_v47 = vmax.f32 %v7924_v27, 0.0  ;;  %v7925_v26 = vadd.f32 %v16532_v0, %v7889_v18  ;;  %v12216_v25 = vpop.f32.mrb[44].mxu1  ;;  %v9053_v28 = vld [vmem:[#allocation2 + $0x4c] sm:$0xf] }
 0x566   : > { %v8100_v33 = vsel %vm13368_vm8, %v8098_v2, %v8099_v36  ;;  %v8101_v62 = vrot.slane %v8099_v36, 4  ;;  %9646 = vrot.lane.b32.xlu0 %v11907_v46, %s13051_s20  ;;  %v11861_v61 = vcombine.low %v8398_v12, %v8401_v55  ;;  %v8574_v24 = vsel %vm15111_vm9, %v11781_v16, %v8573_v22  ;;  %v12217_v1 = vpop.f32.mrb[45].mxu1  ;;  %v16707_v23 = vld [vmem:[#allocation2 + $0x4c] sm:$0xf]  ;;  %v8656_v8 = vld [vmem:[#allocation2 + $0x48] sm:$0xf] }
 0x567   : > { %8216 = vst [vmem:[#allocation2 + $0x58] sm:$0xf] %v8100_v33  ;;  %v8575_v37 = vrot.slane %v8573_v22, 4  ;;  %v9176_v7 = vrot.slane %v9053_v28, 5  ;;  %v12066_v11 = vpack.c.bf16 %v7956_v47, %v7956_v47  ;;  %v7957_v41 = vmax.f32 %v7925_v26, 0.0  ;;  %v12219_v10 = vpop.f32.mrb[46].mxu1 }
 0x568   : > { %8217 = vst [vmem:[#allocation2 + $0x5c] sm:$0x1] %v8101_v62  ;;  %v12218_v19 = vadd.f32 %v12217_v1, %v12216_v25  ;;  %v11938_v45 = vcombine.low %v9052_v20, %v9053_v28  ;;  %9394 = vrot.lane.b32.xlu1 %v11861_v61, %s13045_s9  ;;  %v12220_v52 = vpop.f32.mrb[47].mxu1  ;;  %v8790_v43 = vrot.slane %v16707_v23, 5  ;;  %v8966_v53 = vrot.slane %v16707_v23, 6 }
 0x569   : > { %v8577_v59 = vsel %vm15111_vm9, %v8575_v37, %v8576_v44  ;;  %v9178_v50 = vrot.slane %v9176_v7, 4  ;;  %v8689_v40 = vld [vmem:[#allocation2 + $0x50] sm:$0x1]  ;;  %v8102_v39 = vrot.slane %v12066_v11, 7  ;;  %v12067_v54 = vpack.c.bf16 %v7957_v41, %v7957_v41  ;;  %v9084_v35 = vld [vmem:[#allocation2 + $0x48] sm:$0xe] }
 0x56a   : > { %v11877_v51 = vcombine.low %v8574_v24, %v8577_v59  ;;  %v7890_v32 = vmul.f32 %v12218_v19, %v16527_v63  ;;  %v9085_v57 = vld [vmem:[#allocation2 + $0x50] sm:$0x1]  ;;  %v12221_v38 = vadd.f32 %v12220_v52, %v12219_v10  ;;  %v11892_v15 = vcombine.low %v8656_v8, %v16707_v23  ;;  %v8484_v48 = vld [vmem:[#allocation2 + $0x48] sm:$0xc]  ;;  %v16722_v17 = vld [vmem:[#allocation2 + $0x4c] sm:$0xf] }
 0x56b   : > { %v11796_v58 = vrot.slane %v8688_v13, 9  ;;  %v8792_v30 = vrot.slane %v8790_v43, 4  ;;  %v8103_v60 = vrot.slane %v8102_v39, 4  ;;  %8218 = vst [vmem:[#allocation2 + $0x60] sm:$0xe] %v8102_v39  ;;  %v8104_v3 = vrot.slane %v12067_v54, 7 }
 0x56c   : > { %9474 = vrot.lane.b32.xlu0 %v11877_v51, %s13046_s13  ;;  %v7926_v14 = vadd.f32 %v16532_v0, %v7890_v32  ;;  %v8793_v5 = vrot.slane %v8689_v40, 5  ;;  %v7891_v34 = vmul.f32 %v12221_v38, %v16527_v63  ;;  %9820 = vrot.lane.b32.xlu1 %v11938_v45, %s13052_s22  ;;  %v11826_v56 = vrot.slane %v9084_v35, 9  ;;  %v8485_v31 = vld [vmem:[#allocation2 + $0x50] sm:$0x3]  ;;  %v12222_v29 = vpop.f32.mrb[48].mxu1 }
 0x56d   : > { %v8791_v42 = vsel %vm13353_vm6, %v11796_v58, %v8790_v43  ;;  %v9179_v49 = vrot.slane %v9085_v57, 5  ;;  %v8105_v46 = vsel %vm13368_vm8, %v8103_v60, %v8104_v3  ;;  %v8106_v12 = vrot.slane %v8104_v3, 4  ;;  %v8880_v36 = vld [vmem:[#allocation2 + $0x48] sm:$0xc]  ;;  %v12223_v22 = vpop.f32.mrb[49].mxu1 }
 0x56e   : > { %v7958_v4 = vmax.f32 %v7926_v14, 0.0  ;;  %v8794_v2 = vsel %vm13353_vm6, %v8792_v30, %v8793_v5  ;;  %8219 = vst [vmem:[#allocation2 + $0x64] sm:$0xf] %v8105_v46  ;;  %v7927_v27 = vadd.f32 %v16532_v0, %v7891_v34  ;;  %v9177_v55 = vsel %vm13353_vm6, %v11826_v56, %v9176_v7  ;;  %v12225_v62 = vpop.f32.mrb[50].mxu1  ;;  %v8881_v26 = vld [vmem:[#allocation2 + $0x50] sm:$0x3] }
 0x56f   : > { %v11908_v18 = vcombine.low %v8791_v42, %v8794_v2  ;;  %v9180_v16 = vsel %vm13353_vm6, %v9178_v50, %v9179_v49  ;;  %8220 = vst [vmem:[#allocation2 + $0x68] sm:$0x1] %v8106_v12  ;;  %v12224_v33 = vadd.f32 %v12223_v22, %v12222_v29  ;;  %v11782_v47 = vrot.slane %v8484_v48, 10  ;;  %v12226_v28 = vpop.f32.mrb[51].mxu1  ;;  %v16737_v41 = vld [vmem:[#allocation2 + $0x58] sm:$0xf] }
 0x570   : > { %v12068_v44 = vpack.c.bf16 %v7958_v4, %v7958_v4  ;;  %9568 = vrot.lane.b32.xlu0 %v11892_v15, %s13050_s17  ;;  %v11954_v20 = vcombine.low %v9177_v55, %v9180_v16  ;;  %v7959_v25 = vmax.f32 %v7927_v27, 0.0  ;;  %v8580_v61 = vrot.slane %v16722_v17, 6  ;;  %v8658_v43 = vld [vmem:[#allocation2 + $0x54] sm:$0xf]  ;;  %v8292_v40 = vld [vmem:[#allocation2 + $0x48] sm:$0xe] }
 0x571   : > { %9648 = vrot.lane.b32.xlu1 %v11908_v18, %s13051_s20  ;;  %v8583_v24 = vrot.slane %v8485_v31, 6  ;;  %v11812_v37 = vrot.slane %v8880_v36, 10  ;;  %v7892_v7 = vmul.f32 %v12224_v33, %v16527_v63  ;;  %v12227_v23 = vadd.f32 %v12226_v28, %v12225_v62  ;;  %v16753_v58 = vld [vmem:[#allocation2 + $0x58] sm:$0xf]  ;;  %v9086_v30 = vld [vmem:[#allocation2 + $0x54] sm:$0xe] }
 0x572   : > { %v8107_v1 = vrot.slane %v12068_v44, 7  ;;  %v8968_v11 = vrot.slane %v8966_v53, 4  ;;  %v12069_v19 = vpack.c.bf16 %v7959_v25, %v7959_v25  ;;  %v8581_v10 = vsel %vm15111_vm9, %v11782_v47, %v8580_v61  ;;  %v9087_v4 = vld [vmem:[#allocation2 + $0x5c] sm:$0x1]  ;;  %v8882_v33 = vld [vmem:[#allocation2 + $0x54] sm:$0xc] }
 0x573   : > { %v8582_v45 = vrot.slane %v8580_v61, 4  ;;  %v8967_v8 = vsel %vm15111_vm9, %v11812_v37, %v8966_v53  ;;  %v7928_v59 = vadd.f32 %v16532_v0, %v7892_v7  ;;  %v7893_v52 = vmul.f32 %v12227_v23, %v16527_v63  ;;  %v8293_v53 = vld [vmem:[#allocation2 + $0x50] sm:$0x1]  ;;  %v9054_v28 = vld [vmem:[#allocation2 + $0x54] sm:$0xf] }
 0x574   : > { %v8108_v13 = vrot.slane %v8107_v1, 4  ;;  %8221 = vst [vmem:[#allocation2 + $0x6c] sm:$0xe] %v8107_v1  ;;  %9900 = vrot.lane.b32.xlu0 %v11954_v20, %s13054_s30  ;;  %v8969_v50 = vrot.slane %v8881_v26, 6  ;;  %v8109_v39 = vrot.slane %v12069_v19, 7  ;;  %v8797_v51 = vrot.slane %v16737_v41, 5 }
 0x575   : > { %v8584_v54 = vsel %vm15111_vm9, %v8582_v45, %v8583_v24  ;;  %v8973_v32 = vrot.slane %v16737_v41, 6  ;;  %v7960_v35 = vmax.f32 %v7928_v59, 0.0  ;;  %v7929_v57 = vadd.f32 %v16532_v0, %v7893_v52  ;;  %v12228_v63 = vpop.f32.mrb[52].mxu1  ;;  %v16778_v24 = vld [vmem:[%s17812_s4 + $0x3] ss:$0 sm:$0xff] }
 0x576   : > { %v11878_v38 = vcombine.low %v8581_v10, %v8584_v54  ;;  %v8970_v15 = vsel %vm15111_vm9, %v8968_v11, %v8969_v50  ;;  %v8110_v60 = vsel %vm13368_vm8, %v8108_v13, %v8109_v39  ;;  %v8111_v3 = vrot.slane %v8109_v39, 4  ;;  %v12229_v48 = vpop.f32.mrb[53].mxu1  ;;  %v8883_v23 = vld [vmem:[#allocation2 + $0x5c] sm:$0x3]  ;;  %v8690_v11 = vld [vmem:[#allocation2 + $0x54] sm:$0xe] }
 0x577   : > { %v11924_v14 = vcombine.low %v8967_v8, %v8970_v15  ;;  %v11893_v5 = vcombine.low %v8658_v43, %v16737_v41  ;;  %8222 = vst [vmem:[#allocation2 + $0x70] sm:$0xf] %v8110_v60  ;;  %v12070_v34 = vpack.c.bf16 %v7960_v35, %v7960_v35  ;;  %v7961_v42 = vmax.f32 %v7929_v57, 0.0  ;;  %v12231_v49 = vpop.f32.mrb[54].mxu1  ;;  %v8691_v59 = vld [vmem:[#allocation2 + $0x5c] sm:$0x1] }
 0x578   : > { %9476 = vrot.lane.b32.xlu1 %v11878_v38, %s13046_s13  ;;  %v11766_v0 = vrot.slane %v8292_v40, 9  ;;  %v8404_v56 = vrot.slane %v16722_v17, 5  ;;  %8223 = vst [vmem:[#allocation2 + $0x74] sm:$0x1] %v8111_v3  ;;  %v8407_v31 = vrot.slane %v8293_v53, 5  ;;  %v12230_v46 = vadd.f32 %v12229_v48, %v12228_v63  ;;  %v12232_v12 = vpop.f32.mrb[55].mxu1 }
 0x579   : > { %9728 = vrot.lane.b32.xlu0 %v11924_v14, %s13053_s12  ;;  %v11827_v29 = vrot.slane %v9086_v30, 9  ;;  %v9183_v2 = vrot.slane %v16753_v58, 5  ;;  %v8112_v36 = vrot.slane %v12070_v34, 7  ;;  %v12071_v27 = vpack.c.bf16 %v7961_v42, %v7961_v42  ;;  %v16767_v17 = vld [vmem:[%s17812_s4 + $0x2] ss:$0 sm:$0xff] }
 0x57a   : > { %v8405_v18 = vsel %vm13353_vm6, %v11766_v0, %v8404_v56  ;;  %v8406_v55 = vrot.slane %v8404_v56, 4  ;;  %v7894_v16 = vmul.f32 %v16767_v17, %v12230_v46  ;;  %v12233_v22 = vadd.f32 %v12232_v12, %v12231_v49  ;;  %v8294_v54 = vld [vmem:[#allocation2 + $0x54] sm:$0xe]  ;;  %v8263_v14 = vld [vmem:[#allocation2 + $0x58] sm:$0xf] }
 0x57b   : > { %v9184_v44 = vsel %vm13353_vm6, %v11827_v29, %v9183_v2  ;;  %v9185_v20 = vrot.slane %v9183_v2, 4  ;;  %v8113_v62 = vrot.slane %v8112_v36, 4  ;;  %8224 = vst [vmem:[#allocation2 + $0x78] sm:$0xe] %v8112_v36  ;;  %v8114_v47 = vrot.slane %v12071_v27, 7 }
 0x57c   : > { %9570 = vrot.lane.b32.xlu1 %v11893_v5, %s13050_s17  ;;  %v8408_v26 = vsel %vm13353_vm6, %v8406_v55, %v8407_v31  ;;  %v9186_v25 = vrot.slane %v9087_v4, 5  ;;  %v7930_v37 = vadd.f32 %v16778_v24, %v7894_v16  ;;  %v7895_v1 = vmul.f32 %v16767_v17, %v12233_v22  ;;  %v12234_v8 = vpop.f32.mrb[56].mxu1  ;;  %v8295_v34 = vld [vmem:[#allocation2 + $0x5c] sm:$0x1]  ;;  %v8486_v0 = vld [vmem:[#allocation2 + $0x54] sm:$0xc] }
 0x57d   : > { %v11862_v61 = vcombine.low %v8405_v18, %v8408_v26  ;;  %v11939_v7 = vcombine.low %v9054_v28, %v16753_v58  ;;  %v8115_v19 = vsel %vm13368_vm8, %v8113_v62, %v8114_v47  ;;  %v8116_v10 = vrot.slane %v8114_v47, 4  ;;  %v12235_v39 = vpop.f32.mrb[57].mxu1  ;;  %v8487_v2 = vld [vmem:[#allocation2 + $0x5c] sm:$0x3]  ;;  %v16810_v55 = vld [vmem:[#allocation2 + $0x64] sm:$0xf] }
 0x57e   : > { %v9187_v45 = vsel %vm13353_vm6, %v9185_v20, %v9186_v25  ;;  %v11813_v13 = vrot.slane %v8882_v33, 10  ;;  %8225 = vst [vmem:[#allocation2 + $0x7c] sm:$0xf] %v8115_v19  ;;  %v7962_v52 = vmax.f32 %v7930_v37, 0.0  ;;  %v7931_v50 = vadd.f32 %v16778_v24, %v7895_v1  ;;  %v12237_v15 = vpop.f32.mrb[58].mxu1 }
 0x57f   : > { %9396 = vrot.lane.b32.xlu0 %v11862_v61, %s13045_s9  ;;  %v11955_v43 = vcombine.low %v9184_v44, %v9187_v45  ;;  %v8975_v40 = vrot.slane %v8973_v32, 4  ;;  %8226 = vst [vmem:[#allocation2 + $0x80] sm:$0x1] %v8116_v10  ;;  %v8976_v35 = vrot.slane %v8883_v23, 6  ;;  %v11797_v57 = vrot.slane %v8690_v11, 9  ;;  %v12238_v3 = vpop.f32.mrb[59].mxu1 }
 0x580   : > { %v8974_v53 = vsel %vm15111_vm9, %v11813_v13, %v8973_v32  ;;  %v8799_v38 = vrot.slane %v8797_v51, 4  ;;  %v12072_v63 = vpack.c.bf16 %v7962_v52, %v7962_v52  ;;  %v7963_v58 = vmax.f32 %v7931_v50, 0.0  ;;  %v16819_v28 = vld [vmem:[#allocation2 + $0x64] sm:$0xf]  ;;  %v9056_v23 = vld [vmem:[#allocation2 + $0x60] sm:$0xf] }
 0x581   : > { %9902 = vrot.lane.b32.xlu1 %v11955_v43, %s13054_s30  ;;  %v8800_v30 = vrot.slane %v8691_v59, 5  ;;  %v12236_v60 = vadd.f32 %v12235_v39, %v12234_v8  ;;  %v8977_v5 = vsel %vm15111_vm9, %v8975_v40, %v8976_v35  ;;  %v8798_v32 = vsel %vm13353_vm6, %v11797_v57, %v8797_v51  ;;  %v8660_v59 = vld [vmem:[#allocation2 + $0x60] sm:$0xf] }
 0x582   : > { %v12239_v48 = vadd.f32 %v12238_v3, %v12237_v15  ;;  %v11767_v42 = vrot.slane %v8294_v54, 9  ;;  %v8117_v56 = vrot.slane %v12072_v63, 7  ;;  %v12073_v49 = vpack.c.bf16 %v7963_v58, %v7963_v58  ;;  %v8692_v54 = vld [vmem:[#allocation2 + $0x60] sm:$0xe] }
 0x583   : > { %9822 = vrot.lane.b32.xlu0 %v11939_v7, %s13052_s22  ;;  %v11925_v31 = vcombine.low %v8974_v53, %v8977_v5  ;;  %v8801_v46 = vsel %vm13353_vm6, %v8799_v38, %v8800_v30  ;;  %v7896_v4 = vmul.f32 %v16767_v17, %v12236_v60  ;;  %v8411_v29 = vrot.slane %v8263_v14, 5  ;;  %v8693_v53 = vld [vmem:[#allocation2 + $0x68] sm:$0x1]  ;;  %v9088_v63 = vld [vmem:[#allocation2 + $0x60] sm:$0xe] }
 0x584   : > { %v11909_v12 = vcombine.low %v8798_v32, %v8801_v46  ;;  %v7897_v41 = vmul.f32 %v16767_v17, %v12239_v48  ;;  %v8118_v51 = vrot.slane %v8117_v56, 4  ;;  %8227 = vst [vmem:[#allocation2 + $0x84] sm:$0xe] %v8117_v56  ;;  %v8119_v36 = vrot.slane %v12073_v49, 7  ;;  %v12240_v33 = vpop.f32.mrb[60].mxu1 }
 0x585   : > { %9730 = vrot.lane.b32.xlu1 %v11925_v31, %s13053_s12  ;;  %v8414_v27 = vrot.slane %v8295_v34, 5  ;;  %v11783_v18 = vrot.slane %v8486_v0, 10  ;;  %v7932_v16 = vadd.f32 %v16778_v24, %v7896_v4  ;;  %v8412_v44 = vsel %vm13353_vm6, %v11767_v42, %v8411_v29  ;;  %v12241_v61 = vpop.f32.mrb[61].mxu1  ;;  %v16834_v42 = vld [vmem:[#allocation2 + $0x64] sm:$0xf] }
 0x586   : > { %v7933_v22 = vadd.f32 %v16778_v24, %v7897_v41  ;;  %v8413_v20 = vrot.slane %v8411_v29, 4  ;;  %v8120_v62 = vsel %vm13368_vm8, %v8118_v51, %v8119_v36  ;;  %v8121_v47 = vrot.slane %v8119_v36, 4  ;;  %v12243_v19 = vpop.f32.mrb[62].mxu1  ;;  %v8489_v51 = vld [vmem:[#allocation2 + $0x68] sm:$0x3] }
 0x587   : > { %9650 = vrot.lane.b32.xlu0 %v11909_v12, %s13051_s20  ;;  %v8587_v26 = vrot.slane %v8263_v14, 6  ;;  %v8590_v25 = vrot.slane %v8487_v2, 6  ;;  %8228 = vst [vmem:[#allocation2 + $0x88] sm:$0xf] %v8120_v62  ;;  %v7964_v37 = vmax.f32 %v7932_v16, 0.0  ;;  %v9190_v11 = vrot.slane %v16810_v55, 5 }
 0x588   : > { %v7965_v1 = vmax.f32 %v7933_v22, 0.0  ;;  %v8415_v7 = vsel %vm13353_vm6, %v8413_v20, %v8414_v27  ;;  %8229 = vst [vmem:[#allocation2 + $0x8c] sm:$0x1] %v8121_v47  ;;  %v11940_v13 = vcombine.low %v9056_v23, %v16810_v55  ;;  %v12244_v52 = vpop.f32.mrb[63].mxu1  ;;  %v8804_v39 = vrot.slane %v16819_v28, 5 }
 0x589   : > { %v11863_v10 = vcombine.low %v8412_v44, %v8415_v7  ;;  %v8588_v45 = vsel %vm15111_vm9, %v11783_v18, %v8587_v26  ;;  %v8589_v8 = vrot.slane %v8587_v26, 4  ;;  %v12074_v50 = vpack.c.bf16 %v7964_v37, %v7964_v37  ;;  %v9089_v14 = vld [vmem:[#allocation2 + $0x68] sm:$0x1]  ;;  %v8488_v12 = vld [vmem:[#allocation2 + $0x60] sm:$0xc] }
 0x58a   : > { %v12075_v43 = vpack.c.bf16 %v7965_v1, %v7965_v1  ;;  %v9192_v40 = vrot.slane %v9190_v11, 4  ;;  %v8980_v57 = vrot.slane %v16819_v28, 6  ;;  %v11894_v38 = vcombine.low %v8660_v59, %v16819_v28  ;;  %v8884_v36 = vld [vmem:[#allocation2 + $0x60] sm:$0xc]  ;;  %v8885_v26 = vld [vmem:[#allocation2 + $0x68] sm:$0x3] }
 0x58b   : > { %9398 = vrot.lane.b32.xlu1 %v11863_v10, %s13045_s9  ;;  %v8591_v35 = vsel %vm15111_vm9, %v8589_v8, %v8590_v25  ;;  %v12242_v15 = vadd.f32 %v12241_v61, %v12240_v33  ;;  %v8122_v58 = vrot.slane %v12074_v50, 7  ;;  %v12245_v3 = vadd.f32 %v12244_v52, %v12243_v19  ;;  %v16853_v7 = vld [vmem:[#allocation2 + $0x70] sm:$0xf] }
 0x58c   : > { %v8124_v30 = vrot.slane %v12075_v43, 7  ;;  %v11879_v60 = vcombine.low %v8588_v45, %v8591_v35  ;;  %v11798_v32 = vrot.slane %v8692_v54, 9  ;;  %v8806_v48 = vrot.slane %v8804_v39, 4  ;;  %v12246_v46 = vpop.f32.mrb[64].mxu1  ;;  %v8296_v54 = vld [vmem:[#allocation2 + $0x60] sm:$0xe] }
 0x58d   : > { %v7898_v5 = vmul.f32 %v16767_v17, %v12242_v15  ;;  %v8807_v34 = vrot.slane %v8693_v53, 5  ;;  %v8123_v0 = vrot.slane %v8122_v58, 4  ;;  %8230 = vst [vmem:[#allocation2 + $0x90] sm:$0xe] %v8122_v58  ;;  %v7899_v49 = vmul.f32 %v16767_v17, %v12245_v3  ;;  %v12247_v27 = vpop.f32.mrb[65].mxu1 }
 0x58e   : > { %v8126_v56 = vrot.slane %v8124_v30, 4  ;;  %9478 = vrot.lane.b32.xlu0 %v11879_v60, %s13046_s13  ;;  %v11828_v31 = vrot.slane %v9088_v63, 9  ;;  %v8805_v41 = vsel %vm13353_vm6, %v11798_v32, %v8804_v39  ;;  %v9193_v2 = vrot.slane %v9089_v14, 5  ;;  %v12249_v44 = vpop.f32.mrb[66].mxu1  ;;  %v8297_v53 = vld [vmem:[#allocation2 + $0x68] sm:$0x1] }
 0x58f   : > { %9824 = vrot.lane.b32.xlu1 %v11940_v13, %s13052_s22  ;;  %v7934_v4 = vadd.f32 %v16778_v24, %v7898_v5  ;;  %v8808_v29 = vsel %vm13353_vm6, %v8806_v48, %v8807_v34  ;;  %v8125_v18 = vsel %vm13368_vm8, %v8123_v0, %v8124_v30  ;;  %v7935_v55 = vadd.f32 %v16778_v24, %v7899_v49  ;;  %v12250_v25 = vpop.f32.mrb[67].mxu1  ;;  %v16867_v58 = vld [vmem:[#allocation2 + $0x70] sm:$0xf]  ;;  %v9090_v30 = vld [vmem:[#allocation2 + $0x6c] sm:$0xe] }
 0x590   : > { %8232 = vst [vmem:[#allocation2 + $0x98] sm:$0x1] %v8126_v56  ;;  %v11910_v16 = vcombine.low %v8805_v41, %v8808_v29  ;;  %v9191_v22 = vsel %vm13353_vm6, %v11828_v31, %v9190_v11  ;;  %8231 = vst [vmem:[#allocation2 + $0x94] sm:$0xf] %v8125_v18  ;;  %v9194_v33 = vsel %vm13353_vm6, %v9192_v40, %v9193_v2  ;;  %v11784_v62 = vrot.slane %v8488_v12, 10  ;;  %v16874_v31 = vpop.permute.xlu0 %9384 }
 0x591   : > { %v7966_v20 = vmax.f32 %v7934_v4, 0.0  ;;  %v8594_v47 = vrot.slane %v16834_v42, 6  ;;  %v7967_v28 = vmax.f32 %v7935_v55, 0.0  ;;  %v11956_v61 = vcombine.low %v9191_v22, %v9194_v33  ;;  %v8662_v40 = vld [vmem:[#allocation2 + $0x6c] sm:$0xf] }
 0x592   : > { %9572 = vrot.lane.b32.xlu0 %v11894_v38, %s13050_s17  ;;  %v8597_v37 = vrot.slane %v8489_v51, 6  ;;  %v11814_v1 = vrot.slane %v8884_v36, 10  ;;  %v8982_v10 = vrot.slane %v8980_v57, 4  ;;  %v8983_v13 = vrot.slane %v8885_v26, 6  ;;  %v9091_v32 = vld [vmem:[#allocation2 + $0x74] sm:$0x1]  ;;  %v16882_v36 = vpop.permute.xlu1 %9464 }
 0x593   : > { %v12076_v23 = vpack.c.bf16 %v7966_v20, %v7966_v20  ;;  %9652 = vrot.lane.b32.xlu1 %v11910_v16, %s13051_s20  ;;  %v8595_v11 = vsel %vm15111_vm9, %v11784_v62, %v8594_v47  ;;  %v8596_v19 = vrot.slane %v8594_v47, 4  ;;  %v12077_v45 = vpack.c.bf16 %v7967_v28, %v7967_v28  ;;  %v16880_v2 = vld [vmem:[#allocation2 + $0x6c] sm:$0xf] }
 0x594   : > { %v8981_v8 = vsel %vm15111_vm9, %v11814_v1, %v8980_v57  ;;  %v12248_v59 = vadd.f32 %v12247_v27, %v12246_v46  ;;  %v12251_v43 = vadd.f32 %v12250_v25, %v12249_v44  ;;  %v8811_v39 = vrot.slane %v16853_v7, 5  ;;  %v12252_v63 = vpop.f32.mrb[68].mxu1  ;;  %v8886_v22 = vld [vmem:[#allocation2 + $0x6c] sm:$0xc]  ;;  %v8887_v1 = vld [vmem:[#allocation2 + $0x74] sm:$0x3] }
 0x595   : > { %v8127_v52 = vrot.slane %v12076_v23, 7  ;;  %v8598_v50 = vsel %vm15111_vm9, %v8596_v19, %v8597_v37  ;;  %v8129_v35 = vrot.slane %v12077_v45, 7  ;;  %v8984_v15 = vsel %vm15111_vm9, %v8982_v10, %v8983_v13  ;;  %v12253_v48 = vpop.f32.mrb[69].mxu1  ;;  %v16898_v13 = vpop.permute.xlu0 %9466 }
 0x596   : > { %9904 = vrot.lane.b32.xlu0 %v11956_v61, %s13054_s30  ;;  %v11880_v38 = vcombine.low %v8595_v11, %v8598_v50  ;;  %v7900_v57 = vmul.f32 %v16767_v17, %v12248_v59  ;;  %v11926_v3 = vcombine.low %v8981_v8, %v8984_v15  ;;  %v7901_v14 = vmul.f32 %v16767_v17, %v12251_v43  ;;  %v12255_v46 = vpop.f32.mrb[70].mxu1  ;;  %v8694_v8 = vld [vmem:[#allocation2 + $0x6c] sm:$0xe] }
 0x597   : > { %v8128_v60 = vrot.slane %v8127_v52, 4  ;;  %8233 = vst [vmem:[#allocation2 + $0x9c] sm:$0xe] %v8127_v52  ;;  %v8987_v5 = vrot.slane %v16853_v7, 6  ;;  %v8131_v34 = vrot.slane %v8129_v35, 4  ;;  %v11895_v56 = vcombine.low %v8662_v40, %v16853_v7  ;;  %v12256_v51 = vpop.f32.mrb[71].mxu1 }
 0x598   : > { %9480 = vrot.lane.b32.xlu1 %v11880_v38, %s13046_s13  ;;  %v7936_v0 = vadd.f32 %v16778_v24, %v7900_v57  ;;  %v11768_v49 = vrot.slane %v8296_v54, 9  ;;  %v7937_v4 = vadd.f32 %v16778_v24, %v7901_v14  ;;  %v8418_v41 = vrot.slane %v16834_v42, 5  ;;  %v8695_v40 = vld [vmem:[#allocation2 + $0x74] sm:$0x1]  ;;  %v16903_v54 = vpop.permute.xlu1 %9386  ;;  %v8267_v57 = vld [vmem:[#allocation2 + $0x70] sm:$0xf] }
 0x599   : > { %v8130_v12 = vsel %vm13368_vm8, %v8128_v60, %v8129_v35  ;;  %v8421_v29 = vrot.slane %v8297_v53, 5  ;;  %8235 = vst [vmem:[#allocation2 + $0xa4] sm:$0x1] %v8131_v34  ;;  %v11829_v18 = vrot.slane %v9090_v30, 9  ;;  %v9197_v55 = vrot.slane %v16867_v58, 5 }
 0x59a   : > { %8234 = vst [vmem:[#allocation2 + $0xa0] sm:$0xf] %v8130_v12  ;;  %9732 = vrot.lane.b32.xlu0 %v11926_v3, %s13053_s12  ;;  %v7968_v27 = vmax.f32 %v7936_v0, 0.0  ;;  %v9200_v16 = vrot.slane %v9091_v32, 5  ;;  %v7969_v44 = vmax.f32 %v7937_v4, 0.0  ;;  %v8419_v42 = vsel %vm13353_vm6, %v11768_v49, %v8418_v41 }
 0x59b   : > { %v8420_v20 = vrot.slane %v8418_v41, 4  ;;  %v11941_v33 = vcombine.low %v16880_v2, %v16867_v58  ;;  %v9198_v47 = vsel %vm13353_vm6, %v11829_v18, %v9197_v55  ;;  %v9199_v26 = vrot.slane %v9197_v55, 4  ;;  %v8299_v3 = vld [vmem:[#allocation2 + $0x74] sm:$0x1]  ;;  %v8298_v0 = vld [vmem:[#allocation2 + $0x6c] sm:$0xe] }
 0x59c   : > { %v12078_v62 = vpack.c.bf16 %v7968_v27, %v7968_v27  ;;  %9574 = vrot.lane.b32.xlu1 %v11895_v56, %s13050_s17  ;;  %v12254_v25 = vadd.f32 %v12253_v48, %v12252_v63  ;;  %v12079_v28 = vpack.c.bf16 %v7969_v44, %v7969_v44  ;;  %v12257_v37 = vadd.f32 %v12256_v51, %v12255_v46  ;;  %v8490_v12 = vld [vmem:[#allocation2 + $0x6c] sm:$0xc]  ;;  %v8491_v4 = vld [vmem:[#allocation2 + $0x74] sm:$0x3] }
 0x59d   : > { %v8422_v61 = vsel %vm13353_vm6, %v8420_v20, %v8421_v29  ;;  %v11815_v23 = vrot.slane %v8886_v22, 10  ;;  %v9201_v10 = vsel %vm13353_vm6, %v9199_v26, %v9200_v16  ;;  %v8989_v38 = vrot.slane %v8987_v5, 4  ;;  %v16922_v18 = vpop.permute.xlu0 %9560 }
 0x59e   : > { %v8132_v11 = vrot.slane %v12078_v62, 7  ;;  %v11864_v19 = vcombine.low %v8419_v42, %v8422_v61  ;;  %v7902_v45 = vmul.f32 %v16767_v17, %v12254_v25  ;;  %v8134_v59 = vrot.slane %v12079_v28, 7 }
 0x59f   : > { %v11957_v52 = vcombine.low %v9198_v47, %v9201_v10  ;;  %v7903_v50 = vmul.f32 %v16767_v17, %v12257_v37  ;;  %v8988_v43 = vsel %vm15111_vm9, %v11815_v23, %v8987_v5  ;;  %v8990_v15 = vrot.slane %v8887_v1, 6  ;;  %v16929_v37 = vld [vmem:[#allocation2 + $0x7c] sm:$0xf] }
 0x5a0   : > { %v8133_v53 = vrot.slane %v8132_v11, 4  ;;  %8236 = vst [vmem:[#allocation2 + $0xa8] sm:$0xe] %v8132_v11  ;;  %9400 = vrot.lane.b32.xlu0 %v11864_v19, %s13045_s9  ;;  %v7938_v35 = vadd.f32 %v16778_v24, %v7902_v45  ;;  %v8136_v63 = vrot.slane %v8134_v59, 4  ;;  %v11799_v30 = vrot.slane %v8694_v8, 9  ;;  %v12258_v34 = vpop.f32.mrb[72].mxu1 }
 0x5a1   : > { %9906 = vrot.lane.b32.xlu1 %v11957_v52, %s13054_s30  ;;  %v7939_v58 = vadd.f32 %v16778_v24, %v7903_v50  ;;  %v8813_v60 = vrot.slane %v8811_v39, 4  ;;  %v8991_v48 = vsel %vm15111_vm9, %v8989_v38, %v8990_v15  ;;  %v8814_v5 = vrot.slane %v8695_v40, 5  ;;  %v12259_v41 = vpop.f32.mrb[73].mxu1  ;;  %v16936_v10 = vld [vmem:[#allocation2 + $0x7c] sm:$0xf] }
 0x5a2   : > { %v8135_v14 = vsel %vm13368_vm8, %v8133_v53, %v8134_v59  ;;  %v7970_v32 = vmax.f32 %v7938_v35, 0.0  ;;  %8238 = vst [vmem:[#allocation2 + $0xb0] sm:$0x1] %v8136_v63  ;;  %v11927_v49 = vcombine.low %v8988_v43, %v8991_v48  ;;  %v8812_v46 = vsel %vm13353_vm6, %v11799_v30, %v8811_v39  ;;  %v12261_v55 = vpop.f32.mrb[74].mxu1  ;;  %v16947_v38 = vpop.permute.xlu0 %9720  ;;  %v8696_v15 = vld [vmem:[#allocation2 + $0x78] sm:$0xe] }
 0x5a3   : > { %8237 = vst [vmem:[#allocation2 + $0xac] sm:$0xf] %v8135_v14  ;;  %v7971_v56 = vmax.f32 %v7939_v58, 0.0  ;;  %v8815_v2 = vsel %vm13353_vm6, %v8813_v60, %v8814_v5  ;;  %v8425_v51 = vrot.slane %v8267_v57, 5  ;;  %v8428_v27 = vrot.slane %v8299_v3, 5  ;;  %v12262_v44 = vpop.f32.mrb[75].mxu1  ;;  %v16925_v42 = vpop.permute.xlu1 %9640 }
 0x5a4   : > { %9826 = vrot.lane.b32.xlu0 %v11941_v33, %s13052_s22  ;;  %v12080_v29 = vpack.c.bf16 %v7970_v32, %v7970_v32  ;;  %v11911_v7 = vcombine.low %v8812_v46, %v8815_v2  ;;  %v11769_v22 = vrot.slane %v8298_v0, 9  ;;  %v8601_v39 = vrot.slane %v8267_v57, 6  ;;  %v8697_v57 = vld [vmem:[#allocation2 + $0x80] sm:$0x1]  ;;  %v9060_v58 = vld [vmem:[#allocation2 + $0x78] sm:$0xf] }
 0x5a5   : > { %v12081_v16 = vpack.c.bf16 %v7971_v56, %v7971_v56  ;;  %9734 = vrot.lane.b32.xlu1 %v11927_v49, %s13053_s12  ;;  %v8427_v33 = vrot.slane %v8425_v51, 4  ;;  %v11785_v62 = vrot.slane %v8490_v12, 10  ;;  %v8604_v47 = vrot.slane %v8491_v4, 6  ;;  %v9093_v60 = vld [vmem:[#allocation2 + $0x80] sm:$0x1] }
 0x5a6   : > { %v8137_v20 = vrot.slane %v12080_v29, 7  ;;  %v8426_v25 = vsel %vm13353_vm6, %v11769_v22, %v8425_v51  ;;  %v8603_v28 = vrot.slane %v8601_v39, 4  ;;  %v12260_v61 = vadd.f32 %v12259_v41, %v12258_v34  ;;  %v8248_v3 = vld [vmem:[#allocation2] sm:$0xf]  ;;  %v9092_v5 = vld [vmem:[#allocation2 + $0x78] sm:$0xe] }
 0x5a7   : > { %v8139_v26 = vrot.slane %v12081_v16, 7  ;;  %v8429_v23 = vsel %vm13353_vm6, %v8427_v33, %v8428_v27  ;;  %v8602_v11 = vsel %vm15111_vm9, %v11785_v62, %v8601_v39  ;;  %v12263_v19 = vadd.f32 %v12262_v44, %v12261_v55  ;;  %v16941_v50 = vpop.permute.xlu1 %9468  ;;  %v8664_v0 = vld [vmem:[#allocation2 + $0x78] sm:$0xf]  ;;  %v16957_v2 = vld [vmem:[#allocation2 + $0x7c] sm:$0xf] }
 0x5a8   : > { %v8138_v1 = vrot.slane %v8137_v20, 4  ;;  %8239 = vst [vmem:[#allocation2 + $0xb4] sm:$0xe] %v8137_v20  ;;  %9654 = vrot.lane.b32.xlu0 %v11911_v7, %s13051_s20  ;;  %v11865_v8 = vcombine.low %v8426_v25, %v8429_v23  ;;  %v8605_v59 = vsel %vm15111_vm9, %v8603_v28, %v8604_v47  ;;  %v7904_v52 = vmul.f32 %v16767_v17, %v12260_v61  ;;  %v8493_v22 = vld [vmem:[#allocation2 + $0x80] sm:$0x3]  ;;  %v16969_v25 = vpop.permute.xlu0 %9388 }
 0x5a9   : > { %v8141_v45 = vrot.slane %v8139_v26, 4  ;;  %v11881_v40 = vcombine.low %v8602_v11, %v8605_v59  ;;  %v7905_v53 = vmul.f32 %v16767_v17, %v12263_v19  ;;  %v9204_v35 = vrot.slane %v16929_v37, 5  ;;  %v12801_v44 = vld [vmem:[#allocation2 + $0x4] sm:$0xf]  ;;  %v8492_v28 = vld [vmem:[#allocation2 + $0x78] sm:$0xc] }
 0x5aa   : > { %v8140_v43 = vsel %vm13368_vm8, %v8138_v1, %v8139_v26  ;;  %9402 = vrot.lane.b32.xlu1 %v11865_v8, %s13045_s9  ;;  %v7940_v63 = vadd.f32 %v16778_v24, %v7904_v52  ;;  %v8818_v30 = vrot.slane %v16936_v10, 5  ;;  %v11942_v48 = vcombine.low %v9060_v58, %v16929_v37  ;;  %v8888_v61 = vld [vmem:[#allocation2 + $0x78] sm:$0xc] }
 0x5ab   : > { %8240 = vst [vmem:[#allocation2 + $0xb8] sm:$0xf] %v8140_v43  ;;  %8241 = vst [vmem:[#allocation2 + $0xbc] sm:$0x1] %v8141_v45  ;;  %v7941_v14 = vadd.f32 %v16778_v24, %v7905_v53  ;;  %v9206_v32 = vrot.slane %v9204_v35, 4  ;;  %v11800_v56 = vrot.slane %v8696_v15, 9  ;;  %v11896_v41 = vcombine.low %v8664_v0, %v16936_v10  ;;  %v16964_v39 = vpop.permute.xlu1 %9562 }
 0x5ac   : > { %9482 = vrot.lane.b32.xlu0 %v11881_v40, %s13046_s13  ;;  %v7972_v34 = vmax.f32 %v7940_v63, 0.0  ;;  %v8820_v49 = vrot.slane %v8818_v30, 4  ;;  %v8821_v46 = vrot.slane %v8697_v57, 5  ;;  %v8994_v4 = vrot.slane %v16936_v10, 6  ;;  %v8889_v10 = vld [vmem:[#allocation2 + $0x80] sm:$0x3] }
 0x5ad   : > { %v7973_v12 = vmax.f32 %v7941_v14, 0.0  ;;  %v9207_v29 = vrot.slane %v9093_v60, 5  ;;  %v8819_v27 = vsel %vm13353_vm6, %v11800_v56, %v8818_v30  ;;  %v11830_v16 = vrot.slane %v9092_v5, 9  ;;  %v12264_v7 = vpop.f32.mrb[76].mxu1  ;;  %v16993_v56 = vpop.permute.xlu0 %9642 }
 0x5ae   : > { %v12082_v51 = vpack.c.bf16 %v7972_v34, %v7972_v34  ;;  %9828 = vrot.lane.b32.xlu1 %v11942_v48, %s13052_s22  ;;  %v8822_v55 = vsel %vm13353_vm6, %v8820_v49, %v8821_v46  ;;  %v11840_v20 = vcombine.low %v8248_v3, %v12801_v44  ;;  %v12265_v26 = vpop.f32.mrb[77].mxu1  ;;  %v8608_v19 = vrot.slane %v16957_v2, 6  ;;  %v16995_v49 = vld [vmem:[#allocation2 + $0x88] sm:$0xf] }
 0x5af   : > { %v12083_v33 = vpack.c.bf16 %v7973_v12, %v7973_v12  ;;  %v11912_v62 = vcombine.low %v8819_v27, %v8822_v55  ;;  %v9208_v47 = vsel %vm13353_vm6, %v9206_v32, %v9207_v29  ;;  %v9205_v1 = vsel %vm13353_vm6, %v11830_v16, %v9204_v35  ;;  %v12267_v11 = vpop.f32.mrb[78].mxu1  ;;  %v16983_v48 = vpop.permute.xlu1 %9722  ;;  %v16998_v27 = vld [vmem:[#allocation2 + $0x88] sm:$0xf]  ;;  %v9095_v16 = vld [vmem:[#allocation2 + $0x8c] sm:$0x1] }
 0x5b0   : > { %9576 = vrot.lane.b32.xlu0 %v11896_v41, %s13050_s17  ;;  %v8142_v37 = vrot.slane %v12082_v51, 7  ;;  %v12266_v23 = vadd.f32 %v12265_v26, %v12264_v7  ;;  %v11958_v8 = vcombine.low %v9205_v1, %v9208_v47  ;;  %v12268_v59 = vpop.f32.mrb[79].mxu1  ;;  %v8611_v52 = vrot.slane %v8493_v22, 6  ;;  %v8300_v51 = vld [vmem:[#allocation2 + $0x78] sm:$0xe] }
 0x5b1   : > { %v8144_v45 = vrot.slane %v12083_v33, 7  ;;  %v8996_v43 = vrot.slane %v8994_v4, 4  ;;  %v12269_v15 = vadd.f32 %v12268_v59, %v12267_v11  ;;  %v11786_v57 = vrot.slane %v8492_v28, 10  ;;  %v8666_v33 = vld [vmem:[#allocation2 + $0x84] sm:$0xf] }
 0x5b2   : > { %v8143_v40 = vrot.slane %v8142_v37, 4  ;;  %8242 = vst [vmem:[#allocation2 + $0xc0] sm:$0xe] %v8142_v37  ;;  %9656 = vrot.lane.b32.xlu1 %v11912_v62, %s13051_s20  ;;  %v7906_v53 = vmul.f32 %v16767_v17, %v12266_v23  ;;  %v8610_v35 = vrot.slane %v8608_v19, 4  ;;  %v11816_v58 = vrot.slane %v8888_v61, 10 }
 0x5b3   : > { %v8146_v63 = vrot.slane %v8144_v45, 4  ;;  %v8997_v30 = vrot.slane %v8889_v10, 6  ;;  %v9930_v60 = vsel %vm4374_vm13, %v11840_v20, %v16874_v31  ;;  %v7907_v32 = vmul.f32 %v16767_v17, %v12269_v15  ;;  %v8301_v17 = vld [vmem:[#allocation2 + $0x80] sm:$0x1]  ;;  %v9094_v20 = vld [vmem:[#allocation2 + $0x84] sm:$0xe]  ;;  %v17009_v1 = vpop.permute.xlu1 %9390  ;;  %v17015_v10 = vpop.permute.xlu0 %9470 }
 0x5b4   : > { %9908 = vrot.lane.b32.xlu0 %v11958_v8, %s13054_s30  ;;  %v8145_v3 = vsel %vm13368_vm8, %v8143_v40, %v8144_v45  ;;  %v7942_v14 = vadd.f32 %v16778_v24, %v7906_v53  ;;  %v8609_v5 = vsel %vm15111_vm9, %v11786_v57, %v8608_v19  ;;  %v8612_v34 = vsel %vm15111_vm9, %v8610_v35, %v8611_v52  ;;  %v8891_v23 = vld [vmem:[#allocation2 + $0x8c] sm:$0x3]  ;;  %v8890_v59 = vld [vmem:[#allocation2 + $0x84] sm:$0xc] }
 0x5b5   : > { %8243 = vst [vmem:[#allocation2 + $0xc4] sm:$0xf] %v8145_v3  ;;  %8244 = vst [vmem:[#allocation2 + $0xc8] sm:$0x1] %v8146_v63  ;;  %v8995_v31 = vsel %vm15111_vm9, %v11816_v58, %v8994_v4  ;;  %v8998_v0 = vsel %vm15111_vm9, %v8996_v43, %v8997_v30  ;;  %v7943_v12 = vadd.f32 %v16778_v24, %v7907_v32  ;;  %v8432_v4 = vrot.slane %v16957_v2, 5 }
 0x5b6   : > { %v7974_v46 = vmax.f32 %v7942_v14, 0.0  ;;  %v11882_v41 = vcombine.low %v8609_v5, %v8612_v34  ;;  %v11928_v29 = vcombine.low %v8995_v31, %v8998_v0  ;;  %v9977_v55 = vsel %vm4440_vm15, %v9930_v60, %v16882_v36  ;;  %v8698_v53 = vld [vmem:[#allocation2 + $0x84] sm:$0xe]  ;;  %v8699_v15 = vld [vmem:[#allocation2 + $0x8c] sm:$0x1] }
 0x5b7   : > { %v7975_v22 = vmax.f32 %v7943_v12, 0.0  ;;  %v8825_v44 = vrot.slane %v16995_v49, 5  ;;  %v8435_v24 = vrot.slane %v8301_v17, 5  ;;  %v9001_v62 = vrot.slane %v16995_v49, 6  ;;  %v8250_v57 = vld [vmem:[#allocation2 + $0xc] sm:$0xf] }
 0x5b8   : > { %v12084_v7 = vpack.c.bf16 %v7974_v46, %v7974_v46  ;;  %9484 = vrot.lane.b32.xlu1 %v11882_v41, %s13046_s13  ;;  %9736 = vrot.lane.b32.xlu0 %v11928_v29, %s13053_s12  ;;  %v11770_v47 = vrot.slane %v8300_v51, 9  ;;  %v8434_v26 = vrot.slane %v8432_v4, 4  ;;  %v9211_v36 = vrot.slane %v16998_v27, 5  ;;  %v8271_v60 = vld [vmem:[#allocation2 + $0x88] sm:$0xf] }
 0x5b9   : > { %v12085_v2 = vpack.c.bf16 %v7975_v22, %v7975_v22  ;;  %v11897_v61 = vcombine.low %v8666_v33, %v16995_v49  ;;  %v9214_v37 = vrot.slane %v9095_v16, 5  ;;  %v11831_v45 = vrot.slane %v9094_v20, 9  ;;  %v8303_v3 = vld [vmem:[#allocation2 + $0x8c] sm:$0x1]  ;;  %v9062_v31 = vld [vmem:[#allocation2 + $0x84] sm:$0xf] }
 0x5ba   : > { %v8147_v28 = vrot.slane %v12084_v7, 7  ;;  %v8433_v11 = vsel %vm13353_vm6, %v11770_v47, %v8432_v4  ;;  %v8436_v19 = vsel %vm13353_vm6, %v8434_v26, %v8435_v24  ;;  %v9213_v8 = vrot.slane %v9211_v36, 4  ;;  %v8495_v0 = vld [vmem:[#allocation2 + $0x8c] sm:$0x3]  ;;  %v17035_v7 = vld [vmem:[#allocation2 + $0x94] sm:$0xf] }
 0x5bb   : > { %v8149_v43 = vrot.slane %v12085_v2, 7  ;;  %v11866_v40 = vcombine.low %v8433_v11, %v8436_v19  ;;  %v9212_v63 = vsel %vm13353_vm6, %v11831_v45, %v9211_v36  ;;  %v9003_v58 = vrot.slane %v9001_v62, 4  ;;  %v17041_v47 = vld [vmem:[#allocation2 + $0x94] sm:$0xf]  ;;  %v12802_v26 = vld [vmem:[#allocation2 + $0x10] sm:$0xf] }
 0x5bc   : > { %v8148_v52 = vrot.slane %v8147_v28, 4  ;;  %8245 = vst [vmem:[#allocation2 + $0xcc] sm:$0xe] %v8147_v28  ;;  %9578 = vrot.lane.b32.xlu1 %v11897_v61, %s13050_s17  ;;  %v9215_v35 = vsel %vm13353_vm6, %v9213_v8, %v9214_v37  ;;  %v9004_v30 = vrot.slane %v8891_v23, 6  ;;  %v10009_v14 = vsel %vm4506_vm1, %v9977_v55, %v16922_v18  ;;  %v8302_v18 = vld [vmem:[#allocation2 + $0x84] sm:$0xe] }
 0x5bd   : > { %v8151_v5 = vrot.slane %v8149_v43, 4  ;;  %9404 = vrot.lane.b32.xlu0 %v11866_v40, %s13045_s9  ;;  %v11959_v34 = vcombine.low %v9212_v63, %v9215_v35  ;;  %v9817_v17 = vpop.permute.xlu1 %9816  ;;  %v11817_v46 = vrot.slane %v8890_v59, 10  ;;  %v8827_v41 = vrot.slane %v8825_v44, 4  ;;  %v8494_v61 = vld [vmem:[#allocation2 + $0x84] sm:$0xc] }
 0x5be   : > { %v8150_v32 = vsel %vm13368_vm8, %v8148_v52, %v8149_v43  ;;  %v9005_v12 = vsel %vm15111_vm9, %v9003_v58, %v9004_v30  ;;  %v8828_v29 = vrot.slane %v8699_v15, 5  ;;  %v17031_v51 = vpop.permute.xlu0 %9564  ;;  %v11943_v6 = vcombine.low %v9062_v31, %v16998_v27  ;;  %v8701_v8 = vld [vmem:[#allocation2 + $0x98] sm:$0x1]  ;;  %v17066_v63 = vld [vmem:[#allocation2 + $0x94] sm:$0xf] }
 0x5bf   : > { %8246 = vst [vmem:[#allocation2 + $0xd0] sm:$0xf] %v8150_v32  ;;  %8247 = vst [vmem:[#allocation2 + $0xd4] sm:$0x1] %v8151_v5  ;;  %v11801_v55 = vrot.slane %v8698_v53, 9  ;;  %v8439_v4 = vrot.slane %v8271_v60, 5  ;;  %v9002_v22 = vsel %vm15111_vm9, %v11817_v46, %v9001_v62  ;;  %v11841_v36 = vcombine.low %v8250_v57, %v12802_v26 }
 0x5c0   : > { %9910 = vrot.lane.b32.xlu1 %v11959_v34, %s13054_s30  ;;  %v8442_v16 = vrot.slane %v8303_v3, 5  ;;  %v8829_v24 = vsel %vm13353_vm6, %v8827_v41, %v8828_v29  ;;  %v8615_v20 = vrot.slane %v8271_v60, 6  ;;  %v8618_v33 = vrot.slane %v8495_v0, 6  ;;  %v9097_v43 = vld [vmem:[#allocation2 + $0x98] sm:$0x1] }
 0x5c1   : > { %v10041_v27 = vsel %vm4572_vm3, %v10009_v14, %v16925_v42  ;;  %9830 = vrot.lane.b32.xlu0 %v11943_v6, %s13052_s22  ;;  %v11929_v28 = vcombine.low %v9002_v22, %v9005_v12  ;;  %v8441_v2 = vrot.slane %v8439_v4, 4  ;;  %v8826_v62 = vsel %vm13353_vm6, %v11801_v55, %v8825_v44  ;;  %v9064_v58 = vld [vmem:[#allocation2 + $0x90] sm:$0xf]  ;;  %v10204_v14 = vld [vmem:[#allocation2 + $0x40] sm:$0xf] }
 0x5c2   : > { %v11771_v37 = vrot.slane %v8302_v18, 9  ;;  %v8617_v23 = vrot.slane %v8615_v20, 4  ;;  %v8832_v11 = vrot.slane %v17035_v7, 5  ;;  %v11913_v19 = vcombine.low %v8826_v62, %v8829_v24  ;;  %v10205_v32 = vld [vmem:[#allocation2 + $0x44] sm:$0x3] }
 0x5c3   : > { %v8443_v42 = vsel %vm13353_vm6, %v8441_v2, %v8442_v16  ;;  %v9218_v45 = vrot.slane %v17041_v47, 5  ;;  %v11787_v52 = vrot.slane %v8494_v61, 10  ;;  %v9933_v53 = vsel %vm4374_vm13, %v11841_v36, %v16903_v54  ;;  %v8700_v34 = vld [vmem:[#allocation2 + $0x90] sm:$0xe]  ;;  %v8497_v0 = vld [vmem:[#allocation2 + $0x98] sm:$0x3] }
 0x5c4   : > { %9738 = vrot.lane.b32.xlu1 %v11929_v28, %s13053_s12  ;;  %v17055_v59 = vpop.permute.xlu1 %9644  ;;  %v8440_v49 = vsel %vm13353_vm6, %v11771_v37, %v8439_v4  ;;  %v8619_v44 = vsel %vm15111_vm9, %v8617_v23, %v8618_v33  ;;  %v10073_v57 = vsel %vm7100_vm10, %v10041_v27, %v16947_v38  ;;  %v8834_v60 = vrot.slane %v8832_v11, 4  ;;  %v8668_v12 = vld [vmem:[#allocation2 + $0x90] sm:$0xf]  ;;  %v8893_v16 = vld [vmem:[#allocation2 + $0x98] sm:$0x3] }
 0x5c5   : > { %9658 = vrot.lane.b32.xlu0 %v11913_v19, %s13051_s20  ;;  %v11867_v15 = vcombine.low %v8440_v49, %v8443_v42  ;;  %v8616_v35 = vsel %vm15111_vm9, %v11787_v52, %v8615_v20  ;;  %v10105_v30 = vsel %vm7133_vm11, %v10073_v57, %v9817_v17  ;;  %v8835_v3 = vrot.slane %v8701_v8, 5  ;;  %v9096_v29 = vld [vmem:[#allocation2 + $0x90] sm:$0xe]  ;;  %v10203_v36 = vld [vmem:[#allocation2 + $0x3c] sm:$0xc] }
 0x5c6   : > { %v9897_v40 = vpop.permute.xlu0 %9896  ;;  %v11883_v54 = vcombine.low %v8616_v35, %v8619_v44  ;;  %v9220_v5 = vrot.slane %v9218_v45, 4  ;;  %v9221_v31 = vrot.slane %v9097_v43, 5  ;;  %v9008_v41 = vrot.slane %v17035_v7, 6  ;;  %v8496_v4 = vld [vmem:[#allocation2 + $0x90] sm:$0xc] }
 0x5c7   : > { %v10137_v38 = vsel %vm7166_vm12, %v10105_v30, %v9897_v40  ;;  %v8622_v17 = vrot.slane %v17066_v63, 6  ;;  %v9979_v18 = vsel %vm4440_vm15, %v9933_v53, %v16898_v13  ;;  %v11944_v6 = vcombine.low %v9064_v58, %v17041_v47  ;;  %v8892_v62 = vld [vmem:[#allocation2 + $0x90] sm:$0xc]  ;;  %v8305_v52 = vld [vmem:[#allocation2 + $0x98] sm:$0x1] }
 0x5c8   : > { %9406 = vrot.lane.b32.xlu1 %v11867_v15, %s13045_s9  ;;  %10713 = vmatmul.mubr.bf16.vlgmr.msra.gmra.mrb[16].mxu0 %v10137_v38  ;;  %v11898_v55 = vcombine.low %v8668_v12, %v17035_v7  ;;  %v11802_v24 = vrot.slane %v8700_v34, 9  ;;  %v8836_v20 = vsel %vm13353_vm6, %v8834_v60, %v8835_v3  ;;  %v8625_v26 = vrot.slane %v8497_v0, 6  ;;  %v17101_v53 = vld [vmem:[#allocation2 + $0xa0] sm:$0xf]  ;;  %v9099_v30 = vld [vmem:[#allocation2 + $0xa4] sm:$0x1] }
 0x5c9   : > { %v17073_v46 = vpop.permute.xlu1 %9472  ;;  %9486 = vrot.lane.b32.xlu0 %v11883_v54, %s13046_s13  ;;  %v8624_v33 = vrot.slane %v8622_v17, 4  ;;  %v11832_v13 = vrot.slane %v9096_v29, 9  ;;  %v9222_v27 = vsel %vm13353_vm6, %v9220_v5, %v9221_v31  ;;  %v10305_v47 = vrot.slane %v10204_v14, 6  ;;  %v17110_v35 = vld [vmem:[#allocation2 + $0xa0] sm:$0xf] }
 0x5ca   : > { %v17082_v22 = vpop.permute.xlu0 %9724  ;;  %v10308_v28 = vrot.slane %v10205_v32, 6  ;;  %v8833_v2 = vsel %vm13353_vm6, %v11802_v24, %v8832_v11  ;;  %v11788_v61 = vrot.slane %v8496_v4, 10  ;;  %v9010_v37 = vrot.slane %v9008_v41, 4  ;;  %v8252_v60 = vld [vmem:[#allocation2 + $0x18] sm:$0xf] }
 0x5cb   : > { %v9011_v23 = vrot.slane %v8893_v16, 6  ;;  %v11914_v19 = vcombine.low %v8833_v2, %v8836_v20  ;;  %v9219_v42 = vsel %vm13353_vm6, %v11832_v13, %v9218_v45  ;;  %v11969_v8 = vrot.slane %v10203_v36, 10  ;;  %v8304_v32 = vld [vmem:[#allocation2 + $0x90] sm:$0xe]  ;;  %v12803_v34 = vld [vmem:[#allocation2 + $0x1c] sm:$0xf] }
 0x5cc   : > { %9832 = vrot.lane.b32.xlu1 %v11944_v6, %s13052_s22  ;;  %v10307_v49 = vrot.slane %v10305_v47, 4  ;;  %v10011_v44 = vsel %vm4506_vm1, %v9979_v18, %v16964_v39  ;;  %v11960_v43 = vcombine.low %v9219_v42, %v9222_v27  ;;  %v8626_v11 = vsel %vm15111_vm9, %v8624_v33, %v8625_v26  ;;  %v9098_v6 = vld [vmem:[#allocation2 + $0x9c] sm:$0xe]  ;;  %v8895_v26 = vld [vmem:[#allocation2 + $0xa4] sm:$0x3] }
 0x5cd   : > { %v17089_v7 = vpop.permute.xlu1 %9566  ;;  %9580 = vrot.lane.b32.xlu0 %v11898_v55, %s13050_s17  ;;  %v8446_v40 = vrot.slane %v17066_v63, 5  ;;  %v8623_v15 = vsel %vm15111_vm9, %v11788_v61, %v8622_v17  ;;  %v11818_v45 = vrot.slane %v8892_v62, 10  ;;  %v10306_v57 = vsel %vm15111_vm9, %v11969_v8, %v10305_v47  ;;  %v8670_v17 = vld [vmem:[#allocation2 + $0x9c] sm:$0xf]  ;;  %v10207_v47 = vld [vmem:[#allocation2 + $0x4c] sm:$0xf] }
 0x5ce   : > { %v10309_v39 = vsel %vm15111_vm9, %v10307_v49, %v10308_v28  ;;  %v9012_v3 = vsel %vm15111_vm9, %v9010_v37, %v9011_v23  ;;  %v8449_v5 = vrot.slane %v8305_v52, 5  ;;  %v11842_v31 = vcombine.low %v8252_v60, %v12803_v34  ;;  %v10208_v28 = vld [vmem:[#allocation2 + $0x50] sm:$0x3]  ;;  %v8703_v62 = vld [vmem:[#allocation2 + $0xa4] sm:$0x1] }
 0x5cf   : > { %v11985_v14 = vcombine.low %v10306_v57, %v10309_v39  ;;  %v8448_v54 = vrot.slane %v8446_v40, 4  ;;  %v11884_v38 = vcombine.low %v8623_v15, %v8626_v11  ;;  %v9225_v0 = vrot.slane %v17101_v53, 5  ;;  %v17140_v23 = vld [vmem:[#allocation2 + $0xa0] sm:$0xf]  ;;  %v8702_v39 = vld [vmem:[#allocation2 + $0x9c] sm:$0xe] }
 0x5d0   : > { %9660 = vrot.lane.b32.xlu1 %v11914_v19, %s13051_s20  ;;  %v17112_v58 = vpop.permute.xlu0 %9392  ;;  %v10043_v12 = vsel %vm4572_vm3, %v10011_v44, %v16993_v56  ;;  %v9009_v29 = vsel %vm15111_vm9, %v11818_v45, %v9008_v41  ;;  %v9015_v18 = vrot.slane %v17110_v35, 6  ;;  %v9228_v55 = vrot.slane %v9099_v30, 5  ;;  %v8894_v56 = vld [vmem:[#allocation2 + $0x9c] sm:$0xc]  ;;  %v8307_v45 = vld [vmem:[#allocation2 + $0xa4] sm:$0x1] }
 0x5d1   : > { %v9899_v63 = vpop.permute.xlu1 %9898  ;;  %9912 = vrot.lane.b32.xlu0 %v11960_v43, %s13054_s30  ;;  %12119 = vmatprep.mubr.msk.bf16.mxu0 %vm4374_vm13, %v11985_v14  ;;  %v10075_v4 = vsel %vm7100_vm10, %v10043_v12, %v16983_v48  ;;  %v11930_v16 = vcombine.low %v9009_v29, %v9012_v3  ;;  %v11772_v24 = vrot.slane %v8304_v32, 9  ;;  %v9227_v20 = vrot.slane %v9225_v0, 4  ;;  %v9066_v44 = vld [vmem:[#allocation2 + $0x9c] sm:$0xf]  ;;  %v8499_v32 = vld [vmem:[#allocation2 + $0xa4] sm:$0x3] }
 0x5d2   : > { %v8839_v41 = vrot.slane %v17110_v35, 5  ;;  %v8450_v13 = vsel %vm13353_vm6, %v8448_v54, %v8449_v5  ;;  %v9936_v48 = vsel %vm4374_vm13, %v11842_v31, %v16969_v25  ;;  %v11899_v2 = vcombine.low %v8670_v17, %v17110_v35  ;;  %v10206_v25 = vld [vmem:[#allocation2 + $0x48] sm:$0xc] }
 0x5d3   : > { %v8447_v61 = vsel %vm13353_vm6, %v11772_v24, %v8446_v40  ;;  %v11833_v19 = vrot.slane %v9098_v6, 9  ;;  %v9229_v42 = vsel %vm13353_vm6, %v9227_v20, %v9228_v55  ;;  %v9017_v8 = vrot.slane %v9015_v18, 4  ;;  %v8306_v55 = vld [vmem:[#allocation2 + $0x9c] sm:$0xe] }
 0x5d4   : > { %9488 = vrot.lane.b32.xlu1 %v11884_v38, %s13046_s13  ;;  %v9819_v33 = vpop.permute.xlu0 %9818  ;;  %v9018_v49 = vrot.slane %v8895_v26, 6  ;;  %v11868_v52 = vcombine.low %v8447_v61, %v8450_v13  ;;  %v11819_v43 = vrot.slane %v8894_v56, 10  ;;  %v10312_v11 = vrot.slane %v10207_v47, 6  ;;  %v8498_v26 = vld [vmem:[#allocation2 + $0x9c] sm:$0xc] }
 0x5d5   : > { %v17127_v36 = vpop.permute.xlu1 %9726  ;;  %v10107_v27 = vsel %vm7133_vm11, %v10075_v4, %v9819_v33  ;;  %9740 = vrot.lane.b32.xlu0 %v11930_v16, %s13053_s12  ;;  %v10315_v40 = vrot.slane %v10208_v28, 6  ;;  %v9226_v57 = vsel %vm13353_vm6, %v11833_v19, %v9225_v0  ;;  %v8841_v35 = vrot.slane %v8839_v41, 4  ;;  %v17164_v4 = vld [vmem:[#allocation2 + $0xac] sm:$0xf] }
 0x5d6   : > { %v10140_v37 = vsel %vm7166_vm12, %v10107_v27, %v9899_v63  ;;  %v8842_v30 = vrot.slane %v8703_v62, 5  ;;  %v8453_v63 = vrot.slane %v17140_v23, 5  ;;  %v11961_v60 = vcombine.low %v9226_v57, %v9229_v42  ;;  %v17173_v13 = vld [vmem:[#allocation2 + $0xac] sm:$0xf]  ;;  %v8705_v62 = vld [vmem:[#allocation2 + $0xb0] sm:$0x1] }
 0x5d7   : > { %10721 = vmatmul.mubr.bf16.gmra.mrb[20].mxu0 %v10140_v37  ;;  %v11970_v3 = vrot.slane %v10206_v25, 10  ;;  %v10314_v14 = vrot.slane %v10312_v11, 4  ;;  %v8629_v54 = vrot.slane %v17140_v23, 6  ;;  %v11945_v34 = vcombine.low %v9066_v44, %v17101_v53  ;;  %v17184_v37 = vld [vmem:[#allocation2 + $0xac] sm:$0xf] }
 0x5d8   : > { %9582 = vrot.lane.b32.xlu1 %v11899_v2, %s13050_s17  ;;  %v17145_v15 = vpop.permute.xlu0 %9646  ;;  %v9019_v31 = vsel %vm15111_vm9, %v9017_v8, %v9018_v49  ;;  %v8455_v38 = vrot.slane %v8453_v63, 4  ;;  %v8456_v0 = vrot.slane %v8307_v45, 5  ;;  %v9016_v12 = vsel %vm15111_vm9, %v11819_v43, %v9015_v18  ;;  %v8254_v23 = vld [vmem:[#allocation2 + $0x24] sm:$0xf]  ;;  %v9068_v8 = vld [vmem:[#allocation2 + $0xa8] sm:$0xf] }
 0x5d9   : > { %9408 = vrot.lane.b32.xlu0 %v11868_v52, %s13045_s9  ;;  %v11803_v29 = vrot.slane %v8702_v39, 9  ;;  %v10313_v17 = vsel %vm15111_vm9, %v11970_v3, %v10312_v11  ;;  %v10316_v6 = vsel %vm15111_vm9, %v10314_v14, %v10315_v40  ;;  %v8843_v53 = vsel %vm13353_vm6, %v8841_v35, %v8842_v30  ;;  %v8704_v11 = vld [vmem:[#allocation2 + $0xa8] sm:$0xe]  ;;  %v9101_v40 = vld [vmem:[#allocation2 + $0xb0] sm:$0x1] }
 0x5da   : > { %v17152_v5 = vpop.permute.xlu1 %9394  ;;  %v11986_v16 = vcombine.low %v10313_v17, %v10316_v6  ;;  %v8631_v24 = vrot.slane %v8629_v54, 4  ;;  %v8632_v20 = vrot.slane %v8499_v32, 6  ;;  %v9981_v18 = vsel %vm4440_vm15, %v9936_v48, %v16941_v50  ;;  %v10210_v45 = vld [vmem:[#allocation2 + $0x58] sm:$0xf] }
 0x5db   : > { %v11931_v56 = vcombine.low %v9016_v12, %v9019_v31  ;;  %v8840_v47 = vsel %vm13353_vm6, %v11803_v29, %v8839_v41  ;;  %v11773_v28 = vrot.slane %v8306_v55, 9  ;;  %v8457_v2 = vsel %vm13353_vm6, %v8455_v38, %v8456_v0  ;;  %v8501_v31 = vld [vmem:[#allocation2 + $0xb0] sm:$0x3] }
 0x5dc   : > { %9914 = vrot.lane.b32.xlu1 %v11961_v60, %s13054_s30  ;;  %12120 = vmatprep.mubr.msk.bf16.mxu0 %vm4374_vm13, %v11986_v16  ;;  %v8846_v61 = vrot.slane %v17164_v4, 5  ;;  %v10013_v50 = vsel %vm4506_vm1, %v9981_v18, %v17031_v51  ;;  %v11915_v48 = vcombine.low %v8840_v47, %v8843_v53  ;;  %v11789_v19 = vrot.slane %v8498_v26, 10  ;;  %v12804_v51 = vld [vmem:[#allocation2 + $0x28] sm:$0xf]  ;;  %v10211_v60 = vld [vmem:[#allocation2 + $0x5c] sm:$0x3] }
 0x5dd   : > { %9834 = vrot.lane.b32.xlu0 %v11945_v34, %s13052_s22  ;;  %v8454_v41 = vsel %vm13353_vm6, %v11773_v28, %v8453_v63  ;;  %v8633_v42 = vsel %vm15111_vm9, %v8631_v24, %v8632_v20  ;;  %v9232_v49 = vrot.slane %v17173_v13, 5  ;;  %v11843_v52 = vcombine.low %v8254_v23, %v12804_v51  ;;  %v9100_v34 = vld [vmem:[#allocation2 + $0xa8] sm:$0xe] }
 0x5de   : > { %v17168_v33 = vpop.permute.xlu0 %9474  ;;  %v9821_v27 = vpop.permute.xlu1 %9820  ;;  %v10045_v44 = vsel %vm4572_vm3, %v10013_v50, %v17055_v59  ;;  %v11869_v43 = vcombine.low %v8454_v41, %v8457_v2  ;;  %v8630_v57 = vsel %vm15111_vm9, %v11789_v19, %v8629_v54  ;;  %v8848_v39 = vrot.slane %v8846_v61, 4  ;;  %v8672_v54 = vld [vmem:[#allocation2 + $0xa8] sm:$0xf]  ;;  %v17219_v2 = vld [vmem:[#allocation2 + $0xb8] sm:$0xf] }
 0x5df   : > { %v8849_v35 = vrot.slane %v8705_v62, 5  ;;  %v8636_v63 = vrot.slane %v17184_v37, 6  ;;  %v17203_v3 = vsel %vm4374_vm13, %v11843_v52, %v17009_v1  ;;  %v10077_v59 = vsel %vm7100_vm10, %v10045_v44, %v17082_v22  ;;  %v10209_v1 = vld [vmem:[#allocation2 + $0x54] sm:$0xc]  ;;  %v8897_v22 = vld [vmem:[#allocation2 + $0xb0] sm:$0x3] }
 0x5e0   : > { %9742 = vrot.lane.b32.xlu1 %v11931_v56, %s13053_s12  ;;  %v11885_v14 = vcombine.low %v8630_v57, %v8633_v42  ;;  %v11946_v32 = vcombine.low %v9068_v8, %v17173_v13  ;;  %v9234_v38 = vrot.slane %v9232_v49, 4  ;;  %v9022_v0 = vrot.slane %v17164_v4, 6  ;;  %v8500_v18 = vld [vmem:[#allocation2 + $0xa8] sm:$0xc]  ;;  %v8309_v52 = vld [vmem:[#allocation2 + $0xb0] sm:$0x1] }
 0x5e1   : > { %9662 = vrot.lane.b32.xlu0 %v11915_v48, %s13051_s20  ;;  %v10109_v12 = vsel %vm7133_vm11, %v10077_v59, %v9821_v27  ;;  %v9235_v29 = vrot.slane %v9101_v40, 5  ;;  %v11804_v6 = vrot.slane %v8704_v11, 9  ;;  %v10319_v53 = vrot.slane %v10210_v45, 6  ;;  %v8896_v42 = vld [vmem:[#allocation2 + $0xa8] sm:$0xc] }
 0x5e2   : > { %v17191_v25 = vpop.permute.xlu0 %9568  ;;  %v10322_v16 = vrot.slane %v10211_v60, 6  ;;  %v11900_v24 = vcombine.low %v8672_v54, %v17164_v4  ;;  %v8850_v20 = vsel %vm13353_vm6, %v8848_v39, %v8849_v35  ;;  %v8638_v56 = vrot.slane %v8636_v63, 4  ;;  %v17241_v57 = vld [vmem:[#allocation2 + $0xb8] sm:$0xf]  ;;  %v8308_v39 = vld [vmem:[#allocation2 + $0xa8] sm:$0xe] }
 0x5e3   : > { %v17198_v30 = vpop.permute.xlu1 %9648  ;;  %v8639_v26 = vrot.slane %v8501_v31, 6  ;;  %v8847_v13 = vsel %vm13353_vm6, %v11804_v6, %v8846_v61  ;;  %v11834_v27 = vrot.slane %v9100_v34, 9  ;;  %v11971_v47 = vrot.slane %v10209_v1, 10  ;;  %v9103_v35 = vld [vmem:[#allocation2 + $0xbc] sm:$0x1] }
 0x5e4   : > { %9410 = vrot.lane.b32.xlu1 %v11869_v43, %s13045_s9  ;;  %v10321_v28 = vrot.slane %v10319_v53, 4  ;;  %v9236_v4 = vsel %vm13353_vm6, %v9234_v38, %v9235_v29  ;;  %v9024_v50 = vrot.slane %v9022_v0, 4  ;;  %v9025_v48 = vrot.slane %v8897_v22, 6  ;;  %v10213_v54 = vld [vmem:[#allocation2 + $0x64] sm:$0xf] }
 0x5e5   : > { %9490 = vrot.lane.b32.xlu0 %v11885_v14, %s13046_s13  ;;  %v8460_v23 = vrot.slane %v17184_v37, 5  ;;  %v11916_v41 = vcombine.low %v8847_v13, %v8850_v20  ;;  %v11790_v19 = vrot.slane %v8500_v18, 10  ;;  %v10320_v61 = vsel %vm15111_vm9, %v11971_v47, %v10319_v53  ;;  %v10214_v31 = vld [vmem:[#allocation2 + $0x68] sm:$0x3]  ;;  %v9102_v29 = vld [vmem:[#allocation2 + $0xb4] sm:$0xe] }
 0x5e6   : > { %v9901_v17 = vpop.permute.xlu0 %9900  ;;  %v10323_v8 = vsel %vm15111_vm9, %v10321_v28, %v10322_v16  ;;  %v9233_v44 = vsel %vm13353_vm6, %v11834_v27, %v9232_v49  ;;  %v8640_v37 = vsel %vm15111_vm9, %v8638_v56, %v8639_v26  ;;  %v9239_v11 = vrot.slane %v17219_v2, 5  ;;  %v10212_v53 = vld [vmem:[#allocation2 + $0x60] sm:$0xc]  ;;  %v8707_v47 = vld [vmem:[#allocation2 + $0xbc] sm:$0x1] }
 0x5e7   : > { %v10143_v55 = vsel %vm7166_vm12, %v10109_v12, %v9901_v17  ;;  %v11987_v43 = vcombine.low %v10320_v61, %v10323_v8  ;;  %v11962_v40 = vcombine.low %v9233_v44, %v9236_v4  ;;  %v8637_v45 = vsel %vm15111_vm9, %v11790_v19, %v8636_v63  ;;  %v8898_v61 = vld [vmem:[#allocation2 + $0xb4] sm:$0xc] }
 0x5e8   : > { %10729 = vmatmul.mubr.bf16.gmra.mrb[24].mxu0 %v10143_v55  ;;  %9836 = vrot.lane.b32.xlu1 %v11946_v32, %s13052_s22  ;;  %v11820_v60 = vrot.slane %v8896_v42, 10  ;;  %v9026_v49 = vsel %vm15111_vm9, %v9024_v50, %v9025_v48  ;;  %v8462_v59 = vrot.slane %v8460_v23, 4  ;;  %v8463_v14 = vrot.slane %v8309_v52, 5 }
 0x5e9   : > { %9584 = vrot.lane.b32.xlu0 %v11900_v24, %s13050_s17  ;;  %12121 = vmatprep.mubr.msk.bf16.mxu0 %vm4374_vm13, %v11987_v43  ;;  %v9983_v34 = vsel %vm4440_vm15, %v17203_v3, %v17015_v10  ;;  %v11886_v63 = vcombine.low %v8637_v45, %v8640_v37  ;;  %v9029_v12 = vrot.slane %v17241_v57, 6  ;;  %v9241_v17 = vrot.slane %v9239_v11, 4  ;;  %v8899_v3 = vld [vmem:[#allocation2 + $0xbc] sm:$0x3]  ;;  %v8674_v24 = vld [vmem:[#allocation2 + $0xb4] sm:$0xf] }
 0x5ea   : > { %v17223_v62 = vpop.permute.xlu1 %9476  ;;  %v9023_v38 = vsel %vm15111_vm9, %v11820_v60, %v9022_v0  ;;  %v9242_v1 = vrot.slane %v9103_v35, 5  ;;  %v10015_v6 = vsel %vm4506_vm1, %v9983_v34, %v17089_v7  ;;  %v11774_v55 = vrot.slane %v8308_v39, 9  ;;  %v8256_v45 = vld [vmem:[#allocation2 + $0x30] sm:$0xf]  ;;  %v12805_v60 = vld [vmem:[#allocation2 + $0x34] sm:$0xf] }
 0x5eb   : > { %v17231_v51 = vpop.permute.xlu0 %9728  ;;  %v11932_v22 = vcombine.low %v9023_v38, %v9026_v49  ;;  %v10326_v16 = vrot.slane %v10213_v54, 6  ;;  %v10047_v0 = vsel %vm4572_vm3, %v10015_v6, %v17145_v15  ;;  %v8853_v20 = vrot.slane %v17241_v57, 5  ;;  %v17289_v34 = vld [vmem:[#allocation2 + $0xc4] sm:$0xf] }
 0x5ec   : > { %9664 = vrot.lane.b32.xlu1 %v11916_v41, %s13051_s20  ;;  %v8464_v18 = vsel %vm13353_vm6, %v8462_v59, %v8463_v14  ;;  %v10329_v56 = vrot.slane %v10214_v31, 6  ;;  %v11901_v7 = vcombine.low %v8674_v24, %v17241_v57  ;;  %v8461_v26 = vsel %vm13353_vm6, %v11774_v55, %v8460_v23  ;;  %v8706_v57 = vld [vmem:[#allocation2 + $0xb4] sm:$0xe] }
 0x5ed   : > { %9916 = vrot.lane.b32.xlu0 %v11962_v40, %s13054_s30  ;;  %v11835_v13 = vrot.slane %v9102_v29, 9  ;;  %v10328_v28 = vrot.slane %v10326_v16, 4  ;;  %v9243_v15 = vsel %vm13353_vm6, %v9241_v17, %v9242_v1  ;;  %v9031_v4 = vrot.slane %v9029_v12, 4  ;;  %v17281_v40 = vld [vmem:[#allocation2 + $0xc4] sm:$0xf] }
 0x5ee   : > { %v17246_v32 = vpop.permute.xlu1 %9570  ;;  %v9032_v50 = vrot.slane %v8899_v3, 6  ;;  %v11972_v48 = vrot.slane %v10212_v53, 10  ;;  %v11870_v41 = vcombine.low %v8461_v26, %v8464_v18  ;;  %v10079_v42 = vsel %vm7100_vm10, %v10047_v0, %v17127_v36  ;;  %v9070_v59 = vld [vmem:[#allocation2 + $0xb4] sm:$0xf]  ;;  %v17305_v3 = vld [vmem:[#allocation2 + $0x70] sm:$0xf] }
 0x5ef   : > { %v9240_v19 = vsel %vm13353_vm6, %v11835_v13, %v9239_v11  ;;  %v10330_v8 = vsel %vm15111_vm9, %v10328_v28, %v10329_v56  ;;  %v8855_v44 = vrot.slane %v8853_v20, 4  ;;  %v8856_v37 = vrot.slane %v8707_v47, 5  ;;  %v9072_v53 = vld [vmem:[#allocation2 + $0xc0] sm:$0xf]  ;;  %v17311_v0 = vld [vmem:[#allocation2 + $0x3c] sm:$0xf] }
 0x5f0   : > { %9492 = vrot.lane.b32.xlu1 %v11886_v63, %s13046_s13  ;;  %v10327_v43 = vsel %vm15111_vm9, %v11972_v48, %v10326_v16  ;;  %v11963_v11 = vcombine.low %v9240_v19, %v9243_v15  ;;  %v11844_v49 = vcombine.low %v8256_v45, %v12805_v60  ;;  %v11821_v14 = vrot.slane %v8898_v61, 10  ;;  %v8709_v16 = vld [vmem:[#allocation2 + $0xc8] sm:$0x1]  ;;  %v9076_v13 = vld [vmem:[#allocation2 + $0xd8] sm:$0xf] }
 0x5f1   : > { %v17258_v10 = vpop.permute.xlu0 %9396  ;;  %9744 = vrot.lane.b32.xlu0 %v11932_v22, %s13053_s12  ;;  %v11988_v35 = vcombine.low %v10327_v43, %v10330_v8  ;;  %v9033_v54 = vsel %vm15111_vm9, %v9031_v4, %v9032_v50  ;;  %v11947_v63 = vcombine.low %v9070_v59, %v17219_v2  ;;  %v9246_v31 = vrot.slane %v17281_v40, 5  ;;  %v9105_v22 = vld [vmem:[#allocation2 + $0xc8] sm:$0x1]  ;;  %v9104_v15 = vld [vmem:[#allocation2 + $0xc0] sm:$0xe] }
 0x5f2   : > { %v9942_v38 = vsel %vm4374_vm13, %v11844_v49, %v17112_v58  ;;  %v9030_v29 = vsel %vm15111_vm9, %v11821_v14, %v9029_v12  ;;  %v11805_v17 = vrot.slane %v8706_v57, 9  ;;  %v8857_v1 = vsel %vm13353_vm6, %v8855_v44, %v8856_v37  ;;  %v17309_v12 = vld [vmem:[#allocation2 + $0xd0] sm:$0xf]  ;;  %v8708_v44 = vld [vmem:[#allocation2 + $0xc0] sm:$0xe] }
 0x5f3   : > { %v9903_v27 = vpop.permute.xlu1 %9902  ;;  %v11933_v2 = vcombine.low %v9030_v29, %v9033_v54  ;;  %v8860_v55 = vrot.slane %v17289_v34, 5  ;;  %v9985_v24 = vsel %vm4440_vm15, %v9942_v38, %v17073_v46  ;;  %v9248_v56 = vrot.slane %v9246_v31, 4  ;;  %v8901_v46 = vld [vmem:[#allocation2 + $0xc8] sm:$0x3]  ;;  %v9107_v37 = vld [vmem:[#allocation2 + $0xd4] sm:$0x1] }
 0x5f4   : > { %9586 = vrot.lane.b32.xlu1 %v11901_v7, %s13050_s17  ;;  %v8854_v58 = vsel %vm13353_vm6, %v11805_v17, %v8853_v20  ;;  %v8676_v7 = vld [vmem:[#allocation2 + $0xc0] sm:$0xf]  ;;  %v17320_v20 = vld [vmem:[#allocation2 + $0xdc] sm:$0xf]  ;;  %v10017_v47 = vsel %vm4506_vm1, %v9985_v24, %v17191_v25  ;;  %v9036_v28 = vrot.slane %v17289_v34, 6  ;;  %v10333_v4 = vrot.slane %v17305_v3, 6 }
 0x5f5   : > { %v9823_v23 = vpop.permute.xlu0 %9822  ;;  %9412 = vrot.lane.b32.xlu0 %v11870_v41, %s13045_s9  ;;  %v11917_v18 = vcombine.low %v8854_v58, %v8857_v1  ;;  %v11948_v50 = vcombine.low %v9072_v53, %v17281_v40  ;;  %v8862_v48 = vrot.slane %v8860_v55, 4  ;;  %v8863_v41 = vrot.slane %v8709_v16, 5  ;;  %v17345_v60 = vld [vmem:[#allocation2 + $0xb8] sm:$0xf]  ;;  %v10215_v59 = vld [vmem:[#allocation2 + $0x6c] sm:$0xc] }
 0x5f6   : > { %v10111_v52 = vsel %vm7133_vm11, %v10079_v42, %v9823_v23  ;;  %v9253_v19 = vrot.slane %v17309_v12, 5  ;;  %v10217_v42 = vld [vmem:[#allocation2 + $0x74] sm:$0x3]  ;;  %v17331_v23 = vld [vmem:[#allocation2 + $0x40] sm:$0xf]  ;;  %v10049_v61 = vsel %vm4572_vm3, %v10017_v47, %v17198_v30  ;;  %v11902_v8 = vcombine.low %v8676_v7, %v17289_v34 }
 0x5f7   : > { %v10146_v36 = vsel %vm7166_vm12, %v10111_v52, %v9903_v27  ;;  %v17285_v39 = vpop.permute.xlu1 %9730  ;;  %v9249_v27 = vrot.slane %v9105_v22, 5  ;;  %v11845_v25 = vcombine.low %v17311_v0, %v17331_v23  ;;  %v9260_v43 = vrot.slane %v17320_v20, 5  ;;  %v9106_v58 = vld [vmem:[#allocation2 + $0xcc] sm:$0xe]  ;;  %v8311_v53 = vld [vmem:[#allocation2 + $0xbc] sm:$0x1] }
 0x5f8   : > { %10737 = vmatmul.mubr.bf16.gmra.mrb[28].mxu0 %v10146_v36  ;;  %9918 = vrot.lane.b32.xlu1 %v11963_v11, %s13054_s30  ;;  %v11950_v45 = vcombine.low %v9076_v13, %v17320_v20  ;;  %v11836_v11 = vrot.slane %v9104_v15, 9  ;;  %v9038_v30 = vrot.slane %v9036_v28, 4  ;;  %v9039_v49 = vrot.slane %v8901_v46, 6  ;;  %v9109_v7 = vld [vmem:[#allocation2 + $0xe0] sm:$0x1] }
 0x5f9   : > { %12122 = vmatprep.mubr.msk.bf16.mxu0 %vm4374_vm13, %v11988_v35  ;;  %v17301_v6 = vpop.permute.xlu0 %9650  ;;  %9838 = vrot.lane.b32.xlu0 %v11947_v63, %s13052_s22  ;;  %v9250_v57 = vsel %vm13353_vm6, %v9248_v56, %v9249_v27  ;;  %v8900_v35 = vld [vmem:[#allocation2 + $0xc0] sm:$0xc]  ;;  %v10335_v14 = vrot.slane %v10333_v4, 4  ;;  %v10336_v54 = vrot.slane %v10217_v42, 6  ;;  %v11806_v63 = vrot.slane %v8708_v44, 9 }
 0x5fa   : > { %v8864_v38 = vsel %vm13353_vm6, %v8862_v48, %v8863_v41  ;;  %v9255_v29 = vrot.slane %v9253_v19, 4  ;;  %v9256_v17 = vrot.slane %v9107_v37, 5  ;;  %v10081_v1 = vsel %vm7100_vm10, %v10049_v61, %v17231_v51  ;;  %v9108_v56 = vld [vmem:[#allocation2 + $0xd8] sm:$0xe]  ;;  %v8502_v23 = vld [vmem:[#allocation2 + $0xb4] sm:$0xc] }
 0x5fb   : > { %v9247_v22 = vsel %vm13353_vm6, %v11836_v11, %v9246_v31  ;;  %v11822_v3 = vrot.slane %v8900_v35, 10  ;;  %v8467_v16 = vrot.slane %v17345_v60, 5  ;;  %v9262_v24 = vrot.slane %v9260_v43, 4  ;;  %v17384_v11 = vld [vmem:[#allocation2 + $0xd0] sm:$0xf] }
 0x5fc   : > { %9746 = vrot.lane.b32.xlu1 %v11933_v2, %s13053_s12  ;;  %v8861_v51 = vsel %vm13353_vm6, %v11806_v63, %v8860_v55  ;;  %v11973_v31 = vrot.slane %v10215_v59, 10  ;;  %v9040_v47 = vsel %vm15111_vm9, %v9038_v30, %v9039_v49  ;;  %v10337_v15 = vsel %vm15111_vm9, %v10335_v14, %v10336_v54  ;;  %v8503_v30 = vld [vmem:[#allocation2 + $0xbc] sm:$0x3]  ;;  %v17403_v63 = vld [vmem:[#allocation2 + $0xe8] sm:$0xf] }
 0x5fd   : > { %v17318_v26 = vpop.permute.xlu1 %9398  ;;  %9666 = vrot.lane.b32.xlu0 %v11917_v18, %s13051_s20  ;;  %v11964_v18 = vcombine.low %v9247_v22, %v9250_v57  ;;  %v11918_v13 = vcombine.low %v8861_v51, %v8864_v38  ;;  %v9037_v27 = vsel %vm15111_vm9, %v11822_v3, %v9036_v28  ;;  %v11837_v34 = vrot.slane %v9106_v58, 9  ;;  %v8310_v28 = vld [vmem:[#allocation2 + $0xb4] sm:$0xe]  ;;  %v17393_v49 = vld [vmem:[#allocation2 + $0x7c] sm:$0xf] }
 0x5fe   : > { %v9257_v55 = vsel %vm13353_vm6, %v9255_v29, %v9256_v17  ;;  %v10334_v46 = vsel %vm15111_vm9, %v11973_v31, %v10333_v4  ;;  %v8469_v42 = vrot.slane %v8467_v16, 4  ;;  %v11838_v61 = vrot.slane %v9108_v56, 9  ;;  %v8903_v22 = vld [vmem:[#allocation2 + $0xd4] sm:$0x3] }
 0x5ff   : > { %v11934_v44 = vcombine.low %v9037_v27, %v9040_v47  ;;  %v8643_v57 = vrot.slane %v17345_v60, 6  ;;  %v9254_v4 = vsel %vm13353_vm6, %v11837_v34, %v9253_v19  ;;  %v9945_v59 = vsel %vm4374_vm13, %v11845_v25, %v17152_v5  ;;  %v8711_v56 = vld [vmem:[#allocation2 + $0xd4] sm:$0x1]  ;;  %v8678_v27 = vld [vmem:[#allocation2 + $0xcc] sm:$0xf] }
 0x600   : > { %v17338_v52 = vpop.permute.xlu0 %9478  ;;  %9840 = vrot.lane.b32.xlu1 %v11948_v50, %s13052_s22  ;;  %v8470_v50 = vrot.slane %v8311_v53, 5  ;;  %v11965_v14 = vcombine.low %v9254_v4, %v9257_v55  ;;  %v11775_v19 = vrot.slane %v8310_v28, 9  ;;  %v9261_v5 = vsel %vm13353_vm6, %v11838_v61, %v9260_v43  ;;  %v10220_v53 = vld [vmem:[#allocation2 + $0x80] sm:$0x3]  ;;  %v8902_v47 = vld [vmem:[#allocation2 + $0xcc] sm:$0xc] }
 0x601   : > { %v9825_v36 = vpop.permute.xlu1 %9824  ;;  %9588 = vrot.lane.b32.xlu0 %v11902_v8, %s13050_s17  ;;  %v9263_v8 = vrot.slane %v9109_v7, 5  ;;  %v8867_v25 = vrot.slane %v17384_v11, 5  ;;  %v8645_v17 = vrot.slane %v8643_v57, 4  ;;  %v10340_v3 = vrot.slane %v17393_v49, 6  ;;  %v9110_v7 = vld [vmem:[#allocation2 + $0xe4] sm:$0xe] }
 0x602   : > { %v10113_v48 = vsel %vm7133_vm11, %v10081_v1, %v9825_v36  ;;  %v9074_v36 = vld [vmem:[#allocation2 + $0xcc] sm:$0xf]  ;;  %v8471_v29 = vsel %vm13353_vm6, %v8469_v42, %v8470_v50  ;;  %v8646_v1 = vrot.slane %v8503_v30, 6  ;;  %v9987_v20 = vsel %vm4440_vm15, %v9945_v59, %v17168_v33  ;;  %v10218_v42 = vld [vmem:[#allocation2 + $0x78] sm:$0xc] }
 0x603   : > { %v11949_v54 = vcombine.low %v9074_v36, %v17309_v12  ;;  %v9264_v0 = vsel %vm13353_vm6, %v9262_v24, %v9263_v8  ;;  %v9043_v12 = vrot.slane %v17384_v11, 6  ;;  %v8468_v43 = vsel %vm13353_vm6, %v11775_v19, %v8467_v16  ;;  %v8710_v55 = vld [vmem:[#allocation2 + $0xcc] sm:$0xe] }
 0x604   : > { %v17358_v2 = vpop.permute.xlu0 %9572  ;;  %9844 = vrot.lane.b32.xlu1 %v11950_v45, %s13052_s22  ;;  %v11989_v45 = vcombine.low %v10334_v46, %v10337_v15  ;;  %v9267_v24 = vrot.slane %v17403_v63, 5  ;;  %v11871_v51 = vcombine.low %v8468_v43, %v8471_v29  ;;  %v11966_v31 = vcombine.low %v9261_v5, %v9264_v0 }
 0x605   : > { %v17368_v40 = vpop.permute.xlu1 %9652  ;;  %9920 = vrot.lane.b32.xlu0 %v11964_v18, %s13054_s30  ;;  %v10019_v18 = vsel %vm4506_vm1, %v9987_v20, %v17246_v32  ;;  %v11791_v16 = vrot.slane %v8502_v23, 10  ;;  %v9045_v15 = vrot.slane %v9043_v12, 4  ;;  %v9046_v34 = vrot.slane %v8903_v22, 6  ;;  %v9078_v20 = vld [vmem:[#allocation2 + $0xe4] sm:$0xf] }
 0x606   : > { %v10051_v33 = vsel %vm4572_vm3, %v10019_v18, %v17301_v6  ;;  %v8647_v32 = vsel %vm15111_vm9, %v8645_v17, %v8646_v1  ;;  %v8869_v46 = vrot.slane %v8867_v25, 4  ;;  %v10342_v50 = vrot.slane %v10340_v3, 4 }
 0x607   : > { %v8870_v28 = vrot.slane %v8711_v56, 5  ;;  %v9269_v61 = vrot.slane %v9267_v24, 4  ;;  %v11839_v6 = vrot.slane %v9110_v7, 9  ;;  %v10083_v4 = vsel %vm7100_vm10, %v10051_v33, %v17285_v39  ;;  %v10223_v7 = vld [vmem:[#allocation2 + $0x8c] sm:$0x3] }
 0x608   : > { %v9905_v41 = vpop.permute.xlu0 %9904  ;;  %9668 = vrot.lane.b32.xlu1 %v11918_v13, %s13051_s20  ;;  %v9111_v13 = vld [vmem:[#allocation2 + $0xec] sm:$0x1]  ;;  %v11823_v36 = vrot.slane %v8902_v47, 10  ;;  %v9047_v30 = vsel %vm15111_vm9, %v9045_v15, %v9046_v34  ;;  %v11807_v59 = vrot.slane %v8710_v55, 9 }
 0x609   : > { %v10149_v37 = vsel %vm7166_vm12, %v10113_v48, %v9905_v41  ;;  %9748 = vrot.lane.b32.xlu0 %v11934_v44, %s13053_s12  ;;  %v10343_v48 = vrot.slane %v10220_v53, 6  ;;  %v9270_v8 = vrot.slane %v9111_v13, 5  ;;  %v11903_v44 = vcombine.low %v8678_v27, %v17384_v11 }
 0x60a   : > { %10745 = vmatmul.mubr.bf16.gmra.mrb[32].mxu0 %v10149_v37  ;;  %v17391_v35 = vpop.permute.xlu1 %9480  ;;  %v9044_v19 = vsel %vm15111_vm9, %v11823_v36, %v9043_v12  ;;  %v9268_v39 = vsel %vm13353_vm6, %v11839_v6, %v9267_v24  ;;  %v8868_v12 = vsel %vm13353_vm6, %v11807_v59, %v8867_v25  ;;  %v10222_v24 = vld [vmem:[#allocation2 + $0x88] sm:$0xf]  ;;  %v12807_v25 = vld [vmem:[#allocation2 + $0x4c] sm:$0xf]  ;;  %v8262_v6 = vld [vmem:[#allocation2 + $0x54] sm:$0xf] }
 0x60b   : > { %12123 = vmatprep.mubr.msk.bf16.mxu0 %vm4374_vm13, %v11989_v45  ;;  %v8644_v45 = vsel %vm15111_vm9, %v11791_v16, %v8643_v57  ;;  %v8871_v57 = vsel %vm13353_vm6, %v8869_v46, %v8870_v28  ;;  %v9271_v29 = vsel %vm13353_vm6, %v9269_v61, %v9270_v8  ;;  %v11935_v0 = vcombine.low %v9044_v19, %v9047_v30  ;;  %v12808_v8 = vld [vmem:[#allocation2 + $0x58] sm:$0xf]  ;;  %v10224_v19 = vld [vmem:[#allocation2 + $0x90] sm:$0xc] }
 0x60c   : > { %v17405_v38 = vpop.permute.xlu0 %9732  ;;  %9922 = vrot.lane.b32.xlu1 %v11965_v14, %s13054_s30  ;;  %v11887_v49 = vcombine.low %v8644_v45, %v8647_v32  ;;  %v11974_v14 = vrot.slane %v10218_v42, 10  ;;  %v11919_v43 = vcombine.low %v8868_v12, %v8871_v57  ;;  %v11967_v53 = vcombine.low %v9268_v39, %v9271_v29  ;;  %v10226_v36 = vld [vmem:[#allocation2 + $0x98] sm:$0x3] }
 0x60d   : > { %9842 = vrot.lane.b32.xlu0 %v11949_v54, %s13052_s22  ;;  %v10344_v54 = vsel %vm15111_vm9, %v10342_v50, %v10343_v48  ;;  %v10347_v21 = vrot.slane %v10222_v24, 6  ;;  %v10350_v16 = vrot.slane %v10223_v7, 6  ;;  %v11976_v29 = vrot.slane %v10224_v19, 10 }
 0x60e   : > { %v17423_v58 = vpop.permute.xlu1 %9574  ;;  %v10341_v17 = vsel %vm15111_vm9, %v11974_v14, %v10340_v3  ;;  %v11951_v3 = vcombine.low %v9078_v20, %v17403_v63  ;;  %v10221_v63 = vld [vmem:[#allocation2 + $0x84] sm:$0xc]  ;;  %v10357_v14 = vrot.slane %v10226_v36, 6  ;;  %vm13056_vm6 = vmmov 0  }
 0x60f   : > { %v11990_v22 = vcombine.low %v10341_v17, %v10344_v54  ;;  %v10349_v27 = vrot.slane %v10347_v21, 4  ;;  %v11975_v46 = vrot.slane %v10221_v63, 10 }
 0x610   : > { %9414 = vrot.lane.b32.xlu1 %v11871_v51, %s13045_s9  ;;  %v8260_v51 = vld [vmem:[#allocation2 + $0x48] sm:$0xf] }
 0x611   : > { %9924 = vrot.lane.b32.xlu0 %v11966_v31, %s13054_s30  ;;  %v11846_v31 = vcombine.low %v8260_v51, %v12807_v25 }
 0x612   : > { %v17434_v41 = vpop.permute.xlu0 %9400 }
 0x613   : > { %v9907_v37 = vpop.permute.xlu1 %9906  ;;  %v9948_v33 = vsel %vm4374_vm13, %v11846_v31, %v17258_v10  ;;  %v10351_v10 = vsel %vm15111_vm9, %v10349_v27, %v10350_v16 }
 0x614   : > { %9590 = vrot.lane.b32.xlu1 %v11903_v44, %s13050_s17  ;;  %v9989_v15 = vsel %vm4440_vm15, %v9948_v33, %v17223_v62  ;;  %v10348_v62 = vsel %vm15111_vm9, %v11975_v46, %v10347_v21  ;;  %v11847_v44 = vcombine.low %v8262_v6, %v12808_v8  ;;  %v10227_v33 = vld [vmem:[#allocation2 + $0x9c] sm:$0xc]  ;;  %v10232_v8 = vld [vmem:[#allocation2 + $0xb0] sm:$0x3] }
 0x615   : > { %9494 = vrot.lane.b32.xlu0 %v11887_v49, %s13046_s13  ;;  %v10021_v32 = vsel %vm4506_vm1, %v9989_v15, %v17358_v2  ;;  %v11991_v2 = vcombine.low %v10348_v62, %v10351_v10  ;;  %v12810_v62 = vld [vmem:[#allocation2 + $0x70] sm:$0xf] }
 0x616   : > { %v9827_v11 = vpop.permute.xlu0 %9826  ;;  %v10053_v55 = vsel %vm4572_vm3, %v10021_v32, %v17368_v40  ;;  %v10225_v40 = vld [vmem:[#allocation2 + $0x94] sm:$0xf]  ;;  %v11977_v32 = vrot.slane %v10227_v33, 10 }
 0x617   : > { %v10115_v5 = vsel %vm7133_vm11, %v10083_v4, %v9827_v11  ;;  %v17457_v23 = vpop.permute.xlu1 %9734  ;;  %v10085_v50 = vsel %vm7100_vm10, %v10053_v55, %v17405_v38  ;;  %v10354_v45 = vrot.slane %v10225_v40, 6  ;;  %v9951_v4 = vsel %vm4374_vm13, %v11847_v44, %v17318_v26 }
 0x618   : > { %v10152_v1 = vsel %vm7166_vm12, %v10115_v5, %v9907_v37  ;;  %9750 = vrot.lane.b32.xlu1 %v11935_v0, %s13053_s12  ;;  %v9991_v49 = vsel %vm4440_vm15, %v9951_v4, %v17338_v52  ;;  %v10371_v4 = vrot.slane %v10232_v8, 6 }
 0x619   : > { %10753 = vmatmul.mubr.bf16.gmra.mrb[36].mxu0 %v10152_v1  ;;  %9670 = vrot.lane.b32.xlu0 %v11919_v43, %s13051_s20  ;;  %v10356_v59 = vrot.slane %v10354_v45, 4  ;;  %v10023_v54 = vsel %vm4506_vm1, %v9991_v49, %v17423_v58  ;;  %v10355_v17 = vsel %vm15111_vm9, %v11976_v29, %v10354_v45  ;;  %v8264_v43 = vld [vmem:[#allocation2 + $0x60] sm:$0xf] }
 0x61a   : > { %12124 = vmatprep.mubr.msk.bf16.mxu0 %vm4374_vm13, %v11990_v22  ;;  %v9655_v18 = vpop.permute.xlu0 %9654  ;;  %v10228_v22 = vld [vmem:[#allocation2 + $0xa0] sm:$0xf] }
 0x61b   : > { %v10055_v57 = vsel %vm4572_vm3, %v10023_v54, %v9655_v18  ;;  %v10358_v26 = vsel %vm15111_vm9, %v10356_v59, %v10357_v14  ;;  %v10361_v24 = vrot.slane %v10228_v22, 6  ;;  %v10230_v59 = vld [vmem:[#allocation2 + $0xa8] sm:$0xc] }
 0x61c   : > { %9926 = vrot.lane.b32.xlu1 %v11967_v53, %s13054_s30  ;;  %v17469_v56 = vpop.permute.xlu1 %9402  ;;  %v10087_v5 = vsel %vm7100_vm10, %v10055_v57, %v17457_v23  ;;  %v11992_v1 = vcombine.low %v10355_v17, %v10358_v26  ;;  %v12809_v23 = vld [vmem:[#allocation2 + $0x64] sm:$0xf]  ;;  %v11978_v19 = vrot.slane %v10230_v59, 10  ;;  %v8268_v17 = vld [vmem:[#allocation2 + $0x78] sm:$0xf]  ;;  %s12018_s30 = sshll.u32 %s13120_s28, 4 }
 0x61d   : > { %9846 = vrot.lane.b32.xlu0 %v11951_v3, %s13052_s22  ;;  %v11848_v18 = vcombine.low %v8264_v43, %v12809_v23  ;;  %v10229_v3 = vld [vmem:[#allocation2 + $0xa4] sm:$0x3]  ;;  %v10363_v31 = vrot.slane %v10361_v24, 4  ;;  %s17764_s11 = scalar_lea.hbm %s17815_s7, %s12018_s30  ;;  %s13058_s28 = smov [#allocation13]  }
 0x61e   : > { %v17471_v13 = vpop.permute.xlu0 %9482  ;;  %v10364_v7 = vrot.slane %v10229_v3, 6  ;;  %s12962_s9 = sshll.u32 %s13058_s28, 4  ;;  %s12963_s9 = int_to_ptr.vmem [resolvable:$false] %s12962_s9 }
 0x61f   : > { %v9954_v21 = vsel %vm4374_vm13, %v11848_v18, %v17434_v41  ;;  %s12964_s13 = scalar_lea.vmem %s12963_s9, 32  ;;  %p12965_p12 = scmp.lt.s32.totalorder %s17766_s10, %s12963_s9 }
 0x620   : > { %v9829_v47 = vpop.permute.xlu1 %9828  ;;  %v9993_v27 = vsel %vm4440_vm15, %v9954_v21, %v17391_v35  ;;  %v10365_v55 = vsel %vm15111_vm9, %v10363_v31, %v10364_v7  ;;  %v8266_v35 = vld [vmem:[#allocation2 + $0x6c] sm:$0xf]  ;;  %v10233_v21 = vld [vmem:[#allocation2 + $0xb4] sm:$0xc]  ;;  %p12966_p1 = scmp.lt.s32.totalorder %s12964_s13, %s12958_s14 }
 0x621   : > { %v10117_v28 = vsel %vm7133_vm11, %v10085_v50, %v9829_v47  ;;  %v10362_v50 = vsel %vm15111_vm9, %v11977_v32, %v10361_v24 }
 0x622   : > { %v9577_v34 = vpop.permute.xlu0 %9576  ;;  %p12967_p2 = por %p12966_p1, %p12965_p12 }
 0x623   : > { %v10025_v47 = vsel %vm4506_vm1, %v9993_v27, %v9577_v34  ;;  %v11993_v34 = vcombine.low %v10362_v50, %v10365_v55  ;;  %v12812_v50 = vld [vmem:[#allocation2 + $0x88] sm:$0xf] }
 0x624   : > { %v9657_v48 = vpop.permute.xlu1 %9656  ;;  %p12968_p13 = pnand %p12967_p2, %p12961_p7 }
 0x625   : > { %v10057_v63 = vsel %vm4572_vm3, %v10025_v47, %v9657_v48  ;;  %v11849_v48 = vcombine.low %v8266_v35, %v12810_v62  ;;  %v11979_v47 = vrot.slane %v10233_v21, 10  ;;  %v10238_v62 = vld [vmem:[#allocation2 + $0xc8] sm:$0x3]  ;;  %v10242_v21 = vld [vmem:[#allocation2 + $0xd8] sm:$0xc] }
 0x626   : > { %v9909_v42 = vpop.permute.xlu0 %9908 }
 0x627   : > { %v10155_v61 = vsel %vm7166_vm12, %v10117_v28, %v9909_v42  ;;  %v10231_v28 = vld [vmem:[#allocation2 + $0xac] sm:$0xf]  ;;  %v9957_v40 = vsel %vm4374_vm13, %v11849_v48, %v17469_v56 }
 0x628   : > { %10761 = vmatmul.mubr.bf16.gmra.mrb[40].mxu0 %v10155_v61 }
 0x629   : > { %12125 = vmatprep.mubr.msk.bf16.mxu0 %vm4374_vm13, %v11991_v2  ;;  %v10368_v2 = vrot.slane %v10231_v28, 6 }
 0x62a   : > { %v17491_v37 = vpop.permute.xlu1 %9484  ;;  %v9737_v38 = vpop.permute.xlu0 %9736 }
 0x62b   : > { %v10089_v46 = vsel %vm7100_vm10, %v10057_v63, %v9737_v38  ;;  %v9995_v38 = vsel %vm4440_vm15, %v9957_v40, %v17471_v13  ;;  %v10370_v45 = vrot.slane %v10368_v2, 4  ;;  %v10369_v29 = vsel %vm15111_vm9, %v11978_v19, %v10368_v2 }
 0x62d   : > { %v10372_v56 = vsel %vm15111_vm9, %v10370_v45, %v10371_v4  ;;  %v10236_v45 = vld [vmem:[#allocation2 + $0xc0] sm:$0xc] }
 0x62e   : > { %v17495_v30 = vpop.permute.xlu1 %9578  ;;  %v11980_v59 = vrot.slane %v10236_v45, 10 }
 0x62f   : > { %v17501_v11 = vpop.permute.xlu0 %9404  ;;  %v10027_v36 = vsel %vm4506_vm1, %v9995_v38, %v17495_v30 }
 0x632   : > { %v9911_v39 = vpop.permute.xlu1 %9910 }
 0x633   : > { %v9831_v0 = vpop.permute.xlu0 %9830 }
 0x634   : > { %v10119_v52 = vsel %vm7133_vm11, %v10087_v5, %v9831_v0  ;;  %v11994_v5 = vcombine.low %v10369_v29, %v10372_v56  ;;  %v10234_v0 = vld [vmem:[#allocation2 + $0xb8] sm:$0xf] }
 0x635   : > { %v10158_v58 = vsel %vm7166_vm12, %v10119_v52, %v9911_v39 }
 0x636   : > { %v9739_v12 = vpop.permute.xlu1 %9738  ;;  %10769 = vmatmul.mubr.bf16.gmra.mrb[44].mxu0 %v10158_v58 }
 0x637   : > { %12126 = vmatprep.mubr.msk.bf16.mxu0 %vm4374_vm13, %v11992_v1  ;;  %v9659_v20 = vpop.permute.xlu0 %9658  ;;  %v10375_v1 = vrot.slane %v10234_v0, 6  ;;  %v10241_v0 = vld [vmem:[#allocation2 + $0xd4] sm:$0x3] }
 0x638   : > { %v10059_v14 = vsel %vm4572_vm3, %v10027_v36, %v9659_v20  ;;  %v10235_v20 = vld [vmem:[#allocation2 + $0xbc] sm:$0x3] }
 0x639   : > { %v10091_v57 = vsel %vm7100_vm10, %v10059_v14, %v9739_v12  ;;  %v12811_v12 = vld [vmem:[#allocation2 + $0x7c] sm:$0xf]  ;;  %v10377_v18 = vrot.slane %v10375_v1, 4  ;;  %v10378_v3 = vrot.slane %v10235_v20, 6  ;;  %v10240_v14 = vld [vmem:[#allocation2 + $0xd0] sm:$0xf] }
 0x63a   : > { %v17513_v53 = vpop.permute.xlu1 %9406  ;;  %v11850_v22 = vcombine.low %v8268_v17, %v12811_v12  ;;  %v10389_v29 = vrot.slane %v10240_v14, 6  ;;  %v10392_v12 = vrot.slane %v10241_v0, 6  ;;  %v10239_v20 = vld [vmem:[#allocation2 + $0xcc] sm:$0xc] }
 0x63b   : > { %v17515_v51 = vpop.permute.xlu0 %9486  ;;  %v10379_v63 = vsel %vm15111_vm9, %v10377_v18, %v10378_v3  ;;  %v8274_v18 = vld [vmem:[#allocation2 + $0x9c] sm:$0xf] }
 0x63c   : > { %v9960_v24 = vsel %vm4374_vm13, %v11850_v22, %v17501_v11  ;;  %v10243_v22 = vld [vmem:[#allocation2 + $0xdc] sm:$0xf] }
 0x63e   : > { %v9833_v25 = vpop.permute.xlu1 %9832 }
 0x63f   : > { %v9581_v16 = vpop.permute.xlu0 %9580  ;;  %v10121_v41 = vsel %vm7133_vm11, %v10089_v46, %v9833_v25  ;;  %v9997_v25 = vsel %vm4440_vm15, %v9960_v24, %v17491_v37  ;;  %v10376_v46 = vsel %vm15111_vm9, %v11979_v47, %v10375_v1  ;;  %v8270_v37 = vld [vmem:[#allocation2 + $0x84] sm:$0xf]  ;;  %v10391_v1 = vrot.slane %v10389_v29, 4 }
 0x640   : > { %v10029_v7 = vsel %vm4506_vm1, %v9997_v25, %v9581_v16  ;;  %v11995_v16 = vcombine.low %v10376_v46, %v10379_v63  ;;  %v10396_v25 = vrot.slane %v10243_v22, 6 }
 0x642   : > { %v9661_v15 = vpop.permute.xlu1 %9660 }
 0x643   : > { %v9913_v10 = vpop.permute.xlu0 %9912  ;;  %v10061_v33 = vsel %vm4572_vm3, %v10029_v7, %v9661_v15  ;;  %v11851_v15 = vcombine.low %v8270_v37, %v12812_v50  ;;  %v12814_v7 = vld [vmem:[#allocation2 + $0xa0] sm:$0xf]  ;;  %v11982_v37 = vrot.slane %v10242_v21, 10 }
 0x644   : > { %v10161_v42 = vsel %vm7166_vm12, %v10121_v41, %v9913_v10  ;;  %v10237_v41 = vld [vmem:[#allocation2 + $0xc4] sm:$0xf] }
 0x645   : > { %10777 = vmatmul.mubr.bf16.gmra.mrb[48].mxu0 %v10161_v42  ;;  %v10382_v35 = vrot.slane %v10237_v41, 6  ;;  %v9963_v42 = vsel %vm4374_vm13, %v11851_v15, %v17513_v53 }
 0x646   : > { %v17530_v61 = vpop.permute.xlu1 %9488  ;;  %12127 = vmatprep.mubr.msk.bf16.mxu0 %vm4374_vm13, %v11993_v34  ;;  %v9999_v2 = vsel %vm4440_vm15, %v9963_v42, %v17515_v51 }
 0x647   : > { %v9741_v6 = vpop.permute.xlu0 %9740  ;;  %v10384_v40 = vrot.slane %v10382_v35, 4  ;;  %v10383_v56 = vsel %vm15111_vm9, %v11980_v59, %v10382_v35  ;;  %v10246_v35 = vld [vmem:[#allocation2 + $0xe8] sm:$0xf] }
 0x648   : > { %v10093_v32 = vsel %vm7100_vm10, %v10061_v33, %v9741_v6  ;;  %v10385_v6 = vrot.slane %v10238_v62, 6  ;;  %v11853_v33 = vcombine.low %v8274_v18, %v12814_v7  ;;  %v12815_v62 = vld [vmem:[#allocation2 + $0xac] sm:$0xf] }
 0x64a   : > { %v17535_v44 = vpop.permute.xlu1 %9582  ;;  %v10386_v53 = vsel %vm15111_vm9, %v10384_v40, %v10385_v6 }
 0x64b   : > { %v17541_v49 = vpop.permute.xlu0 %9408  ;;  %v10031_v8 = vsel %vm4506_vm1, %v9999_v2, %v17535_v44  ;;  %v8272_v44 = vld [vmem:[#allocation2 + $0x90] sm:$0xf] }
 0x64e   : > { %v9915_v54 = vpop.permute.xlu1 %9914 }
 0x64f   : > { %v9835_v39 = vpop.permute.xlu0 %9834 }
 0x650   : > { %v10123_v13 = vsel %vm7133_vm11, %v10091_v57, %v9835_v39 }
 0x651   : > { %v10164_v30 = vsel %vm7166_vm12, %v10123_v13, %v9915_v54  ;;  %v11996_v13 = vcombine.low %v10383_v56, %v10386_v53  ;;  %v10247_v53 = vld [vmem:[#allocation2 + $0xec] sm:$0x3] }
 0x652   : > { %v9743_v26 = vpop.permute.xlu1 %9742  ;;  %10785 = vmatmul.mubr.bf16.gmra.mrb[52].mxu0 %v10164_v30  ;;  %v12813_v30 = vld [vmem:[#allocation2 + $0x94] sm:$0xf] }
 0x653   : > { %12128 = vmatprep.mubr.msk.bf16.mxu0 %vm4374_vm13, %v11994_v5  ;;  %v9663_v52 = vpop.permute.xlu0 %9662  ;;  %v11852_v5 = vcombine.low %v8272_v44, %v12813_v30 }
 0x654   : > { %v10063_v4 = vsel %vm4572_vm3, %v10031_v8, %v9663_v52  ;;  %v10397_v8 = vsel %vm15111_vm9, %v11982_v37, %v10396_v25 }
 0x655   : > { %v10095_v54 = vsel %vm7100_vm10, %v10063_v4, %v9743_v26  ;;  %v9966_v26 = vsel %vm4374_vm13, %v11852_v5, %v17541_v49  ;;  %v11981_v49 = vrot.slane %v10239_v20, 10  ;;  %v10245_v4 = vld [vmem:[#allocation2 + $0xe4] sm:$0xc]  ;;  %v11015_v20 = vld [vmem:[#allocation12] sm:$0xff] }
 0x656   : > { %v17552_v58 = vpop.permute.xlu1 %9410  ;;  %v10001_v24 = vsel %vm4440_vm15, %v9966_v26, %v17530_v61 }
 0x657   : > { %v17554_v43 = vpop.permute.xlu0 %9490  ;;  %v9969_v61 = vsel %vm4374_vm13, %v11853_v33, %v17552_v58  ;;  %v10390_v41 = vsel %vm15111_vm9, %v11981_v49, %v10389_v29 }
 0x658   : > { %v10003_v42 = vsel %vm4440_vm15, %v9969_v61, %v17554_v43  ;;  %v11018_v61 = vld [vmem:[#allocation12 + $0x18] sm:$0xff] }
 0x65a   : > { %v9837_v23 = vpop.permute.xlu1 %9836 }
 0x65b   : > { %v9585_v31 = vpop.permute.xlu0 %9584  ;;  %v10125_v11 = vsel %vm7133_vm11, %v10093_v32, %v9837_v23  ;;  %v10393_v32 = vsel %vm15111_vm9, %v10391_v1, %v10392_v12 }
 0x65c   : > { %v10033_v3 = vsel %vm4506_vm1, %v10001_v24, %v9585_v31  ;;  %v11016_v24 = vld [vmem:[#allocation12 + $0x8] sm:$0xff] }
 0x65d   : > { %v12483_v9 = vpack.c.bf16 %v11016_v24, %v11015_v20 }
 0x65e   : > { %v9665_v27 = vpop.permute.xlu1 %9664 }
 0x65f   : > { %v9917_v55 = vpop.permute.xlu0 %9916  ;;  %v10065_v47 = vsel %vm4572_vm3, %v10033_v3, %v9665_v27  ;;  %v13055_v3 = vmov 0.0|0.0  }
 0x660   : > { %v10167_v10 = vsel %vm7166_vm12, %v10125_v11, %v9917_v55  ;;  %v10244_v11 = vld [vmem:[#allocation2 + $0xe0] sm:$0x3]  ;;  %12482 = vmatprep.subr.bf16.mxu1 %v13055_v3 }
 0x661   : > { %10793 = vmatmul.mubr.bf16.gmra.mrb[56].mxu0 %v10167_v10  ;;  %v11997_v10 = vcombine.low %v10390_v41, %v10393_v32  ;;  %v10399_v50 = vrot.slane %v10244_v11, 6  ;;  %12484 = vmatpush3.bf16.msra.mxu1 %v12483_v9  ;;  %v17648_v41 = vld [vmem:[%s17812_s4 + $0x4] ss:$0 sm:$0xff] }
 0x662   : > { %v17569_v28 = vpop.permute.xlu1 %9492  ;;  %12129 = vmatprep.mubr.msk.bf16.mxu0 %vm4374_vm13, %v11995_v16  ;;  %v10398_v16 = vrot.slane %v10396_v25, 4  ;;  %12485 = vmatprep.subr.bf16.mxu1 %v13055_v3 }
 0x663   : > { %v9745_v34 = vpop.permute.xlu0 %9744 }
 0x664   : > { %v10097_v55 = vsel %vm7100_vm10, %v10065_v47, %v9745_v34  ;;  %v8276_v34 = vld [vmem:[#allocation2 + $0xa8] sm:$0xf]  ;;  %v10400_v45 = vsel %vm15111_vm9, %v10398_v16, %v10399_v50  ;;  %v17653_v16 = vld [vmem:[%s17812_s4 + $0x5] ss:$0 sm:$0xff] }
 0x665   : > { %v11854_v2 = vcombine.low %v8276_v34, %v12815_v62 }
 0x666   : > { %v17574_v48 = vpop.permute.xlu1 %9586 }
 0x667   : > { %v17580_v38 = vpop.permute.xlu0 %9412  ;;  %v10035_v58 = vsel %vm4506_vm1, %v10003_v42, %v17574_v48 }
 0x668   : > { %v9972_v43 = vsel %vm4374_vm13, %v11854_v2, %v17580_v38 }
 0x66a   : > { %v9919_v36 = vpop.permute.xlu1 %9918 }
 0x66b   : > { %v9839_v19 = vpop.permute.xlu0 %9838 }
 0x66c   : > { %v10127_v51 = vsel %vm7133_vm11, %v10095_v54, %v9839_v19  ;;  %v11998_v54 = vcombine.low %v10397_v8, %v10400_v45  ;;  %v11983_v19 = vrot.slane %v10245_v4, 10  ;;  %v11019_v8 = vld [vmem:[#allocation12 + $0x20] sm:$0xff]  ;;  %v11020_v45 = vld [vmem:[#allocation12 + $0x28] sm:$0xff] }
 0x66d   : > { %v10170_v57 = vsel %vm7166_vm12, %v10127_v51, %v9919_v36  ;;  %v10403_v36 = vrot.slane %v10246_v35, 6  ;;  %v10005_v51 = vsel %vm4440_vm15, %v9972_v43, %v17569_v28  ;;  %v12489_v43 = vpack.c.bf16 %v11020_v45, %v11019_v8  ;;  %v17971_v8 = vld [vmem:[#allocation26_spill] sm:$0xff] }
 0x66e   : > { %v9747_v39 = vpop.permute.xlu1 %9746  ;;  %10801 = vmatmul.mubr.bf16.gmra.mrb[60].mxu0 %v10170_v57  ;;  %v10406_v57 = vrot.slane %v10247_v53, 6 }
 0x66f   : > { %12130 = vmatprep.mubr.msk.bf16.mxu0 %vm4374_vm13, %v11996_v13  ;;  %v9667_v52 = vpop.permute.xlu0 %9666  ;;  %v10405_v44 = vrot.slane %v10403_v36, 4  ;;  %v10404_v0 = vsel %vm15111_vm9, %v11983_v19, %v10403_v36 }
 0x670   : > { %v10067_v6 = vsel %vm4572_vm3, %v10035_v58, %v9667_v52  ;;  %v17964_v58 = vld [vmem:[#allocation21_spill] sm:$0xff] }
 0x671   : > { %v10099_v48 = vsel %vm7100_vm10, %v10067_v6, %v9747_v39  ;;  %v8278_v39 = vld [vmem:[#allocation2 + $0xb4] sm:$0xf]  ;;  %v10407_v28 = vsel %vm15111_vm9, %v10405_v44, %v10406_v57 }
 0x672   : > { %v9841_v17 = vpop.permute.xlu1 %9840  ;;  %v11855_v26 = vcombine.low %v8278_v39, %v17345_v60  ;;  %v11999_v22 = vcombine.low %v10404_v0, %v10407_v28  ;;  %v11021_v0 = vld [vmem:[#allocation12 + $0x30] sm:$0xff]  ;;  %v11022_v28 = vld [vmem:[#allocation12 + $0x38] sm:$0xff] }
 0x673   : > { %v9589_v23 = vpop.permute.xlu0 %9588  ;;  %v10129_v46 = vsel %vm7133_vm11, %v10097_v55, %v9841_v17  ;;  %v11017_v55 = vld [vmem:[#allocation12 + $0x10] sm:$0xff] }
 0x674   : > { %v10037_v13 = vsel %vm4506_vm1, %v10005_v51, %v9589_v23 }
 0x676   : > { %v9845_v63 = vpop.permute.xlu1 %9844 }
 0x677   : > { %v9921_v31 = vpop.permute.xlu0 %9920 }
 0x678   : > { %v10173_v27 = vsel %vm7166_vm12, %v10129_v46, %v9921_v31  ;;  %v12486_v46 = vpack.c.bf16 %v11018_v61, %v11017_v55 }
 0x679   : > { %10809 = vmatmul.mubr.bf16.gmra.mrb[64].mxu0 %v10173_v27 }
 0x67a   : > { %v9669_v15 = vpop.permute.xlu1 %9668  ;;  %12131 = vmatprep.mubr.msk.bf16.mxu0 %vm4374_vm13, %v11997_v10  ;;  %12487 = vmatpush3.bf16.msra.mxu1 %v12486_v46 }
 0x67b   : > { %v9749_v40 = vpop.permute.xlu0 %9748  ;;  %v10069_v38 = vsel %vm4572_vm3, %v10037_v13, %v9669_v15  ;;  %12488 = vmatprep.subr.bf16.mxu1 %v13055_v3  ;;  %v17966_v13 = vld [vmem:[#allocation20_spill] sm:$0xff] }
 0x67c   : > { %v10101_v52 = vsel %vm7100_vm10, %v10069_v38, %v9749_v40  ;;  %v17965_v40 = vld [vmem:[#allocation23_spill] sm:$0xff] }
 0x67d   : > { %v10133_v18 = vsel %vm7133_vm11, %v10101_v52, %v9845_v63  ;;  %v12492_v52 = vpack.c.bf16 %v11022_v28, %v11021_v0  ;;  %v17973_v0 = vld [vmem:[#allocation31_spill] sm:$0xff] }
 0x67e   : > { %v9923_v59 = vpop.permute.xlu1 %9922  ;;  %12490 = vmatpush3.bf16.msra.mxu1 %v12489_v43 }
 0x67f   : > { %v9843_v14 = vpop.permute.xlu0 %9842  ;;  %12491 = vmatprep.subr.bf16.mxu1 %v13055_v3 }
 0x680   : > { %v10131_v56 = vsel %vm7133_vm11, %v10099_v48, %v9843_v14 }
 0x681   : > { %v10176_v29 = vsel %vm7166_vm12, %v10131_v56, %v9923_v59 }
 0x682   : > { %v9415_v30 = vpop.permute.xlu1 %9414  ;;  %10817 = vmatmul.mubr.bf16.gmra.mrb[68].mxu0 %v10176_v29  ;;  %12493 = vmatpush3.bf16.msra.mxu1 %v12492_v52 }
 0x683   : > { %v9925_v5 = vpop.permute.xlu0 %9924  ;;  %12132 = vmatprep.mubr.msk.bf16.mxu0 %vm4374_vm13, %v11998_v54  ;;  %v9975_v1 = vsel %vm4374_vm13, %v11855_v26, %v9415_v30  ;;  %12494 = vmatprep.subr.bf16.mxu1 %v13055_v3 }
 0x684   : > { %v10179_v21 = vsel %vm7166_vm12, %v10133_v18, %v9925_v5  ;;  %v17967_v5 = vld [vmem:[#allocation22_spill] sm:$0xff] }
 0x686   : > { %v9591_v17 = vpop.permute.xlu1 %9590 }
 0x687   : > { %v9495_v12 = vpop.permute.xlu0 %9494 }
 0x688   : > { %v10007_v23 = vsel %vm4440_vm15, %v9975_v1, %v9495_v12 }
 0x689   : > { %v10039_v60 = vsel %vm4506_vm1, %v10007_v23, %v9591_v17 }
 0x68a   : > { %v9751_v25 = vpop.permute.xlu1 %9750  ;;  %10825 = vmatmul.mubr.bf16.gmra.mrb[72].mxu0 %v10179_v21 }
 0x68b   : > { %v9671_v7 = vpop.permute.xlu0 %9670  ;;  %12133 = vmatprep.mubr.msk.bf16.mxu0 %vm4374_vm13, %v11999_v22 }
 0x68c   : > { %v10071_v33 = vsel %vm4572_vm3, %v10039_v60, %v9671_v7  ;;  %v17968_v60 = vld [vmem:[#allocation25_spill] sm:$0xff] }
 0x68d   : > { %v10103_v63 = vsel %vm7100_vm10, %v10071_v33, %v9751_v25 }
 0x68e   : > { %v9927_v47 = vpop.permute.xlu1 %9926 }
 0x68f   : > { %v9847_v49 = vpop.permute.xlu0 %9846 }
 0x690   : > { %v10135_v32 = vsel %vm7133_vm11, %v10103_v63, %v9847_v49  ;;  %v17969_v63 = vld [vmem:[#allocation27_spill] sm:$0xff] }
 0x691   : > { %v10182_v11 = vsel %vm7166_vm12, %v10135_v32, %v9927_v47 }
 0x692   : > { %10833 = vmatmul.mubr.bf16.gmra.mrb[76].mxu0 %v10182_v11 }
 0x69b   : > { %v12286_v31 = vpop.f32.mrb[16].mxu0 }
 0x69c   : > { %v12287_v37 = vpop.f32.mrb[17].mxu0 }
 0x69d   : > { %v12288_v27 = vadd.f32 %v12287_v37, %v12286_v31  ;;  %v12289_v10 = vpop.f32.mrb[18].mxu0 }
 0x69e   : > { %v12290_v50 = vpop.f32.mrb[19].mxu0 }
 0x69f   : > { %v10845_v15 = vmul.f32 %v12288_v27, %v17648_v41  ;;  %v12291_v35 = vadd.f32 %v12290_v50, %v12289_v10 }
 0x6a1   : > { %v10881_v42 = vadd.f32 %v17653_v16, %v10845_v15  ;;  %v10846_v34 = vmul.f32 %v12291_v35, %v17648_v41  ;;  %v11023_v15 = vld [vmem:[#allocation12 + $0x40] sm:$0xff]  ;;  %v11024_v35 = vld [vmem:[#allocation12 + $0x48] sm:$0xff] }
 0x6a3   : > { %v10913_v62 = vadd.f32 %v10881_v42, %v17964_v58  ;;  %v10882_v2 = vadd.f32 %v17653_v16, %v10846_v34  ;;  %v12495_v42 = vpack.c.bf16 %v11024_v35, %v11023_v15 }
 0x6a5   : > { %v10914_v6 = vadd.f32 %v10882_v2, %v17965_v40  ;;  %v10945_v4 = vmax.f32 %v10913_v62, 0.0  ;;  %12496 = vmatpush3.bf16.msra.mxu1 %v12495_v42  ;;  %v17970_v62 = vld [vmem:[#allocation24_spill] sm:$0xff]  ;;  %v13057_v42 = vmov 0.0  }
 0x6a6   : > { %12497 = vmatprep.subr.bf16.mxu1 %v13055_v3  ;;  %12479 = vmatprep.mubr.msk.f32.mxu1 %vm13056_vm6, %v13057_v42 }
 0x6a7   : > { %v10946_v36 = vmax.f32 %v10914_v6, 0.0 }
 0x6a9   : > { %v10977_v59 = vadd.f32 %v10946_v36, %v10945_v4 }
 0x6aa   : > { %v12292_v53 = vpop.f32.mrb[20].mxu0 }
 0x6ab   : > { %v12293_v48 = vpop.f32.mrb[21].mxu0 }
 0x6ac   : > { %v12294_v14 = vadd.f32 %v12293_v48, %v12292_v53  ;;  %v12295_v54 = vpop.f32.mrb[22].mxu0  ;;  %v11026_v53 = vld [vmem:[#allocation12 + $0x58] sm:$0xff] }
 0x6ad   : > { %v12296_v19 = vpop.f32.mrb[23].mxu0 }
 0x6ae   : > { %v10847_v51 = vmul.f32 %v12294_v14, %v17648_v41  ;;  %v12297_v56 = vadd.f32 %v12296_v19, %v12295_v54 }
 0x6b0   : > { %v10883_v44 = vadd.f32 %v17653_v16, %v10847_v51  ;;  %v10848_v57 = vmul.f32 %v12297_v56, %v17648_v41 }
 0x6b2   : > { %v10915_v29 = vadd.f32 %v10883_v44, %v17966_v13  ;;  %v10884_v30 = vadd.f32 %v17653_v16, %v10848_v57 }
 0x6b4   : > { %v10947_v38 = vmax.f32 %v10915_v29, 0.0  ;;  %v10916_v39 = vadd.f32 %v10884_v30, %v17967_v5  ;;  %v17972_v30 = vld [vmem:[#allocation29_spill] sm:$0xff] }
 0x6b6   : > { %v10978_v26 = vadd.f32 %v10977_v59, %v10947_v38  ;;  %v10948_v17 = vmax.f32 %v10916_v39, 0.0  ;;  %v11025_v59 = vld [vmem:[#allocation12 + $0x50] sm:$0xff] }
 0x6b7   : > { %v12498_v14 = vpack.c.bf16 %v11026_v53, %v11025_v59 }
 0x6b8   : > { %v10979_v1 = vadd.f32 %v10978_v26, %v10948_v17 }
 0x6b9   : > { %12499 = vmatpush3.bf16.msra.mxu1 %v12498_v14 }
 0x6ba   : > { %12500 = vmatprep.subr.bf16.mxu1 %v13055_v3 }
 0x6bb   : > { %v12298_v12 = vpop.f32.mrb[24].mxu0 }
 0x6bc   : > { %v12299_v22 = vpop.f32.mrb[25].mxu0 }
 0x6bd   : > { %v12300_v20 = vadd.f32 %v12299_v22, %v12298_v12  ;;  %v12301_v24 = vpop.f32.mrb[26].mxu0  ;;  %v11027_v22 = vld [vmem:[#allocation12 + $0x60] sm:$0xff] }
 0x6be   : > { %v12302_v23 = vpop.f32.mrb[27].mxu0 }
 0x6bf   : > { %v10849_v18 = vmul.f32 %v12300_v20, %v17648_v41  ;;  %v12303_v9 = vadd.f32 %v12302_v23, %v12301_v24  ;;  %v11028_v20 = vld [vmem:[#allocation12 + $0x68] sm:$0xff] }
 0x6c1   : > { %v10885_v21 = vadd.f32 %v17653_v16, %v10849_v18  ;;  %v10850_v25 = vmul.f32 %v12303_v9, %v17648_v41  ;;  %v12501_v18 = vpack.c.bf16 %v11028_v20, %v11027_v22 }
 0x6c3   : > { %v10917_v7 = vadd.f32 %v10885_v21, %v17968_v60  ;;  %v10886_v33 = vadd.f32 %v17653_v16, %v10850_v25  ;;  %12502 = vmatpush3.bf16.msra.mxu1 %v12501_v18 }
 0x6c4   : > { %12503 = vmatprep.subr.bf16.mxu1 %v13055_v3  ;;  %v11030_v3 = vld [vmem:[#allocation12 + $0x78] sm:$0xff] }
 0x6c5   : > { %v10949_v47 = vmax.f32 %v10917_v7, 0.0  ;;  %v10918_v49 = vadd.f32 %v10886_v33, %v17969_v63  ;;  %v17974_v33 = vld [vmem:[#allocation28_spill] sm:$0xff] }
 0x6c7   : > { %v10980_v32 = vadd.f32 %v10979_v1, %v10949_v47  ;;  %v10950_v11 = vmax.f32 %v10918_v49, 0.0 }
 0x6c9   : > { %v10981_v55 = vadd.f32 %v10980_v32, %v10950_v11  ;;  %v17975_v32 = vld [vmem:[#allocation30_spill] sm:$0xff] }
 0x6cb   : > { %v12304_v61 = vpop.f32.mrb[28].mxu0 }
 0x6cc   : > { %v12305_v46 = vpop.f32.mrb[29].mxu0 }
 0x6cd   : > { %v12306_v31 = vadd.f32 %v12305_v46, %v12304_v61  ;;  %v12307_v37 = vpop.f32.mrb[30].mxu0 }
 0x6ce   : > { %v12308_v27 = vpop.f32.mrb[31].mxu0 }
 0x6cf   : > { %v10851_v10 = vmul.f32 %v12306_v31, %v17648_v41  ;;  %v12309_v50 = vadd.f32 %v12308_v27, %v12307_v37 }
 0x6d1   : > { %v10887_v34 = vadd.f32 %v17653_v16, %v10851_v10  ;;  %v10852_v58 = vmul.f32 %v12309_v50, %v17648_v41  ;;  %v11029_v50 = vld [vmem:[#allocation12 + $0x70] sm:$0xff] }
 0x6d2   : > { %v12504_v35 = vpack.c.bf16 %v11030_v3, %v11029_v50  ;;  %v17982_v3 = vld [vmem:[#allocation36_spill] sm:$0xff] }
 0x6d3   : > { %v10919_v2 = vadd.f32 %v10887_v34, %v17970_v62  ;;  %v10888_v40 = vadd.f32 %v17653_v16, %v10852_v58 }
 0x6d4   : > { %12505 = vmatpush3.bf16.msra.mxu1 %v12504_v35 }
 0x6d5   : > { %v10951_v6 = vmax.f32 %v10919_v2, 0.0  ;;  %v10920_v45 = vadd.f32 %v10888_v40, %v17971_v8  ;;  %v17976_v40 = vld [vmem:[#allocation33_spill] sm:$0xff] }
 0x6d7   : > { %v10982_v4 = vadd.f32 %v10981_v55, %v10951_v6  ;;  %v10952_v36 = vmax.f32 %v10920_v45, 0.0 }
 0x6d9   : > { %v10983_v43 = vadd.f32 %v10982_v4, %v10952_v36  ;;  %v17977_v4 = vld [vmem:[#allocation35_spill] sm:$0xff] }
 0x6dd   : > { %v12310_v48 = vpop.f32.mrb[32].mxu0 }
 0x6de   : > { %v12311_v54 = vpop.f32.mrb[33].mxu0 }
 0x6df   : > { %v12312_v19 = vadd.f32 %v12311_v54, %v12310_v48  ;;  %v12313_v51 = vpop.f32.mrb[34].mxu0 }
 0x6e0   : > { %v12314_v56 = vpop.f32.mrb[35].mxu0 }
 0x6e1   : > { %v10853_v44 = vmul.f32 %v12312_v19, %v17648_v41  ;;  %v12315_v57 = vadd.f32 %v12314_v56, %v12313_v51 }
 0x6e3   : > { %v10889_v13 = vadd.f32 %v17653_v16, %v10853_v44  ;;  %v10854_v29 = vmul.f32 %v12315_v57, %v17648_v41 }
 0x6e5   : > { %v10921_v38 = vadd.f32 %v10889_v13, %v17972_v30  ;;  %v10890_v5 = vadd.f32 %v17653_v16, %v10854_v29  ;;  %v17978_v29 = vld [vmem:[#allocation32_spill] sm:$0xff] }
 0x6e7   : > { %v10953_v39 = vmax.f32 %v10921_v38, 0.0  ;;  %v10922_v28 = vadd.f32 %v10890_v5, %v17973_v0 }
 0x6e9   : > { %v10984_v52 = vadd.f32 %v10983_v43, %v10953_v39  ;;  %v10954_v26 = vmax.f32 %v10922_v28, 0.0  ;;  %v17979_v39 = vld [vmem:[#allocation34_spill] sm:$0xff] }
 0x6eb   : > { %v10985_v17 = vadd.f32 %v10984_v52, %v10954_v26 }
 0x6ec   : > { %v12316_v1 = vpop.f32.mrb[36].mxu0 }
 0x6ed   : > { %v12317_v12 = vpop.f32.mrb[37].mxu0 }
 0x6ee   : > { %v12318_v24 = vadd.f32 %v12317_v12, %v12316_v1  ;;  %v12319_v23 = vpop.f32.mrb[38].mxu0 }
 0x6ef   : > { %v12320_v9 = vpop.f32.mrb[39].mxu0 }
 0x6f0   : > { %v10855_v21 = vmul.f32 %v12318_v24, %v17648_v41  ;;  %v12321_v25 = vadd.f32 %v12320_v9, %v12319_v23 }
 0x6f2   : > { %v10891_v60 = vadd.f32 %v17653_v16, %v10855_v21  ;;  %v10856_v7 = vmul.f32 %v12321_v25, %v17648_v41  ;;  %v17980_v21 = vld [vmem:[#allocation37_spill] sm:$0xff] }
 0x6f4   : > { %v10923_v47 = vadd.f32 %v10891_v60, %v17974_v33  ;;  %v10892_v63 = vadd.f32 %v17653_v16, %v10856_v7  ;;  %v17981_v33 = vld [vmem:[#allocation39_spill] sm:$0xff] }
 0x6f6   : > { %v10955_v49 = vmax.f32 %v10923_v47, 0.0  ;;  %v10924_v11 = vadd.f32 %v10892_v63, %v17975_v32 }
 0x6f8   : > { %v10986_v55 = vadd.f32 %v10985_v17, %v10955_v49  ;;  %v10956_v61 = vmax.f32 %v10924_v11, 0.0 }
 0x6fa   : > { %v10987_v46 = vadd.f32 %v10986_v55, %v10956_v61 }
 0x6fb   : > { %v12322_v31 = vpop.f32.mrb[40].mxu0 }
 0x6fc   : > { %v12323_v37 = vpop.f32.mrb[41].mxu0 }
 0x6fd   : > { %v12324_v27 = vadd.f32 %v12323_v37, %v12322_v31  ;;  %v12325_v10 = vpop.f32.mrb[42].mxu0 }
 0x6fe   : > { %v12326_v15 = vpop.f32.mrb[43].mxu0 }
 0x6ff   : > { %v10857_v34 = vmul.f32 %v12324_v27, %v17648_v41  ;;  %v12327_v58 = vadd.f32 %v12326_v15, %v12325_v10 }
 0x701   : > { %v10893_v62 = vadd.f32 %v17653_v16, %v10857_v34  ;;  %v10858_v2 = vmul.f32 %v12327_v58, %v17648_v41  ;;  %v17983_v34 = vld [vmem:[#allocation38_spill] sm:$0xff] }
 0x703   : > { %v10925_v6 = vadd.f32 %v10893_v62, %v17976_v40  ;;  %v10894_v8 = vadd.f32 %v17653_v16, %v10858_v2 }
 0x705   : > { %v10957_v45 = vmax.f32 %v10925_v6, 0.0  ;;  %v10926_v36 = vadd.f32 %v10894_v8, %v17977_v4 }
 0x707   : > { %v10988_v43 = vadd.f32 %v10987_v46, %v10957_v45  ;;  %v10958_v59 = vmax.f32 %v10926_v36, 0.0 }
 0x709   : > { %v10989_v53 = vadd.f32 %v10988_v43, %v10958_v59  ;;  %v12328_v48 = vpop.f32.mrb[44].mxu0 }
 0x70a   : > { %v12329_v14 = vpop.f32.mrb[45].mxu0 }
 0x70b   : > { %v12330_v54 = vadd.f32 %v12329_v14, %v12328_v48  ;;  %v12331_v19 = vpop.f32.mrb[46].mxu0  ;;  %v17984_v14 = vld [vmem:[#allocation41_spill] sm:$0xff] }
 0x70c   : > { %v12332_v51 = vpop.f32.mrb[47].mxu0 }
 0x70d   : > { %v10859_v56 = vmul.f32 %v12330_v54, %v17648_v41  ;;  %v12333_v44 = vadd.f32 %v12332_v51, %v12331_v19 }
 0x70f   : > { %v10895_v57 = vadd.f32 %v17653_v16, %v10859_v56  ;;  %v10860_v13 = vmul.f32 %v12333_v44, %v17648_v41  ;;  %v17985_v56 = vld [vmem:[#allocation43_spill] sm:$0xff] }
 0x711   : > { %v10927_v30 = vadd.f32 %v10895_v57, %v17978_v29  ;;  %v10896_v38 = vadd.f32 %v17653_v16, %v10860_v13 }
 0x713   : > { %v10959_v5 = vmax.f32 %v10927_v30, 0.0  ;;  %v10928_v0 = vadd.f32 %v10896_v38, %v17979_v39 }
 0x715   : > { %v10990_v28 = vadd.f32 %v10989_v53, %v10959_v5  ;;  %v10960_v52 = vmax.f32 %v10928_v0, 0.0 }
 0x717   : > { %v10991_v26 = vadd.f32 %v10990_v28, %v10960_v52 }
 0x718   : > { %v12334_v17 = vpop.f32.mrb[48].mxu0 }
 0x719   : > { %v12335_v1 = vpop.f32.mrb[49].mxu0 }
 0x71a   : > { %v12336_v12 = vadd.f32 %v12335_v1, %v12334_v17  ;;  %v12337_v22 = vpop.f32.mrb[50].mxu0  ;;  %v17986_v1 = vld [vmem:[#allocation40_spill] sm:$0xff] }
 0x71b   : > { %v12338_v20 = vpop.f32.mrb[51].mxu0 }
 0x71c   : > { %v10861_v24 = vmul.f32 %v12336_v12, %v17648_v41  ;;  %v12339_v23 = vadd.f32 %v12338_v20, %v12337_v22 }
 0x71e   : > { %v10897_v18 = vadd.f32 %v17653_v16, %v10861_v24  ;;  %v10862_v9 = vmul.f32 %v12339_v23, %v17648_v41  ;;  %v17987_v24 = vld [vmem:[#allocation42_spill] sm:$0xff] }
 0x720   : > { %v10929_v25 = vadd.f32 %v10897_v18, %v17980_v21  ;;  %v10898_v60 = vadd.f32 %v17653_v16, %v10862_v9 }
 0x722   : > { %v10961_v7 = vmax.f32 %v10929_v25, 0.0  ;;  %v10930_v47 = vadd.f32 %v10898_v60, %v17981_v33 }
 0x724   : > { %v10992_v63 = vadd.f32 %v10991_v26, %v10961_v7  ;;  %v10962_v49 = vmax.f32 %v10930_v47, 0.0 }
 0x725   : > { %v12340_v32 = vpop.f32.mrb[52].mxu0 }
 0x726   : > { %v10993_v11 = vadd.f32 %v10992_v63, %v10962_v49  ;;  %v12341_v55 = vpop.f32.mrb[53].mxu0 }
 0x727   : > { %v12342_v61 = vadd.f32 %v12341_v55, %v12340_v32  ;;  %v12343_v46 = vpop.f32.mrb[54].mxu0  ;;  %v17988_v55 = vld [vmem:[#allocation45_spill] sm:$0xff] }
 0x728   : > { %v12344_v31 = vpop.f32.mrb[55].mxu0 }
 0x729   : > { %v10863_v37 = vmul.f32 %v12342_v61, %v17648_v41  ;;  %v12345_v27 = vadd.f32 %v12344_v31, %v12343_v46 }
 0x72b   : > { %v10899_v10 = vadd.f32 %v17653_v16, %v10863_v37  ;;  %v10864_v50 = vmul.f32 %v12345_v27, %v17648_v41  ;;  %v17989_v27 = vld [vmem:[#allocation47_spill] sm:$0xff] }
 0x72d   : > { %v10931_v15 = vadd.f32 %v10899_v10, %v17982_v3  ;;  %v10900_v35 = vadd.f32 %v17653_v16, %v10864_v50 }
 0x72f   : > { %v10963_v42 = vmax.f32 %v10931_v15, 0.0  ;;  %v10932_v58 = vadd.f32 %v10900_v35, %v17983_v34 }
 0x731   : > { %v10994_v62 = vadd.f32 %v10993_v11, %v10963_v42  ;;  %v10964_v2 = vmax.f32 %v10932_v58, 0.0 }
 0x733   : > { %v10995_v40 = vadd.f32 %v10994_v62, %v10964_v2 }
 0x734   : > { %v12346_v6 = vpop.f32.mrb[56].mxu0 }
 0x735   : > { %v12347_v8 = vpop.f32.mrb[57].mxu0 }
 0x736   : > { %v12348_v45 = vadd.f32 %v12347_v8, %v12346_v6  ;;  %v12349_v4 = vpop.f32.mrb[58].mxu0  ;;  %v17990_v8 = vld [vmem:[#allocation44_spill] sm:$0xff] }
 0x737   : > { %v12350_v36 = vpop.f32.mrb[59].mxu0 }
 0x738   : > { %v10865_v43 = vmul.f32 %v12348_v45, %v17648_v41  ;;  %v12351_v59 = vadd.f32 %v12350_v36, %v12349_v4 }
 0x73a   : > { %v10901_v53 = vadd.f32 %v17653_v16, %v10865_v43  ;;  %v10866_v48 = vmul.f32 %v12351_v59, %v17648_v41 }
 0x73c   : > { %v10933_v54 = vadd.f32 %v10901_v53, %v17984_v14  ;;  %v10902_v19 = vadd.f32 %v17653_v16, %v10866_v48  ;;  %v17991_v53 = vld [vmem:[#allocation46_spill] sm:$0xff] }
 0x73e   : > { %v10965_v51 = vmax.f32 %v10933_v54, 0.0  ;;  %v10934_v44 = vadd.f32 %v10902_v19, %v17985_v56 }
 0x740   : > { %v10996_v57 = vadd.f32 %v10995_v40, %v10965_v51  ;;  %v10966_v13 = vmax.f32 %v10934_v44, 0.0 }
 0x741   : > { %v12352_v29 = vpop.f32.mrb[60].mxu0 }
 0x742   : > { %v10997_v30 = vadd.f32 %v10996_v57, %v10966_v13  ;;  %v12353_v38 = vpop.f32.mrb[61].mxu0 }
 0x743   : > { %v12354_v5 = vadd.f32 %v12353_v38, %v12352_v29  ;;  %v12355_v39 = vpop.f32.mrb[62].mxu0  ;;  %v17992_v38 = vld [vmem:[#allocation53_spill] sm:$0xff] }
 0x744   : > { %v12356_v0 = vpop.f32.mrb[63].mxu0 }
 0x745   : > { %v10867_v28 = vmul.f32 %v12354_v5, %v17648_v41  ;;  %v12357_v52 = vadd.f32 %v12356_v0, %v12355_v39 }
 0x747   : > { %v10903_v26 = vadd.f32 %v17653_v16, %v10867_v28  ;;  %v10868_v17 = vmul.f32 %v12357_v52, %v17648_v41 }
 0x749   : > { %v10935_v12 = vadd.f32 %v10903_v26, %v17986_v1  ;;  %v10904_v22 = vadd.f32 %v17653_v16, %v10868_v17  ;;  %v17993_v26 = vld [vmem:[#allocation55_spill] sm:$0xff] }
 0x74b   : > { %v10967_v20 = vmax.f32 %v10935_v12, 0.0  ;;  %v10936_v23 = vadd.f32 %v10904_v22, %v17987_v24 }
 0x74c   : > { %v12358_v18 = vpop.f32.mrb[64].mxu0 }
 0x74d   : > { %v10998_v9 = vadd.f32 %v10997_v30, %v10967_v20  ;;  %v10968_v21 = vmax.f32 %v10936_v23, 0.0  ;;  %v12359_v25 = vpop.f32.mrb[65].mxu0 }
 0x74e   : > { %v12360_v60 = vadd.f32 %v12359_v25, %v12358_v18  ;;  %v12361_v7 = vpop.f32.mrb[66].mxu0 }
 0x74f   : > { %v10999_v33 = vadd.f32 %v10998_v9, %v10968_v21  ;;  %v12362_v47 = vpop.f32.mrb[67].mxu0 }
 0x750   : > { %v10869_v63 = vmul.f32 %v12360_v60, %v17648_v41  ;;  %v12363_v49 = vadd.f32 %v12362_v47, %v12361_v7  ;;  %v17994_v60 = vld [vmem:[#allocation52_spill] sm:$0xff] }
 0x752   : > { %v10905_v32 = vadd.f32 %v17653_v16, %v10869_v63  ;;  %v10870_v11 = vmul.f32 %v12363_v49, %v17648_v41  ;;  %v17995_v63 = vld [vmem:[#allocation54_spill] sm:$0xff] }
 0x754   : > { %v10937_v61 = vadd.f32 %v10905_v32, %v17988_v55  ;;  %v10906_v46 = vadd.f32 %v17653_v16, %v10870_v11 }
 0x755   : > { %v12364_v31 = vpop.f32.mrb[68].mxu0 }
 0x756   : > { %v10969_v37 = vmax.f32 %v10937_v61, 0.0  ;;  %v10938_v10 = vadd.f32 %v10906_v46, %v17989_v27  ;;  %v12365_v50 = vpop.f32.mrb[69].mxu0 }
 0x757   : > { %v12366_v3 = vadd.f32 %v12365_v50, %v12364_v31  ;;  %v12367_v15 = vpop.f32.mrb[70].mxu0 }
 0x758   : > { %v11000_v35 = vadd.f32 %v10999_v33, %v10969_v37  ;;  %v10970_v42 = vmax.f32 %v10938_v10, 0.0  ;;  %v12368_v34 = vpop.f32.mrb[71].mxu0 }
 0x759   : > { %v10871_v58 = vmul.f32 %v12366_v3, %v17648_v41  ;;  %v12369_v62 = vadd.f32 %v12368_v34, %v12367_v15 }
 0x75a   : > { %v11001_v2 = vadd.f32 %v11000_v35, %v10970_v42 }
 0x75b   : > { %v10907_v40 = vadd.f32 %v17653_v16, %v10871_v58  ;;  %v10872_v6 = vmul.f32 %v12369_v62, %v17648_v41 }
 0x75d   : > { %v10939_v45 = vadd.f32 %v10907_v40, %v17990_v8  ;;  %v10908_v4 = vadd.f32 %v17653_v16, %v10872_v6  ;;  %v12370_v36 = vpop.f32.mrb[72].mxu0 }
 0x75e   : > { %v12371_v43 = vpop.f32.mrb[73].mxu0 }
 0x75f   : > { %v10971_v59 = vmax.f32 %v10939_v45, 0.0  ;;  %v10940_v48 = vadd.f32 %v10908_v4, %v17991_v53  ;;  %v12372_v14 = vadd.f32 %v12371_v43, %v12370_v36  ;;  %v12373_v54 = vpop.f32.mrb[74].mxu0 }
 0x760   : > { %v12374_v19 = vpop.f32.mrb[75].mxu0 }
 0x761   : > { %v11002_v51 = vadd.f32 %v11001_v2, %v10971_v59  ;;  %v10972_v56 = vmax.f32 %v10940_v48, 0.0  ;;  %v10873_v44 = vmul.f32 %v12372_v14, %v17648_v41  ;;  %v12375_v57 = vadd.f32 %v12374_v19, %v12373_v54 }
 0x763   : > { %v11003_v13 = vadd.f32 %v11002_v51, %v10972_v56  ;;  %v10909_v29 = vadd.f32 %v17653_v16, %v10873_v44  ;;  %v10874_v30 = vmul.f32 %v12375_v57, %v17648_v41 }
 0x765   : > { %v10941_v5 = vadd.f32 %v10909_v29, %v17992_v38  ;;  %v10910_v39 = vadd.f32 %v17653_v16, %v10874_v30  ;;  %v12376_v0 = vpop.f32.mrb[76].mxu0 }
 0x766   : > { %v12377_v28 = vpop.f32.mrb[77].mxu0 }
 0x767   : > { %v10973_v52 = vmax.f32 %v10941_v5, 0.0  ;;  %v10942_v17 = vadd.f32 %v10910_v39, %v17993_v26  ;;  %v12378_v1 = vadd.f32 %v12377_v28, %v12376_v0  ;;  %v12379_v12 = vpop.f32.mrb[78].mxu0 }
 0x768   : > { %v12380_v22 = vpop.f32.mrb[79].mxu0 }
 0x769   : > { %v11004_v20 = vadd.f32 %v11003_v13, %v10973_v52  ;;  %v10974_v24 = vmax.f32 %v10942_v17, 0.0  ;;  %v10875_v23 = vmul.f32 %v12378_v1, %v17648_v41  ;;  %v12381_v18 = vadd.f32 %v12380_v22, %v12379_v12 }
 0x76b   : > { %v11005_v9 = vadd.f32 %v11004_v20, %v10974_v24  ;;  %v10911_v21 = vadd.f32 %v17653_v16, %v10875_v23  ;;  %v10876_v25 = vmul.f32 %v12381_v18, %v17648_v41 }
 0x76d   : > { %v10943_v7 = vadd.f32 %v10911_v21, %v17994_v60  ;;  %v10912_v33 = vadd.f32 %v17653_v16, %v10876_v25  ;;  %v11031_v16 = vld [vmem:[%s17814_s6] sm:$0x1] }
 0x76f   : > { %v10975_v47 = vmax.f32 %v10943_v7, 0.0  ;;  %v10944_v49 = vadd.f32 %v10912_v33, %v17995_v63 }
 0x771   : > { %v11006_v32 = vadd.f32 %v11005_v9, %v10975_v47  ;;  %v10976_v11 = vmax.f32 %v10944_v49, 0.0 }
 0x773   : > { %v11007_v55 = vadd.f32 %v11006_v32, %v10976_v11 }
 0x775   : > { %v11008_v61 = vrot.slane %v11007_v55, 4 }
 0x777   : > { %v11009_v46 = vadd.f32 %v11008_v61, %v11007_v55 }
 0x779   : > { %v11010_v31 = vrot.slane %v11009_v46, 2 }
 0x77b   : > { %v11011_v37 = vadd.f32 %v11010_v31, %v11009_v46 }
 0x77d   : > { %v11012_v27 = vrot.slane %v11011_v37, 1 }
 0x77f   : > { %v11013_v10 = vadd.f32 %v11012_v27, %v11011_v37 }
 0x781   : > { %v11014_v41 = vmul.f32 0.00390625, %v11013_v10 }
 0x783   : > { %12480 = vmatmul.mubr.f32.vlgmr.msra.gmra.mrb[80].mxu1 %v11014_v41 }
 0x856   : > { %v11098_v50 = vpop.f32.mrb[80].mxu1 }
 0x857   : > { %v11099_v3 = vadd.f32 %v11098_v50, %v11031_v16  ;;  %v12481_v15 = vpop.f32.mrb[81].mxu1 }
 0x859   : > { %11102 = vst [vmem:[%s353_s8] sm:$0x1] %v11099_v3 }
 0x85a   : > { %12971 = shalt.err (!%p12968_p13)
}
 0x85b   : > { %s12972_s21 = scalar_lea.hbm %s17764_s11, 16  ;;  %s12976_s22 = scalar_lea.hbm %s17815_s7, 32 }
 0x85c   : > { %p12973_p9 = scmp.ne.s32.totalorder %s17764_s11, %s12972_s21  ;;  %p12977_p4 = scmp.lt.u32.totalorder %s17764_s11, %s17815_s7 }
 0x85d   : > { %p12978_p8 = scmp.lt.u32.totalorder %s12976_s22, %s12972_s21  ;;  %p12980_p10 = scmp.lt.u32.totalorder %s12972_s21, %s17764_s11 }
 0x85e   : > { %p12974_p0 = pnand %p12973_p9, %p13270_p3 }
 0x85f   : > { %p12979_p6 = por %p12978_p8, %p12977_p4 }
 0x860   : > { %p12975_p11 = pneg %p12974_p0 }
 0x861   : > { %p12981_p5 = por %p12980_p10, %p12979_p6 }
 0x863   : > { %p12982_p7 = pnand %p12981_p5, %p12975_p11 }
 0x865   : > { %12985 = shalt.err (!%p12982_p7)
}
 0x866   : > { %12540 = dma.vmem_to_hbm [thread:$0]  (%p13270_p3), %s17766_s10, 16, %s17764_s11, %s11104_s15  }
 0x867 PF: > { %s17996_s8 = sld [smem:[#allocation18_spill]]  ;;  %s11128_s18 = sand.u32 1, %s13020_s24  }
 0x868   : > { %p17998_p1 = scmp.ge.s32.totalorder %s13032_s27, 2  ;;  %s11129_s16 = scalar_lea.sflag [#allocation6], %s11128_s18 }
 0x86d   : > { %p17997_p12 = scmp.ne.s32.totalorder %s17996_s8, 0 }
 0x86f   : > { %p12560_p2 = pnand %p17998_p1, %p17997_p12 }
 0x871   : > { %13015 = dma.done.wait (!%p12560_p2), %s11129_s16, 16  }
 0x872   : > { %13017 = vsyncadd (!%p12560_p2), %s11129_s16, 4294967280  ;;  %p22_p13 = scmp.ge.s32.totalorder %s13257_s19, 4   ;;  %s17999_s24 = smov %s13024_s25 }
 0x873   : > { %s18000_s25 = smov %s13028_s26  ;;  %s18001_s26 = smov %s13266_s23 }
 0x874   : > { %s18002_s27 = smov %s13257_s19  ;;  %24 = sbr.rel (!%p22_p13) target bundleno = 7 (0x7), region = 114 }
 0x87b   :  { %11133 = vsyncpa [#allocation5], 1 }
 0x87c   :  { %11135 = vsyncpa [#allocation5 + $0x1], 1 }
 0x87d   :  { %11136 = vsyncpa [#allocation8], 1 }
 0x87e   :  { %11137 = vsyncpa [#allocation11], 1 }
 0x87f   :  { %11138 = vsyncpa [#allocation6], 1 }
 0x880   :  { %11140 = vsyncpa [#allocation6 + $0x1], 1 }

</bundles_post_ra>
